<compile_context>
chip_gen: v7x
topology: tpu7x:2x2x1
jax: 0.10.0
libtpu: 0.0.40
codegen_flags: <defaults>
</compile_context>

<pallas_src>
import jax
import jax.numpy as jnp
import numpy as np
from jax.experimental import pallas as pl
from jax.experimental.pallas import tpu as pltpu

# ----- dimensions implied by the module (fc1 expects 64 * 233 features) -----
L_IN = 940            # 940 -> conv1 -> 938 -> pool -> 469 -> conv2 -> 467 -> pool -> 233
L1 = L_IN - 2         # 938
P1 = L1 // 2          # 469
L2 = P1 - 2           # 467
P2 = L2 // 2          # 233 (torch maxpool drops the trailing odd element)
C1 = 32
C2 = 64
F1 = C2 * P2          # 14912 (torch fc1 in_features)
P2_PAD = 240          # time axis padded so the flattened feature dim is lane aligned
F1P = P2_PAD * C2     # 15360 = 120 * 128
K_CHUNK = 1920        # fc1 reduction tile (15 * 128)
NK = F1P // K_CHUNK   # 8 reduction steps
H1 = 128
H2 = 64
NCLS = 3


# ---------------------------------------------------------------------------
# Kernel 1: conv1 -> relu -> maxpool2 -> conv2 -> relu -> maxpool2
# one batch element per grid step; activations are (length, channels)
# ---------------------------------------------------------------------------
def conv_pool_kernel(x_ref, w1_ref, b1_ref, w2_ref, b2_ref, o_ref, h1_scr, h2_scr):
    # x_ref: (1, L_IN, 1)   w1_ref: (3, C1)   b1_ref: (1, C1)
    # w2_ref: (3, C1, C2)   b2_ref: (1, C2)   o_ref: (1, P2_PAD, C2) bf16
    x_col = x_ref[0]                                             # (L_IN, 1)

    # conv1 (in_channels=1, k=3): accumulate taps directly in VMEM scratch, + relu
    h1_scr[...] = jnp.broadcast_to(b1_ref[...], (L1, C1)).astype(jnp.float32)
    for k in range(3):                                           # static unroll (3 taps)
        h1_scr[...] += x_col[k:k + L1, :] * w1_ref[k:k + 1, :]   # (L1,1)*(1,C1)
    h1_scr[...] = jnp.maximum(h1_scr[...], 0.0)

    # maxpool1d(2): strided sublane reads (even/odd positions)
    p1 = jnp.maximum(h1_scr[pl.ds(0, P1, 2), :],
                     h1_scr[pl.ds(1, P1, 2), :])                 # (P1, C1)

    # conv2 (32 -> 64, k=3) as 3 per-tap MXU matmuls accumulated in scratch, + relu
    h2_scr[...] = jnp.broadcast_to(b2_ref[...], (L2, C2)).astype(jnp.float32)
    for k in range(3):
        h2_scr[...] += jnp.dot(p1[k:k + L2, :], w2_ref[k],
                               preferred_element_type=jnp.float32)
    h2_scr[...] = jnp.maximum(h2_scr[...], 0.0)

    # maxpool1d(2) (odd length 467 -> last element dropped, like torch), then
    # write (t, c)-ordered bf16 features, zero-padded on time to P2_PAD.
    p2 = jnp.maximum(h2_scr[pl.ds(0, P2, 2), :],
                     h2_scr[pl.ds(1, P2, 2), :])                 # (P2, C2)
    o_ref[0, :P2, :] = p2.astype(jnp.bfloat16)
    o_ref[0, P2:, :] = jnp.zeros((P2_PAD - P2, C2), jnp.bfloat16)


def conv_stage(x_lanes, w1t, b1, w2r, b2):
    n = x_lanes.shape[0]
    return pl.pallas_call(
        conv_pool_kernel,
        out_shape=jax.ShapeDtypeStruct((n, P2_PAD, C2), jnp.bfloat16),
        grid=(n,),
        in_specs=[
            pl.BlockSpec((1, L_IN, 1), lambda i: (i, 0, 0)),
            pl.BlockSpec((3, C1), lambda i: (0, 0)),
            pl.BlockSpec((1, C1), lambda i: (0, 0)),
            pl.BlockSpec((3, C1, C2), lambda i: (0, 0, 0)),
            pl.BlockSpec((1, C2), lambda i: (0, 0)),
        ],
        out_specs=pl.BlockSpec((1, P2_PAD, C2), lambda i: (i, 0, 0)),
        scratch_shapes=[pltpu.VMEM((L1, C1), jnp.float32),
                        pltpu.VMEM((L2, C2), jnp.float32)],
        compiler_params=pltpu.CompilerParams(
            dimension_semantics=("parallel",)),   # batch is independent -> both TCs on v7x
    )(x_lanes, w1t, b1, w2r, b2)


# ---------------------------------------------------------------------------
# Kernel 2: fc1 (K-tiled, bf16 weight & activations, f32 accum) -> relu
#           -> fc2 -> relu -> fc3
# grid iterates over fc1's reduction dim; the small fc2/fc3 weights stay
# VMEM-resident across the reduction.
# ---------------------------------------------------------------------------
def mlp_kernel(feat_ref, w1_ref, b1_ref, w2_ref, b2_ref, w3_ref, b3_ref,
               o_ref, acc_ref):
    k = pl.program_id(0)

    @pl.when(k == 0)
    def _():
        acc_ref[...] = jnp.zeros_like(acc_ref)

    acc_ref[...] += jnp.dot(feat_ref[...], w1_ref[...],
                            preferred_element_type=jnp.float32)

    @pl.when(k == pl.num_programs(0) - 1)
    def _():
        h = jnp.maximum(acc_ref[...] + b1_ref[...], 0.0)
        h = jnp.maximum(jnp.dot(h, w2_ref[...],
                                preferred_element_type=jnp.float32) + b2_ref[...], 0.0)
        o_ref[...] = jnp.dot(h, w3_ref[...],
                             preferred_element_type=jnp.float32) + b3_ref[...]


def mlp_stage(feat, w1, b1, w2, b2, w3, b3):
    n = feat.shape[0]
    return pl.pallas_call(
        mlp_kernel,
        out_shape=jax.ShapeDtypeStruct((n, NCLS), jnp.float32),
        grid=(NK,),
        in_specs=[
            pl.BlockSpec((n, K_CHUNK), lambda k: (0, k)),     # bf16 feature K-chunk
            pl.BlockSpec((K_CHUNK, H1), lambda k: (k, 0)),    # bf16 fc1 weight K-chunk
            pl.BlockSpec((1, H1), lambda k: (0, 0)),
            pl.BlockSpec((H1, H2), lambda k: (0, 0)),
            pl.BlockSpec((1, H2), lambda k: (0, 0)),
            pl.BlockSpec((H2, NCLS), lambda k: (0, 0)),
            pl.BlockSpec((1, NCLS), lambda k: (0, 0)),
        ],
        out_specs=pl.BlockSpec((n, NCLS), lambda k: (0, 0)),
        scratch_shapes=[pltpu.VMEM((n, H1), jnp.float32)],
        compiler_params=pltpu.CompilerParams(
            dimension_semantics=("arbitrary",)),  # reduction axis
    )(feat, w1, b1, w2, b2, w3, b3)


# ---------------------------------------------------------------------------
# One-time parameter preparation (runs ONCE, outside the jitted hot path):
# conv-weight reshuffles + fc1 flatten-fold / time-pad / bf16 cast.
# ---------------------------------------------------------------------------
def prepare_params(params):
    (c1w, c1b, c2w, c2b, f1w, f1b, f2w, f2b, f3w, f3b) = params
    w1t = jnp.transpose(c1w[:, 0, :], (1, 0))               # (3, C1)      [k, c_out]
    b1 = c1b.reshape(1, C1)
    w2r = jnp.transpose(c2w, (2, 1, 0))                     # (3, C1, C2)  [k, c_in, c_out]
    b2 = c2b.reshape(1, C2)

    # fc1: torch flatten index = c*P2 + t; kernel feature index = t*C2 + c.
    w = f1w.reshape(H1, C2, P2)                              # (128, 64, 233)
    w = jnp.pad(w, ((0, 0), (0, 0), (0, P2_PAD - P2)))       # pad time 233 -> 240 (zeros)
    fw1 = jnp.transpose(w, (2, 1, 0)).reshape(F1P, H1)       # (15360, 128), row = t*C2 + c
    fw1 = fw1.astype(jnp.bfloat16)                           # halve dominant HBM traffic

    return (w1t, b1, w2r, b2,
            fw1, f1b.reshape(1, H1),
            f2w.T, f2b.reshape(1, H2),
            f3w.T, f3b.reshape(1, NCLS))


# ---------------------------------------------------------------------------
# Full forward (hot path: two pallas_calls + one free reshape)
# ---------------------------------------------------------------------------
def audio_classifier_forward(x, prepped):
    (w1t, b1, w2r, b2, fw1, fb1, fw2, fb2, fw3, fb3) = prepped
    n = x.shape[0]
    x_lanes = x.reshape(n, L_IN, 1)             # length on sublanes (C=1, pure view)
    p2 = conv_stage(x_lanes, w1t, b1, w2r, b2)  # (n, P2_PAD, C2) bf16, (t, c) order
    # dropout1 / dropout2: identity at inference time.
    # flatten is folded into the fc1 weight permutation -> free row-major collapse:
    feat = p2.reshape(n, F1P)
    return mlp_stage(feat, fw1, fb1, fw2, fb2, fw3, fb3)


# ---------------------------------------------------------------------------
# Deterministic parameter init (PyTorch-style uniform(-1/sqrt(fan_in), ...))
# ---------------------------------------------------------------------------
def init_params(key):
    def uni(k, shape, fan_in):
        b = 1.0 / np.sqrt(fan_in)
        return jax.random.uniform(k, shape, jnp.float32, -b, b)
    ks = jax.random.split(key, 10)
    c1w = uni(ks[0], (C1, 1, 3), 3);        c1b = uni(ks[1], (C1,), 3)
    c2w = uni(ks[2], (C2, C1, 3), C1 * 3);  c2b = uni(ks[3], (C2,), C1 * 3)
    f1w = uni(ks[4], (H1, F1), F1);         f1b = uni(ks[5], (H1,), F1)
    f2w = uni(ks[6], (H2, H1), H1);         f2b = uni(ks[7], (H2,), H1)
    f3w = uni(ks[8], (NCLS, H2), H2);       f3b = uni(ks[9], (NCLS,), H2)
    return (c1w, c1b, c2w, c2b, f1w, f1b, f2w, f2b, f3w, f3b)


# Pure-JAX reference mirroring the PyTorch forward (eval mode).  fc1 uses the
# same bf16-weight / bf16-activation / f32-accumulate recipe as the kernel.
def reference_forward(x, params):
    (c1w, c1b, c2w, c2b, f1w, f1b, f2w, f2b, f3w, f3b) = params
    n = x.shape[0]
    xs = x[:, 0, :]                                                    # (N, L_IN)
    h1 = c1b[None, :, None] + sum(
        c1w[:, 0, k][None, :, None] * xs[:, None, k:k + L1] for k in range(3))
    h1 = jnp.maximum(h1, 0.0)                                          # (N, C1, L1)
    p1 = jnp.maximum(h1[:, :, 0:2 * P1:2], h1[:, :, 1:2 * P1:2])       # (N, C1, P1)
    h2 = c2b[None, :, None] + sum(
        jnp.einsum("nct,dc->ndt", p1[:, :, k:k + L2], c2w[:, :, k]) for k in range(3))
    h2 = jnp.maximum(h2, 0.0)                                          # (N, C2, L2)
    p2 = jnp.maximum(h2[:, :, 0:2 * P2:2], h2[:, :, 1:2 * P2:2])       # (N, C2, P2)
    flat = p2.reshape(n, F1)                                           # channel-major flatten
    f1o = jnp.dot(flat.astype(jnp.bfloat16), f1w.T.astype(jnp.bfloat16),
                  preferred_element_type=jnp.float32) + f1b
    f1o = jnp.maximum(f1o, 0.0)
    f2o = jnp.maximum(f1o @ f2w.T + f2b, 0.0)
    return f2o @ f3w.T + f3b


if __name__ == "__main__":
    key = jax.random.PRNGKey(0)
    pkey, xkey = jax.random.split(key)
    params = init_params(pkey)
    prepped = prepare_params(params)            # one-time weight layout / bf16 prep
    x = jax.random.normal(xkey, (2, 1, L_IN), jnp.float32)   # NCW, like PyTorch

    fwd = jax.jit(audio_classifier_forward)
    out = jax.block_until_ready(fwd(x, prepped))
    assert out.shape == (2, NCLS) and out.dtype == jnp.float32

    ref = reference_forward(x, params)
    np.testing.assert_allclose(np.asarray(out), np.asarray(ref), rtol=2e-2, atol=2e-2)
    print("KERNEL_OK")
</pallas_src>

<mosaic_0001>
module attributes {stable_mosaic.version = 11 : i64} {
  func.func @conv_pool_kernel(%arg0: i32, %arg1: memref<1x940x1xf32, #tpu.memory_space<vmem>>, %arg2: memref<3x32xf32, #tpu.memory_space<vmem>>, %arg3: memref<1x32xf32, #tpu.memory_space<vmem>>, %arg4: memref<3x32x64xf32, #tpu.memory_space<vmem>>, %arg5: memref<1x64xf32, #tpu.memory_space<vmem>>, %arg6: memref<1x240x64xbf16, #tpu.memory_space<vmem>>, %arg7: memref<938x32xf32, #tpu.memory_space<vmem>>, %arg8: memref<467x64xf32, #tpu.memory_space<vmem>>) attributes {dimension_semantics = [#tpu.dimension_semantics<parallel>], iteration_bounds = array<i64: 2>, scalar_prefetch = 0 : i64, scratch_operands = 2 : i64, tpu.core_type = #tpu.core_type<tc>, window_params = [{transform_indices = @transform_0, window_bounds = array<i64: 1, 940, 1>}, {pipeline_mode = #tpu.pipeline_mode<synchronous>, transform_indices = @transform_1, window_bounds = array<i64: 3, 32>}, {pipeline_mode = #tpu.pipeline_mode<synchronous>, transform_indices = @transform_2, window_bounds = array<i64: 1, 32>}, {pipeline_mode = #tpu.pipeline_mode<synchronous>, transform_indices = @transform_3, window_bounds = array<i64: 3, 32, 64>}, {pipeline_mode = #tpu.pipeline_mode<synchronous>, transform_indices = @transform_4, window_bounds = array<i64: 1, 64>}, {transform_indices = @transform_5, window_bounds = array<i64: 1, 240, 64>}]} {
    %c0 = arith.constant 0 : index
    %c0_0 = arith.constant 0 : index
    %c0_1 = arith.constant 0 : index
    %0 = vector.load %arg1[%c0, %c0_0, %c0_1] : memref<1x940x1xf32, #tpu.memory_space<vmem>>, vector<1x940x1xf32>
    %1 = vector.shape_cast %0 : vector<1x940x1xf32> to vector<940x1xf32>
    %c0_2 = arith.constant 0 : index
    %c0_3 = arith.constant 0 : index
    %2 = vector.load %arg3[%c0_2, %c0_3] : memref<1x32xf32, #tpu.memory_space<vmem>>, vector<1x32xf32>
    %3 = vector.shape_cast %2 : vector<1x32xf32> to vector<1x32xf32>
    %4 = vector.broadcast %3 : vector<1x32xf32> to vector<938x32xf32>
    %c0_4 = arith.constant 0 : index
    %c0_5 = arith.constant 0 : index
    %5 = vector.load %arg7[%c0_4, %c0_5] : memref<938x32xf32, #tpu.memory_space<vmem>>, vector<938x32xf32>
    tpu.vector_store %arg7[%c0_4, %c0_5], %4 {strides = array<i32>} : memref<938x32xf32, #tpu.memory_space<vmem>>, vector<938x32xf32>,
    %c0_6 = arith.constant 0 : index
    %c0_7 = arith.constant 0 : index
    %6 = vector.load %arg7[%c0_6, %c0_7] : memref<938x32xf32, #tpu.memory_space<vmem>>, vector<938x32xf32>
    %7 = vector.extract_strided_slice %1 {offsets = [0, 0], sizes = [938, 1], strides = [1, 1]} : vector<940x1xf32> to vector<938x1xf32>
    %c0_8 = arith.constant 0 : index
    %c0_9 = arith.constant 0 : index
    %8 = vector.load %arg2[%c0_8, %c0_9] : memref<3x32xf32, #tpu.memory_space<vmem>>, vector<1x32xf32>
    %9 = vector.broadcast %7 : vector<938x1xf32> to vector<938x32xf32>
    %10 = vector.broadcast %8 : vector<1x32xf32> to vector<938x32xf32>
    %11 = arith.mulf %9, %10 : vector<938x32xf32>
    %12 = arith.addf %6, %11 : vector<938x32xf32>
    %c0_10 = arith.constant 0 : index
    %c0_11 = arith.constant 0 : index
    %13 = vector.load %arg7[%c0_10, %c0_11] : memref<938x32xf32, #tpu.memory_space<vmem>>, vector<938x32xf32>
    tpu.vector_store %arg7[%c0_10, %c0_11], %12 {strides = array<i32>} : memref<938x32xf32, #tpu.memory_space<vmem>>, vector<938x32xf32>,
    %c0_12 = arith.constant 0 : index
    %c0_13 = arith.constant 0 : index
    %14 = vector.load %arg7[%c0_12, %c0_13] : memref<938x32xf32, #tpu.memory_space<vmem>>, vector<938x32xf32>
    %15 = vector.extract_strided_slice %1 {offsets = [1, 0], sizes = [938, 1], strides = [1, 1]} : vector<940x1xf32> to vector<938x1xf32>
    %c1 = arith.constant 1 : index
    %c0_14 = arith.constant 0 : index
    %16 = vector.load %arg2[%c1, %c0_14] : memref<3x32xf32, #tpu.memory_space<vmem>>, vector<1x32xf32>
    %17 = vector.broadcast %15 : vector<938x1xf32> to vector<938x32xf32>
    %18 = vector.broadcast %16 : vector<1x32xf32> to vector<938x32xf32>
    %19 = arith.mulf %17, %18 : vector<938x32xf32>
    %20 = arith.addf %14, %19 : vector<938x32xf32>
    %c0_15 = arith.constant 0 : index
    %c0_16 = arith.constant 0 : index
    %21 = vector.load %arg7[%c0_15, %c0_16] : memref<938x32xf32, #tpu.memory_space<vmem>>, vector<938x32xf32>
    tpu.vector_store %arg7[%c0_15, %c0_16], %20 {strides = array<i32>} : memref<938x32xf32, #tpu.memory_space<vmem>>, vector<938x32xf32>,
    %c0_17 = arith.constant 0 : index
    %c0_18 = arith.constant 0 : index
    %22 = vector.load %arg7[%c0_17, %c0_18] : memref<938x32xf32, #tpu.memory_space<vmem>>, vector<938x32xf32>
    %23 = vector.extract_strided_slice %1 {offsets = [2, 0], sizes = [938, 1], strides = [1, 1]} : vector<940x1xf32> to vector<938x1xf32>
    %c2 = arith.constant 2 : index
    %c0_19 = arith.constant 0 : index
    %24 = vector.load %arg2[%c2, %c0_19] : memref<3x32xf32, #tpu.memory_space<vmem>>, vector<1x32xf32>
    %25 = vector.broadcast %23 : vector<938x1xf32> to vector<938x32xf32>
    %26 = vector.broadcast %24 : vector<1x32xf32> to vector<938x32xf32>
    %27 = arith.mulf %25, %26 : vector<938x32xf32>
    %28 = arith.addf %22, %27 : vector<938x32xf32>
    %c0_20 = arith.constant 0 : index
    %c0_21 = arith.constant 0 : index
    %29 = vector.load %arg7[%c0_20, %c0_21] : memref<938x32xf32, #tpu.memory_space<vmem>>, vector<938x32xf32>
    tpu.vector_store %arg7[%c0_20, %c0_21], %28 {strides = array<i32>} : memref<938x32xf32, #tpu.memory_space<vmem>>, vector<938x32xf32>,
    %c0_22 = arith.constant 0 : index
    %c0_23 = arith.constant 0 : index
    %30 = vector.load %arg7[%c0_22, %c0_23] : memref<938x32xf32, #tpu.memory_space<vmem>>, vector<938x32xf32>
    %cst = arith.constant 0.000000e+00 : f32
    %31 = vector.broadcast %cst : f32 to vector<938x32xf32>
    %32 = arith.maximumf %30, %31 : vector<938x32xf32>
    %c0_24 = arith.constant 0 : index
    %c0_25 = arith.constant 0 : index
    %33 = vector.load %arg7[%c0_24, %c0_25] : memref<938x32xf32, #tpu.memory_space<vmem>>, vector<938x32xf32>
    tpu.vector_store %arg7[%c0_24, %c0_25], %32 {strides = array<i32>} : memref<938x32xf32, #tpu.memory_space<vmem>>, vector<938x32xf32>,
    %c0_26 = arith.constant 0 : index
    %c0_27 = arith.constant 0 : index
    %34 = tpu.strided_load %arg7[%c0_26, %c0_27] {strides = array<i32: 2, 1>} : memref<938x32xf32, #tpu.memory_space<vmem>>, vector<469x32xf32>
    %c1_28 = arith.constant 1 : index
    %c0_29 = arith.constant 0 : index
    %35 = tpu.strided_load %arg7[%c1_28, %c0_29] {strides = array<i32: 2, 1>} : memref<938x32xf32, #tpu.memory_space<vmem>>, vector<469x32xf32>
    %36 = arith.maximumf %34, %35 : vector<469x32xf32>
    %c0_30 = arith.constant 0 : index
    %c0_31 = arith.constant 0 : index
    %37 = vector.load %arg5[%c0_30, %c0_31] : memref<1x64xf32, #tpu.memory_space<vmem>>, vector<1x64xf32>
    %38 = vector.shape_cast %37 : vector<1x64xf32> to vector<1x64xf32>
    %39 = vector.broadcast %38 : vector<1x64xf32> to vector<467x64xf32>
    %c0_32 = arith.constant 0 : index
    %c0_33 = arith.constant 0 : index
    %40 = vector.load %arg8[%c0_32, %c0_33] : memref<467x64xf32, #tpu.memory_space<vmem>>, vector<467x64xf32>
    tpu.vector_store %arg8[%c0_32, %c0_33], %39 {strides = array<i32>} : memref<467x64xf32, #tpu.memory_space<vmem>>, vector<467x64xf32>,
    %c0_34 = arith.constant 0 : index
    %c0_35 = arith.constant 0 : index
    %41 = vector.load %arg8[%c0_34, %c0_35] : memref<467x64xf32, #tpu.memory_space<vmem>>, vector<467x64xf32>
    %42 = vector.extract_strided_slice %36 {offsets = [0, 0], sizes = [467, 32], strides = [1, 1]} : vector<469x32xf32> to vector<467x32xf32>
    %c0_36 = arith.constant 0 : index
    %c0_37 = arith.constant 0 : index
    %c0_38 = arith.constant 0 : index
    %43 = vector.load %arg4[%c0_36, %c0_37, %c0_38] : memref<3x32x64xf32, #tpu.memory_space<vmem>>, vector<1x32x64xf32>
    %44 = vector.shape_cast %43 : vector<1x32x64xf32> to vector<32x64xf32>
    %cst_39 = arith.constant dense<0.000000e+00> : vector<467x64xf32>
    %45 = tpu.matmul %42, %44, %cst_39 {dimension_numbers = #tpu.dot_dimension_numbers<[1], [0], [0], [1], [0, 0, 1, 1], [], []>} : vector<467x32xf32>, vector<32x64xf32>, vector<467x64xf32> -> vector<467x64xf32>
    %46 = arith.addf %41, %45 : vector<467x64xf32>
    %c0_40 = arith.constant 0 : index
    %c0_41 = arith.constant 0 : index
    %47 = vector.load %arg8[%c0_40, %c0_41] : memref<467x64xf32, #tpu.memory_space<vmem>>, vector<467x64xf32>
    tpu.vector_store %arg8[%c0_40, %c0_41], %46 {strides = array<i32>} : memref<467x64xf32, #tpu.memory_space<vmem>>, vector<467x64xf32>,
    %c0_42 = arith.constant 0 : index
    %c0_43 = arith.constant 0 : index
    %48 = vector.load %arg8[%c0_42, %c0_43] : memref<467x64xf32, #tpu.memory_space<vmem>>, vector<467x64xf32>
    %49 = vector.extract_strided_slice %36 {offsets = [1, 0], sizes = [467, 32], strides = [1, 1]} : vector<469x32xf32> to vector<467x32xf32>
    %c1_44 = arith.constant 1 : index
    %c0_45 = arith.constant 0 : index
    %c0_46 = arith.constant 0 : index
    %50 = vector.load %arg4[%c1_44, %c0_45, %c0_46] : memref<3x32x64xf32, #tpu.memory_space<vmem>>, vector<1x32x64xf32>
    %51 = vector.shape_cast %50 : vector<1x32x64xf32> to vector<32x64xf32>
    %cst_47 = arith.constant dense<0.000000e+00> : vector<467x64xf32>
    %52 = tpu.matmul %49, %51, %cst_47 {dimension_numbers = #tpu.dot_dimension_numbers<[1], [0], [0], [1], [0, 0, 1, 1], [], []>} : vector<467x32xf32>, vector<32x64xf32>, vector<467x64xf32> -> vector<467x64xf32>
    %53 = arith.addf %48, %52 : vector<467x64xf32>
    %c0_48 = arith.constant 0 : index
    %c0_49 = arith.constant 0 : index
    %54 = vector.load %arg8[%c0_48, %c0_49] : memref<467x64xf32, #tpu.memory_space<vmem>>, vector<467x64xf32>
    tpu.vector_store %arg8[%c0_48, %c0_49], %53 {strides = array<i32>} : memref<467x64xf32, #tpu.memory_space<vmem>>, vector<467x64xf32>,
    %c0_50 = arith.constant 0 : index
    %c0_51 = arith.constant 0 : index
    %55 = vector.load %arg8[%c0_50, %c0_51] : memref<467x64xf32, #tpu.memory_space<vmem>>, vector<467x64xf32>
    %56 = vector.extract_strided_slice %36 {offsets = [2, 0], sizes = [467, 32], strides = [1, 1]} : vector<469x32xf32> to vector<467x32xf32>
    %c2_52 = arith.constant 2 : index
    %c0_53 = arith.constant 0 : index
    %c0_54 = arith.constant 0 : index
    %57 = vector.load %arg4[%c2_52, %c0_53, %c0_54] : memref<3x32x64xf32, #tpu.memory_space<vmem>>, vector<1x32x64xf32>
    %58 = vector.shape_cast %57 : vector<1x32x64xf32> to vector<32x64xf32>
    %cst_55 = arith.constant dense<0.000000e+00> : vector<467x64xf32>
    %59 = tpu.matmul %56, %58, %cst_55 {dimension_numbers = #tpu.dot_dimension_numbers<[1], [0], [0], [1], [0, 0, 1, 1], [], []>} : vector<467x32xf32>, vector<32x64xf32>, vector<467x64xf32> -> vector<467x64xf32>
    %60 = arith.addf %55, %59 : vector<467x64xf32>
    %c0_56 = arith.constant 0 : index
    %c0_57 = arith.constant 0 : index
    %61 = vector.load %arg8[%c0_56, %c0_57] : memref<467x64xf32, #tpu.memory_space<vmem>>, vector<467x64xf32>
    tpu.vector_store %arg8[%c0_56, %c0_57], %60 {strides = array<i32>} : memref<467x64xf32, #tpu.memory_space<vmem>>, vector<467x64xf32>,
    %c0_58 = arith.constant 0 : index
    %c0_59 = arith.constant 0 : index
    %62 = vector.load %arg8[%c0_58, %c0_59] : memref<467x64xf32, #tpu.memory_space<vmem>>, vector<467x64xf32>
    %cst_60 = arith.constant 0.000000e+00 : f32
    %63 = vector.broadcast %cst_60 : f32 to vector<467x64xf32>
    %64 = arith.maximumf %62, %63 : vector<467x64xf32>
    %c0_61 = arith.constant 0 : index
    %c0_62 = arith.constant 0 : index
    %65 = vector.load %arg8[%c0_61, %c0_62] : memref<467x64xf32, #tpu.memory_space<vmem>>, vector<467x64xf32>
    tpu.vector_store %arg8[%c0_61, %c0_62], %64 {strides = array<i32>} : memref<467x64xf32, #tpu.memory_space<vmem>>, vector<467x64xf32>,
    %c0_63 = arith.constant 0 : index
    %c0_64 = arith.constant 0 : index
    %66 = tpu.strided_load %arg8[%c0_63, %c0_64] {strides = array<i32: 2, 1>} : memref<467x64xf32, #tpu.memory_space<vmem>>, vector<233x64xf32>
    %c1_65 = arith.constant 1 : index
    %c0_66 = arith.constant 0 : index
    %67 = tpu.strided_load %arg8[%c1_65, %c0_66] {strides = array<i32: 2, 1>} : memref<467x64xf32, #tpu.memory_space<vmem>>, vector<233x64xf32>
    %68 = arith.maximumf %66, %67 : vector<233x64xf32>
    %69 = arith.truncf %68 : vector<233x64xf32> to vector<233x64xbf16>
    %c0_67 = arith.constant 0 : index
    %c0_68 = arith.constant 0 : index
    %c0_69 = arith.constant 0 : index
    %70 = vector.load %arg6[%c0_67, %c0_68, %c0_69] : memref<1x240x64xbf16, #tpu.memory_space<vmem>>, vector<1x233x64xbf16>
    %71 = vector.shape_cast %70 : vector<1x233x64xbf16> to vector<233x64xbf16>
    %72 = vector.shape_cast %69 : vector<233x64xbf16> to vector<1x233x64xbf16>
    tpu.vector_store %arg6[%c0_67, %c0_68, %c0_69], %72 {strides = array<i32>} : memref<1x240x64xbf16, #tpu.memory_space<vmem>>, vector<1x233x64xbf16>,
    %cst_70 = arith.constant 0.000000e+00 : bf16
    %73 = vector.broadcast %cst_70 : bf16 to vector<7x64xbf16>
    %c0_71 = arith.constant 0 : index
    %c233 = arith.constant 233 : index
    %c0_72 = arith.constant 0 : index
    %74 = vector.load %arg6[%c0_71, %c233, %c0_72] : memref<1x240x64xbf16, #tpu.memory_space<vmem>>, vector<1x7x64xbf16>
    %75 = vector.shape_cast %74 : vector<1x7x64xbf16> to vector<7x64xbf16>
    %76 = vector.shape_cast %73 : vector<7x64xbf16> to vector<1x7x64xbf16>
    tpu.vector_store %arg6[%c0_71, %c233, %c0_72], %76 {strides = array<i32>} : memref<1x240x64xbf16, #tpu.memory_space<vmem>>, vector<1x7x64xbf16>,
    return
  }
  func.func @transform_0(%arg0: i32) -> (i32, i32, i32) {
    %c0_i32 = arith.constant 0 : i32
    %c0_i32_0 = arith.constant 0 : i32
    %c0_i32_1 = arith.constant 0 : i32
    return %arg0, %c0_i32, %c0_i32_0 : i32, i32, i32
  }
  func.func @transform_1(%arg0: i32) -> (i32, i32) {
    %c0_i32 = arith.constant 0 : i32
    %c0_i32_0 = arith.constant 0 : i32
    %c0_i32_1 = arith.constant 0 : i32
    return %c0_i32, %c0_i32_0 : i32, i32
  }
  func.func @transform_2(%arg0: i32) -> (i32, i32) {
    %c0_i32 = arith.constant 0 : i32
    %c0_i32_0 = arith.constant 0 : i32
    %c0_i32_1 = arith.constant 0 : i32
    return %c0_i32, %c0_i32_0 : i32, i32
  }
  func.func @transform_3(%arg0: i32) -> (i32, i32, i32) {
    %c0_i32 = arith.constant 0 : i32
    %c0_i32_0 = arith.constant 0 : i32
    %c0_i32_1 = arith.constant 0 : i32
    %c0_i32_2 = arith.constant 0 : i32
    return %c0_i32, %c0_i32_0, %c0_i32_1 : i32, i32, i32
  }
  func.func @transform_4(%arg0: i32) -> (i32, i32) {
    %c0_i32 = arith.constant 0 : i32
    %c0_i32_0 = arith.constant 0 : i32
    %c0_i32_1 = arith.constant 0 : i32
    return %c0_i32, %c0_i32_0 : i32, i32
  }
  func.func @transform_5(%arg0: i32) -> (i32, i32, i32) {
    %c0_i32 = arith.constant 0 : i32
    %c0_i32_0 = arith.constant 0 : i32
    %c0_i32_1 = arith.constant 0 : i32
    return %arg0, %c0_i32, %c0_i32_0 : i32, i32, i32
  }
}

module attributes {stable_mosaic.version = 11 : i64} {
  func.func @mlp_kernel(%arg0: i32, %arg1: memref<2x1920xbf16, #tpu.memory_space<vmem>>, %arg2: memref<1920x128xbf16, #tpu.memory_space<vmem>>, %arg3: memref<1x128xf32, #tpu.memory_space<vmem>>, %arg4: memref<128x64xf32, #tpu.memory_space<vmem>>, %arg5: memref<1x64xf32, #tpu.memory_space<vmem>>, %arg6: memref<64x3xf32, #tpu.memory_space<vmem>>, %arg7: memref<1x3xf32, #tpu.memory_space<vmem>>, %arg8: memref<2x3xf32, #tpu.memory_space<vmem>>, %arg9: memref<2x128xf32, #tpu.memory_space<vmem>>) attributes {dimension_semantics = [#tpu.dimension_semantics<arbitrary>], iteration_bounds = array<i64: 8>, scalar_prefetch = 0 : i64, scratch_operands = 1 : i64, tpu.core_type = #tpu.core_type<tc>, window_params = [{transform_indices = @transform_0, window_bounds = array<i64: 2, 1920>}, {transform_indices = @transform_1, window_bounds = array<i64: 1920, 128>}, {pipeline_mode = #tpu.pipeline_mode<synchronous>, transform_indices = @transform_2, window_bounds = array<i64: 1, 128>}, {pipeline_mode = #tpu.pipeline_mode<synchronous>, transform_indices = @transform_3, window_bounds = array<i64: 128, 64>}, {pipeline_mode = #tpu.pipeline_mode<synchronous>, transform_indices = @transform_4, window_bounds = array<i64: 1, 64>}, {pipeline_mode = #tpu.pipeline_mode<synchronous>, transform_indices = @transform_5, window_bounds = array<i64: 64, 3>}, {pipeline_mode = #tpu.pipeline_mode<synchronous>, transform_indices = @transform_6, window_bounds = array<i64: 1, 3>}, {pipeline_mode = #tpu.pipeline_mode<synchronous>, transform_indices = @transform_7, window_bounds = array<i64: 2, 3>}]} {
    %c0_i32 = arith.constant 0 : i32
    %0 = arith.cmpi eq, %arg0, %c0_i32 : i32
    %1 = arith.extui %0 : i1 to i32
    %c0_i32_0 = arith.constant 0 : i32
    %2 = arith.cmpi ne, %1, %c0_i32_0 : i32
    scf.if %2 {
      %cst_9 = arith.constant 0.000000e+00 : f32
      %12 = vector.broadcast %cst_9 : f32 to vector<2x128xf32>
      %c0_10 = arith.constant 0 : index
      %c0_11 = arith.constant 0 : index
      %13 = vector.load %arg9[%c0_10, %c0_11] : memref<2x128xf32, #tpu.memory_space<vmem>>, vector<2x128xf32>
      tpu.vector_store %arg9[%c0_10, %c0_11], %12 {strides = array<i32>} : memref<2x128xf32, #tpu.memory_space<vmem>>, vector<2x128xf32>,
    } else {
    }
    %c0 = arith.constant 0 : index
    %c0_1 = arith.constant 0 : index
    %3 = vector.load %arg9[%c0, %c0_1] : memref<2x128xf32, #tpu.memory_space<vmem>>, vector<2x128xf32>
    %c0_2 = arith.constant 0 : index
    %c0_3 = arith.constant 0 : index
    %4 = vector.load %arg1[%c0_2, %c0_3] : memref<2x1920xbf16, #tpu.memory_space<vmem>>, vector<2x1920xbf16>
    %c0_4 = arith.constant 0 : index
    %c0_5 = arith.constant 0 : index
    %5 = vector.load %arg2[%c0_4, %c0_5] : memref<1920x128xbf16, #tpu.memory_space<vmem>>, vector<1920x128xbf16>
    %cst = arith.constant dense<0.000000e+00> : vector<2x128xf32>
    %6 = tpu.matmul %4, %5, %cst {dimension_numbers = #tpu.dot_dimension_numbers<[1], [0], [0], [1], [0, 0, 1, 1], [], []>} : vector<2x1920xbf16>, vector<1920x128xbf16>, vector<2x128xf32> -> vector<2x128xf32>
    %7 = arith.addf %3, %6 : vector<2x128xf32>
    %c0_6 = arith.constant 0 : index
    %c0_7 = arith.constant 0 : index
    %8 = vector.load %arg9[%c0_6, %c0_7] : memref<2x128xf32, #tpu.memory_space<vmem>>, vector<2x128xf32>
    tpu.vector_store %arg9[%c0_6, %c0_7], %7 {strides = array<i32>} : memref<2x128xf32, #tpu.memory_space<vmem>>, vector<2x128xf32>,
    %c7_i32 = arith.constant 7 : i32
    %9 = arith.cmpi eq, %arg0, %c7_i32 : i32
    %10 = arith.extui %9 : i1 to i32
    %c0_i32_8 = arith.constant 0 : i32
    %11 = arith.cmpi ne, %10, %c0_i32_8 : i32
    scf.if %11 {
      %c0_9 = arith.constant 0 : index
      %c0_10 = arith.constant 0 : index
      %12 = vector.load %arg9[%c0_9, %c0_10] : memref<2x128xf32, #tpu.memory_space<vmem>>, vector<2x128xf32>
      %c0_11 = arith.constant 0 : index
      %c0_12 = arith.constant 0 : index
      %13 = vector.load %arg3[%c0_11, %c0_12] : memref<1x128xf32, #tpu.memory_space<vmem>>, vector<1x128xf32>
      %14 = vector.broadcast %13 : vector<1x128xf32> to vector<2x128xf32>
      %15 = arith.addf %12, %14 : vector<2x128xf32>
      %cst_13 = arith.constant 0.000000e+00 : f32
      %16 = vector.broadcast %cst_13 : f32 to vector<2x128xf32>
      %17 = arith.maximumf %15, %16 : vector<2x128xf32>
      %c0_14 = arith.constant 0 : index
      %c0_15 = arith.constant 0 : index
      %18 = vector.load %arg4[%c0_14, %c0_15] : memref<128x64xf32, #tpu.memory_space<vmem>>, vector<128x64xf32>
      %cst_16 = arith.constant dense<0.000000e+00> : vector<2x64xf32>
      %19 = tpu.matmul %17, %18, %cst_16 {dimension_numbers = #tpu.dot_dimension_numbers<[1], [0], [0], [1], [0, 0, 1, 1], [], []>} : vector<2x128xf32>, vector<128x64xf32>, vector<2x64xf32> -> vector<2x64xf32>
      %c0_17 = arith.constant 0 : index
      %c0_18 = arith.constant 0 : index
      %20 = vector.load %arg5[%c0_17, %c0_18] : memref<1x64xf32, #tpu.memory_space<vmem>>, vector<1x64xf32>
      %21 = vector.broadcast %20 : vector<1x64xf32> to vector<2x64xf32>
      %22 = arith.addf %19, %21 : vector<2x64xf32>
      %cst_19 = arith.constant 0.000000e+00 : f32
      %23 = vector.broadcast %cst_19 : f32 to vector<2x64xf32>
      %24 = arith.maximumf %22, %23 : vector<2x64xf32>
      %c0_20 = arith.constant 0 : index
      %c0_21 = arith.constant 0 : index
      %25 = vector.load %arg6[%c0_20, %c0_21] : memref<64x3xf32, #tpu.memory_space<vmem>>, vector<64x3xf32>
      %cst_22 = arith.constant dense<0.000000e+00> : vector<2x3xf32>
      %26 = tpu.matmul %24, %25, %cst_22 {dimension_numbers = #tpu.dot_dimension_numbers<[1], [0], [0], [1], [0, 0, 1, 1], [], []>} : vector<2x64xf32>, vector<64x3xf32>, vector<2x3xf32> -> vector<2x3xf32>
      %c0_23 = arith.constant 0 : index
      %c0_24 = arith.constant 0 : index
      %27 = vector.load %arg7[%c0_23, %c0_24] : memref<1x3xf32, #tpu.memory_space<vmem>>, vector<1x3xf32>
      %28 = vector.broadcast %27 : vector<1x3xf32> to vector<2x3xf32>
      %29 = arith.addf %26, %28 : vector<2x3xf32>
      %c0_25 = arith.constant 0 : index
      %c0_26 = arith.constant 0 : index
      %30 = vector.load %arg8[%c0_25, %c0_26] : memref<2x3xf32, #tpu.memory_space<vmem>>, vector<2x3xf32>
      tpu.vector_store %arg8[%c0_25, %c0_26], %29 {strides = array<i32>} : memref<2x3xf32, #tpu.memory_space<vmem>>, vector<2x3xf32>,
    } else {
    }
    return
  }
  func.func @transform_0(%arg0: i32) -> (i32, i32) {
    %c0_i32 = arith.constant 0 : i32
    %c0_i32_0 = arith.constant 0 : i32
    return %c0_i32, %arg0 : i32, i32
  }
  func.func @transform_1(%arg0: i32) -> (i32, i32) {
    %c0_i32 = arith.constant 0 : i32
    %c0_i32_0 = arith.constant 0 : i32
    return %arg0, %c0_i32 : i32, i32
  }
  func.func @transform_2(%arg0: i32) -> (i32, i32) {
    %c0_i32 = arith.constant 0 : i32
    %c0_i32_0 = arith.constant 0 : i32
    %c0_i32_1 = arith.constant 0 : i32
    return %c0_i32, %c0_i32_0 : i32, i32
  }
  func.func @transform_3(%arg0: i32) -> (i32, i32) {
    %c0_i32 = arith.constant 0 : i32
    %c0_i32_0 = arith.constant 0 : i32
    %c0_i32_1 = arith.constant 0 : i32
    return %c0_i32, %c0_i32_0 : i32, i32
  }
  func.func @transform_4(%arg0: i32) -> (i32, i32) {
    %c0_i32 = arith.constant 0 : i32
    %c0_i32_0 = arith.constant 0 : i32
    %c0_i32_1 = arith.constant 0 : i32
    return %c0_i32, %c0_i32_0 : i32, i32
  }
  func.func @transform_5(%arg0: i32) -> (i32, i32) {
    %c0_i32 = arith.constant 0 : i32
    %c0_i32_0 = arith.constant 0 : i32
    %c0_i32_1 = arith.constant 0 : i32
    return %c0_i32, %c0_i32_0 : i32, i32
  }
  func.func @transform_6(%arg0: i32) -> (i32, i32) {
    %c0_i32 = arith.constant 0 : i32
    %c0_i32_0 = arith.constant 0 : i32
    %c0_i32_1 = arith.constant 0 : i32
    return %c0_i32, %c0_i32_0 : i32, i32
  }
  func.func @transform_7(%arg0: i32) -> (i32, i32) {
    %c0_i32 = arith.constant 0 : i32
    %c0_i32_0 = arith.constant 0 : i32
    %c0_i32_1 = arith.constant 0 : i32
    return %c0_i32, %c0_i32_0 : i32, i32
  }
}

</mosaic_0001>

<bundles_post_ra>
// kernel: audio_classifier_forward.3
= control target key start
LH: loop header
LB: loop body
LE: loop exit
PB: predicated region body
PF: predicated region fallthrough
CT: control target
= control target key end

     0   :  { %12 = vsyncpa [#allocation4], 0  ;;  %s3389_s0 = inlined_call_operand.vmem [shape: bf16[2,15360], index: 0, kind: input, shape index: {}]   ;;  %s3390_s1 = inlined_call_operand.hbm [shape: bf16[15360,128], index: 1, kind: input, shape index: {}]   ;;  %s3391_s2 = inlined_call_operand.hbm [shape: f32[1,128], index: 2, kind: input, shape index: {}]   ;;  %s3392_s3 = inlined_call_operand.vmem [shape: f32[128,64], index: 3, kind: input, shape index: {}]   ;;  %s3393_s4 = inlined_call_operand.hbm [shape: f32[1,64], index: 4, kind: input, shape index: {}]   ;;  %s3394_s5 = inlined_call_operand.vmem [shape: f32[64,3], index: 5, kind: input, shape index: {}]   ;;  %s3395_s6 = inlined_call_operand.hbm [shape: f32[1,3], index: 6, kind: input, shape index: {}]   ;;  %s3396_s7 = inlined_call_operand.hbm [shape: f32[2,3], index: 7, kind: output, shape index: {}]  }
   0x1   :  { %14 = vsyncpa [#allocation4 + $0x1], 0 }
   0x2   :  { %15 = vsyncpa [#allocation7], 0 }
   0x3   :  { %16 = vsyncpa [#allocation10], 0 }
   0x4   :  { %17 = vsyncpa [#allocation5], 0  ;;  %s2935_s24 = smov 0   ;;  %s2937_s25 = smov 0  }
   0x5   :  { %s2939_s26 = smov 0   ;;  %s2941_s27 = smov 0  }
   0x6 LB: > { %s2954_s28 = sadd.s32 4294967295, %s2879_s27   ;;  %p69_p0 = scmp.ne.s32.totalorder %s2871_s25, %s2867_s24  ;;  %s2879_s27 = sphi %s2941_s27, %s3415_s27   ;;  %s2875_s26 = sphi %s2939_s26, %s3414_s26   ;;  %s2871_s25 = sphi %s2937_s25, %s3413_s25   ;;  %s2867_s24 = sphi %s2935_s24, %s3412_s24  }
   0x7   : > { %p3397_p1 = scmp.eq.s32.totalorder %s2954_s28, 0  ;;  %p2043_p2 = scmp.ge.s32.totalorder %s2879_s27, 1 }
   0x8   : > { %p206_p3 = scmp.lt.s32.totalorder %s2879_s27, 9  ;;  %s2881_s8 = smov [#allocation6]  }
   0x9   : > { %p2963_p5 = por %p3397_p1, %p69_p0  ;;  %s219_s9 = sshll.u32 %s2881_s8, 4  ;;  %s220_s9 = int_to_ptr.vmem [resolvable:$true] %s219_s9 }
   0xa   : > { %p2967_p6 = pnand %p2043_p2, %p206_p3  ;;  %s2882_s10 = smov [#allocation8]  }
   0xb   : > { %s3400_s29 = scalar_select %p2963_p5, 1, 0 }
   0xc   : > { %s3401_s30 = scalar_select %p2967_p6, 1, 0 }
   0xd   : > { %p2503_p7 = pneg %p2967_p6  ;;  %s233_s11 = sshll.u32 %s2882_s10, 4  ;;  %s2979_s11 = int_to_ptr.vmem [resolvable:$true] %s233_s11 }
   0xe   : > { %s2883_s13 = smov [#allocation9]   ;;  %s2693_s17 = scalar_lea.hbm %s3391_s2, 16 }
   0xf   : > { %p2975_p8 = pnand %p2503_p7, %p3397_p1  ;;  %s247_s14 = sshll.u32 %s2883_s13, 4  ;;  %s2981_s14 = int_to_ptr.vmem [resolvable:$true] %s247_s14 }
  0x10   : > { %p2694_p9 = scmp.ne.s32.totalorder %s3391_s2, %s2693_s17  ;;  %p2700_p13 = scmp.lt.u32.totalorder %s2693_s17, %s3391_s2 }
  0x11   : > { %p2991_p10 = pneg %p2975_p8 }
  0x13   : > { %p2696_p11 = pnand %p2991_p10, %p2694_p9 }
  0x15   : > { %p2697_p12 = pneg %p2696_p11 }
  0x17   : > { %p2702_p0 = pnand %p2700_p13, %p2697_p12 }
  0x19   : > { %2705 = shalt.err (!%p2702_p0)
}
  0x1a   : > { %s2706_s23 = scalar_lea.vmem %s220_s9, 16  ;;  %s2713_s24 = scalar_lea.vmem %s220_s9, 32 }
  0x1b   : > { %p2707_p2 = scmp.ne.s32.totalorder %s220_s9, %s2706_s23  ;;  %p2714_p4 = scmp.lt.s32.totalorder %s220_s9, %s220_s9 }
  0x1c   : > { %p2715_p1 = scmp.lt.s32.totalorder %s2713_s24, %s2706_s23 }
  0x1d   : > { %p2709_p3 = pnand %p2707_p2, %p2991_p10 }
  0x1e   : > { %p2716_p5 = por %p2715_p1, %p2714_p4 }
  0x1f   : > { %p2710_p7 = pneg %p2709_p3 }
  0x21   : > { %p2717_p6 = pnand %p2716_p5, %p2710_p7 }
  0x23   : > { %2720 = shalt.err (!%p2717_p6)
}
  0x24   : > { %2506 = dma.hbm_to_vmem [thread:$0]  (!%p2975_p8), %s3391_s2, 16, %s220_s9, [#allocation7]  }
  0x25   : > { %s2721_s16 = scalar_lea.hbm %s3393_s4, 16 }
  0x26   : > { %p2722_p9 = scmp.ne.s32.totalorder %s3393_s4, %s2721_s16  ;;  %p2728_p4 = scmp.lt.u32.totalorder %s2721_s16, %s3393_s4 }
  0x28   : > { %p2724_p11 = pnand %p2722_p9, %p2991_p10 }
  0x2a   : > { %p2725_p1 = pneg %p2724_p11 }
  0x2c   : > { %p2730_p5 = pnand %p2728_p4, %p2725_p1 }
  0x2e   : > { %2733 = shalt.err (!%p2730_p5)
}
  0x2f   : > { %s2734_s9 = scalar_lea.vmem %s2979_s11, 16  ;;  %s2741_s22 = scalar_lea.vmem %s2979_s11, 32 }
  0x30   : > { %p2735_p6 = scmp.ne.s32.totalorder %s2979_s11, %s2734_s9  ;;  %p2742_p0 = scmp.lt.s32.totalorder %s2979_s11, %s2979_s11 }
  0x31   : > { %p2743_p2 = scmp.lt.s32.totalorder %s2741_s22, %s2734_s9 }
  0x32   : > { %p2737_p12 = pnand %p2735_p6, %p2991_p10 }
  0x33   : > { %p2744_p3 = por %p2743_p2, %p2742_p0 }
  0x34   : > { %p2738_p13 = pneg %p2737_p12 }
  0x36   : > { %p2745_p7 = pnand %p2744_p3, %p2738_p13 }
  0x38   : > { %2748 = shalt.err (!%p2745_p7)
}
  0x39   : > { %2509 = dma.hbm_to_vmem [thread:$0]  (!%p2975_p8), %s3393_s4, 16, %s2979_s11, [#allocation7]  }
  0x3a   : > { %s2749_s13 = scalar_lea.hbm %s3395_s6, 16 }
  0x3b   : > { %p2750_p9 = scmp.ne.s32.totalorder %s3395_s6, %s2749_s13  ;;  %p2756_p4 = scmp.lt.u32.totalorder %s2749_s13, %s3395_s6 }
  0x3d   : > { %p2752_p11 = pnand %p2750_p9, %p2991_p10 }
  0x3f   : > { %p2753_p1 = pneg %p2752_p11 }
  0x41   : > { %p2758_p5 = pnand %p2756_p4, %p2753_p1 }
  0x43   : > { %2761 = shalt.err (!%p2758_p5)
}
  0x44   : > { %s2762_s11 = scalar_lea.vmem %s2981_s14, 16  ;;  %s2769_s19 = scalar_lea.vmem %s2981_s14, 32 }
  0x45   : > { %p2763_p6 = scmp.ne.s32.totalorder %s2981_s14, %s2762_s11  ;;  %p2770_p0 = scmp.lt.s32.totalorder %s2981_s14, %s2981_s14 }
  0x46   : > { %p2771_p2 = scmp.lt.s32.totalorder %s2769_s19, %s2762_s11 }
  0x47   : > { %p2765_p12 = pnand %p2763_p6, %p2991_p10 }
  0x48   : > { %p2772_p3 = por %p2771_p2, %p2770_p0 }
  0x49   : > { %p2766_p13 = pneg %p2765_p12 }
  0x4b   : > { %p2773_p7 = pnand %p2772_p3, %p2766_p13 }
  0x4d   : > { %2776 = shalt.err (!%p2773_p7)
}
  0x4e   : > { %2512 = dma.hbm_to_vmem [thread:$0]  (!%p2975_p8), %s3395_s6, 16, %s2981_s14, [#allocation10]  }
  0x4f   : > { %s3056_s20 = sadd.s32 1, %s2879_s27   ;;  %s56_s12 = sadd.s32 1, %s2875_s26 }
  0x50   : > { %s53_s22 = ssub.s32 %s2879_s27, %s3056_s20  ;;  %p63_p9 = scmp.ne.s32.totalorder %s2875_s26, %s2871_s25 }
  0x51   : > { %p54_p10 = scmp.eq.s32.totalorder %s53_s22, 0  ;;  %p64_p11 = scmp.eq.s32.totalorder %s2879_s27, 0 }
  0x52   : > { %p2520_p1 = scmp.lt.s32.totalorder %s2879_s27, 8  ;;  %s266_s24 = sand.u32 1, %s2875_s26  }
  0x53   : > { %s3066_s23 = scalar_select %p54_p10, %s2875_s26, %s56_s12  }
  0x54   : > { %p65_p4 = por %p64_p11, %p63_p9  ;;  %s2483_s8 = smul.u32 960, %s266_s24 }
  0x55   : > { %s2183_s10 = smul.u32 15360, %s2879_s27  ;;  %s3081_s27 = scalar_lea.sflag [#allocation4], %s266_s24 }
  0x56   : > { %p3070_p5 = pnand %p2520_p1, %p65_p4  ;;  %s270_s17 = scalar_lea.vmem [#allocation3], %s2483_s8 }
  0x57   : > { %s3077_s16 = scalar_lea.hbm %s3390_s1, %s2183_s10  ;;  %s277_s18 = sshll.u32 %s270_s17, 4  ;;  %s3079_s18 = int_to_ptr.vmem [resolvable:$true] %s277_s18 }
  0x58   : > { %s2777_s11 = scalar_lea.hbm %s3077_s16, 15360  ;;  %p2779_p6 = pneg %p3070_p5 }
  0x59   : > { %p2778_p8 = scmp.ne.s32.totalorder %s3077_s16, %s2777_s11  ;;  %s2782_s9 = scalar_lea.hbm %s3390_s1, 122880 }
  0x5a   : > { %p2783_p0 = scmp.lt.u32.totalorder %s3077_s16, %s3390_s1  ;;  %p2784_p2 = scmp.lt.u32.totalorder %s2782_s9, %s2777_s11 }
  0x5b   : > { %p2780_p12 = pnand %p2779_p6, %p2778_p8  ;;  %p2786_p7 = scmp.lt.u32.totalorder %s2777_s11, %s3077_s16 }
  0x5c   : > { %p2785_p3 = por %p2784_p2, %p2783_p0 }
  0x5d   : > { %p2781_p13 = pneg %p2780_p12 }
  0x5e   : > { %p2787_p10 = por %p2786_p7, %p2785_p3 }
  0x60   : > { %p2788_p9 = pnand %p2787_p10, %p2781_p13 }
  0x62   : > { %2791 = shalt.err (!%p2788_p9)
}
  0x63   : > { %s2792_s24 = scalar_lea.vmem %s3079_s18, 15360  ;;  %s2884_s8 = smov [#allocation3]  }
  0x64   : > { %p2793_p11 = scmp.ne.s32.totalorder %s3079_s18, %s2792_s24  ;;  %s2797_s10 = sshll.u32 %s2884_s8, 4  ;;  %s2798_s10 = int_to_ptr.vmem [resolvable:$false] %s2797_s10 }
  0x65   : > { %s2799_s14 = scalar_lea.vmem %s2798_s10, 30720  ;;  %p2800_p8 = scmp.lt.s32.totalorder %s3079_s18, %s2798_s10 }
  0x66   : > { %p2795_p1 = pnand %p2793_p11, %p2779_p6  ;;  %p2801_p12 = scmp.lt.s32.totalorder %s2799_s14, %s2792_s24 }
  0x68   : > { %p2796_p4 = pneg %p2795_p1  ;;  %p2802_p0 = por %p2801_p12, %p2800_p8 }
  0x6a   : > { %p2803_p2 = pnand %p2802_p0, %p2796_p4 }
  0x6c   : > { %2806 = shalt.err (!%p2803_p2)
}
  0x6d   : > { %s2885_s15 = smov 64   ;;  %s2886_s17 = smov 4  }
  0x6e   : > { %2516 = dma.hbm_to_vmem [thread:$0]  (!%p3070_p5), %s3077_s16, 15360, %s3079_s18, %s3081_s27, %s2885_s15, %s2885_s15, %s2886_s17  }
  0x6f   : > { %p3405_p6 = scmp.ne.s32.totalorder %s3401_s30, 0 }
  0x70   : > { %s291_s11 = sand.u32 (!%p3405_p6), 1, %s2871_s25   ;;  %p3406_p13 = scmp.ne.s32.totalorder (!%p3405_p6), %s3400_s29, 0 }
  0x71   : > { %289 = sbr.rel (%p3405_p6) target bundleno = 955 (0x3bb), region = 48  ;;  %s292_s21 = scalar_lea.sflag (!%p3405_p6), [#allocation4], %s291_s11 }
  0x72   : > { %s2484_s19 = smul.u32 (!%p3405_p6), 960, %s291_s11 }
  0x74   : > { %s3112_s9 = scalar_lea.vmem (!%p3405_p6), [#allocation3], %s2484_s19 }
  0x78   : > { %2850 = dma.done.wait (%p3406_p13), %s292_s21, 15360  }
  0x79   : > { %2852 = vsyncadd (%p3406_p13), %s292_s21, 4294951936  ;;  %p3407_p3 = scmp.eq.s32.totalorder %s2954_s28, 0 }
  0x7b   : > { %2854 = dma.done.wait (%p3407_p3), [#allocation7], 32   ;;  %p3408_p5 = pmov %p3407_p3 }
  0x7c   : > { %p3409_p7 = pmov %p3407_p3 }
  0x7d   : > { %2856 = vsyncadd (%p3408_p5), [#allocation7], 4294967264 }
  0x7e   : > { %2858 = dma.done.wait (%p3409_p7), [#allocation10], 16   ;;  %p3410_p10 = pmov %p3407_p3 }
  0x7f   : > { %s337_s30 = smul.u32 15, %s2954_s28  ;;  %p3411_p11 = scmp.ne.s32.totalorder %s2954_s28, 0 }
  0x80   : > { %2860 = vsyncadd (%p3410_p10), [#allocation10], 4294967280  ;;  %v2887_v0 = vmov (!%p3411_p11), 0.0  }
  0x81   : > { %p338_p9 = scmp.lt.s32.totalorder %s337_s30, 119  ;;  %347 = sbr.rel (%p3411_p11) target bundleno = 136 (0x88), region = 68  ;;  %348 = vst [vmem:[#allocation2] sm:$0x3] (!%p3411_p11), %v2887_v0 }
  0x83   : > { %s3417_s30 = smov (!%p338_p9, %s337_s30), 119 }
  0x84   : > { %s3130_s29 = scalar_lea.vmem %s3389_s0, %s3417_s30 }
  0x88 PF: > { %v2571_v1 = vld [vmem:[%s3112_s9 + $0x40] sm:$0xff]   ;;  %v2575_v5 = vld [vmem:[%s3112_s9 + $0x48] sm:$0xff]   ;;  %v2579_v9 = vld [vmem:[%s3112_s9 + $0x50] sm:$0xff]   ;;  %v598_v30 = vlaneseq  ;;  %v2888_v36 = vmov 1966171168   ;;  %vm2890_vm0 = vmmov 0  }
  0x89   : > { %v2572_v2 = vld [vmem:[%s3112_s9 + $0xc0] sm:$0xff]   ;;  %2184 = vmatprep.subr.bf16.mxu0 %v2571_v1  ;;  %v2576_v6 = vld [vmem:[%s3112_s9 + $0xc8] sm:$0xff]   ;;  %v2580_v10 = vld [vmem:[%s3112_s9 + $0xd0] sm:$0xff]   ;;  %v596_v37 = vunpack.c.l.s4 %v2888_v36  ;;  %p2174_p1 = scmp.ne.s32.totalorder %s2954_s28, 7 }
  0x8a   : > { %v2573_v3 = vld [vmem:[%s3112_s9] sm:$0xff]   ;;  %2206 = vmatprep.subr.bf16.mxu1 %v2572_v2  ;;  %v2577_v7 = vld [vmem:[%s3112_s9 + $0x8] sm:$0xff]   ;;  %v2581_v11 = vld [vmem:[%s3112_s9 + $0x10] sm:$0xff]   ;;  %v599_v34 = vshrl.u32 %v598_v30, 7  ;;  %vm2892_vm1 = vmmov (!%p2174_p1), 0   ;;  %vm1871_vm2 = vcmask (!%p2174_p1), 523264  }
  0x8b   : > { %v2574_v4 = vld [vmem:[%s3112_s9 + $0x80] sm:$0xff]   ;;  %2185 = vmatpush3.bf16.msra.mxu0 %v2573_v3  ;;  %v2578_v8 = vld [vmem:[%s3112_s9 + $0x88] sm:$0xff]   ;;  %v2582_v12 = vld [vmem:[%s3112_s9 + $0x90] sm:$0xff]   ;;  %v597_v40 = vunpack.c.0.s8 %v596_v37  ;;  %vm1945_vm3 = vcmask (!%p2174_p1), 17408  }
  0x8c   : > { %2207 = vmatpush3.bf16.msra.mxu1 %v2574_v4  ;;  %2186 = vmatprep.subr.bf16.mxu0 %v2575_v5  ;;  %v2583_v13 = vld [vmem:[%s3112_s9 + $0x58] sm:$0xff]   ;;  %v2587_v17 = vld [vmem:[%s3112_s9 + $0x60] sm:$0xff]   ;;  %v2591_v21 = vld [vmem:[%s3112_s9 + $0x68] sm:$0xff]  }
  0x8d   : > { %2208 = vmatprep.subr.bf16.mxu1 %v2576_v6  ;;  %v2584_v14 = vld [vmem:[%s3112_s9 + $0xd8] sm:$0xff]   ;;  %v2588_v18 = vld [vmem:[%s3112_s9 + $0xe0] sm:$0xff]   ;;  %v2592_v22 = vld [vmem:[%s3112_s9 + $0xe8] sm:$0xff]   ;;  %v3169_v42 = vsub.s32 %v597_v40, %v599_v34 }
  0x8e   : > { %v2585_v15 = vld [vmem:[%s3112_s9 + $0x18] sm:$0xff]   ;;  %v2589_v19 = vld [vmem:[%s3112_s9 + $0x20] sm:$0xff]   ;;  %v2593_v23 = vld [vmem:[%s3112_s9 + $0x28] sm:$0xff]  }
  0x8f   : > { %2187 = vmatpush3.bf16.msra.mxu0 %v2577_v7  ;;  %v2586_v16 = vld [vmem:[%s3112_s9 + $0x98] sm:$0xff]   ;;  %v2590_v20 = vld [vmem:[%s3112_s9 + $0xa0] sm:$0xff]   ;;  %v2594_v24 = vld [vmem:[%s3112_s9 + $0xa8] sm:$0xff]  }
  0x90   : > { %2209 = vmatpush3.bf16.msra.mxu1 %v2578_v8  ;;  %2188 = vmatprep.subr.bf16.mxu0 %v2579_v9  ;;  %v2595_v25 = vld [vmem:[%s3112_s9 + $0x70] sm:$0xff]   ;;  %v2599_v29 = vld [vmem:[%s3112_s9 + $0x78] sm:$0xff]   ;;  %v2604_v35 = vld [vmem:[%s3112_s9 + $0x140] sm:$0xff]  }
  0x91   : > { %2210 = vmatprep.subr.bf16.mxu1 %v2580_v10  ;;  %v2596_v26 = vld [vmem:[%s3112_s9 + $0xf0] sm:$0xff]   ;;  %v2600_v31 = vld [vmem:[%s3112_s9 + $0xf8] sm:$0xff]   ;;  %v2606_v41 = vld [vmem:[%s3112_s9 + $0x1c0] sm:$0xff]  }
  0x92   : > { %v2597_v27 = vld [vmem:[%s3112_s9 + $0x30] sm:$0xff]   ;;  %v2601_v32 = vld [vmem:[%s3112_s9 + $0x38] sm:$0xff]   ;;  %v2605_v49 = vld [vmem:[%s3112_s9 + $0x100] sm:$0xff]  }
  0x93   : > { %2189 = vmatpush3.bf16.msra.mxu0 %v2581_v11  ;;  %v2598_v28 = vld [vmem:[%s3112_s9 + $0xb0] sm:$0xff]   ;;  %v2602_v33 = vld [vmem:[%s3112_s9 + $0xb8] sm:$0xff]   ;;  %v2608_v52 = vld [vmem:[%s3112_s9 + $0x148] sm:$0xff]  }
  0x94   : > { %2211 = vmatpush3.bf16.msra.mxu1 %v2582_v12  ;;  %2190 = vmatprep.subr.bf16.mxu0 %v2583_v13  ;;  %v350_v38 = vld [vmem:[%s3130_s29] sm:$0xff]  ;;  %v2610_v55 = vld [vmem:[%s3112_s9 + $0x1c8] sm:$0xff]   ;;  %v2612_v58 = vld [vmem:[%s3112_s9 + $0x150] sm:$0xff]  }
  0x95   : > { %2212 = vmatprep.subr.bf16.mxu1 %v2584_v14  ;;  %v594_v39 = vcombine.high %v350_v38, %v350_v38  ;;  %v601_v43 = vrot.slane %v350_v38, %v3169_v42  ;;  %v2607_v54 = vld [vmem:[%s3112_s9 + $0x180] sm:$0xff]   ;;  %v2609_v57 = vld [vmem:[%s3112_s9 + $0x108] sm:$0xff]   ;;  %v2614_v60 = vld [vmem:[%s3112_s9 + $0x1d0] sm:$0xff]  }
  0x96   : > { %v2611_v59 = vld [vmem:[%s3112_s9 + $0x188] sm:$0xff]   ;;  %v2613_v61 = vld [vmem:[%s3112_s9 + $0x110] sm:$0xff]   ;;  %v2616_v62 = vld [vmem:[%s3112_s9 + $0x158] sm:$0xff]  }
  0x97   : > { %2191 = vmatpush3.bf16.msra.mxu0 %v2585_v15  ;;  %v3173_v44 = vrot.slane %v594_v39, %v3169_v42  ;;  %v609_v45 = vcombine.high %v601_v43, %v601_v43  ;;  %v617_v46 = vrot.slane %v601_v43, %v3169_v42  ;;  %v2615_v63 = vld [vmem:[%s3112_s9 + $0x190] sm:$0xff]   ;;  %v2618_v0 = vld [vmem:[%s3112_s9 + $0x1d8] sm:$0xff]   ;;  %v2620_v2 = vld [vmem:[%s3112_s9 + $0x160] sm:$0xff]  }
  0x98   : > { %2213 = vmatpush3.bf16.msra.mxu1 %v2586_v16  ;;  %2192 = vmatprep.subr.bf16.mxu0 %v2587_v17  ;;  %v2617_v1 = vld [vmem:[%s3112_s9 + $0x118] sm:$0xff]   ;;  %v2622_v4 = vld [vmem:[%s3112_s9 + $0x1e0] sm:$0xff]   ;;  %v2624_v6 = vld [vmem:[%s3112_s9 + $0x168] sm:$0xff]  }
  0x99   : > { %2214 = vmatprep.subr.bf16.mxu1 %v2588_v18  ;;  %v610_v47 = vcombine.high %v3173_v44, %v3173_v44  ;;  %v631_v48 = vrot.slane %v609_v45, %v3169_v42  ;;  %v639_v51 = vcombine.high %v617_v46, %v617_v46  ;;  %v2619_v3 = vld [vmem:[%s3112_s9 + $0x198] sm:$0xff]   ;;  %v2621_v5 = vld [vmem:[%s3112_s9 + $0x120] sm:$0xff]   ;;  %v2626_v8 = vld [vmem:[%s3112_s9 + $0x1e8] sm:$0xff]   ;;  %v624_v18 = vrot.slane %v3173_v44, %v3169_v42 }
  0x9a   : > { %v2623_v7 = vld [vmem:[%s3112_s9 + $0x1a0] sm:$0xff]   ;;  %v2625_v9 = vld [vmem:[%s3112_s9 + $0x128] sm:$0xff]   ;;  %v2628_v10 = vld [vmem:[%s3112_s9 + $0x170] sm:$0xff]  }
  0x9b   : > { %2193 = vmatpush3.bf16.msra.mxu0 %v2589_v19  ;;  %v638_v50 = vrot.slane %v610_v47, %v3169_v42  ;;  %1458 = vmatprep.mubr.bf16.mxu0 %v631_v48  ;;  %v641_v53 = vcombine.high %v631_v48, %v631_v48  ;;  %v2627_v11 = vld [vmem:[%s3112_s9 + $0x1a8] sm:$0xff]   ;;  %v2630_v12 = vld [vmem:[%s3112_s9 + $0x1f0] sm:$0xff]   ;;  %v2632_v14 = vld [vmem:[%s3112_s9 + $0x178] sm:$0xff]  }
  0x9c   : > { %2215 = vmatpush3.bf16.msra.mxu1 %v2590_v20  ;;  %2194 = vmatprep.subr.bf16.mxu0 %v2591_v21  ;;  %v2629_v13 = vld [vmem:[%s3112_s9 + $0x130] sm:$0xff]   ;;  %v2634_v16 = vld [vmem:[%s3112_s9 + $0x1f8] sm:$0xff]   ;;  %v2636_v19 = vld [vmem:[%s3112_s9 + $0x240] sm:$0xff]  }
  0x9d   : > { %2216 = vmatprep.subr.bf16.mxu1 %v2592_v22  ;;  %v642_v56 = vcombine.high %v638_v50, %v638_v50  ;;  %1498 = vmatprep.mubr.bf16.mxu1 %v641_v53  ;;  %v2631_v15 = vld [vmem:[%s3112_s9 + $0x1b0] sm:$0xff]   ;;  %v2633_v17 = vld [vmem:[%s3112_s9 + $0x138] sm:$0xff]   ;;  %v2638_v21 = vld [vmem:[%s3112_s9 + $0x2c0] sm:$0xff]  }
  0x9e   : > { %v2635_v20 = vld [vmem:[%s3112_s9 + $0x1b8] sm:$0xff]   ;;  %v2637_v22 = vld [vmem:[%s3112_s9 + $0x200] sm:$0xff]   ;;  %v2646_v30 = vld [vmem:[%s3112_s9 + $0x2d0] sm:$0xff]  }
  0x9f   : > { %2195 = vmatpush3.bf16.msra.mxu0 %v2593_v23  ;;  %v640_v23 = vcombine.high %v624_v18, %v624_v18  ;;  %v2650_v34 = vld [vmem:[%s3112_s9 + $0x2d8] sm:$0xff]   ;;  %v2652_v36 = vld [vmem:[%s3112_s9 + $0x260] sm:$0xff]   ;;  %v2656_v40 = vld [vmem:[%s3112_s9 + $0x268] sm:$0xff]  }
  0xa0   : > { %2217 = vmatpush3.bf16.msra.mxu1 %v2594_v24  ;;  %2196 = vmatprep.subr.bf16.mxu0 %v2595_v25  ;;  %v2640_v24 = vld [vmem:[%s3112_s9 + $0x248] sm:$0xff]   ;;  %v2639_v25 = vld [vmem:[%s3112_s9 + $0x280] sm:$0xff]   ;;  %v2651_v37 = vld [vmem:[%s3112_s9 + $0x298] sm:$0xff]  }
  0xa1   : > { %2218 = vmatprep.subr.bf16.mxu1 %v2596_v26  ;;  %v2642_v26 = vld [vmem:[%s3112_s9 + $0x2c8] sm:$0xff]   ;;  %v2654_v38 = vld [vmem:[%s3112_s9 + $0x2e0] sm:$0xff]  }
  0xa2   : > { %v2653_v39 = vld [vmem:[%s3112_s9 + $0x220] sm:$0xff]   ;;  %v2658_v43 = vld [vmem:[%s3112_s9 + $0x2e8] sm:$0xff]  }
  0xa3   : > { %2197 = vmatpush3.bf16.msra.mxu0 %v2597_v27  ;;  %v2641_v27 = vld [vmem:[%s3112_s9 + $0x208] sm:$0xff]  }
  0xa4   : > { %2219 = vmatpush3.bf16.msra.mxu1 %v2598_v28  ;;  %2198 = vmatprep.subr.bf16.mxu0 %v2599_v29  ;;  %v2644_v28 = vld [vmem:[%s3112_s9 + $0x250] sm:$0xff]   ;;  %v2643_v29 = vld [vmem:[%s3112_s9 + $0x288] sm:$0xff]  }
  0xa5   : > { %2220 = vmatprep.subr.bf16.mxu1 %v2600_v31  ;;  %v2645_v31 = vld [vmem:[%s3112_s9 + $0x210] sm:$0xff]   ;;  %v2657_v44 = vld [vmem:[%s3112_s9 + $0x228] sm:$0xff]  }
  0xa6   : > { %v351_v45 = vld [vmem:[%s3130_s29 + $0x8] sm:$0x7f] }
  0xa7   : > { %2199 = vmatpush3.bf16.msra.mxu0 %v2601_v32  ;;  %v2648_v32 = vld [vmem:[%s3112_s9 + $0x258] sm:$0xff]   ;;  %v650_v47 = vrot.slane %v351_v45, %v3169_v42  ;;  %v643_v48 = vcombine.high %v351_v45, %v351_v45 }
  0xa8   : > { %2221 = vmatpush3.bf16.msra.mxu1 %v2602_v33  ;;  %2228 = vmatprep.subr.bf16.mxu0 %v2604_v35  ;;  %v2647_v33 = vld [vmem:[%s3112_s9 + $0x290] sm:$0xff]   ;;  %v2649_v35 = vld [vmem:[%s3112_s9 + $0x218] sm:$0xff]  }
  0xa9   : > { %2250 = vmatprep.subr.bf16.mxu1 %v2606_v41  ;;  %v2655_v41 = vld [vmem:[%s3112_s9 + $0x2a0] sm:$0xff]   ;;  %v3242_v53 = vrot.slane %v643_v48, %v3169_v42 }
  0xaa   : > { %1459 = vmatmul.mubr.bf16.vlgmr.msra.gmra.mrb[0].mxu0 %v617_v46  ;;  %v2660_v46 = vld [vmem:[%s3112_s9 + $0x270] sm:$0xff]  }
  0xab   : > { %2229 = vmatpush3.bf16.msra.mxu0 %v2605_v49  ;;  %1499 = vmatmul.mubr.bf16.vlgmr.msra.gmra.mrb[0].mxu1 %v639_v51  ;;  %v2659_v49 = vld [vmem:[%s3112_s9 + $0x2a8] sm:$0xff]   ;;  %v658_v51 = vcombine.high %v650_v47, %v650_v47 }
  0xac   : > { %2230 = vmatprep.subr.bf16.mxu0 %v2608_v52  ;;  %2251 = vmatpush3.bf16.msra.mxu1 %v2607_v54  ;;  %v2661_v52 = vld [vmem:[%s3112_s9 + $0x230] sm:$0xff]   ;;  %v2664_v54 = vld [vmem:[%s3112_s9 + $0x278] sm:$0xff]  }
  0xad   : > { %1538 = vmatprep.mubr.bf16.mxu0 %v638_v50  ;;  %2252 = vmatprep.subr.bf16.mxu1 %v2610_v55  ;;  %v2662_v50 = vld [vmem:[%s3112_s9 + $0x2f0] sm:$0xff]   ;;  %v680_v55 = vrot.slane %v658_v51, %v3169_v42 }
  0xae   : > { %1578 = vmatprep.mubr.bf16.mxu1 %v642_v56  ;;  %v2663_v56 = vld [vmem:[%s3112_s9 + $0x2b0] sm:$0xff]  }
  0xaf   : > { %2231 = vmatpush3.bf16.msra.mxu0 %v2609_v57  ;;  %v2666_v57 = vld [vmem:[%s3112_s9 + $0x2f8] sm:$0xff]  }
  0xb0   : > { %2232 = vmatprep.subr.bf16.mxu0 %v2612_v58  ;;  %2253 = vmatpush3.bf16.msra.mxu1 %v2611_v59  ;;  %v690_v58 = vcombine.high %v680_v55, %v680_v55  ;;  %v2665_v59 = vld [vmem:[%s3112_s9 + $0x238] sm:$0xff]  }
  0xb1   : > { %2254 = vmatprep.subr.bf16.mxu1 %v2614_v60  ;;  %v659_v60 = vcombine.high %v3242_v53, %v3242_v53 }
  0xb3   : > { %2233 = vmatpush3.bf16.msra.mxu0 %v2613_v61  ;;  %v666_v61 = vrot.slane %v650_v47, %v3169_v42 }
  0xb4   : > { %2234 = vmatprep.subr.bf16.mxu0 %v2616_v62  ;;  %2255 = vmatpush3.bf16.msra.mxu1 %v2615_v63  ;;  %v2668_v62 = vld [vmem:[%s3112_s9 + $0x340] sm:$0xff]   ;;  %v2667_v63 = vld [vmem:[%s3112_s9 + $0x2b8] sm:$0xff]  }
  0xb5   : > { %2256 = vmatprep.subr.bf16.mxu1 %v2618_v0  ;;  %v2669_v0 = vld [vmem:[%s3112_s9 + $0x300] sm:$0xff]  }
  0xb7   : > { %2235 = vmatpush3.bf16.msra.mxu0 %v2617_v1  ;;  %v687_v1 = vrot.slane %v659_v60, %v3169_v42 }
  0xb8   : > { %2236 = vmatprep.subr.bf16.mxu0 %v2620_v2  ;;  %2257 = vmatpush3.bf16.msra.mxu1 %v2619_v3  ;;  %v688_v2 = vcombine.high %v666_v61, %v666_v61  ;;  %v2671_v3 = vld [vmem:[%s3112_s9 + $0x348] sm:$0xff]  }
  0xb9   : > { %2258 = vmatprep.subr.bf16.mxu1 %v2622_v4  ;;  %v2670_v4 = vld [vmem:[%s3112_s9 + $0x380] sm:$0xff]  }
  0xbb   : > { %2237 = vmatpush3.bf16.msra.mxu0 %v2621_v5  ;;  %v2889_v5 = vmov 0.0  }
  0xbc   : > { %2238 = vmatprep.subr.bf16.mxu0 %v2624_v6  ;;  %2259 = vmatpush3.bf16.msra.mxu1 %v2623_v7  ;;  %v2672_v6 = vld [vmem:[%s3112_s9 + $0x308] sm:$0xff]   ;;  %v2674_v7 = vld [vmem:[%s3112_s9 + $0x350] sm:$0xff]  }
  0xbd   : > { %2260 = vmatprep.subr.bf16.mxu1 %v2626_v8  ;;  %v2673_v8 = vld [vmem:[%s3112_s9 + $0x388] sm:$0xff]  }
  0xbf   : > { %2239 = vmatpush3.bf16.msra.mxu0 %v2625_v9  ;;  %v2675_v9 = vld [vmem:[%s3112_s9 + $0x310] sm:$0xff]  }
  0xc0   : > { %2240 = vmatprep.subr.bf16.mxu0 %v2628_v10  ;;  %2261 = vmatpush3.bf16.msra.mxu1 %v2627_v11  ;;  %v2677_v10 = vld [vmem:[%s3112_s9 + $0x358] sm:$0xff]   ;;  %v2676_v11 = vld [vmem:[%s3112_s9 + $0x390] sm:$0xff]  }
  0xc1   : > { %2262 = vmatprep.subr.bf16.mxu1 %v2630_v12  ;;  %v2678_v12 = vld [vmem:[%s3112_s9 + $0x318] sm:$0xff]  }
  0xc3   : > { %2241 = vmatpush3.bf16.msra.mxu0 %v2629_v13  ;;  %v2680_v13 = vld [vmem:[%s3112_s9 + $0x360] sm:$0xff]  }
  0xc4   : > { %2242 = vmatprep.subr.bf16.mxu0 %v2632_v14  ;;  %2263 = vmatpush3.bf16.msra.mxu1 %v2631_v15  ;;  %v2679_v14 = vld [vmem:[%s3112_s9 + $0x398] sm:$0xff]   ;;  %v2681_v15 = vld [vmem:[%s3112_s9 + $0x320] sm:$0xff]  }
  0xc5   : > { %2264 = vmatprep.subr.bf16.mxu1 %v2634_v16  ;;  %v2683_v16 = vld [vmem:[%s3112_s9 + $0x368] sm:$0xff]  }
  0xc7   : > { %2243 = vmatpush3.bf16.msra.mxu0 %v2633_v17  ;;  %v2682_v17 = vld [vmem:[%s3112_s9 + $0x3a0] sm:$0xff]  }
  0xc8   : > { %2272 = vmatprep.subr.bf16.mxu0 %v2636_v19  ;;  %2265 = vmatpush3.bf16.msra.mxu1 %v2635_v20  ;;  %v2686_v19 = vld [vmem:[%s3112_s9 + $0x370] sm:$0xff]   ;;  %v2685_v20 = vld [vmem:[%s3112_s9 + $0x3a8] sm:$0xff]  }
  0xc9   : > { %2294 = vmatprep.subr.bf16.mxu1 %v2638_v21  ;;  %v2687_v21 = vld [vmem:[%s3112_s9 + $0x330] sm:$0xff]  }
  0xca   : > { %1539 = vmatmul.mubr.bf16.vlgmr.msra.gmra.mrb[4].mxu0 %v624_v18  ;;  %v2684_v18 = vld [vmem:[%s3112_s9 + $0x328] sm:$0xff]  }
  0xcb   : > { %2273 = vmatpush3.bf16.msra.mxu0 %v2637_v22  ;;  %1579 = vmatmul.mubr.bf16.vlgmr.msra.gmra.mrb[4].mxu1 %v640_v23  ;;  %v2689_v22 = vld [vmem:[%s3112_s9 + $0x378] sm:$0xff]   ;;  %v2688_v23 = vld [vmem:[%s3112_s9 + $0x3b0] sm:$0xff]  }
  0xcc   : > { %2274 = vmatprep.subr.bf16.mxu0 %v2640_v24  ;;  %2295 = vmatpush3.bf16.msra.mxu1 %v2639_v25  ;;  %v2690_v24 = vld [vmem:[%s3112_s9 + $0x338] sm:$0xff]   ;;  %v673_v25 = vrot.slane %v3242_v53, %v3169_v42 }
  0xcd   : > { %2296 = vmatprep.subr.bf16.mxu1 %v2642_v26  ;;  %1618 = vmatprep.mubr.bf16.mxu0 %v680_v55  ;;  %v2692_v26 = vld [vmem:[%s3112_s9 + $0x3b8] sm:$0xff]  }
  0xce   : > { %1658 = vmatprep.mubr.bf16.mxu1 %v690_v58 }
  0xcf   : > { %2275 = vmatpush3.bf16.msra.mxu0 %v2641_v27  ;;  %v689_v27 = vcombine.high %v673_v25, %v673_v25 }
  0xd0   : > { %2276 = vmatprep.subr.bf16.mxu0 %v2644_v28  ;;  %2297 = vmatpush3.bf16.msra.mxu1 %v2643_v29 }
  0xd1   : > { %2298 = vmatprep.subr.bf16.mxu1 %v2646_v30 }
  0xd3   : > { %2277 = vmatpush3.bf16.msra.mxu0 %v2645_v31 }
  0xd4   : > { %2278 = vmatprep.subr.bf16.mxu0 %v2648_v32  ;;  %2299 = vmatpush3.bf16.msra.mxu1 %v2647_v33 }
  0xd5   : > { %2300 = vmatprep.subr.bf16.mxu1 %v2650_v34 }
  0xd7   : > { %2279 = vmatpush3.bf16.msra.mxu0 %v2649_v35 }
  0xd8   : > { %2280 = vmatprep.subr.bf16.mxu0 %v2652_v36  ;;  %2301 = vmatpush3.bf16.msra.mxu1 %v2651_v37 }
  0xd9   : > { %2302 = vmatprep.subr.bf16.mxu1 %v2654_v38 }
  0xdb   : > { %2281 = vmatpush3.bf16.msra.mxu0 %v2653_v39 }
  0xdc   : > { %2282 = vmatprep.subr.bf16.mxu0 %v2656_v40  ;;  %2303 = vmatpush3.bf16.msra.mxu1 %v2655_v41 }
  0xdd   : > { %2304 = vmatprep.subr.bf16.mxu1 %v2658_v43 }
  0xdf   : > { %2283 = vmatpush3.bf16.msra.mxu0 %v2657_v44 }
  0xe0   : > { %2284 = vmatprep.subr.bf16.mxu0 %v2660_v46  ;;  %2305 = vmatpush3.bf16.msra.mxu1 %v2659_v49 }
  0xe1   : > { %2306 = vmatprep.subr.bf16.mxu1 %v2662_v50 }
  0xe3   : > { %2285 = vmatpush3.bf16.msra.mxu0 %v2661_v52 }
  0xe4   : > { %2286 = vmatprep.subr.bf16.mxu0 %v2664_v54  ;;  %2307 = vmatpush3.bf16.msra.mxu1 %v2663_v56 }
  0xe5   : > { %2308 = vmatprep.subr.bf16.mxu1 %v2666_v57 }
  0xe7   : > { %2287 = vmatpush3.bf16.msra.mxu0 %v2665_v59 }
  0xe8   : > { %2316 = vmatprep.subr.bf16.mxu0 %v2668_v62  ;;  %2309 = vmatpush3.bf16.msra.mxu1 %v2667_v63 }
  0xe9   : > { %2373 = vmatprep.subr.bf16.mxu1 %v2889_v5 }
  0xea   : > { %1619 = vmatmul.mubr.bf16.vlgmr.msra.gmra.mrb[8].mxu0 %v666_v61 }
  0xeb   : > { %2317 = vmatpush3.bf16.msra.mxu0 %v2669_v0  ;;  %1698 = vmatprep.mubr.bf16.mxu0 %v687_v1 }
  0xec   : > { %1659 = vmatmul.mubr.bf16.vlgmr.msra.gmra.mrb[8].mxu1 %v688_v2  ;;  %2318 = vmatprep.subr.bf16.mxu0 %v2671_v3 }
  0xed   : > { %2374 = vmatpush3.bf16.msra.mxu1 %v2670_v4  ;;  %2389 = vmatprep.mubr.msk.bf16.mxu1 %vm2890_vm0, %v2889_v5 }
  0xee   : > { %2375 = vmatprep.subr.bf16.mxu1 %v2889_v5 }
  0xef   : > { %2319 = vmatpush3.bf16.msra.mxu0 %v2672_v6 }
  0xf0   : > { %2320 = vmatprep.subr.bf16.mxu0 %v2674_v7 }
  0xf1   : > { %2376 = vmatpush3.bf16.msra.mxu1 %v2673_v8  ;;  %v349_v8 = vld [vmem:[#allocation2] sm:$0x3] }
  0xf2   : > { %2377 = vmatprep.subr.bf16.mxu1 %v2889_v5 }
  0xf3   : > { %2321 = vmatpush3.bf16.msra.mxu0 %v2675_v9 }
  0xf4   : > { %2322 = vmatprep.subr.bf16.mxu0 %v2677_v10 }
  0xf5   : > { %2378 = vmatpush3.bf16.msra.mxu1 %v2676_v11 }
  0xf6   : > { %2379 = vmatprep.subr.bf16.mxu1 %v2889_v5 }
  0xf7   : > { %2323 = vmatpush3.bf16.msra.mxu0 %v2678_v12  ;;  %v1762_v12 = vld [vmem:[%s3392_s3] sm:$0xff] (!%p2174_p1) }
  0xf8   : > { %2324 = vmatprep.subr.bf16.mxu0 %v2680_v13  ;;  %v1763_v13 = vld [vmem:[%s3392_s3 + $0x8] sm:$0xff] (!%p2174_p1) }
  0xf9   : > { %2380 = vmatpush3.bf16.msra.mxu1 %v2679_v14  ;;  %v1764_v14 = vld [vmem:[%s3392_s3 + $0x10] sm:$0xff] (!%p2174_p1) }
  0xfa   : > { %2381 = vmatprep.subr.bf16.mxu1 %v2889_v5 }
  0xfb   : > { %2325 = vmatpush3.bf16.msra.mxu0 %v2681_v15  ;;  %v2891_v15 = vmov (!%p2174_p1), 0.0|0.0  }
  0xfc   : > { %2326 = vmatprep.subr.bf16.mxu0 %v2683_v16  ;;  %v2448_v16 = vpack.c.bf16 (!%p2174_p1), %v1763_v13, %v1762_v12 }
  0xfd   : > { %2382 = vmatpush3.bf16.msra.mxu1 %v2682_v17  ;;  %v1765_v17 = vld [vmem:[%s3392_s3 + $0x18] sm:$0xff] (!%p2174_p1) }
  0xfe   : > { %2383 = vmatprep.subr.bf16.mxu1 %v2889_v5 }
  0xff   : > { %2327 = vmatpush3.bf16.msra.mxu0 %v2684_v18  ;;  %v2893_v18 = vmov (!%p2174_p1), 0.0  }
 0x100   : > { %2328 = vmatprep.subr.bf16.mxu0 %v2686_v19  ;;  %v2451_v19 = vpack.c.bf16 (!%p2174_p1), %v1765_v17, %v1764_v14 }
 0x101   : > { %2384 = vmatpush3.bf16.msra.mxu1 %v2685_v20  ;;  %v1766_v20 = vld [vmem:[%s3392_s3 + $0x20] sm:$0xff] (!%p2174_p1) }
 0x102   : > { %2385 = vmatprep.subr.bf16.mxu1 %v2889_v5 }
 0x103   : > { %2329 = vmatpush3.bf16.msra.mxu0 %v2687_v21  ;;  %v1767_v21 = vld [vmem:[%s3392_s3 + $0x28] sm:$0xff] (!%p2174_p1) }
 0x104   : > { %2330 = vmatprep.subr.bf16.mxu0 %v2689_v22  ;;  %v1856_v22 = vld [vmem:[%s3394_s5] sm:$0xff] (!%p2174_p1) }
 0x105   : > { %2386 = vmatpush3.bf16.msra.mxu1 %v2688_v23  ;;  %v1857_v23 = vld [vmem:[%s3394_s5 + $0x8] sm:$0xff] (!%p2174_p1) }
 0x106   : > { %2387 = vmatprep.subr.bf16.mxu1 %v2889_v5 }
 0x107   : > { %2331 = vmatpush3.bf16.msra.mxu0 %v2690_v24  ;;  %v1858_v24 = vld [vmem:[%s3394_s5 + $0x10] sm:$0xff] (!%p2174_p1) }
 0x108   : > { %2447 = vmatprep.subr.bf16.mxu0 (!%p2174_p1), %v2891_v15 }
 0x109   : > { %2388 = vmatpush3.bf16.msra.mxu1 %v2692_v26  ;;  %v2472_v26 = vpack.c.bf16 (!%p2174_p1), %v1857_v23, %v1856_v22 }
 0x10a   : > { %1699 = vmatmul.mubr.bf16.vlgmr.msra.gmra.mrb[12].mxu0 %v673_v25  ;;  %2471 = vmatprep.subr.bf16.mxu1 (!%p2174_p1), %v2891_v15  ;;  %v2454_v25 = vpack.c.bf16 (!%p2174_p1), %v1767_v21, %v1766_v20 }
 0x10b   : > { %2425 = vmatprep.mubr.msk.f32.mxu0 (!%p2174_p1), %vm2892_vm1, %v2893_v18  ;;  %2449 = vmatpush3.bf16.msra.mxu0 (!%p2174_p1), %v2448_v16 }
 0x10c   : > { %2390 = vmatmul.mubr.bf16.vlgmr.msra.gmra.mrb[12].mxu1 %v689_v27  ;;  %2450 = vmatprep.subr.bf16.mxu0 (!%p2174_p1), %v2891_v15  ;;  %v1859_v27 = vld [vmem:[%s3394_s5 + $0x18] sm:$0xff] (!%p2174_p1) }
 0x10d   : > { %2444 = vmatprep.mubr.msk.f32.mxu1 (!%p2174_p1), %vm2892_vm1, %v2893_v18  ;;  %2473 = vmatpush3.bf16.msra.mxu1 (!%p2174_p1), %v2472_v26 }
 0x10e   : > { %2474 = vmatprep.subr.bf16.mxu1 (!%p2174_p1), %v2891_v15 }
 0x10f   : > { %2452 = vmatpush3.bf16.msra.mxu0 (!%p2174_p1), %v2451_v19 }
 0x110   : > { %2453 = vmatprep.subr.bf16.mxu0 (!%p2174_p1), %v2891_v15 }
 0x113   : > { %2455 = vmatpush3.bf16.msra.mxu0 (!%p2174_p1), %v2454_v25 }
 0x114   : > { %2456 = vmatprep.subr.bf16.mxu0 (!%p2174_p1), %v2891_v15 }
 0x17d   : > { %v2200_v28 = vpop.f32.mrb[0].mxu0 }
 0x17e   : > { %v2201_v29 = vpop.f32.mrb[1].mxu0  ;;  %v2222_v30 = vpop.f32.mrb[0].mxu1 }
 0x17f   : > { %v2202_v31 = vadd.f32 %v2201_v29, %v2200_v28  ;;  %v2203_v32 = vpop.f32.mrb[2].mxu0  ;;  %v2223_v33 = vpop.f32.mrb[1].mxu1  ;;  %v1768_v28 = vld [vmem:[%s3392_s3 + $0x30] sm:$0xff] (!%p2174_p1)  ;;  %v1769_v29 = vld [vmem:[%s3392_s3 + $0x38] sm:$0xff] (!%p2174_p1) }
 0x180   : > { %v2204_v34 = vpop.f32.mrb[3].mxu0  ;;  %v2224_v35 = vadd.f32 %v2223_v33, %v2222_v30  ;;  %v2225_v36 = vpop.f32.mrb[2].mxu1  ;;  %v2475_v30 = vpack.c.bf16 (!%p2174_p1), %v1859_v27, %v1858_v24  ;;  %v1861_v32 = vld [vmem:[%s3394_s5 + $0x28] sm:$0xff] (!%p2174_p1)  ;;  %v2457_v33 = vpack.c.bf16 (!%p2174_p1), %v1769_v29, %v1768_v28 }
 0x181   : > { %v2226_v37 = vpop.f32.mrb[3].mxu1  ;;  %v1770_v34 = vld [vmem:[%s3392_s3 + $0x40] sm:$0xff] (!%p2174_p1) }
 0x182   : > { %v1501_v38 = vadd.f32 %v2224_v35, %v2202_v31  ;;  %v1860_v31 = vld [vmem:[%s3394_s5 + $0x20] sm:$0xff] (!%p2174_p1)  ;;  %v1771_v35 = vld [vmem:[%s3392_s3 + $0x48] sm:$0xff] (!%p2174_p1)  ;;  %2476 = vmatpush3.bf16.msra.mxu1 (!%p2174_p1), %v2475_v30  ;;  %2458 = vmatpush3.bf16.msra.mxu0 (!%p2174_p1), %v2457_v33 }
 0x183   : > { %v2478_v36 = vpack.c.bf16 (!%p2174_p1), %v1861_v32, %v1860_v31  ;;  %2477 = vmatprep.subr.bf16.mxu1 (!%p2174_p1), %v2891_v15  ;;  %v2460_v37 = vpack.c.bf16 (!%p2174_p1), %v1771_v35, %v1770_v34  ;;  %2459 = vmatprep.subr.bf16.mxu0 (!%p2174_p1), %v2891_v15 }
 0x186   : > { %2479 = vmatpush3.bf16.msra.mxu1 (!%p2174_p1), %v2478_v36  ;;  %2461 = vmatpush3.bf16.msra.mxu0 (!%p2174_p1), %v2460_v37 }
 0x187   : > { %2480 = vmatprep.subr.bf16.mxu1 (!%p2174_p1), %v2891_v15  ;;  %2462 = vmatprep.subr.bf16.mxu0 (!%p2174_p1), %v2891_v15 }
 0x19d   : > { %v2244_v42 = vpop.f32.mrb[4].mxu0 }
 0x19e   : > { %v2245_v39 = vpop.f32.mrb[5].mxu0  ;;  %v2266_v43 = vpop.f32.mrb[4].mxu1 }
 0x19f   : > { %v2246_v40 = vadd.f32 %v2245_v39, %v2244_v42  ;;  %v2247_v41 = vpop.f32.mrb[6].mxu0  ;;  %v2267_v45 = vpop.f32.mrb[5].mxu1  ;;  %v1773_v42 = vld [vmem:[%s3392_s3 + $0x58] sm:$0xff] (!%p2174_p1) }
 0x1a0   : > { %v2248_v44 = vpop.f32.mrb[7].mxu0  ;;  %v2268_v47 = vadd.f32 %v2267_v45, %v2266_v43  ;;  %v2269_v48 = vpop.f32.mrb[6].mxu1  ;;  %v1775_v41 = vld [vmem:[%s3392_s3 + $0x68] sm:$0xff] (!%p2174_p1)  ;;  %v2175_v45 = vld [vmem:[#allocation6] ss:$0 sm:$0xff] (!%p2174_p1) }
 0x1a1   : > { %v1541_v46 = vadd.f32 %v2246_v40, %v1501_v38  ;;  %v2270_v49 = vpop.f32.mrb[7].mxu1  ;;  %v1772_v38 = vld [vmem:[%s3392_s3 + $0x50] sm:$0xff] (!%p2174_p1)  ;;  %v1774_v40 = vld [vmem:[%s3392_s3 + $0x60] sm:$0xff] (!%p2174_p1) }
 0x1a2   : > { %v2463_v39 = vpack.c.bf16 (!%p2174_p1), %v1773_v42, %v1772_v38  ;;  %v2466_v43 = vpack.c.bf16 (!%p2174_p1), %v1775_v41, %v1774_v40 }
 0x1a3   : > { %v1581_v50 = vadd.f32 %v2268_v47, %v1541_v46  ;;  %v1776_v46 = vld [vmem:[%s3392_s3 + $0x70] sm:$0xff] (!%p2174_p1)  ;;  %v1777_v47 = vld [vmem:[%s3392_s3 + $0x78] sm:$0xff] (!%p2174_p1) }
 0x1a4   : > { %2464 = vmatpush3.bf16.msra.mxu0 (!%p2174_p1), %v2463_v39  ;;  %v2469_v49 = vpack.c.bf16 (!%p2174_p1), %v1777_v47, %v1776_v46 }
 0x1a5   : > { %2465 = vmatprep.subr.bf16.mxu0 (!%p2174_p1), %v2891_v15 }
 0x1a8   : > { %2467 = vmatpush3.bf16.msra.mxu0 (!%p2174_p1), %v2466_v43 }
 0x1a9   : > { %2468 = vmatprep.subr.bf16.mxu0 (!%p2174_p1), %v2891_v15 }
 0x1ac   : > { %2470 = vmatpush3.bf16.msra.mxu0 (!%p2174_p1), %v2469_v49 }
 0x1bd   : > { %v2288_v51 = vpop.f32.mrb[8].mxu0 }
 0x1be   : > { %v2289_v52 = vpop.f32.mrb[9].mxu0 }
 0x1bf   : > { %v2290_v53 = vadd.f32 %v2289_v52, %v2288_v51  ;;  %v2291_v54 = vpop.f32.mrb[10].mxu0  ;;  %v2310_v55 = vpop.f32.mrb[8].mxu1  ;;  %v1862_v51 = vld [vmem:[%s3394_s5 + $0x30] sm:$0xff] (!%p2174_p1)  ;;  %v1863_v52 = vld [vmem:[%s3394_s5 + $0x38] sm:$0xff] (!%p2174_p1) }
 0x1c0   : > { %v2292_v56 = vpop.f32.mrb[11].mxu0  ;;  %v2311_v57 = vpop.f32.mrb[9].mxu1  ;;  %v2176_v54 = vld [vmem:[#allocation8] ss:$0 sm:$0xff] (!%p2174_p1) }
 0x1c1   : > { %v1621_v58 = vadd.f32 %v2290_v53, %v1581_v50  ;;  %v2312_v59 = vadd.f32 %v2311_v57, %v2310_v55  ;;  %v2313_v60 = vpop.f32.mrb[10].mxu1  ;;  %v2481_v53 = vpack.c.bf16 (!%p2174_p1), %v1863_v52, %v1862_v51 }
 0x1c2   : > { %v2314_v61 = vpop.f32.mrb[11].mxu1 }
 0x1c3   : > { %v1661_v62 = vadd.f32 %v2312_v59, %v1621_v58  ;;  %2482 = vmatpush3.bf16.msra.mxu1 (!%p2174_p1), %v2481_v53  ;;  %v2177_v59 = vld [vmem:[#allocation9] ss:$0 sm:$0xff] (!%p2174_p1) }
 0x1dd   : > { %v2332_v63 = vpop.f32.mrb[12].mxu0 }
 0x1de   : > { %v2333_v0 = vpop.f32.mrb[13].mxu0 }
 0x1df   : > { %v2334_v1 = vadd.f32 %v2333_v0, %v2332_v63  ;;  %v2335_v2 = vpop.f32.mrb[14].mxu0  ;;  %v1740_v3 = vpop.f32.mrb[12].mxu1 }
 0x1e0   : > { %v2336_v4 = vpop.f32.mrb[15].mxu0  ;;  %v2391_v5 = vpop.f32.mrb[13].mxu1 }
 0x1e1   : > { %v1701_v6 = vadd.f32 %v2334_v1, %v1661_v62  ;;  %v1743_v7 = vpop.f32.mrb[14].mxu1  ;;  %1751 = sbr.rel (%p2174_p1) target bundleno = 930 (0x3a2), region = 72 }
 0x1e2   : > { %v2392_v9 = vpop.f32.mrb[15].mxu1 }
 0x1e3   : > { %v1741_v10 = vadd.f32 %v1740_v3, %v1701_v6 }
 0x1e5   : > { %v1746_v11 = vadd.f32 %v1741_v10, %v349_v8 }
 0x1e7   : > { %1747 = vst [vmem:[#allocation2] sm:$0x3] %v1746_v11 }
 0x1ee   : > { %v1752_v44 = vld [vmem:[#allocation2] sm:$0x3] }
 0x1ef   : > { %v1760_v48 = vadd.f32 %v2175_v45, %v1752_v44 }
 0x1f1   : > { %v1761_v50 = vmax.f32 %v1760_v48, 0.0 }
 0x1f3   : > { %2426 = vmatmul.mubr.f32.vlgmr.msra.gmra.mrb[0].mxu0 %v1761_v50 }
 0x2c6   : > { %v1851_v55 = vpop.f32.mrb[0].mxu0 }
 0x2c7   : > { %v1852_v56 = vadd.f32 %v2176_v54, %v1851_v55  ;;  %v2427_v57 = vpop.f32.mrb[1].mxu0 }
 0x2c9   : > { %v1855_v58 = vmax.f32 %v1852_v56, 0.0 }
 0x2cb   : > { %2445 = vmatmul.mubr.msk.f32.vlgmr.msra.gmra.mrb[0].mxu1 %vm1871_vm2, %v1855_v58 }
 0x39e   : > { %v1941_v60 = vpop.f32.mrb[0].mxu1 }
 0x39f   : > { %v1942_v61 = vadd.f32 %v2177_v59, %v1941_v60  ;;  %v2446_v62 = vpop.f32.mrb[1].mxu1 }
 0x3a1   : > { %1946 = vst.msk [vmem:[#allocation11] sm:$0x3] %vm1945_vm3, %v1942_v61 }
 0x3a2 PF: > { %p2524_p4 = scmp.eq.s32.totalorder %s2954_s28, 7  ;;  %s2894_s21 = smov [#allocation11]  }
 0x3a3   : > { %s1954_s9 = sshll.u32 %s2894_s21, 4  ;;  %s1955_s9 = int_to_ptr.vmem [resolvable:$true] %s1954_s9 }
 0x3a4   : > { %s2807_s30 = scalar_lea.vmem %s1955_s9, 32  ;;  %p2814_p2 = scmp.lt.s32.totalorder %s1955_s9, %s1955_s9 }
 0x3a5   : > { %p2808_p8 = scmp.ne.s32.totalorder %s1955_s9, %s2807_s30  ;;  %p2815_p6 = scmp.lt.s32.totalorder %s2807_s30, %s2807_s30 }
 0x3a7   : > { %p2809_p12 = pnand %p2808_p8, %p2524_p4  ;;  %p2816_p13 = por %p2815_p6, %p2814_p2 }
 0x3a9   : > { %p2810_p0 = pneg %p2809_p12 }
 0x3ab   : > { %p2817_p3 = pnand %p2816_p13, %p2810_p0 }
 0x3ad   : > { %2820 = shalt.err (!%p2817_p3)
}
 0x3ae   : > { %s2821_s29 = scalar_lea.hbm %s3396_s7, 32 }
 0x3af   : > { %p2822_p5 = scmp.ne.s32.totalorder %s3396_s7, %s2821_s29  ;;  %p2827_p9 = scmp.lt.u32.totalorder %s2821_s29, %s3396_s7 }
 0x3b1   : > { %p2823_p7 = pnand %p2822_p5, %p2524_p4 }
 0x3b3   : > { %p2824_p10 = pneg %p2823_p7 }
 0x3b5   : > { %p2829_p11 = pnand %p2827_p9, %p2824_p10 }
 0x3b7   : > { %2832 = shalt.err (!%p2829_p11)
}
 0x3b8   : > { %2500 = dma.vmem_to_hbm [thread:$0]  (%p2524_p4), %s1955_s9, 32, %s3396_s7, [#allocation5]  }
 0x3b9   : > { %2862 = dma.done.wait (%p2524_p4), [#allocation5], 32  }
 0x3ba   : > { %2864 = vsyncadd (%p2524_p4), [#allocation5], 4294967264 }
 0x3bb PF: > { %p20_p1 = scmp.ge.s32.totalorder %s3056_s20, 10   ;;  %s3412_s24 = smov %s2871_s25 }
 0x3bc   : > { %s3413_s25 = smov %s2875_s26  ;;  %s3414_s26 = smov %s3066_s23 }
 0x3bd   : > { %s3415_s27 = smov %s3056_s20  ;;  %22 = sbr.rel (!%p20_p1) target bundleno = 6 (0x6), region = 108 }
 0x3c4   :  { %1967 = vsyncpa [#allocation4], 1 }
 0x3c5   :  { %1969 = vsyncpa [#allocation4 + $0x1], 1 }
 0x3c6   :  { %1970 = vsyncpa [#allocation7], 1 }
 0x3c7   :  { %1971 = vsyncpa [#allocation10], 1 }
 0x3c8   :  { %1972 = vsyncpa [#allocation5], 1 }
 0x3c9   :  { %1974 = vsyncpa [#allocation5 + $0x1], 1 }

// kernel: audio_classifier_forward.2
= control target key start
LH: loop header
LB: loop body
LE: loop exit
PB: predicated region body
PF: predicated region fallthrough
CT: control target
= control target key end

     0   :  { %10 = vsyncpa [#allocation5], 0  ;;  %s13331_s0 = inlined_call_operand.vmem [shape: f32[2,940,1], index: 0, kind: input, shape index: {}]   ;;  %s13332_s1 = inlined_call_operand.hbm [shape: f32[3,32], index: 1, kind: input, shape index: {}]   ;;  %s13333_s2 = inlined_call_operand.hbm [shape: f32[1,32], index: 2, kind: input, shape index: {}]   ;;  %s13334_s3 = inlined_call_operand.hbm [shape: f32[3,32,64], index: 3, kind: input, shape index: {}]   ;;  %s13335_s4 = inlined_call_operand.hbm [shape: f32[1,64], index: 4, kind: input, shape index: {}]   ;;  %s13336_s5 = inlined_call_operand.vmem [shape: bf16[2,240,64], index: 5, kind: output, shape index: {}]  }
   0x1   :  { %11 = vsyncpa [#allocation7], 0 }
   0x2   :  { %12 = vsyncpa [#allocation10], 0  ;;  %s8332_s18 = smov 0  }
   0x3 LB: > { %s8292_s19 = smov [#allocation6]   ;;  %s8338_s21 = sadd.s32 4294967295, %s8290_s18   ;;  %s8290_s18 = sphi %s8332_s18, %s18_s18  }
   0x4   : > { %s183_s20 = sshll.u32 %s8292_s19, 4  ;;  %p7063_p0 = scmp.ge.s32.totalorder %s8290_s18, 1  ;;  %s8343_s20 = int_to_ptr.vmem [resolvable:$true] %s183_s20 }
   0x5   : > { %p159_p1 = scmp.lt.s32.totalorder %s8290_s18, 3  ;;  %p13337_p2 = scmp.eq.s32.totalorder %s8338_s21, 0 }
   0x6   : > { %s8293_s23 = smov [#allocation4]   ;;  %s8294_s25 = smov [#allocation8]  }
   0x7   : > { %p8345_p3 = pnand %p7063_p0, %p159_p1  ;;  %s172_s24 = sshll.u32 %s8293_s23, 4  ;;  %s8351_s24 = int_to_ptr.vmem [resolvable:$true] %s172_s24 }
   0x8   : > { %s193_s26 = sshll.u32 %s8294_s25, 4  ;;  %s8295_s28 = smov [#allocation9]   ;;  %s8359_s26 = int_to_ptr.vmem [resolvable:$true] %s193_s26 }
   0x9   : > { %s13444_s22 = scalar_select %p8345_p3, 1, 0 }
   0xa   : > { %p8104_p4 = pneg %p8345_p3  ;;  %s8361_s29 = sshll.u32 %s8295_s28, 4  ;;  %s208_s29 = int_to_ptr.vmem [resolvable:$true] %s8361_s29 }
   0xb   : > { %s8160_s7 = scalar_lea.hbm %s13333_s2, 16 }
   0xc   : > { %p8355_p5 = pnand %p13337_p2, %p8104_p4  ;;  %p8161_p6 = scmp.ne.s32.totalorder %s13333_s2, %s8160_s7 }
   0xd   : > { %p8167_p10 = scmp.lt.u32.totalorder %s8160_s7, %s13333_s2 }
   0xe   : > { %p8371_p7 = pneg %p8355_p5 }
  0x10   : > { %p8163_p8 = pnand %p8371_p7, %p8161_p6 }
  0x12   : > { %p8164_p9 = pneg %p8163_p8 }
  0x14   : > { %p8169_p11 = pnand %p8167_p10, %p8164_p9 }
  0x16   : > { %8172 = shalt.err (!%p8169_p11)
}
  0x17   : > { %s8173_s13 = scalar_lea.vmem %s8343_s20, 16  ;;  %s8180_s14 = scalar_lea.vmem %s8343_s20, 32 }
  0x18   : > { %p8174_p12 = scmp.ne.s32.totalorder %s8343_s20, %s8173_s13  ;;  %p8181_p1 = scmp.lt.s32.totalorder %s8343_s20, %s8343_s20 }
  0x19   : > { %p8182_p4 = scmp.lt.s32.totalorder %s8180_s14, %s8173_s13 }
  0x1a   : > { %p8176_p13 = pnand %p8174_p12, %p8371_p7 }
  0x1b   : > { %p8183_p6 = por %p8182_p4, %p8181_p1 }
  0x1c   : > { %p8177_p0 = pneg %p8176_p13 }
  0x1e   : > { %p8184_p8 = pnand %p8183_p6, %p8177_p0 }
  0x20   : > { %8187 = shalt.err (!%p8184_p8)
}
  0x21   : > { %8110 = dma.hbm_to_vmem [thread:$0]  (!%p8355_p5), %s13333_s2, 16, %s8343_s20, [#allocation7]  }
  0x22   : > { %s8188_s23 = scalar_lea.hbm %s13332_s1, 64 }
  0x23   : > { %p8189_p9 = scmp.ne.s32.totalorder %s13332_s1, %s8188_s23  ;;  %p8195_p12 = scmp.lt.u32.totalorder %s8188_s23, %s13332_s1 }
  0x25   : > { %p8191_p10 = pnand %p8189_p9, %p8371_p7 }
  0x27   : > { %p8192_p11 = pneg %p8191_p10 }
  0x29   : > { %p8197_p13 = pnand %p8195_p12, %p8192_p11 }
  0x2b   : > { %8200 = shalt.err (!%p8197_p13)
}
  0x2c   : > { %s8201_s20 = scalar_lea.vmem %s8351_s24, 64  ;;  %p8209_p6 = scmp.lt.s32.totalorder %s8351_s24, %s8351_s24 }
  0x2d   : > { %p8202_p0 = scmp.ne.s32.totalorder %s8351_s24, %s8201_s20  ;;  %p8210_p8 = scmp.lt.s32.totalorder %s8201_s20, %s8201_s20 }
  0x2f   : > { %p8204_p1 = pnand %p8202_p0, %p8371_p7  ;;  %p8211_p9 = por %p8210_p8, %p8209_p6 }
  0x31   : > { %p8205_p4 = pneg %p8204_p1 }
  0x33   : > { %p8212_p10 = pnand %p8211_p9, %p8205_p4 }
  0x35   : > { %8215 = shalt.err (!%p8212_p10)
}
  0x36   : > { %8107 = dma.hbm_to_vmem [thread:$0]  (!%p8355_p5), %s13332_s1, 64, %s8351_s24, [#allocation5]  }
  0x37   : > { %s8216_s12 = scalar_lea.hbm %s13334_s3, 1536 }
  0x38   : > { %p8217_p11 = scmp.ne.s32.totalorder %s13334_s3, %s8216_s12  ;;  %p8223_p0 = scmp.lt.u32.totalorder %s8216_s12, %s13334_s3 }
  0x3a   : > { %p8219_p12 = pnand %p8217_p11, %p8371_p7 }
  0x3c   : > { %p8220_p13 = pneg %p8219_p12 }
  0x3e   : > { %p8225_p1 = pnand %p8223_p0, %p8220_p13 }
  0x40   : > { %8228 = shalt.err (!%p8225_p1)
}
  0x41   : > { %s8229_s24 = scalar_lea.vmem %s8359_s26, 1536  ;;  %p8237_p9 = scmp.lt.s32.totalorder %s8359_s26, %s8359_s26 }
  0x42   : > { %p8230_p4 = scmp.ne.s32.totalorder %s8359_s26, %s8229_s24  ;;  %p8238_p10 = scmp.lt.s32.totalorder %s8229_s24, %s8229_s24 }
  0x44   : > { %p8232_p6 = pnand %p8230_p4, %p8371_p7  ;;  %p8239_p11 = por %p8238_p10, %p8237_p9 }
  0x46   : > { %p8233_p8 = pneg %p8232_p6 }
  0x48   : > { %p8240_p12 = pnand %p8239_p11, %p8233_p8 }
  0x4a   : > { %8243 = shalt.err (!%p8240_p12)
}
  0x4b   : > { %s8296_s17 = smov 128   ;;  %s8297_s19 = smov 8  }
  0x4c   : > { %8113 = dma.hbm_to_vmem [thread:$0]  (!%p8355_p5), %s13334_s3, 1536, %s8359_s26, [#allocation7], %s8296_s17, %s8296_s17, %s8297_s19  }
  0x4d   : > { %s8244_s6 = scalar_lea.hbm %s13335_s4, 16 }
  0x4e   : > { %p8245_p13 = scmp.ne.s32.totalorder %s13335_s4, %s8244_s6  ;;  %p8251_p4 = scmp.lt.u32.totalorder %s8244_s6, %s13335_s4 }
  0x50   : > { %p8247_p0 = pnand %p8245_p13, %p8371_p7 }
  0x52   : > { %p8248_p1 = pneg %p8247_p0 }
  0x54   : > { %p8253_p6 = pnand %p8251_p4, %p8248_p1 }
  0x56   : > { %8256 = shalt.err (!%p8253_p6)
}
  0x57   : > { %s8257_s11 = scalar_lea.vmem %s208_s29, 16  ;;  %s8264_s26 = scalar_lea.vmem %s208_s29, 32 }
  0x58   : > { %p8258_p8 = scmp.ne.s32.totalorder %s208_s29, %s8257_s11  ;;  %p8265_p11 = scmp.lt.s32.totalorder %s208_s29, %s208_s29 }
  0x59   : > { %p8266_p12 = scmp.lt.s32.totalorder %s8264_s26, %s8257_s11 }
  0x5a   : > { %p8260_p9 = pnand %p8258_p8, %p8371_p7 }
  0x5b   : > { %p8267_p2 = por %p8266_p12, %p8265_p11 }
  0x5c   : > { %p8261_p10 = pneg %p8260_p9 }
  0x5e   : > { %p8268_p3 = pnand %p8267_p2, %p8261_p10 }
  0x60   : > { %8271 = shalt.err (!%p8268_p3)
}
  0x61   : > { %8116 = dma.hbm_to_vmem [thread:$0]  (!%p8355_p5), %s13335_s4, 16, %s208_s29, [#allocation10]  }
  0x62   : > { %p13447_p13 = scmp.ne.s32.totalorder %s13444_s22, 0 }
  0x64   : > { %228 = sbr.rel (%p13447_p13) target bundleno = 1164 (0x48c), region = 40 }
  0x6b   : > { %p13448_p0 = scmp.eq.s32.totalorder %s8338_s21, 0 }
  0x6d   : > { %8277 = dma.done.wait (%p13448_p0), [#allocation5], 64   ;;  %p13449_p7 = pmov %p13448_p0 }
  0x6e   : > { %p13450_p1 = pmov %p13448_p0 }
  0x6f   : > { %8279 = vsyncadd (%p13449_p7), [#allocation5], 4294967232 }
  0x70   : > { %8281 = dma.done.wait (%p13450_p1), [#allocation7], 1552   ;;  %p13451_p2 = pmov %p13448_p0 }
  0x71   : > { %p13452_p3 = pmov %p13448_p0 }
  0x72   : > { %8283 = vsyncadd (%p13451_p2), [#allocation7], 4294965744 }
  0x73   : > { %8285 = dma.done.wait (%p13452_p3), [#allocation10], 16   ;;  %p13453_p5 = pmov %p13448_p0 }
  0x74   : > { %p268_p4 = scmp.lt.s32.totalorder %s8338_s21, 1  ;;  %v8298_v0 = vmov 0   ;;  %vm404_vm0 = vcmask 261120   ;;  %v8494_v13 = vld [vmem:[#allocation6] ss:$0 sm:$0xff]  ;;  %v4264_v30 = vld [vmem:[#allocation8] sm:$0xff] }
  0x75   : > { %8287 = vsyncadd (%p13453_p5), [#allocation10], 4294967280  ;;  %8144 = vset.pattern.permute.xlu1 %v8298_v0  ;;  %8143 = vset.pattern.permute.xlu0 %v8298_v0  ;;  %467 = vst.msk [vmem:[#allocation2 + $0x1f0] sm:$0xff] %vm404_vm0, %v8494_v13  ;;  %v4265_v33 = vld [vmem:[#allocation8 + $0x8] sm:$0xff]  ;;  %v13341_v34 = vmov 0.0|0.0   ;;  %v4266_v38 = vld [vmem:[#allocation8 + $0x10] sm:$0xff] }
  0x76   : > { %s13648_s21 = smov (!%p268_p4, %s8338_s21), 1  ;;  %405 = vst.msk [vmem:[#allocation2] sm:$0xff] %vm404_vm0, %v8494_v13  ;;  %406 = vst.msk [vmem:[#allocation2 + $0x8] sm:$0xff] %vm404_vm0, %v8494_v13  ;;  %8082 = vmatprep.subr.bf16.mxu1 %v13341_v34  ;;  %v8065_v35 = vpack.c.bf16 %v4265_v33, %v4264_v30  ;;  %8064 = vmatprep.subr.bf16.mxu0 %v13341_v34  ;;  %v4267_v39 = vld [vmem:[#allocation8 + $0x18] sm:$0xff]  ;;  %vm8300_vm1 = vmmov 0   ;;  %v13343_v43 = vmov 0.0  }
  0x77   : > { %s8086_s22 = smul.u32 944, %s13648_s21  ;;  %407 = vst.msk [vmem:[#allocation2 + $0x10] sm:$0xff] %vm404_vm0, %v8494_v13  ;;  %408 = vst.msk [vmem:[#allocation2 + $0x18] sm:$0xff] %vm404_vm0, %v8494_v13  ;;  %v8068_v40 = vpack.c.bf16 %v4267_v39, %v4266_v38  ;;  %7607 = vmatprep.mubr.msk.f32.mxu1 %vm8300_vm1, %v13343_v43  ;;  %7517 = vmatprep.mubr.msk.f32.mxu0 %vm8300_vm1, %v13343_v43  ;;  %vm1950_vm2 = vcmask 1046528   ;;  %vm2899_vm3 = vcmask 1045504   ;;  %vm522_vm4 = vcmask 254976  }
  0x78   : > { %409 = vst.msk [vmem:[#allocation2 + $0x20] sm:$0xff] %vm404_vm0, %v8494_v13  ;;  %410 = vst.msk [vmem:[#allocation2 + $0x28] sm:$0xff] %vm404_vm0, %v8494_v13  ;;  %8084 = vmatpush3.bf16.msra.mxu1 %v8065_v35  ;;  %8066 = vmatpush3.bf16.msra.mxu0 %v8065_v35  ;;  %vm4144_vm5 = vcmask 523264   ;;  %vm4203_vm6 = vcmask 518144   ;;  %s8087_s14 = smul.u32 120, %s13648_s21  ;;  %vm6923_vm7 = vcmask 519168  }
  0x79   : > { %s8480_s10 = scalar_lea.vmem %s13331_s0, %s8086_s22  ;;  %411 = vst.msk [vmem:[#allocation2 + $0x30] sm:$0xff] %vm404_vm0, %v8494_v13  ;;  %412 = vst.msk [vmem:[#allocation2 + $0x38] sm:$0xff] %vm404_vm0, %v8494_v13  ;;  %8083 = vmatprep.subr.bf16.mxu1 %v13341_v34  ;;  %8067 = vmatprep.subr.bf16.mxu0 %v13341_v34  ;;  %vm6953_vm8 = vcmask 516096   ;;  %vm6954_vm9 = vsmask.f32 256 }
  0x7a   : > { %v341_v1 = vld [vmem:[%s8480_s10 + $0x1f0] sm:$0xff]  ;;  %v339_v2 = vld [vmem:[%s8480_s10 + $0x1e0] sm:$0xff]  ;;  %v342_v3 = vld [vmem:[%s8480_s10 + $0x1f8] sm:$0xff]  ;;  %413 = vst.msk [vmem:[#allocation2 + $0x40] sm:$0xff] %vm404_vm0, %v8494_v13  ;;  %s13106_s16 = scalar_lea.vmem %s13336_s5, %s8087_s14  ;;  %vm6960_vm11 = vsmask.f32 7938 }
  0x7b   : > { %955 = vperm.xlu1 %8144, %v341_v1   ;;  %945 = vperm.xlu0 %8143, %v339_v2   ;;  %v340_v4 = vld [vmem:[%s8480_s10 + $0x1e8] sm:$0xff]  ;;  %v279_v6 = vld [vmem:[%s8480_s10] sm:$0xff]  ;;  %v282_v9 = vld [vmem:[%s8480_s10 + $0x18] sm:$0xff]  ;;  %414 = vst.msk [vmem:[#allocation2 + $0x48] sm:$0xff] %vm404_vm0, %v8494_v13 }
  0x7c   : > { %v280_v5 = vld [vmem:[%s8480_s10 + $0x8] sm:$0xff]  ;;  %v343_v8 = vld [vmem:[%s8480_s10 + $0x200] sm:$0xff]  ;;  %v281_v10 = vld [vmem:[%s8480_s10 + $0x10] sm:$0xff]  ;;  %415 = vst.msk [vmem:[#allocation2 + $0x50] sm:$0xff] %vm404_vm0, %v8494_v13  ;;  %8085 = vmatpush3.bf16.msra.mxu1 %v8068_v40  ;;  %8069 = vmatpush3.bf16.msra.mxu0 %v8068_v40 }
  0x7d   : > { %v344_v7 = vld [vmem:[%s8480_s10 + $0x208] sm:$0xff]  ;;  %v346_v11 = vld [vmem:[%s8480_s10 + $0x218] sm:$0xff]  ;;  %v345_v12 = vld [vmem:[%s8480_s10 + $0x210] sm:$0xff]  ;;  %416 = vst.msk [vmem:[#allocation2 + $0x58] sm:$0xff] %vm404_vm0, %v8494_v13  ;;  %8070 = vmatprep.subr.bf16.mxu1 %v13341_v34  ;;  %8076 = vmatprep.subr.bf16.mxu0 %v13341_v34 }
  0x7e   : > { %v8497_v14 = vld [vmem:[%s8480_s10 + $0x28] sm:$0xff]  ;;  %v8500_v15 = vld [vmem:[%s8480_s10 + $0x20] sm:$0xff]  ;;  %417 = vst.msk [vmem:[#allocation2 + $0x60] sm:$0xff] %vm404_vm0, %v8494_v13  ;;  %418 = vst.msk [vmem:[#allocation2 + $0x68] sm:$0xff] %vm404_vm0, %v8494_v13 }
  0x7f   : > { %960 = vperm.xlu1 %8144, %v342_v3   ;;  %950 = vperm.xlu0 %8143, %v340_v4   ;;  %419 = vst.msk [vmem:[#allocation2 + $0x70] sm:$0xff] %vm404_vm0, %v8494_v13  ;;  %420 = vst.msk [vmem:[#allocation2 + $0x78] sm:$0xff] %vm404_vm0, %v8494_v13  ;;  %v348_v16 = vld [vmem:[%s8480_s10 + $0x228] sm:$0xff]  ;;  %v347_v17 = vld [vmem:[%s8480_s10 + $0x220] sm:$0xff] }
  0x80   : > { %421 = vst.msk [vmem:[#allocation2 + $0x80] sm:$0xff] %vm404_vm0, %v8494_v13  ;;  %422 = vst.msk [vmem:[#allocation2 + $0x88] sm:$0xff] %vm404_vm0, %v8494_v13  ;;  %v286_v18 = vld [vmem:[%s8480_s10 + $0x38] sm:$0xff]  ;;  %v285_v19 = vld [vmem:[%s8480_s10 + $0x30] sm:$0xff] }
  0x81   : > { %423 = vst.msk [vmem:[#allocation2 + $0x90] sm:$0xff] %vm404_vm0, %v8494_v13  ;;  %424 = vst.msk [vmem:[#allocation2 + $0x98] sm:$0xff] %vm404_vm0, %v8494_v13  ;;  %v350_v20 = vld [vmem:[%s8480_s10 + $0x238] sm:$0xff]  ;;  %v349_v21 = vld [vmem:[%s8480_s10 + $0x230] sm:$0xff] }
  0x82   : > { %425 = vst.msk [vmem:[#allocation2 + $0xa0] sm:$0xff] %vm404_vm0, %v8494_v13  ;;  %426 = vst.msk [vmem:[#allocation2 + $0xa8] sm:$0xff] %vm404_vm0, %v8494_v13  ;;  %v288_v22 = vld [vmem:[%s8480_s10 + $0x48] sm:$0xff]  ;;  %v287_v23 = vld [vmem:[%s8480_s10 + $0x40] sm:$0xff] }
  0x83   : > { %650 = vperm.xlu1 %8144, %v280_v5   ;;  %645 = vperm.xlu0 %8143, %v279_v6   ;;  %427 = vst.msk [vmem:[#allocation2 + $0xb0] sm:$0xff] %vm404_vm0, %v8494_v13  ;;  %428 = vst.msk [vmem:[#allocation2 + $0xb8] sm:$0xff] %vm404_vm0, %v8494_v13  ;;  %v352_v24 = vld [vmem:[%s8480_s10 + $0x248] sm:$0xff]  ;;  %v351_v25 = vld [vmem:[%s8480_s10 + $0x240] sm:$0xff] }
  0x84   : > { %429 = vst.msk [vmem:[#allocation2 + $0xc0] sm:$0xff] %vm404_vm0, %v8494_v13  ;;  %430 = vst.msk [vmem:[#allocation2 + $0xc8] sm:$0xff] %vm404_vm0, %v8494_v13  ;;  %v290_v26 = vld [vmem:[%s8480_s10 + $0x58] sm:$0xff]  ;;  %v289_v27 = vld [vmem:[%s8480_s10 + $0x50] sm:$0xff] }
  0x85   : > { %431 = vst.msk [vmem:[#allocation2 + $0xd0] sm:$0xff] %vm404_vm0, %v8494_v13  ;;  %432 = vst.msk [vmem:[#allocation2 + $0xd8] sm:$0xff] %vm404_vm0, %v8494_v13  ;;  %v354_v28 = vld [vmem:[%s8480_s10 + $0x258] sm:$0xff]  ;;  %v353_v29 = vld [vmem:[%s8480_s10 + $0x250] sm:$0xff] }
  0x86   : > { %433 = vst.msk [vmem:[#allocation2 + $0xe0] sm:$0xff] %vm404_vm0, %v8494_v13  ;;  %434 = vst.msk [vmem:[#allocation2 + $0xe8] sm:$0xff] %vm404_vm0, %v8494_v13  ;;  %v292_v31 = vld [vmem:[%s8480_s10 + $0x68] sm:$0xff]  ;;  %v291_v32 = vld [vmem:[%s8480_s10 + $0x60] sm:$0xff] }
  0x87   : > { %970 = vperm.xlu1 %8144, %v344_v7   ;;  %965 = vperm.xlu0 %8143, %v343_v8   ;;  %435 = vst.msk [vmem:[#allocation2 + $0xf0] sm:$0xff] %vm404_vm0, %v8494_v13  ;;  %436 = vst.msk [vmem:[#allocation2 + $0xf8] sm:$0xff] %vm404_vm0, %v8494_v13  ;;  %v356_v36 = vld [vmem:[%s8480_s10 + $0x268] sm:$0xff]  ;;  %v355_v37 = vld [vmem:[%s8480_s10 + $0x260] sm:$0xff] }
  0x88   : > { %437 = vst.msk [vmem:[#allocation2 + $0x100] sm:$0xff] %vm404_vm0, %v8494_v13  ;;  %438 = vst.msk [vmem:[#allocation2 + $0x108] sm:$0xff] %vm404_vm0, %v8494_v13  ;;  %v294_v41 = vld [vmem:[%s8480_s10 + $0x78] sm:$0xff]  ;;  %v293_v42 = vld [vmem:[%s8480_s10 + $0x70] sm:$0xff] }
  0x89   : > { %439 = vst.msk [vmem:[#allocation2 + $0x110] sm:$0xff] %vm404_vm0, %v8494_v13  ;;  %440 = vst.msk [vmem:[#allocation2 + $0x118] sm:$0xff] %vm404_vm0, %v8494_v13  ;;  %v358_v44 = vld [vmem:[%s8480_s10 + $0x278] sm:$0xff]  ;;  %v357_v45 = vld [vmem:[%s8480_s10 + $0x270] sm:$0xff] }
  0x8a   : > { %441 = vst.msk [vmem:[#allocation2 + $0x120] sm:$0xff] %vm404_vm0, %v8494_v13  ;;  %442 = vst.msk [vmem:[#allocation2 + $0x128] sm:$0xff] %vm404_vm0, %v8494_v13  ;;  %v296_v46 = vld [vmem:[%s8480_s10 + $0x88] sm:$0xff]  ;;  %v295_v47 = vld [vmem:[%s8480_s10 + $0x80] sm:$0xff] }
  0x8b   : > { %660 = vperm.xlu1 %8144, %v282_v9   ;;  %655 = vperm.xlu0 %8143, %v281_v10   ;;  %443 = vst.msk [vmem:[#allocation2 + $0x130] sm:$0xff] %vm404_vm0, %v8494_v13  ;;  %444 = vst.msk [vmem:[#allocation2 + $0x138] sm:$0xff] %vm404_vm0, %v8494_v13  ;;  %v360_v48 = vld [vmem:[%s8480_s10 + $0x288] sm:$0xff]  ;;  %v359_v49 = vld [vmem:[%s8480_s10 + $0x280] sm:$0xff] }
  0x8c   : > { %445 = vst.msk [vmem:[#allocation2 + $0x140] sm:$0xff] %vm404_vm0, %v8494_v13  ;;  %446 = vst.msk [vmem:[#allocation2 + $0x148] sm:$0xff] %vm404_vm0, %v8494_v13  ;;  %v298_v50 = vld [vmem:[%s8480_s10 + $0x98] sm:$0xff]  ;;  %v297_v51 = vld [vmem:[%s8480_s10 + $0x90] sm:$0xff] }
  0x8d   : > { %447 = vst.msk [vmem:[#allocation2 + $0x150] sm:$0xff] %vm404_vm0, %v8494_v13  ;;  %448 = vst.msk [vmem:[#allocation2 + $0x158] sm:$0xff] %vm404_vm0, %v8494_v13  ;;  %v362_v52 = vld [vmem:[%s8480_s10 + $0x298] sm:$0xff]  ;;  %v361_v53 = vld [vmem:[%s8480_s10 + $0x290] sm:$0xff] }
  0x8e   : > { %449 = vst.msk [vmem:[#allocation2 + $0x160] sm:$0xff] %vm404_vm0, %v8494_v13  ;;  %450 = vst.msk [vmem:[#allocation2 + $0x168] sm:$0xff] %vm404_vm0, %v8494_v13  ;;  %v300_v54 = vld [vmem:[%s8480_s10 + $0xa8] sm:$0xff]  ;;  %v299_v55 = vld [vmem:[%s8480_s10 + $0xa0] sm:$0xff] }
  0x8f   : > { %980 = vperm.xlu1 %8144, %v346_v11   ;;  %975 = vperm.xlu0 %8143, %v345_v12   ;;  %451 = vst.msk [vmem:[#allocation2 + $0x170] sm:$0xff] %vm404_vm0, %v8494_v13  ;;  %452 = vst.msk [vmem:[#allocation2 + $0x178] sm:$0xff] %vm404_vm0, %v8494_v13  ;;  %v364_v56 = vld [vmem:[%s8480_s10 + $0x2a8] sm:$0xff]  ;;  %v363_v57 = vld [vmem:[%s8480_s10 + $0x2a0] sm:$0xff] }
  0x90   : > { %453 = vst.msk [vmem:[#allocation2 + $0x180] sm:$0xff] %vm404_vm0, %v8494_v13  ;;  %454 = vst.msk [vmem:[#allocation2 + $0x188] sm:$0xff] %vm404_vm0, %v8494_v13  ;;  %v302_v58 = vld [vmem:[%s8480_s10 + $0xb8] sm:$0xff]  ;;  %v301_v59 = vld [vmem:[%s8480_s10 + $0xb0] sm:$0xff] }
  0x91   : > { %455 = vst.msk [vmem:[#allocation2 + $0x190] sm:$0xff] %vm404_vm0, %v8494_v13  ;;  %456 = vst.msk [vmem:[#allocation2 + $0x198] sm:$0xff] %vm404_vm0, %v8494_v13  ;;  %v366_v60 = vld [vmem:[%s8480_s10 + $0x2b8] sm:$0xff]  ;;  %v365_v61 = vld [vmem:[%s8480_s10 + $0x2b0] sm:$0xff] }
  0x92   : > { %457 = vst.msk [vmem:[#allocation2 + $0x1a0] sm:$0xff] %vm404_vm0, %v8494_v13  ;;  %458 = vst.msk [vmem:[#allocation2 + $0x1a8] sm:$0xff] %vm404_vm0, %v8494_v13  ;;  %v304_v62 = vld [vmem:[%s8480_s10 + $0xc8] sm:$0xff]  ;;  %v303_v63 = vld [vmem:[%s8480_s10 + $0xc0] sm:$0xff] }
  0x93   : > { %459 = vst.msk [vmem:[#allocation2 + $0x1b0] sm:$0xff] %vm404_vm0, %v8494_v13  ;;  %460 = vst.msk [vmem:[#allocation2 + $0x1b8] sm:$0xff] %vm404_vm0, %v8494_v13  ;;  %670 = vperm.xlu1 %8144, %v8497_v14   ;;  %665 = vperm.xlu0 %8143, %v8500_v15   ;;  %v368_v0 = vld [vmem:[%s8480_s10 + $0x2c8] sm:$0xff]  ;;  %v367_v1 = vld [vmem:[%s8480_s10 + $0x2c0] sm:$0xff] }
  0x94   : > { %461 = vst.msk [vmem:[#allocation2 + $0x1c0] sm:$0xff] %vm404_vm0, %v8494_v13  ;;  %462 = vst.msk [vmem:[#allocation2 + $0x1c8] sm:$0xff] %vm404_vm0, %v8494_v13  ;;  %v306_v2 = vld [vmem:[%s8480_s10 + $0xd8] sm:$0xff]  ;;  %v305_v3 = vld [vmem:[%s8480_s10 + $0xd0] sm:$0xff] }
  0x95   : > { %463 = vst.msk [vmem:[#allocation2 + $0x1d0] sm:$0xff] %vm404_vm0, %v8494_v13  ;;  %464 = vst.msk [vmem:[#allocation2 + $0x1d8] sm:$0xff] %vm404_vm0, %v8494_v13  ;;  %v370_v4 = vld [vmem:[%s8480_s10 + $0x2d8] sm:$0xff]  ;;  %v369_v5 = vld [vmem:[%s8480_s10 + $0x2d0] sm:$0xff] }
  0x96   : > { %465 = vst.msk [vmem:[#allocation2 + $0x1e0] sm:$0xff] %vm404_vm0, %v8494_v13  ;;  %466 = vst.msk [vmem:[#allocation2 + $0x1e8] sm:$0xff] %vm404_vm0, %v8494_v13  ;;  %v308_v6 = vld [vmem:[%s8480_s10 + $0xe8] sm:$0xff]  ;;  %v307_v7 = vld [vmem:[%s8480_s10 + $0xe0] sm:$0xff] }
  0x97   : > { %468 = vst.msk [vmem:[#allocation2 + $0x1f8] sm:$0xff] %vm404_vm0, %v8494_v13  ;;  %469 = vst.msk [vmem:[#allocation2 + $0x200] sm:$0xff] %vm404_vm0, %v8494_v13  ;;  %990 = vperm.xlu1 %8144, %v348_v16   ;;  %985 = vperm.xlu0 %8143, %v347_v17   ;;  %v372_v8 = vld [vmem:[%s8480_s10 + $0x2e8] sm:$0xff]  ;;  %v371_v9 = vld [vmem:[%s8480_s10 + $0x2e0] sm:$0xff] }
  0x98   : > { %470 = vst.msk [vmem:[#allocation2 + $0x208] sm:$0xff] %vm404_vm0, %v8494_v13  ;;  %471 = vst.msk [vmem:[#allocation2 + $0x210] sm:$0xff] %vm404_vm0, %v8494_v13  ;;  %v8798_v10 = vld [vmem:[#allocation4] ss:$0 sm:$0xff]  ;;  %v310_v11 = vld [vmem:[%s8480_s10 + $0xf8] sm:$0xff] }
  0x99   : > { %472 = vst.msk [vmem:[#allocation2 + $0x218] sm:$0xff] %vm404_vm0, %v8494_v13  ;;  %473 = vst.msk [vmem:[#allocation2 + $0x220] sm:$0xff] %vm404_vm0, %v8494_v13  ;;  %v309_v12 = vld [vmem:[%s8480_s10 + $0xf0] sm:$0xff] }
  0x9a   : > { %474 = vst.msk [vmem:[#allocation2 + $0x228] sm:$0xff] %vm404_vm0, %v8494_v13  ;;  %475 = vst.msk [vmem:[#allocation2 + $0x230] sm:$0xff] %vm404_vm0, %v8494_v13  ;;  %v586_v14 = vld [vmem:[#allocation2 + $0x1f0] sm:$0xff] }
  0x9b   : > { %476 = vst.msk [vmem:[#allocation2 + $0x238] sm:$0xff] %vm404_vm0, %v8494_v13  ;;  %477 = vst.msk [vmem:[#allocation2 + $0x240] sm:$0xff] %vm404_vm0, %v8494_v13  ;;  %680 = vperm.xlu1 %8144, %v286_v18   ;;  %675 = vperm.xlu0 %8143, %v285_v19  }
  0x9c   : > { %478 = vst.msk [vmem:[#allocation2 + $0x248] sm:$0xff] %vm404_vm0, %v8494_v13  ;;  %479 = vst.msk [vmem:[#allocation2 + $0x250] sm:$0xff] %vm404_vm0, %v8494_v13 }
  0x9d   : > { %480 = vst.msk [vmem:[#allocation2 + $0x258] sm:$0xff] %vm404_vm0, %v8494_v13  ;;  %481 = vst.msk [vmem:[#allocation2 + $0x260] sm:$0xff] %vm404_vm0, %v8494_v13  ;;  %v584_v16 = vld [vmem:[#allocation2 + $0x1e0] sm:$0xff] }
  0x9e   : > { %482 = vst.msk [vmem:[#allocation2 + $0x268] sm:$0xff] %vm404_vm0, %v8494_v13  ;;  %483 = vst.msk [vmem:[#allocation2 + $0x270] sm:$0xff] %vm404_vm0, %v8494_v13 }
  0x9f   : > { %484 = vst.msk [vmem:[#allocation2 + $0x278] sm:$0xff] %vm404_vm0, %v8494_v13  ;;  %485 = vst.msk [vmem:[#allocation2 + $0x280] sm:$0xff] %vm404_vm0, %v8494_v13  ;;  %1000 = vperm.xlu1 %8144, %v350_v20   ;;  %995 = vperm.xlu0 %8143, %v349_v21   ;;  %v374_v20 = vld [vmem:[%s8480_s10 + $0x2f8] sm:$0xff]  ;;  %v8805_v21 = vld [vmem:[#allocation4 + $0x1] ss:$0 sm:$0xff] }
  0xa0   : > { %486 = vst.msk [vmem:[#allocation2 + $0x288] sm:$0xff] %vm404_vm0, %v8494_v13  ;;  %487 = vst.msk [vmem:[#allocation2 + $0x290] sm:$0xff] %vm404_vm0, %v8494_v13 }
  0xa1   : > { %488 = vst.msk [vmem:[#allocation2 + $0x298] sm:$0xff] %vm404_vm0, %v8494_v13  ;;  %489 = vst.msk [vmem:[#allocation2 + $0x2a0] sm:$0xff] %vm404_vm0, %v8494_v13 }
  0xa2   : > { %490 = vst.msk [vmem:[#allocation2 + $0x2a8] sm:$0xff] %vm404_vm0, %v8494_v13  ;;  %491 = vst.msk [vmem:[#allocation2 + $0x2b0] sm:$0xff] %vm404_vm0, %v8494_v13 }
  0xa3   : > { %492 = vst.msk [vmem:[#allocation2 + $0x2b8] sm:$0xff] %vm404_vm0, %v8494_v13  ;;  %493 = vst.msk [vmem:[#allocation2 + $0x2c0] sm:$0xff] %vm404_vm0, %v8494_v13  ;;  %690 = vperm.xlu1 %8144, %v288_v22   ;;  %685 = vperm.xlu0 %8143, %v287_v23  }
  0xa4   : > { %494 = vst.msk [vmem:[#allocation2 + $0x2c8] sm:$0xff] %vm404_vm0, %v8494_v13  ;;  %495 = vst.msk [vmem:[#allocation2 + $0x2d0] sm:$0xff] %vm404_vm0, %v8494_v13 }
  0xa5   : > { %496 = vst.msk [vmem:[#allocation2 + $0x2d8] sm:$0xff] %vm404_vm0, %v8494_v13  ;;  %497 = vst.msk [vmem:[#allocation2 + $0x2e0] sm:$0xff] %vm404_vm0, %v8494_v13 }
  0xa6   : > { %498 = vst.msk [vmem:[#allocation2 + $0x2e8] sm:$0xff] %vm404_vm0, %v8494_v13  ;;  %499 = vst.msk [vmem:[#allocation2 + $0x2f0] sm:$0xff] %vm404_vm0, %v8494_v13 }
  0xa7   : > { %500 = vst.msk [vmem:[#allocation2 + $0x2f8] sm:$0xff] %vm404_vm0, %v8494_v13  ;;  %501 = vst.msk [vmem:[#allocation2 + $0x300] sm:$0xff] %vm404_vm0, %v8494_v13  ;;  %1010 = vperm.xlu1 %8144, %v352_v24   ;;  %1005 = vperm.xlu0 %8143, %v351_v25   ;;  %v373_v24 = vld [vmem:[%s8480_s10 + $0x2f0] sm:$0xff]  ;;  %v587_v25 = vld [vmem:[#allocation2 + $0x1f8] sm:$0xff] }
  0xa8   : > { %502 = vst.msk [vmem:[#allocation2 + $0x308] sm:$0xff] %vm404_vm0, %v8494_v13  ;;  %503 = vst.msk [vmem:[#allocation2 + $0x310] sm:$0xff] %vm404_vm0, %v8494_v13 }
  0xa9   : > { %504 = vst.msk [vmem:[#allocation2 + $0x318] sm:$0xff] %vm404_vm0, %v8494_v13  ;;  %505 = vst.msk [vmem:[#allocation2 + $0x320] sm:$0xff] %vm404_vm0, %v8494_v13 }
  0xaa   : > { %506 = vst.msk [vmem:[#allocation2 + $0x328] sm:$0xff] %vm404_vm0, %v8494_v13  ;;  %507 = vst.msk [vmem:[#allocation2 + $0x330] sm:$0xff] %vm404_vm0, %v8494_v13 }
  0xab   : > { %508 = vst.msk [vmem:[#allocation2 + $0x338] sm:$0xff] %vm404_vm0, %v8494_v13  ;;  %509 = vst.msk [vmem:[#allocation2 + $0x340] sm:$0xff] %vm404_vm0, %v8494_v13  ;;  %700 = vperm.xlu1 %8144, %v290_v26   ;;  %695 = vperm.xlu0 %8143, %v289_v27   ;;  %v585_v27 = vld [vmem:[#allocation2 + $0x1e8] sm:$0xff] }
  0xac   : > { %510 = vst.msk [vmem:[#allocation2 + $0x348] sm:$0xff] %vm404_vm0, %v8494_v13  ;;  %511 = vst.msk [vmem:[#allocation2 + $0x350] sm:$0xff] %vm404_vm0, %v8494_v13 }
  0xad   : > { %512 = vst.msk [vmem:[#allocation2 + $0x358] sm:$0xff] %vm404_vm0, %v8494_v13  ;;  %513 = vst.msk [vmem:[#allocation2 + $0x360] sm:$0xff] %vm404_vm0, %v8494_v13 }
  0xae   : > { %514 = vst.msk [vmem:[#allocation2 + $0x368] sm:$0xff] %vm404_vm0, %v8494_v13  ;;  %515 = vst.msk [vmem:[#allocation2 + $0x370] sm:$0xff] %vm404_vm0, %v8494_v13 }
  0xaf   : > { %516 = vst.msk [vmem:[#allocation2 + $0x378] sm:$0xff] %vm404_vm0, %v8494_v13  ;;  %517 = vst.msk [vmem:[#allocation2 + $0x380] sm:$0xff] %vm404_vm0, %v8494_v13  ;;  %1020 = vperm.xlu1 %8144, %v354_v28   ;;  %1015 = vperm.xlu0 %8143, %v353_v29  }
  0xb0   : > { %518 = vst.msk [vmem:[#allocation2 + $0x388] sm:$0xff] %vm404_vm0, %v8494_v13  ;;  %519 = vst.msk [vmem:[#allocation2 + $0x390] sm:$0xff] %vm404_vm0, %v8494_v13 }
  0xb1   : > { %520 = vst.msk [vmem:[#allocation2 + $0x398] sm:$0xff] %vm404_vm0, %v8494_v13  ;;  %521 = vst.msk [vmem:[#allocation2 + $0x3a0] sm:$0xff] %vm404_vm0, %v8494_v13 }
  0xb2   : > { %523 = vst.msk [vmem:[#allocation2 + $0x3a8] sm:$0x3] %vm522_vm4, %v8494_v13  ;;  %vm6955_vm10 = vmand %vm6953_vm8, %vm6954_vm9 }
  0xb3   : > { %710 = vperm.xlu1 %8144, %v292_v31   ;;  %705 = vperm.xlu0 %8143, %v291_v32   ;;  %v8815_v32 = vld [vmem:[#allocation4 + $0x2] ss:$0 sm:$0xff]  ;;  %vm6961_vm12 = vmand %vm6923_vm7, %vm6960_vm11 }
  0xb7   : > { %1030 = vperm.xlu1 %8144, %v356_v36   ;;  %1025 = vperm.xlu0 %8143, %v355_v37   ;;  %v312_v37 = vld [vmem:[%s8480_s10 + $0x108] sm:$0xff] }
  0xbb   : > { %720 = vperm.xlu1 %8144, %v294_v41   ;;  %715 = vperm.xlu0 %8143, %v293_v42   ;;  %v311_v41 = vld [vmem:[%s8480_s10 + $0x100] sm:$0xff] }
  0xbf   : > { %1040 = vperm.xlu1 %8144, %v358_v44   ;;  %1035 = vperm.xlu0 %8143, %v357_v45   ;;  %v525_v45 = vld [vmem:[#allocation2 + $0x8] sm:$0xff] }
  0xc3   : > { %730 = vperm.xlu1 %8144, %v296_v46   ;;  %725 = vperm.xlu0 %8143, %v295_v47  }
  0xc7   : > { %1050 = vperm.xlu1 %8144, %v360_v48   ;;  %1045 = vperm.xlu0 %8143, %v359_v49  }
  0xcb   : > { %740 = vperm.xlu1 %8144, %v298_v50   ;;  %735 = vperm.xlu0 %8143, %v297_v51  }
  0xcf   : > { %1060 = vperm.xlu1 %8144, %v362_v52   ;;  %1055 = vperm.xlu0 %8143, %v361_v53   ;;  %v524_v53 = vld [vmem:[#allocation2] sm:$0xff] }
  0xd3   : > { %750 = vperm.xlu1 %8144, %v300_v54   ;;  %745 = vperm.xlu0 %8143, %v299_v55   ;;  %v376_v54 = vld [vmem:[%s8480_s10 + $0x308] sm:$0xff] }
  0xd7   : > { %1070 = vperm.xlu1 %8144, %v364_v56   ;;  %1065 = vperm.xlu0 %8143, %v363_v57  }
  0xdb   : > { %760 = vperm.xlu1 %8144, %v302_v58   ;;  %755 = vperm.xlu0 %8143, %v301_v59   ;;  %v375_v59 = vld [vmem:[%s8480_s10 + $0x300] sm:$0xff] }
  0xdf   : > { %1080 = vperm.xlu1 %8144, %v366_v60   ;;  %1075 = vperm.xlu0 %8143, %v365_v61  }
  0xe3   : > { %770 = vperm.xlu1 %8144, %v304_v62   ;;  %765 = vperm.xlu0 %8143, %v303_v63  }
  0xe7   : > { %1090 = vperm.xlu1 %8144, %v368_v0   ;;  %1085 = vperm.xlu0 %8143, %v367_v1  }
  0xeb   : > { %780 = vperm.xlu1 %8144, %v306_v2   ;;  %775 = vperm.xlu0 %8143, %v305_v3  }
  0xef   : > { %1100 = vperm.xlu1 %8144, %v370_v4   ;;  %1095 = vperm.xlu0 %8143, %v369_v5  }
  0xf3   : > { %790 = vperm.xlu1 %8144, %v308_v6   ;;  %785 = vperm.xlu0 %8143, %v307_v7  }
  0xf7   : > { %1110 = vperm.xlu1 %8144, %v372_v8   ;;  %1105 = vperm.xlu0 %8143, %v371_v9   ;;  %v589_v8 = vld [vmem:[#allocation2 + $0x208] sm:$0xff] }
  0xfa   : > { %v956_v15 = vpop.permute.xlu1 %955  ;;  %v946_v17 = vpop.permute.xlu0 %945 }
  0xfb   : > { %v1299_v18 = vmul.f32 %v8798_v10, %v956_v15  ;;  %v1297_v19 = vmul.f32 %v8798_v10, %v946_v17  ;;  %800 = vperm.xlu1 %8144, %v310_v11   ;;  %795 = vperm.xlu0 %8143, %v309_v12   ;;  %v8818_v33 = vmul.f32 %v8805_v21, %v956_v15 }
  0xfc   : > { %v8821_v35 = vmul.f32 %v8805_v21, %v946_v17  ;;  %v8834_v48 = vmul.f32 %v8815_v32, %v956_v15  ;;  %v8842_v52 = vmul.f32 %v8815_v32, %v946_v17  ;;  %v588_v15 = vld [vmem:[#allocation2 + $0x200] sm:$0xff] }
  0xfd   : > { %v1417_v22 = vadd.f32 %v1299_v18, %v586_v14  ;;  %v1415_v23 = vadd.f32 %v1297_v19, %v584_v16  ;;  %v2074_v50 = vrot.slane %v8818_v33, 1  ;;  %v314_v16 = vld [vmem:[%s8480_s10 + $0x118] sm:$0xff] }
  0xfe   : > { %v961_v26 = vpop.permute.xlu1 %960  ;;  %v951_v28 = vpop.permute.xlu0 %950  ;;  %v13340_v51 = vrot.slane %v8821_v35, 1  ;;  %v3023_v4 = vrot.slane %v8834_v48, 2  ;;  %v13339_v9 = vrot.slane %v8842_v52, 2  ;;  %v378_v48 = vld [vmem:[%s8480_s10 + $0x318] sm:$0xff] }
  0xff   : > { %1535 = vst.msk [vmem:[#allocation2 + $0x1f0] sm:$0xff] %vm404_vm0, %v1417_v22  ;;  %1533 = vst.msk [vmem:[#allocation2 + $0x1e0] sm:$0xff] %vm404_vm0, %v1415_v23  ;;  %v1300_v29 = vmul.f32 %v8798_v10, %v961_v26  ;;  %v8812_v30 = vmul.f32 %v8805_v21, %v961_v26  ;;  %v1298_v31 = vmul.f32 %v8798_v10, %v951_v28  ;;  %1120 = vperm.xlu1 %8144, %v374_v20   ;;  %v313_v22 = vld [vmem:[%s8480_s10 + $0x110] sm:$0xff] }
 0x100   : > { %v8824_v36 = vmul.f32 %v8805_v21, %v951_v28  ;;  %1115 = vperm.xlu0 %8143, %v373_v24   ;;  %v8828_v39 = vmul.f32 %v8815_v32, %v961_v26  ;;  %v8847_v56 = vmul.f32 %v8815_v32, %v951_v28 }
 0x101   : > { %v1418_v38 = vadd.f32 %v1300_v29, %v587_v25  ;;  %v1416_v40 = vadd.f32 %v1298_v31, %v585_v27  ;;  %v2076_v42 = vrot.slane %v8812_v30, 1 }
 0x102   : > { %v2072_v44 = vrot.slane %v8824_v36, 1  ;;  %v651_v46 = vpop.permute.xlu1 %650  ;;  %v646_v47 = vpop.permute.xlu0 %645  ;;  %v3025_v55 = vrot.slane %v8828_v39, 2  ;;  %v3021_v18 = vrot.slane %v8847_v56, 2  ;;  %v377_v56 = vld [vmem:[%s8480_s10 + $0x310] sm:$0xff] }
 0x103   : > { %1536 = vst.msk [vmem:[#allocation2 + $0x1f8] sm:$0xff] %vm404_vm0, %v1418_v38  ;;  %1534 = vst.msk [vmem:[#allocation2 + $0x1e8] sm:$0xff] %vm404_vm0, %v1416_v40  ;;  %v1238_v49 = vmul.f32 %v8798_v10, %v651_v46  ;;  %810 = vperm.xlu1 %8144, %v312_v37   ;;  %v1237_v58 = vmul.f32 %v8798_v10, %v646_v47  ;;  %v2077_v61 = vsel %vm1950_vm2, %v2074_v50, %v2076_v42  ;;  %v527_v40 = vld [vmem:[#allocation2 + $0x18] sm:$0xff] }
 0x104   : > { %805 = vperm.xlu0 %8143, %v311_v41   ;;  %v2073_v63 = vsel %vm1950_vm2, %v13340_v51, %v2072_v44  ;;  %v8858_v0 = vmul.f32 %v8805_v21, %v651_v46  ;;  %v1714_v1 = vmul.f32 %v8805_v21, %v646_v47  ;;  %v8865_v11 = vmul.f32 %v8815_v32, %v651_v46 }
 0x105   : > { %v1356_v57 = vadd.f32 %v1238_v49, %v525_v45  ;;  %v1355_v7 = vadd.f32 %v1237_v58, %v524_v53  ;;  %v2663_v12 = vmul.f32 %v8815_v32, %v646_v47  ;;  %v3026_v17 = vsel %vm2899_vm3, %v3023_v4, %v3025_v55  ;;  %v526_v47 = vld [vmem:[#allocation2 + $0x10] sm:$0xff] }
 0x106   : > { %v1653_v60 = vld [vmem:[#allocation2 + $0x1f0] sm:$0xff]  ;;  %v1651_v62 = vld [vmem:[#allocation2 + $0x1e0] sm:$0xff]  ;;  %v971_v2 = vpop.permute.xlu1 %970  ;;  %v966_v3 = vpop.permute.xlu0 %965  ;;  %v2075_v24 = vsel %vm1950_vm2, %v2072_v44, %v2074_v50  ;;  %v1952_v25 = vrot.slane %v8858_v0, 1  ;;  %v1951_v26 = vrot.slane %v1714_v1, 1  ;;  %v2901_v41 = vrot.slane %v8865_v11, 2  ;;  %v382_v11 = vld [vmem:[%s8480_s10 + $0x338] sm:$0xff] }
 0x107   : > { %v2366_v5 = vadd.f32 %v2077_v61, %v1653_v60  ;;  %v2364_v6 = vadd.f32 %v2073_v63, %v1651_v62  ;;  %1474 = vst.msk [vmem:[#allocation2 + $0x8] sm:$0xff] %vm404_vm0, %v1356_v57  ;;  %1130 = vperm.xlu1 %8144, %v376_v54   ;;  %v1302_v14 = vmul.f32 %v8798_v10, %v971_v2  ;;  %1473 = vst.msk [vmem:[#allocation2] sm:$0xff] %vm404_vm0, %v1355_v7 }
 0x108   : > { %1125 = vperm.xlu0 %8143, %v375_v59   ;;  %v1301_v19 = vmul.f32 %v8798_v10, %v966_v3  ;;  %v8879_v20 = vmul.f32 %v8805_v21, %v966_v3  ;;  %v8887_v33 = vmul.f32 %v8805_v21, %v971_v2  ;;  %v2900_v44 = vrot.slane %v2663_v12, 2 }
 0x109   : > { %2484 = vst.msk [vmem:[#allocation2 + $0x1f0] sm:$0xff] %vm404_vm0, %v2366_v5  ;;  %2482 = vst.msk [vmem:[#allocation2 + $0x1e0] sm:$0xff] %vm404_vm0, %v2364_v6  ;;  %v1420_v27 = vadd.f32 %v1302_v14, %v589_v8  ;;  %v8893_v45 = vmul.f32 %v8815_v32, %v966_v3  ;;  %v3022_v49 = vsel %vm2899_vm3, %v13339_v9, %v3021_v18  ;;  %v591_v3 = vld [vmem:[#allocation2 + $0x218] sm:$0xff]  ;;  %v316_v5 = vld [vmem:[%s8480_s10 + $0x128] sm:$0xff] }
 0x10a   : > { %v1652_v23 = vld [vmem:[#allocation2 + $0x1e8] sm:$0xff]  ;;  %v661_v28 = vpop.permute.xlu1 %660  ;;  %v8884_v29 = vpop.permute.xlu0 %655  ;;  %v1654_v36 = vld [vmem:[#allocation2 + $0x1f8] sm:$0xff]  ;;  %v1419_v37 = vadd.f32 %v1301_v19, %v588_v15  ;;  %v2078_v38 = vrot.slane %v8879_v20, 1  ;;  %v3024_v57 = vsel %vm2899_vm3, %v3021_v18, %v3023_v4  ;;  %v8914_v58 = vmul.f32 %v8815_v32, %v971_v2  ;;  %v315_v20 = vld [vmem:[%s8480_s10 + $0x120] sm:$0xff] }
 0x10b   : > { %v2365_v31 = vadd.f32 %v2075_v24, %v1652_v23  ;;  %820 = vperm.xlu1 %8144, %v314_v16   ;;  %1538 = vst.msk [vmem:[#allocation2 + $0x208] sm:$0xff] %vm404_vm0, %v1420_v27  ;;  %v1240_v46 = vmul.f32 %v8798_v10, %v661_v28  ;;  %v1239_v53 = vmul.f32 %v8798_v10, %v8884_v29  ;;  %v2080_v62 = vrot.slane %v8887_v33, 1  ;;  %v590_v27 = vld [vmem:[#allocation2 + $0x210] sm:$0xff] }
 0x10c   : > { %815 = vperm.xlu0 %8143, %v313_v22   ;;  %1537 = vst.msk [vmem:[#allocation2 + $0x200] sm:$0xff] %vm404_vm0, %v1419_v37  ;;  %v2079_v50 = vsel %vm1950_vm2, %v2076_v42, %v2078_v38  ;;  %v8909_v54 = vmul.f32 %v8805_v21, %v8884_v29  ;;  %v1953_v42 = vsel %vm1950_vm2, %v1951_v26, %v1952_v25  ;;  %v3027_v8 = vrot.slane %v8893_v45, 2 }
 0x10d   : > { %2483 = vst.msk [vmem:[#allocation2 + $0x1e8] sm:$0xff] %vm404_vm0, %v2365_v31  ;;  %v2367_v59 = vadd.f32 %v2079_v50, %v1654_v36  ;;  %v1358_v60 = vadd.f32 %v1240_v46, %v527_v40  ;;  %v1357_v0 = vadd.f32 %v1239_v53, %v526_v47  ;;  %v8923_v7 = vsel %vm2899_vm3, %v2900_v44, %v2901_v41  ;;  %v529_v40 = vld [vmem:[#allocation2 + $0x28] sm:$0xff] }
 0x10e   : > { %v981_v61 = vpop.permute.xlu1 %980  ;;  %v976_v30 = vpop.permute.xlu0 %975  ;;  %v1592_v63 = vld [vmem:[#allocation2 + $0x8] sm:$0xff]  ;;  %v1954_v1 = vrot.slane %v8909_v54, 1  ;;  %v1591_v2 = vld [vmem:[#allocation2] sm:$0xff]  ;;  %v8929_v12 = vmul.f32 %v8805_v21, %v661_v28  ;;  %v3029_v22 = vrot.slane %v8914_v58, 2  ;;  %v8939_v23 = vmul.f32 %v8815_v32, %v661_v28 }
 0x10f   : > { %1140 = vperm.xlu1 %8144, %v378_v48   ;;  %2485 = vst.msk [vmem:[#allocation2 + $0x1f8] sm:$0xff] %vm404_vm0, %v2367_v59  ;;  %1476 = vst.msk [vmem:[#allocation2 + $0x18] sm:$0xff] %vm404_vm0, %v1358_v60  ;;  %v1304_v14 = vmul.f32 %v8798_v10, %v981_v61  ;;  %v2304_v18 = vadd.f32 %v1953_v42, %v1591_v2  ;;  %v8953_v28 = vmul.f32 %v8815_v32, %v8884_v29  ;;  %v380_v48 = vld [vmem:[%s8480_s10 + $0x328] sm:$0xff] }
 0x110   : > { %v2602_v4 = vld [vmem:[#allocation2 + $0x1f0] sm:$0xff]  ;;  %v2600_v6 = vld [vmem:[#allocation2 + $0x1e0] sm:$0xff]  ;;  %1135 = vperm.xlu0 %8143, %v377_v56   ;;  %1475 = vst.msk [vmem:[#allocation2 + $0x10] sm:$0xff] %vm404_vm0, %v1357_v0  ;;  %v1955_v19 = vsel %vm1950_vm2, %v1952_v25, %v1954_v1  ;;  %v2081_v25 = vsel %vm1950_vm2, %v2078_v38, %v2080_v62  ;;  %v1303_v36 = vmul.f32 %v8798_v10, %v976_v30  ;;  %v1956_v38 = vrot.slane %v8929_v12, 1 }
 0x111   : > { %v3315_v15 = vadd.f32 %v3026_v17, %v2602_v4  ;;  %v3313_v16 = vadd.f32 %v3022_v49, %v2600_v6  ;;  %v2305_v24 = vadd.f32 %v1955_v19, %v1592_v63  ;;  %v1422_v26 = vadd.f32 %v1304_v14, %v591_v3  ;;  %2422 = vst.msk [vmem:[#allocation2] sm:$0xff] %vm404_vm0, %v2304_v18  ;;  %v379_v56 = vld [vmem:[%s8480_s10 + $0x320] sm:$0xff]  ;;  %v381_v12 = vld [vmem:[%s8480_s10 + $0x330] sm:$0xff] }
 0x112   : > { %v8941_v31 = vpop.permute.xlu1 %670  ;;  %v8943_v17 = vpop.permute.xlu0 %665  ;;  %v8957_v37 = vmul.f32 %v8805_v21, %v976_v30  ;;  %v3028_v46 = vsel %vm2899_vm3, %v3025_v55, %v3027_v8  ;;  %v8966_v29 = vmul.f32 %v8805_v21, %v981_v61  ;;  %v1656_v53 = vld [vmem:[#allocation2 + $0x208] sm:$0xff]  ;;  %v1421_v39 = vadd.f32 %v1303_v36, %v590_v27  ;;  %v528_v0 = vld [vmem:[#allocation2 + $0x20] sm:$0xff]  ;;  %v317_v27 = vld [vmem:[%s8480_s10 + $0x130] sm:$0xff] }
 0x113   : > { %3433 = vst.msk [vmem:[#allocation2 + $0x1f0] sm:$0xff] %vm404_vm0, %v3315_v15  ;;  %3431 = vst.msk [vmem:[#allocation2 + $0x1e0] sm:$0xff] %vm404_vm0, %v3313_v16  ;;  %830 = vperm.xlu1 %8144, %v316_v5   ;;  %v1655_v45 = vld [vmem:[#allocation2 + $0x200] sm:$0xff]  ;;  %v1242_v47 = vmul.f32 %v8798_v10, %v8941_v31  ;;  %v8976_v59 = vsel %vm2899_vm3, %v3027_v8, %v3029_v22  ;;  %v8979_v60 = vmul.f32 %v8815_v32, %v981_v61  ;;  %v318_v15 = vld [vmem:[%s8480_s10 + $0x138] sm:$0xff] }
 0x114   : > { %v2601_v44 = vld [vmem:[#allocation2 + $0x1e8] sm:$0xff]  ;;  %2423 = vst.msk [vmem:[#allocation2 + $0x8] sm:$0xff] %vm404_vm0, %v2305_v24  ;;  %1540 = vst.msk [vmem:[#allocation2 + $0x218] sm:$0xff] %vm404_vm0, %v1422_v26  ;;  %825 = vperm.xlu0 %8143, %v315_v20   ;;  %v2368_v50 = vadd.f32 %v2081_v25, %v1655_v45  ;;  %v2082_v55 = vrot.slane %v8957_v37, 1  ;;  %v8982_v42 = vmul.f32 %v8815_v32, %v976_v30  ;;  %v2903_v4 = vrot.slane %v8953_v28, 2 }
 0x115   : > { %v3314_v49 = vadd.f32 %v3024_v57, %v2601_v44  ;;  %v1360_v63 = vadd.f32 %v1242_v47, %v529_v40  ;;  %1539 = vst.msk [vmem:[#allocation2 + $0x210] sm:$0xff] %vm404_vm0, %v1421_v39  ;;  %v1241_v30 = vmul.f32 %v8798_v10, %v8943_v17  ;;  %v8999_v6 = vmul.f32 %v8805_v21, %v8943_v17  ;;  %v593_v26 = vld [vmem:[#allocation2 + $0x228] sm:$0xff] }
 0x116   : > { %v8984_v57 = vpop.permute.xlu1 %990  ;;  %v8986_v3 = vpop.permute.xlu0 %985  ;;  %2486 = vst.msk [vmem:[#allocation2 + $0x200] sm:$0xff] %vm404_vm0, %v2368_v50  ;;  %v2603_v5 = vld [vmem:[#allocation2 + $0x1f8] sm:$0xff]  ;;  %v2083_v61 = vsel %vm1950_vm2, %v2080_v62, %v2082_v55  ;;  %v2905_v8 = vrot.slane %v8939_v23, 2  ;;  %v1957_v33 = vsel %vm1950_vm2, %v1954_v1, %v1956_v38  ;;  %v2084_v18 = vrot.slane %v8966_v29, 1 }
 0x117   : > { %3432 = vst.msk [vmem:[#allocation2 + $0x1e8] sm:$0xff] %vm404_vm0, %v3314_v49  ;;  %1150 = vperm.xlu1 %8144, %v380_v48   ;;  %v3316_v2 = vadd.f32 %v3028_v46, %v2603_v5  ;;  %v1593_v14 = vld [vmem:[#allocation2 + $0x10] sm:$0xff]  ;;  %v2369_v62 = vadd.f32 %v2083_v61, %v1656_v53  ;;  %1478 = vst.msk [vmem:[#allocation2 + $0x28] sm:$0xff] %vm404_vm0, %v1360_v63  ;;  %v9012_v19 = vmul.f32 %v8805_v21, %v8941_v31  ;;  %v1594_v20 = vld [vmem:[#allocation2 + $0x18] sm:$0xff] }
 0x118   : > { %1145 = vperm.xlu0 %8143, %v379_v56   ;;  %v2306_v16 = vadd.f32 %v1957_v33, %v1593_v14  ;;  %v1359_v24 = vadd.f32 %v1241_v30, %v528_v0  ;;  %v2540_v28 = vld [vmem:[#allocation2] sm:$0xff]  ;;  %v3033_v1 = vrot.slane %v8979_v60, 2  ;;  %v3031_v36 = vrot.slane %v8982_v42, 2 }
 0x119   : > { %3434 = vst.msk [vmem:[#allocation2 + $0x1f8] sm:$0xff] %vm404_vm0, %v3316_v2  ;;  %2487 = vst.msk [vmem:[#allocation2 + $0x208] sm:$0xff] %vm404_vm0, %v2369_v62  ;;  %v1958_v37 = vrot.slane %v8999_v6, 1  ;;  %v1306_v40 = vmul.f32 %v8798_v10, %v8984_v57  ;;  %v3253_v48 = vadd.f32 %v8923_v7, %v2540_v28  ;;  %v2904_v50 = vsel %vm2899_vm3, %v2901_v41, %v2903_v4  ;;  %v592_v5 = vld [vmem:[#allocation2 + $0x220] sm:$0xff] }
 0x11a   : > { %v3551_v25 = vld [vmem:[#allocation2 + $0x1f0] sm:$0xff]  ;;  %v3549_v54 = vld [vmem:[#allocation2 + $0x1e0] sm:$0xff]  ;;  %v9022_v44 = vpop.permute.xlu1 %680  ;;  %v9024_v45 = vpop.permute.xlu0 %675  ;;  %2424 = vst.msk [vmem:[#allocation2 + $0x10] sm:$0xff] %vm404_vm0, %v2306_v16  ;;  %1477 = vst.msk [vmem:[#allocation2 + $0x20] sm:$0xff] %vm404_vm0, %v1359_v24  ;;  %v2906_v53 = vsel %vm2899_vm3, %v2903_v4, %v2905_v8  ;;  %v9037_v56 = vmul.f32 %v8815_v32, %v8941_v31  ;;  %v2085_v41 = vsel %vm1950_vm2, %v2082_v55, %v2084_v18  ;;  %v1960_v63 = vrot.slane %v9012_v19, 1 }
 0x11b   : > { %v3669_v46 = vmax.f32 %v3551_v25, 0.0  ;;  %v3667_v47 = vmax.f32 %v3549_v54, 0.0  ;;  %v2541_v49 = vld [vmem:[#allocation2 + $0x8] sm:$0xff]  ;;  %840 = vperm.xlu1 %8144, %v318_v15   ;;  %v1959_v7 = vsel %vm1950_vm2, %v1956_v38, %v1958_v37  ;;  %3371 = vst.msk [vmem:[#allocation2] sm:$0xff] %vm404_vm0, %v3253_v48  ;;  %v1424_v0 = vadd.f32 %v1306_v40, %v593_v26  ;;  %v1658_v16 = vld [vmem:[#allocation2 + $0x218] sm:$0xff] }
 0x11c   : > { %v3254_v39 = vadd.f32 %v2904_v50, %v2541_v49  ;;  %835 = vperm.xlu0 %8143, %v317_v27   ;;  %v2307_v31 = vadd.f32 %v1959_v7, %v1594_v20  ;;  %v1657_v61 = vld [vmem:[#allocation2 + $0x210] sm:$0xff]  ;;  %v3032_v30 = vsel %vm2899_vm3, %v3029_v22, %v3031_v36  ;;  %v9059_v55 = vmul.f32 %v8815_v32, %v8943_v17  ;;  %v320_v27 = vld [vmem:[%s8480_s10 + $0x148] sm:$0xff] }
 0x11d   : > { %3787 = vst.msk [vmem:[#allocation2 + $0x1f0] sm:$0xff] %vm404_vm0, %v3669_v46  ;;  %3785 = vst.msk [vmem:[#allocation2 + $0x1e0] sm:$0xff] %vm404_vm0, %v3667_v47  ;;  %v2604_v38 = vld [vmem:[#allocation2 + $0x200] sm:$0xff]  ;;  %v1305_v6 = vmul.f32 %v8798_v10, %v8986_v3  ;;  %v9065_v2 = vmul.f32 %v8805_v21, %v8986_v3  ;;  %v2370_v22 = vadd.f32 %v2085_v41, %v1657_v61  ;;  %v595_v61 = vld [vmem:[#allocation2 + $0x238] sm:$0xff] }
 0x11e   : > { %v3550_v4 = vld [vmem:[#allocation2 + $0x1e8] sm:$0xff]  ;;  %3372 = vst.msk [vmem:[#allocation2 + $0x8] sm:$0xff] %vm404_vm0, %v3254_v39  ;;  %v9067_v14 = vpop.permute.xlu1 %1000  ;;  %v9069_v33 = vpop.permute.xlu0 %995  ;;  %v3317_v58 = vadd.f32 %v8976_v59, %v2604_v38  ;;  %2425 = vst.msk [vmem:[#allocation2 + $0x18] sm:$0xff] %vm404_vm0, %v2307_v31  ;;  %v9076_v17 = vmul.f32 %v8805_v21, %v8984_v57  ;;  %v9080_v15 = vmul.f32 %v8815_v32, %v8984_v57  ;;  %v531_v59 = vld [vmem:[#allocation2 + $0x38] sm:$0xff]  ;;  %v2907_v7 = vrot.slane %v9059_v55, 2 }
 0x11f   : > { %v3668_v62 = vmax.f32 %v3550_v4, 0.0  ;;  %1542 = vst.msk [vmem:[#allocation2 + $0x228] sm:$0xff] %vm404_vm0, %v1424_v0  ;;  %1160 = vperm.xlu1 %8144, %v382_v11   ;;  %v1423_v20 = vadd.f32 %v1305_v6, %v592_v5  ;;  %v2086_v24 = vrot.slane %v9065_v2, 1  ;;  %v1244_v26 = vmul.f32 %v8798_v10, %v9022_v44  ;;  %2488 = vst.msk [vmem:[#allocation2 + $0x210] sm:$0xff] %vm404_vm0, %v2370_v22  ;;  %v319_v47 = vld [vmem:[%s8480_s10 + $0x140] sm:$0xff] }
 0x120   : > { %1155 = vperm.xlu0 %8143, %v381_v12   ;;  %3435 = vst.msk [vmem:[#allocation2 + $0x200] sm:$0xff] %vm404_vm0, %v3317_v58  ;;  %v3552_v25 = vld [vmem:[#allocation2 + $0x1f8] sm:$0xff]  ;;  %v2605_v57 = vld [vmem:[#allocation2 + $0x208] sm:$0xff]  ;;  %v1961_v54 = vsel %vm1950_vm2, %v1958_v37, %v1960_v63  ;;  %v9094_v28 = vmul.f32 %v8815_v32, %v8986_v3  ;;  %v1243_v40 = vmul.f32 %v8798_v10, %v9024_v45  ;;  %v530_v37 = vld [vmem:[#allocation2 + $0x30] sm:$0xff]  ;;  %v2909_v0 = vrot.slane %v9037_v56, 2 }
 0x121   : > { %3786 = vst.msk [vmem:[#allocation2 + $0x1e8] sm:$0xff] %vm404_vm0, %v3668_v62  ;;  %v9100_v46 = vmul.f32 %v8805_v21, %v9024_v45  ;;  %v3670_v48 = vmax.f32 %v3552_v25, 0.0  ;;  %v2542_v49 = vld [vmem:[#allocation2 + $0x10] sm:$0xff]  ;;  %v3318_v50 = vadd.f32 %v3032_v30, %v2605_v57  ;;  %v1595_v39 = vld [vmem:[#allocation2 + $0x20] sm:$0xff]  ;;  %1541 = vst.msk [vmem:[#allocation2 + $0x220] sm:$0xff] %vm404_vm0, %v1423_v20  ;;  %v2087_v3 = vsel %vm1950_vm2, %v2084_v18, %v2086_v24 }
 0x122   : > { %v9110_v11 = vpop.permute.xlu1 %690  ;;  %v9112_v41 = vpop.permute.xlu0 %685  ;;  %v3255_v31 = vadd.f32 %v2906_v53, %v2542_v49  ;;  %v2308_v5 = vadd.f32 %v1961_v54, %v1595_v39  ;;  %v2371_v12 = vadd.f32 %v2087_v3, %v1658_v16  ;;  %v3489_v4 = vld [vmem:[#allocation2] sm:$0xff]  ;;  %v3034_v29 = vsel %vm2899_vm3, %v3031_v36, %v3033_v1  ;;  %v384_v30 = vld [vmem:[%s8480_s10 + $0x348] sm:$0xff] }
 0x123   : > { %850 = vperm.xlu1 %8144, %v320_v27   ;;  %3788 = vst.msk [vmem:[#allocation2 + $0x1f8] sm:$0xff] %vm404_vm0, %v3670_v48  ;;  %3436 = vst.msk [vmem:[#allocation2 + $0x208] sm:$0xff] %vm404_vm0, %v3318_v50  ;;  %v2088_v18 = vrot.slane %v9076_v17, 1  ;;  %v1362_v53 = vadd.f32 %v1244_v26, %v531_v59  ;;  %v9125_v38 = vmul.f32 %v8805_v21, %v9022_v44  ;;  %v3607_v55 = vmax.f32 %v3489_v4, 0.0  ;;  %v1596_v36 = vld [vmem:[#allocation2 + $0x28] sm:$0xff]  ;;  %v383_v22 = vld [vmem:[%s8480_s10 + $0x340] sm:$0xff] }
 0x124   : > { %845 = vperm.xlu0 %8143, %v319_v47   ;;  %3373 = vst.msk [vmem:[#allocation2 + $0x10] sm:$0xff] %vm404_vm0, %v3255_v31  ;;  %2426 = vst.msk [vmem:[#allocation2 + $0x20] sm:$0xff] %vm404_vm0, %v2308_v5  ;;  %v3035_v42 = vrot.slane %v9094_v28, 2  ;;  %v1361_v62 = vadd.f32 %v1243_v40, %v530_v37  ;;  %v1962_v58 = vrot.slane %v9100_v46, 1  ;;  %v2908_v59 = vsel %vm2899_vm3, %v2905_v8, %v2907_v7  ;;  %v594_v37 = vld [vmem:[#allocation2 + $0x230] sm:$0xff] }
 0x125   : > { %v3490_v6 = vld [vmem:[#allocation2 + $0x8] sm:$0xff]  ;;  %2489 = vst.msk [vmem:[#allocation2 + $0x218] sm:$0xff] %vm404_vm0, %v2371_v12  ;;  %v2543_v20 = vld [vmem:[#allocation2 + $0x18] sm:$0xff]  ;;  %v3037_v26 = vrot.slane %v9080_v15, 2  ;;  %1480 = vst.msk [vmem:[#allocation2 + $0x38] sm:$0xff] %vm404_vm0, %v1362_v53  ;;  %v1308_v27 = vmul.f32 %v8798_v10, %v9067_v14  ;;  %v2910_v23 = vsel %vm2899_vm3, %v2907_v7, %v2909_v0  ;;  %v9157_v40 = vmul.f32 %v8815_v32, %v9024_v45 }
 0x126   : > { %v3608_v16 = vmax.f32 %v3490_v6, 0.0  ;;  %v9141_v25 = vpop.permute.xlu1 %1010  ;;  %v9143_v57 = vpop.permute.xlu0 %1005  ;;  %3725 = vst.msk [vmem:[#allocation2] sm:$0xff] %vm404_vm0, %v3607_v55  ;;  %v3256_v54 = vadd.f32 %v2908_v59, %v2543_v20  ;;  %1479 = vst.msk [vmem:[#allocation2 + $0x30] sm:$0xff] %vm404_vm0, %v1361_v62  ;;  %v1963_v8 = vsel %vm1950_vm2, %v1960_v63, %v1962_v58  ;;  %v2606_v48 = vld [vmem:[#allocation2 + $0x210] sm:$0xff]  ;;  %v2089_v49 = vsel %vm1950_vm2, %v2086_v24, %v2088_v18  ;;  %v322_v45 = vld [vmem:[%s8480_s10 + $0x158] sm:$0xff] }
 0x127   : > { %1170 = vperm.xlu1 %8144, %v384_v30   ;;  %v3553_v47 = vld [vmem:[#allocation2 + $0x200] sm:$0xff]  ;;  %v9167_v19 = vmul.f32 %v8815_v32, %v9022_v44  ;;  %v2309_v63 = vadd.f32 %v1963_v8, %v1596_v36  ;;  %v1426_v50 = vadd.f32 %v1308_v27, %v595_v61  ;;  %v3319_v7 = vadd.f32 %v3034_v29, %v2606_v48  ;;  %v321_v44 = vld [vmem:[%s8480_s10 + $0x150] sm:$0xff]  ;;  %v1660_v30 = vld [vmem:[#allocation2 + $0x228] sm:$0xff] }
 0x128   : > { %3726 = vst.msk [vmem:[#allocation2 + $0x8] sm:$0xff] %vm404_vm0, %v3608_v16  ;;  %1165 = vperm.xlu0 %8143, %v383_v22   ;;  %v3671_v39 = vmax.f32 %v3553_v47, 0.0  ;;  %3374 = vst.msk [vmem:[#allocation2 + $0x18] sm:$0xff] %vm404_vm0, %v3256_v54  ;;  %v1659_v3 = vld [vmem:[#allocation2 + $0x220] sm:$0xff]  ;;  %v3036_v2 = vsel %vm2899_vm3, %v3033_v1, %v3035_v42  ;;  %v1964_v24 = vrot.slane %v9125_v38, 1  ;;  %v9182_v5 = vmul.f32 %v8805_v21, %v9067_v14  ;;  %v533_v1 = vld [vmem:[#allocation2 + $0x48] sm:$0xff] }
 0x129   : > { %v2372_v31 = vadd.f32 %v2089_v49, %v1659_v3  ;;  %2427 = vst.msk [vmem:[#allocation2 + $0x28] sm:$0xff] %vm404_vm0, %v2309_v63  ;;  %1544 = vst.msk [vmem:[#allocation2 + $0x238] sm:$0xff] %vm404_vm0, %v1426_v50  ;;  %v1307_v12 = vmul.f32 %v8798_v10, %v9069_v33  ;;  %v9188_v60 = vmul.f32 %v8805_v21, %v9069_v33  ;;  %v2911_v53 = vrot.slane %v9157_v40, 2  ;;  %v386_v62 = vld [vmem:[%s8480_s10 + $0x358] sm:$0xff]  ;;  %v532_v48 = vld [vmem:[#allocation2 + $0x40] sm:$0xff] }
 0x12a   : > { %v9190_v4 = vpop.permute.xlu1 %700  ;;  %3789 = vst.msk [vmem:[#allocation2 + $0x200] sm:$0xff] %vm404_vm0, %v3671_v39  ;;  %3437 = vst.msk [vmem:[#allocation2 + $0x210] sm:$0xff] %vm404_vm0, %v3319_v7  ;;  %v3554_v29 = vld [vmem:[#allocation2 + $0x208] sm:$0xff]  ;;  %v9197_v61 = vmul.f32 %v8815_v32, %v9067_v14  ;;  %v9201_v55 = vmul.f32 %v8815_v32, %v9069_v33  ;;  %v1246_v6 = vmul.f32 %v8798_v10, %v9110_v11  ;;  %v9205_v36 = vpop.permute.xlu0 %695  ;;  %v385_v49 = vld [vmem:[%s8480_s10 + $0x350] sm:$0xff]  ;;  %v2913_v50 = vrot.slane %v9167_v19, 2 }
 0x12b   : > { %860 = vperm.xlu1 %8144, %v322_v45   ;;  %v3491_v22 = vld [vmem:[#allocation2 + $0x10] sm:$0xff]  ;;  %v3672_v16 = vmax.f32 %v3554_v29, 0.0  ;;  %v2544_v20 = vld [vmem:[#allocation2 + $0x20] sm:$0xff]  ;;  %2490 = vst.msk [vmem:[#allocation2 + $0x220] sm:$0xff] %vm404_vm0, %v2372_v31  ;;  %v1425_v59 = vadd.f32 %v1307_v12, %v594_v37  ;;  %v2090_v27 = vrot.slane %v9188_v60, 1  ;;  %v1245_v33 = vmul.f32 %v8798_v10, %v9112_v41  ;;  %v324_v12 = vld [vmem:[%s8480_s10 + $0x168] sm:$0xff] }
 0x12c   : > { %v2607_v14 = vld [vmem:[#allocation2 + $0x218] sm:$0xff]  ;;  %855 = vperm.xlu0 %8143, %v321_v44   ;;  %v3609_v54 = vmax.f32 %v3491_v22, 0.0  ;;  %v3257_v8 = vadd.f32 %v2910_v23, %v2544_v20  ;;  %v1364_v47 = vadd.f32 %v1246_v6, %v533_v1  ;;  %v3038_v63 = vsel %vm2899_vm3, %v3035_v42, %v3037_v26  ;;  %v596_v44 = vld [vmem:[#allocation2 + $0x240] sm:$0xff] }
 0x12d   : > { %v3320_v40 = vadd.f32 %v3036_v2, %v2607_v14  ;;  %3790 = vst.msk [vmem:[#allocation2 + $0x208] sm:$0xff] %vm404_vm0, %v3672_v16  ;;  %v1597_v45 = vld [vmem:[#allocation2 + $0x30] sm:$0xff]  ;;  %v1965_v23 = vsel %vm1950_vm2, %v1962_v58, %v1964_v24  ;;  %1543 = vst.msk [vmem:[#allocation2 + $0x230] sm:$0xff] %vm404_vm0, %v1425_v59  ;;  %v2091_v39 = vsel %vm1950_vm2, %v2088_v18, %v2090_v27  ;;  %v2092_v42 = vrot.slane %v9182_v5, 1  ;;  %v597_v58 = vld [vmem:[#allocation2 + $0x248] sm:$0xff] }
 0x12e   : > { %3727 = vst.msk [vmem:[#allocation2 + $0x10] sm:$0xff] %vm404_vm0, %v3609_v54  ;;  %3375 = vst.msk [vmem:[#allocation2 + $0x20] sm:$0xff] %vm404_vm0, %v3257_v8  ;;  %v2310_v28 = vadd.f32 %v1965_v23, %v1597_v45  ;;  %v3041_v46 = vrot.slane %v9197_v61, 2  ;;  %v2373_v7 = vadd.f32 %v2091_v39, %v1660_v30  ;;  %v2912_v18 = vsel %vm2899_vm3, %v2909_v0, %v2911_v53  ;;  %v9244_v31 = vpop.permute.xlu1 %1020  ;;  %v9256_v30 = vpop.permute.xlu0 %1015  ;;  %v323_v6 = vld [vmem:[%s8480_s10 + $0x160] sm:$0xff]  ;;  %v1598_v20 = vld [vmem:[#allocation2 + $0x38] sm:$0xff] }
 0x12f   : > { %3438 = vst.msk [vmem:[#allocation2 + $0x218] sm:$0xff] %vm404_vm0, %v3320_v40  ;;  %1482 = vst.msk [vmem:[#allocation2 + $0x48] sm:$0xff] %vm404_vm0, %v1364_v47  ;;  %1180 = vperm.xlu1 %8144, %v386_v62   ;;  %v3492_v17 = vld [vmem:[#allocation2 + $0x18] sm:$0xff]  ;;  %v1363_v3 = vadd.f32 %v1245_v33, %v532_v48  ;;  %v9240_v2 = vmul.f32 %v8805_v21, %v9112_v41  ;;  %v1310_v37 = vmul.f32 %v8798_v10, %v9141_v25  ;;  %v387_v23 = vld [vmem:[%s8480_s10 + $0x360] sm:$0xff] }
 0x130   : > { %1175 = vperm.xlu0 %8143, %v385_v49   ;;  %v3610_v60 = vmax.f32 %v3492_v17, 0.0  ;;  %2428 = vst.msk [vmem:[#allocation2 + $0x30] sm:$0xff] %vm404_vm0, %v2310_v28  ;;  %v2545_v56 = vld [vmem:[#allocation2 + $0x28] sm:$0xff]  ;;  %2491 = vst.msk [vmem:[#allocation2 + $0x228] sm:$0xff] %vm404_vm0, %v2373_v7  ;;  %v3039_v0 = vrot.slane %v9201_v55, 2  ;;  %v9252_v1 = vmul.f32 %v8805_v21, %v9110_v11  ;;  %v1309_v29 = vmul.f32 %v8798_v10, %v9143_v57  ;;  %v535_v45 = vld [vmem:[#allocation2 + $0x58] sm:$0xff] }
 0x131   : > { %v3555_v62 = vld [vmem:[#allocation2 + $0x210] sm:$0xff]  ;;  %v2914_v22 = vsel %vm2899_vm3, %v2911_v53, %v2913_v50  ;;  %v3258_v16 = vadd.f32 %v2912_v18, %v2545_v56  ;;  %1481 = vst.msk [vmem:[#allocation2 + $0x40] sm:$0xff] %vm404_vm0, %v1363_v3  ;;  %v1966_v55 = vrot.slane %v9240_v2, 1  ;;  %v1428_v14 = vadd.f32 %v1310_v37, %v597_v58  ;;  %v3903_v18 = vld [vmem:[#allocation2 + $0x1e0] ss:$2 sm:$0xff] }
 0x132   : > { %v3673_v59 = vmax.f32 %v3555_v62, 0.0  ;;  %3728 = vst.msk [vmem:[#allocation2 + $0x18] sm:$0xff] %vm404_vm0, %v3610_v60  ;;  %v2608_v33 = vld [vmem:[#allocation2 + $0x220] sm:$0xff]  ;;  %v2093_v54 = vsel %vm1950_vm2, %v2090_v27, %v2092_v42  ;;  %v9270_v8 = vmul.f32 %v8815_v32, %v9110_v11  ;;  %v1427_v53 = vadd.f32 %v1309_v29, %v596_v44  ;;  %v388_v27 = vld [vmem:[%s8480_s10 + $0x368] sm:$0xff]  ;;  %v534_v17 = vld [vmem:[#allocation2 + $0x50] sm:$0xff]  ;;  %v9307_v3 = vpop.permute.xlu1 %710  ;;  %v9311_v56 = vpop.permute.xlu0 %705 }
 0x133   : > { %870 = vperm.xlu1 %8144, %v324_v12   ;;  %v3321_v40 = vadd.f32 %v3038_v63, %v2608_v33  ;;  %3376 = vst.msk [vmem:[#allocation2 + $0x28] sm:$0xff] %vm404_vm0, %v3258_v16  ;;  %v1967_v47 = vsel %vm1950_vm2, %v1964_v24, %v1966_v55  ;;  %v9278_v48 = vmul.f32 %v8815_v32, %v9112_v41  ;;  %1546 = vst.msk [vmem:[#allocation2 + $0x248] sm:$0xff] %vm404_vm0, %v1428_v14  ;;  %v1662_v12 = vld [vmem:[#allocation2 + $0x238] sm:$0xff]  ;;  %v4021_v14 = vld [vmem:[#allocation2 + $0x1e1] ss:$2 sm:$0xff] }
 0x134   : > { %v9283_v11 = vmul.f32 %v8805_v21, %v9141_v25  ;;  %865 = vperm.xlu0 %8143, %v323_v6   ;;  %3791 = vst.msk [vmem:[#allocation2 + $0x210] sm:$0xff] %vm404_vm0, %v3673_v59  ;;  %v1661_v49 = vld [vmem:[#allocation2 + $0x230] sm:$0xff]  ;;  %v3040_v38 = vsel %vm2899_vm3, %v3037_v26, %v3039_v0  ;;  %v1968_v24 = vrot.slane %v9252_v1, 1  ;;  %v2311_v63 = vadd.f32 %v1967_v47, %v1598_v20  ;;  %v327_v61 = vld [vmem:[%s8480_s10 + $0x180] sm:$0xff] }
 0x135   : > { %1545 = vst.msk [vmem:[#allocation2 + $0x240] sm:$0xff] %vm404_vm0, %v1427_v53  ;;  %v1786_v41 = vmul.f32 %v8805_v21, %v9143_v57  ;;  %v3493_v39 = vld [vmem:[#allocation2 + $0x20] sm:$0xff]  ;;  %3439 = vst.msk [vmem:[#allocation2 + $0x220] sm:$0xff] %vm404_vm0, %v3321_v40  ;;  %v2374_v7 = vadd.f32 %v2093_v54, %v1661_v49  ;;  %v9299_v15 = vsel %vm2899_vm3, %v3039_v0, %v3041_v46  ;;  %v2917_v44 = vrot.slane %v9270_v8, 2  ;;  %v325_v47 = vld [vmem:[%s8480_s10 + $0x170] sm:$0xff] }
 0x136   : > { %v3556_v28 = vld [vmem:[#allocation2 + $0x218] sm:$0xff]  ;;  %v9303_v26 = vmul.f32 %v8815_v32, %v9141_v25  ;;  %v1248_v58 = vmul.f32 %v8798_v10, %v9190_v4  ;;  %v3611_v2 = vmax.f32 %v3493_v39, 0.0  ;;  %2429 = vst.msk [vmem:[#allocation2 + $0x38] sm:$0xff] %vm404_vm0, %v2311_v63  ;;  %v2915_v6 = vrot.slane %v9278_v48, 2  ;;  %v389_v39 = vld [vmem:[%s8480_s10 + $0x370] sm:$0xff] }
 0x137   : > { %v3674_v37 = vmax.f32 %v3556_v28, 0.0  ;;  %v2094_v60 = vrot.slane %v1786_v41, 1  ;;  %1190 = vperm.xlu1 %8144, %v388_v27   ;;  %v326_v25 = vld [vmem:[%s8480_s10 + $0x178] sm:$0xff]  ;;  %v2546_v0 = vld [vmem:[#allocation2 + $0x30] sm:$0xff]  ;;  %2492 = vst.msk [vmem:[#allocation2 + $0x230] sm:$0xff] %vm404_vm0, %v2374_v7  ;;  %v2609_v29 = vld [vmem:[#allocation2 + $0x228] sm:$0xff]  ;;  %v1247_v20 = vmul.f32 %v8798_v10, %v9205_v36  ;;  %v1969_v53 = vsel %vm1950_vm2, %v1966_v55, %v1968_v24 }
 0x138   : > { %v2096_v62 = vrot.slane %v9283_v11, 1  ;;  %v1366_v16 = vadd.f32 %v1248_v58, %v535_v45  ;;  %1185 = vperm.xlu0 %8143, %v387_v23   ;;  %3729 = vst.msk [vmem:[#allocation2 + $0x20] sm:$0xff] %vm404_vm0, %v3611_v2  ;;  %v3259_v59 = vadd.f32 %v2914_v22, %v2546_v0  ;;  %v3322_v33 = vadd.f32 %v3040_v38, %v2609_v29  ;;  %v1599_v54 = vld [vmem:[#allocation2 + $0x40] sm:$0xff]  ;;  %v599_v38 = vld [vmem:[#allocation2 + $0x258] sm:$0xff]  ;;  %v9397_v48 = vld [vmem:[#allocation4 + $0x1] ss:$0 sm:$0xff] }
 0x139   : > { %3792 = vst.msk [vmem:[#allocation2 + $0x218] sm:$0xff] %vm404_vm0, %v3674_v37  ;;  %v2095_v40 = vsel %vm1950_vm2, %v2092_v42, %v2094_v60  ;;  %v2312_v27 = vadd.f32 %v1969_v53, %v1599_v54  ;;  %v3045_v49 = vrot.slane %v9303_v26, 2  ;;  %v9331_v22 = vmul.f32 %v8815_v32, %v9143_v57  ;;  %v598_v57 = vld [vmem:[#allocation2 + $0x250] sm:$0xff]  ;;  %v390_v23 = vld [vmem:[%s8480_s10 + $0x378] sm:$0xff]  ;;  %v9360_v37 = vpop.permute.xlu1 %1030  ;;  %v3843_v29 = vld [vmem:[#allocation2] ss:$2 sm:$0xff] }
 0x13a   : > { %v2375_v63 = vadd.f32 %v2095_v40, %v1662_v12  ;;  %1484 = vst.msk [vmem:[#allocation2 + $0x58] sm:$0xff] %vm404_vm0, %v1366_v16  ;;  %3377 = vst.msk [vmem:[#allocation2 + $0x30] sm:$0xff] %vm404_vm0, %v3259_v59  ;;  %v3494_v55 = vld [vmem:[#allocation2 + $0x28] sm:$0xff]  ;;  %v9338_v5 = vmul.f32 %v8805_v21, %v9190_v4  ;;  %v1365_v42 = vadd.f32 %v1247_v20, %v534_v17  ;;  %v4023_v2 = vld [vmem:[#allocation2 + $0x1f1] ss:$2 sm:$0xff]  ;;  %v9374_v16 = vpop.permute.xlu0 %1025 }
 0x13b   : > { %3440 = vst.msk [vmem:[#allocation2 + $0x228] sm:$0xff] %vm404_vm0, %v3322_v33  ;;  %v9342_v41 = vmul.f32 %v8805_v21, %v9205_v36  ;;  %v9344_v45 = vmax.f32 %v3903_v18, %v4021_v14  ;;  %880 = vperm.xlu1 %8144, %v326_v25   ;;  %v3612_v28 = vmax.f32 %v3494_v55, 0.0  ;;  %2430 = vst.msk [vmem:[#allocation2 + $0x40] sm:$0xff] %vm404_vm0, %v2312_v27  ;;  %v3905_v18 = vld [vmem:[#allocation2 + $0x1f0] ss:$2 sm:$0xff]  ;;  %v3043_v14 = vrot.slane %v9331_v22, 2 }
 0x13c   : > { %v2916_v7 = vsel %vm2899_vm3, %v2913_v50, %v2915_v6  ;;  %v1663_v58 = vld [vmem:[#allocation2 + $0x240] sm:$0xff]  ;;  %v2097_v21 = vsel %vm1950_vm2, %v2094_v60, %v2096_v62  ;;  %2493 = vst.msk [vmem:[#allocation2 + $0x238] sm:$0xff] %vm404_vm0, %v2375_v63  ;;  %v1312_v17 = vmul.f32 %v8798_v10, %v9244_v31  ;;  %875 = vperm.xlu0 %8143, %v325_v47   ;;  %v1600_v50 = vld [vmem:[#allocation2 + $0x48] sm:$0xff]  ;;  %1483 = vst.msk [vmem:[#allocation2 + $0x50] sm:$0xff] %vm404_vm0, %v1365_v42 }
 0x13d   : > { %13454 = vst [vmem:[#allocation14_spill] sm:$0xff] %v9344_v45  ;;  %v3557_v12 = vld [vmem:[#allocation2 + $0x220] sm:$0xff]  ;;  %v2376_v25 = vadd.f32 %v2097_v21, %v1663_v58  ;;  %v9364_v19 = vmul.f32 %v8815_v32, %v9190_v4  ;;  %v1970_v60 = vrot.slane %v9342_v41, 1  ;;  %7608 = vmatmul.mubr.msk.f32.vlgmr.msra.gmra.mrb[0].mxu1 %vm404_vm0, %v9344_v45  ;;  %v9370_v10 = vld [vmem:[#allocation4] ss:$0 sm:$0xff]  ;;  %3730 = vst.msk [vmem:[#allocation2 + $0x28] sm:$0xff] %vm404_vm0, %v3612_v28  ;;  %v9429_v21 = vpop.permute.xlu1 %720 }
 0x13e   : > { %v1311_v0 = vmul.f32 %v9370_v10, %v9256_v30  ;;  %v3675_v20 = vmax.f32 %v3557_v12, 0.0  ;;  %v2547_v4 = vld [vmem:[#allocation2 + $0x38] sm:$0xff]  ;;  %v9380_v59 = vmul.f32 %v8815_v32, %v9205_v36  ;;  %7610 = vmatprep.mubr.msk.f32.mxu1 %vm8300_vm1, %v13343_v43  ;;  %v1430_v33 = vadd.f32 %v1312_v17, %v599_v38  ;;  %v3961_v54 = vld [vmem:[#allocation2 + $0x1] ss:$2 sm:$0xff]  ;;  %v2610_v53 = vld [vmem:[#allocation2 + $0x230] sm:$0xff] }
 0x13f   : > { %v2918_v40 = vsel %vm2899_vm3, %v2915_v6, %v2917_v44  ;;  %v3260_v47 = vadd.f32 %v2916_v7, %v2547_v4  ;;  %2494 = vst.msk [vmem:[#allocation2 + $0x240] sm:$0xff] %vm404_vm0, %v2376_v25  ;;  %v1972_v27 = vrot.slane %v9338_v5, 1  ;;  %v1971_v32 = vsel %vm1950_vm2, %v1968_v24, %v1970_v60  ;;  %1200 = vperm.xlu1 %8144, %v390_v23   ;;  %v537_v55 = vld [vmem:[#allocation2 + $0x68] sm:$0xff] }
 0x140   : > { %3793 = vst.msk [vmem:[#allocation2 + $0x220] sm:$0xff] %vm404_vm0, %v3675_v20  ;;  %v3323_v36 = vadd.f32 %v9299_v15, %v2610_v53  ;;  %v2313_v63 = vadd.f32 %v1971_v32, %v1600_v50  ;;  %1548 = vst.msk [vmem:[#allocation2 + $0x258] sm:$0xff] %vm404_vm0, %v1430_v33  ;;  %v9401_v6 = vmul.f32 %v9397_v48, %v9244_v31  ;;  %1195 = vperm.xlu0 %8143, %v389_v39   ;;  %v328_v42 = vld [vmem:[%s8480_s10 + $0x188] sm:$0xff]  ;;  %v9439_v50 = vpop.permute.xlu0 %715 }
 0x141   : > { %v1429_v22 = vadd.f32 %v1311_v0, %v598_v57  ;;  %3378 = vst.msk [vmem:[#allocation2 + $0x38] sm:$0xff] %vm404_vm0, %v3260_v47  ;;  %v2921_v1 = vrot.slane %v9364_v19, 2  ;;  %v9407_v24 = vmul.f32 %v9397_v48, %v9256_v30  ;;  %v9409_v15 = vmax.f32 %v3905_v18, %v4023_v2  ;;  %v3495_v41 = vld [vmem:[#allocation2 + $0x30] sm:$0xff]  ;;  %v9421_v28 = vld [vmem:[#allocation4 + $0x2] ss:$0 sm:$0xff] }
 0x142   : > { %v9411_v38 = vmax.f32 %v3843_v29, %v3961_v54  ;;  %3441 = vst.msk [vmem:[#allocation2 + $0x230] sm:$0xff] %vm404_vm0, %v3323_v36  ;;  %v3558_v57 = vld [vmem:[#allocation2 + $0x228] sm:$0xff]  ;;  %v3044_v23 = vsel %vm2899_vm3, %v3041_v46, %v3043_v14  ;;  %2431 = vst.msk [vmem:[#allocation2 + $0x48] sm:$0xff] %vm404_vm0, %v2313_v63  ;;  %v2919_v39 = vrot.slane %v9380_v59, 2  ;;  %v9425_v7 = vmul.f32 %v9421_v28, %v9256_v30  ;;  %v2548_v18 = vld [vmem:[#allocation2 + $0x40] sm:$0xff] }
 0x143   : > { %13455 = vst [vmem:[#allocation15_spill] sm:$0xff] %v9409_v15  ;;  %1547 = vst.msk [vmem:[#allocation2 + $0x250] sm:$0xff] %vm404_vm0, %v1429_v22  ;;  %v1250_v58 = vmul.f32 %v9370_v10, %v9307_v3  ;;  %v3613_v17 = vmax.f32 %v3495_v41, 0.0  ;;  %v3676_v46 = vmax.f32 %v3558_v57, 0.0  ;;  %v2611_v2 = vld [vmem:[#allocation2 + $0x238] sm:$0xff]  ;;  %v1664_v12 = vld [vmem:[#allocation2 + $0x248] sm:$0xff]  ;;  %7611 = vmatmul.mubr.msk.f32.gmra.mrb[2].mxu1 %vm404_vm0, %v9409_v15  ;;  %v1249_v30 = vmul.f32 %v9370_v10, %v9311_v56 }
 0x144   : > { %v2098_v25 = vrot.slane %v9407_v24, 1  ;;  %7518 = vmatmul.mubr.msk.f32.vlgmr.msra.gmra.mrb[0].mxu0 %vm404_vm0, %v9411_v38  ;;  %v3261_v0 = vadd.f32 %v2918_v40, %v2548_v18  ;;  %v3324_v29 = vadd.f32 %v3044_v23, %v2611_v2  ;;  %v1601_v20 = vld [vmem:[#allocation2 + $0x50] sm:$0xff]  ;;  %v1973_v4 = vsel %vm1950_vm2, %v1970_v60, %v1972_v27  ;;  %v536_v54 = vld [vmem:[#allocation2 + $0x60] sm:$0xff]  ;;  %7613 = vmatprep.mubr.msk.f32.mxu1 %vm8300_vm1, %v13343_v43  ;;  %v9493_v2 = vpop.permute.xlu1 %1040 }
 0x145   : > { %v2100_v33 = vrot.slane %v9401_v6, 1  ;;  %7520 = vmatprep.mubr.msk.f32.mxu0 %vm8300_vm1, %v13343_v43  ;;  %3731 = vst.msk [vmem:[#allocation2 + $0x30] sm:$0xff] %vm404_vm0, %v3613_v17  ;;  %3794 = vst.msk [vmem:[#allocation2 + $0x228] sm:$0xff] %vm404_vm0, %v3676_v46  ;;  %v3046_v53 = vsel %vm2899_vm3, %v3043_v14, %v3045_v49  ;;  %v2314_v40 = vadd.f32 %v1973_v4, %v1601_v20  ;;  %v3907_v32 = vld [vmem:[#allocation2 + $0x200] ss:$2 sm:$0xff]  ;;  %890 = vperm.xlu1 %8144, %v328_v42  }
 0x146   : > { %v9456_v60 = vmul.f32 %v9421_v28, %v9244_v31  ;;  %v2099_v47 = vsel %vm1950_vm2, %v2096_v62, %v2098_v25  ;;  %v4025_v36 = vld [vmem:[#allocation2 + $0x201] ss:$2 sm:$0xff]  ;;  %3379 = vst.msk [vmem:[#allocation2 + $0x40] sm:$0xff] %vm404_vm0, %v3261_v0  ;;  %3442 = vst.msk [vmem:[#allocation2 + $0x238] sm:$0xff] %vm404_vm0, %v3324_v29  ;;  %v2920_v31 = vsel %vm2899_vm3, %v2917_v44, %v2919_v39  ;;  %885 = vperm.xlu0 %8143, %v327_v61   ;;  %v1602_v61 = vld [vmem:[#allocation2 + $0x58] sm:$0xff] }
 0x147   : > { %v2612_v63 = vld [vmem:[#allocation2 + $0x240] sm:$0xff]  ;;  %v2377_v14 = vadd.f32 %v2099_v47, %v1664_v12  ;;  %v1368_v22 = vadd.f32 %v1250_v58, %v537_v55  ;;  %v9470_v11 = vmul.f32 %v9397_v48, %v9307_v3  ;;  %v392_v62 = vld [vmem:[%s8480_s10 + $0x388] sm:$0xff]  ;;  %2432 = vst.msk [vmem:[#allocation2 + $0x50] sm:$0xff] %vm404_vm0, %v2314_v40  ;;  %v3047_v42 = vrot.slane %v9425_v7, 2  ;;  %v330_v12 = vld [vmem:[%s8480_s10 + $0x198] sm:$0xff] }
 0x148   : > { %v3325_v24 = vadd.f32 %v3046_v53, %v2612_v63  ;;  %v1367_v41 = vadd.f32 %v1249_v30, %v536_v54  ;;  %v9477_v8 = vmul.f32 %v9397_v48, %v9311_v56  ;;  %v601_v44 = vld [vmem:[#allocation2 + $0x268] sm:$0xff]  ;;  %v391_v57 = vld [vmem:[%s8480_s10 + $0x380] sm:$0xff]  ;;  %v3496_v55 = vld [vmem:[#allocation2 + $0x38] sm:$0xff]  ;;  %v2101_v23 = vsel %vm1950_vm2, %v2098_v25, %v2100_v33  ;;  %v9505_v54 = vpop.permute.xlu0 %1035 }
 0x149   : > { %2495 = vst.msk [vmem:[#allocation2 + $0x248] sm:$0xff] %vm404_vm0, %v2377_v14  ;;  %1486 = vst.msk [vmem:[#allocation2 + $0x68] sm:$0xff] %vm404_vm0, %v1368_v22  ;;  %v9487_v58 = vmul.f32 %v9421_v28, %v9307_v3  ;;  %v9489_v17 = vmax.f32 %v3907_v32, %v4025_v36  ;;  %v1314_v46 = vmul.f32 %v9370_v10, %v9360_v37  ;;  %v600_v18 = vld [vmem:[#allocation2 + $0x260] sm:$0xff]  ;;  %v3559_v30 = vld [vmem:[#allocation2 + $0x230] sm:$0xff]  ;;  %v3614_v25 = vmax.f32 %v3496_v55, 0.0 }
 0x14a   : > { %3443 = vst.msk [vmem:[#allocation2 + $0x240] sm:$0xff] %vm404_vm0, %v3325_v24  ;;  %v2549_v0 = vld [vmem:[#allocation2 + $0x48] sm:$0xff]  ;;  %v1665_v29 = vld [vmem:[#allocation2 + $0x250] sm:$0xff]  ;;  %1485 = vst.msk [vmem:[#allocation2 + $0x60] sm:$0xff] %vm404_vm0, %v1367_v41  ;;  %v1974_v3 = vrot.slane %v9477_v8, 1  ;;  %v9501_v20 = vmul.f32 %v9421_v28, %v9311_v56  ;;  %v1313_v4 = vmul.f32 %v9370_v10, %v9374_v16  ;;  %1210 = vperm.xlu1 %8144, %v392_v62   ;;  %v3677_v53 = vmax.f32 %v3559_v30, 0.0  ;;  %v9551_v30 = vpop.permute.xlu1 %730 }
 0x14b   : > { %13456 = vst [vmem:[#allocation16_spill] sm:$0xff] %v9489_v17  ;;  %v3262_v40 = vadd.f32 %v2920_v31, %v2549_v0  ;;  %v3049_v47 = vrot.slane %v9456_v60, 2  ;;  %v2378_v32 = vadd.f32 %v2101_v23, %v1665_v29  ;;  %7614 = vmatmul.mubr.msk.f32.gmra.mrb[4].mxu1 %vm404_vm0, %v9489_v17  ;;  %v3845_v36 = vld [vmem:[#allocation2 + $0x10] ss:$2 sm:$0xff]  ;;  %v3963_v63 = vld [vmem:[#allocation2 + $0x11] ss:$2 sm:$0xff]  ;;  %1205 = vperm.xlu0 %8143, %v391_v57  }
 0x14c   : > { %3732 = vst.msk [vmem:[#allocation2 + $0x38] sm:$0xff] %vm404_vm0, %v3614_v25  ;;  %v2922_v56 = vsel %vm2899_vm3, %v2919_v39, %v2921_v1  ;;  %v3048_v31 = vsel %vm2899_vm3, %v3045_v49, %v3047_v42  ;;  %v1975_v14 = vsel %vm1950_vm2, %v1972_v27, %v1974_v3  ;;  %v1432_v22 = vadd.f32 %v1314_v46, %v601_v44  ;;  %v329_v62 = vld [vmem:[%s8480_s10 + $0x190] sm:$0xff]  ;;  %v539_v57 = vld [vmem:[#allocation2 + $0x78] sm:$0xff] }
 0x14d   : > { %7616 = vmatprep.mubr.msk.f32.mxu1 %vm8300_vm1, %v13343_v43  ;;  %3795 = vst.msk [vmem:[#allocation2 + $0x230] sm:$0xff] %vm404_vm0, %v3677_v53  ;;  %3380 = vst.msk [vmem:[#allocation2 + $0x48] sm:$0xff] %vm404_vm0, %v3262_v40  ;;  %v1976_v59 = vrot.slane %v9470_v11, 1  ;;  %v2925_v26 = vrot.slane %v9487_v58, 2  ;;  %v2315_v49 = vadd.f32 %v1975_v14, %v1602_v61  ;;  %v9534_v5 = vmul.f32 %v9397_v48, %v9360_v37  ;;  %v3497_v27 = vld [vmem:[#allocation2 + $0x40] sm:$0xff]  ;;  %v3560_v39 = vld [vmem:[#allocation2 + $0x238] sm:$0xff] }
 0x14e   : > { %2496 = vst.msk [vmem:[#allocation2 + $0x250] sm:$0xff] %vm404_vm0, %v2378_v32  ;;  %v2923_v24 = vrot.slane %v9501_v20, 2  ;;  %1550 = vst.msk [vmem:[#allocation2 + $0x268] sm:$0xff] %vm404_vm0, %v1432_v22  ;;  %v1431_v41 = vadd.f32 %v1313_v4, %v600_v18  ;;  %v9540_v8 = vmul.f32 %v9397_v48, %v9374_v16  ;;  %v9542_v44 = vmax.f32 %v3845_v36, %v3963_v63  ;;  %v2550_v61 = vld [vmem:[#allocation2 + $0x50] sm:$0xff]  ;;  %v394_v25 = vld [vmem:[%s8480_s10 + $0x398] sm:$0xff]  ;;  %v9568_v32 = vpop.permute.xlu0 %725 }
 0x14f   : > { %900 = vperm.xlu1 %8144, %v330_v12   ;;  %v3615_v55 = vmax.f32 %v3497_v27, 0.0  ;;  %v3678_v23 = vmax.f32 %v3560_v39, 0.0  ;;  %2433 = vst.msk [vmem:[#allocation2 + $0x58] sm:$0xff] %vm404_vm0, %v2315_v49  ;;  %v9547_v46 = vmul.f32 %v9421_v28, %v9374_v16  ;;  %v1252_v18 = vmul.f32 %v9370_v10, %v9429_v21  ;;  %895 = vperm.xlu0 %8143, %v329_v62   ;;  %v393_v0 = vld [vmem:[%s8480_s10 + $0x390] sm:$0xff]  ;;  %v1666_v4 = vld [vmem:[#allocation2 + $0x258] sm:$0xff] }
 0x150   : > { %v3263_v29 = vadd.f32 %v2922_v56, %v2550_v61  ;;  %v2613_v20 = vld [vmem:[#allocation2 + $0x248] sm:$0xff]  ;;  %v3050_v12 = vsel %vm2899_vm3, %v3047_v42, %v3049_v47  ;;  %v9562_v16 = vmul.f32 %v9421_v28, %v9360_v37  ;;  %1549 = vst.msk [vmem:[#allocation2 + $0x260] sm:$0xff] %vm404_vm0, %v1431_v41  ;;  %v2102_v53 = vrot.slane %v9540_v8, 1  ;;  %7521 = vmatmul.mubr.msk.f32.gmra.mrb[2].mxu0 %vm404_vm0, %v9542_v44  ;;  %v3909_v40 = vld [vmem:[#allocation2 + $0x210] ss:$2 sm:$0xff] }
 0x151   : > { %3733 = vst.msk [vmem:[#allocation2 + $0x40] sm:$0xff] %vm404_vm0, %v3615_v55  ;;  %v3561_v7 = vld [vmem:[#allocation2 + $0x240] sm:$0xff]  ;;  %3796 = vst.msk [vmem:[#allocation2 + $0x238] sm:$0xff] %vm404_vm0, %v3678_v23  ;;  %v3326_v42 = vadd.f32 %v3048_v31, %v2613_v20  ;;  %v1977_v37 = vsel %vm1950_vm2, %v1974_v3, %v1976_v59  ;;  %v2104_v63 = vrot.slane %v9534_v5, 1  ;;  %v1370_v56 = vadd.f32 %v1252_v18, %v539_v57  ;;  %v4027_v14 = vld [vmem:[#allocation2 + $0x211] ss:$2 sm:$0xff] }
 0x152   : > { %v1603_v36 = vld [vmem:[#allocation2 + $0x60] sm:$0xff]  ;;  %7523 = vmatprep.mubr.msk.f32.mxu0 %vm8300_vm1, %v13343_v43  ;;  %v3679_v22 = vmax.f32 %v3561_v7, 0.0  ;;  %3381 = vst.msk [vmem:[#allocation2 + $0x50] sm:$0xff] %vm404_vm0, %v3263_v29  ;;  %v2103_v31 = vsel %vm1950_vm2, %v2100_v33, %v2102_v53  ;;  %v9584_v49 = vmul.f32 %v9397_v48, %v9429_v21  ;;  %v2924_v3 = vsel %vm2899_vm3, %v2921_v1, %v2923_v24  ;;  %v538_v33 = vld [vmem:[#allocation2 + $0x70] sm:$0xff]  ;;  %v332_v41 = vld [vmem:[%s8480_s10 + $0x1a8] sm:$0xff] }
 0x153   : > { %v2316_v62 = vadd.f32 %v1977_v37, %v1603_v36  ;;  %1220 = vperm.xlu1 %8144, %v394_v25   ;;  %3444 = vst.msk [vmem:[#allocation2 + $0x248] sm:$0xff] %vm404_vm0, %v3326_v42  ;;  %v9593_v27 = vsel %vm2899_vm3, %v2923_v24, %v2925_v26  ;;  %v2379_v39 = vadd.f32 %v2103_v31, %v1666_v4  ;;  %v3051_v6 = vrot.slane %v9547_v46, 2  ;;  %v603_v23 = vld [vmem:[#allocation2 + $0x278] sm:$0xff]  ;;  %v331_v29 = vld [vmem:[%s8480_s10 + $0x1a0] sm:$0xff]  ;;  %v1604_v7 = vld [vmem:[#allocation2 + $0x68] sm:$0xff] }
 0x154   : > { %1488 = vst.msk [vmem:[#allocation2 + $0x78] sm:$0xff] %vm404_vm0, %v1370_v56  ;;  %1215 = vperm.xlu0 %8143, %v393_v0   ;;  %3797 = vst.msk [vmem:[#allocation2 + $0x240] sm:$0xff] %vm404_vm0, %v3679_v22  ;;  %v3498_v8 = vld [vmem:[#allocation2 + $0x48] sm:$0xff]  ;;  %v9602_v1 = vmul.f32 %v9421_v28, %v9429_v21  ;;  %v1251_v24 = vmul.f32 %v9370_v10, %v9439_v50  ;;  %v9608_v57 = vmul.f32 %v9397_v48, %v9439_v50  ;;  %v9619_v0 = vpop.permute.xlu1 %1050  ;;  %v602_v22 = vld [vmem:[#allocation2 + $0x270] sm:$0xff] }
 0x155   : > { %v2614_v19 = vld [vmem:[#allocation2 + $0x250] sm:$0xff]  ;;  %2434 = vst.msk [vmem:[#allocation2 + $0x60] sm:$0xff] %vm404_vm0, %v2316_v62  ;;  %v9610_v55 = vmax.f32 %v3909_v40, %v4027_v14  ;;  %v3616_v61 = vmax.f32 %v3498_v8, 0.0  ;;  %2497 = vst.msk [vmem:[#allocation2 + $0x258] sm:$0xff] %vm404_vm0, %v2379_v39  ;;  %v9615_v25 = vmul.f32 %v9421_v28, %v9439_v50  ;;  %v1316_v21 = vmul.f32 %v9370_v10, %v9493_v2  ;;  %v9627_v50 = vpop.permute.xlu0 %1045  ;;  %v396_v31 = vld [vmem:[%s8480_s10 + $0x3a8] sm:$0xf] }
 0x156   : > { %v3327_v18 = vadd.f32 %v3050_v12, %v2614_v19  ;;  %v2551_v20 = vld [vmem:[#allocation2 + $0x58] sm:$0xff]  ;;  %v3053_v4 = vrot.slane %v9562_v16, 2  ;;  %v1980_v40 = vrot.slane %v9584_v49, 1  ;;  %v1369_v12 = vadd.f32 %v1251_v24, %v538_v33  ;;  %v3965_v8 = vld [vmem:[#allocation2 + $0x21] ss:$2 sm:$0xff] }
 0x157   : > { %13457 = vst [vmem:[#allocation17_spill] sm:$0xff] %v9610_v55  ;;  %v1978_v42 = vrot.slane %v9608_v57, 1  ;;  %7617 = vmatmul.mubr.msk.f32.gmra.mrb[6].mxu1 %vm404_vm0, %v9610_v55  ;;  %910 = vperm.xlu1 %8144, %v332_v41   ;;  %3734 = vst.msk [vmem:[#allocation2 + $0x48] sm:$0xff] %vm404_vm0, %v3616_v61  ;;  %v3264_v36 = vadd.f32 %v2924_v3, %v2551_v20  ;;  %v1667_v37 = vld [vmem:[#allocation2 + $0x260] sm:$0xff]  ;;  %v2105_v56 = vsel %vm1950_vm2, %v2102_v53, %v2104_v63 }
 0x158   : > { %3445 = vst.msk [vmem:[#allocation2 + $0x250] sm:$0xff] %vm404_vm0, %v3327_v18  ;;  %v1434_v14 = vadd.f32 %v1316_v21, %v603_v23  ;;  %v1315_v62 = vmul.f32 %v9370_v10, %v9505_v54  ;;  %7619 = vmatprep.mubr.msk.f32.mxu1 %vm8300_vm1, %v13343_v43  ;;  %v2380_v39 = vadd.f32 %v2105_v56, %v1667_v37  ;;  %1487 = vst.msk [vmem:[#allocation2 + $0x70] sm:$0xff] %vm404_vm0, %v1369_v12  ;;  %v3847_v41 = vld [vmem:[#allocation2 + $0x20] ss:$2 sm:$0xff] }
 0x159   : > { %v3052_v3 = vsel %vm2899_vm3, %v3049_v47, %v3051_v6  ;;  %v1979_v53 = vsel %vm1950_vm2, %v1976_v59, %v1978_v42  ;;  %v9650_v33 = vmul.f32 %v9397_v48, %v9493_v2  ;;  %905 = vperm.xlu0 %8143, %v331_v29   ;;  %v3499_v19 = vld [vmem:[#allocation2 + $0x50] sm:$0xff]  ;;  %3382 = vst.msk [vmem:[#allocation2 + $0x58] sm:$0xff] %vm404_vm0, %v3264_v36  ;;  %v2929_v60 = vrot.slane %v9602_v1, 2  ;;  %v395_v59 = vld [vmem:[%s8480_s10 + $0x3a0] sm:$0xff]  ;;  %v9678_v36 = vpop.permute.xlu1 %740 }
 0x15a   : > { %v2317_v24 = vadd.f32 %v1979_v53, %v1604_v7  ;;  %v2927_v47 = vrot.slane %v9615_v25, 2  ;;  %1552 = vst.msk [vmem:[#allocation2 + $0x278] sm:$0xff] %vm404_vm0, %v1434_v14  ;;  %v9658_v11 = vmul.f32 %v9421_v28, %v9493_v2  ;;  %v3617_v57 = vmax.f32 %v3499_v19, 0.0  ;;  %v3562_v23 = vld [vmem:[#allocation2 + $0x248] sm:$0xff]  ;;  %2498 = vst.msk [vmem:[#allocation2 + $0x260] sm:$0xff] %vm404_vm0, %v2380_v39  ;;  %v333_v19 = vld [vmem:[%s8480_s10 + $0x1b0] sm:$0xff] }
 0x15b   : > { %v1433_v61 = vadd.f32 %v1315_v62, %v602_v22  ;;  %v1792_v18 = vmul.f32 %v9397_v48, %v9505_v54  ;;  %v9666_v21 = vmul.f32 %v9421_v28, %v9505_v54  ;;  %v541_v25 = vld [vmem:[#allocation2 + $0x88] sm:$0xff]  ;;  %1230 = vperm.xlu1 %8144, %v396_v31   ;;  %v3680_v29 = vmax.f32 %v3562_v23, 0.0  ;;  %v540_v54 = vld [vmem:[#allocation2 + $0x80] sm:$0xff]  ;;  %v9687_v62 = vpop.permute.xlu0 %735  ;;  %v334_v31 = vld [vmem:[%s8480_s10 + $0x1b8] sm:$0xff] }
 0x15c   : > { %v2552_v20 = vld [vmem:[#allocation2 + $0x60] sm:$0xff]  ;;  %v3054_v2 = vsel %vm2899_vm3, %v3051_v6, %v3053_v4  ;;  %2435 = vst.msk [vmem:[#allocation2 + $0x68] sm:$0xff] %vm404_vm0, %v2317_v24  ;;  %v9674_v7 = vmax.f32 %v3847_v41, %v3965_v8  ;;  %v1254_v12 = vmul.f32 %v9370_v10, %v9551_v30  ;;  %3735 = vst.msk [vmem:[#allocation2 + $0x50] sm:$0xff] %vm404_vm0, %v3617_v57  ;;  %v2615_v56 = vld [vmem:[#allocation2 + $0x258] sm:$0xff]  ;;  %v2108_v6 = vrot.slane %v9650_v33, 1 }
 0x15d   : > { %v3265_v37 = vadd.f32 %v9593_v27, %v2552_v20  ;;  %v1981_v46 = vsel %vm1950_vm2, %v1978_v42, %v1980_v40  ;;  %v1668_v14 = vld [vmem:[#allocation2 + $0x268] sm:$0xff]  ;;  %1551 = vst.msk [vmem:[#allocation2 + $0x270] sm:$0xff] %vm404_vm0, %v1433_v61  ;;  %v2106_v22 = vrot.slane %v1792_v18, 1  ;;  %1225 = vperm.xlu0 %8143, %v395_v59   ;;  %3798 = vst.msk [vmem:[#allocation2 + $0x248] sm:$0xff] %vm404_vm0, %v3680_v29  ;;  %v3055_v27 = vrot.slane %v9666_v21, 2 }
 0x15e   : > { %v3328_v39 = vadd.f32 %v3052_v3, %v2615_v56  ;;  %7524 = vmatmul.mubr.msk.f32.gmra.mrb[4].mxu0 %vm404_vm0, %v9674_v7  ;;  %v1372_v42 = vadd.f32 %v1254_v12, %v541_v25  ;;  %v1253_v53 = vmul.f32 %v9370_v10, %v9568_v32  ;;  %v3911_v41 = vld [vmem:[#allocation2 + $0x220] ss:$2 sm:$0xff]  ;;  %v4029_v8 = vld [vmem:[#allocation2 + $0x221] ss:$2 sm:$0xff]  ;;  %v2928_v59 = vsel %vm2899_vm3, %v2925_v26, %v2927_v47 }
 0x15f   : > { %v3563_v24 = vld [vmem:[#allocation2 + $0x250] sm:$0xff]  ;;  %3383 = vst.msk [vmem:[#allocation2 + $0x60] sm:$0xff] %vm404_vm0, %v3265_v37  ;;  %v9704_v3 = vsel %vm2899_vm3, %v2927_v47, %v2929_v60  ;;  %v3057_v57 = vrot.slane %v9658_v11, 2  ;;  %v2107_v23 = vsel %vm1950_vm2, %v2104_v63, %v2106_v22  ;;  %7526 = vmatprep.mubr.msk.f32.mxu0 %vm8300_vm1, %v13343_v43  ;;  %v9716_v47 = vmul.f32 %v9397_v48, %v9551_v30  ;;  %v605_v20 = vld [vmem:[#allocation2 + $0x288] sm:$0xff] }
 0x160   : > { %v3681_v61 = vmax.f32 %v3563_v24, 0.0  ;;  %3446 = vst.msk [vmem:[#allocation2 + $0x258] sm:$0xff] %vm404_vm0, %v3328_v39  ;;  %v1605_v58 = vld [vmem:[#allocation2 + $0x70] sm:$0xff]  ;;  %v2381_v26 = vadd.f32 %v2107_v23, %v1668_v14  ;;  %1490 = vst.msk [vmem:[#allocation2 + $0x88] sm:$0xff] %vm404_vm0, %v1372_v42  ;;  %v1371_v18 = vadd.f32 %v1253_v53, %v540_v54  ;;  %920 = vperm.xlu1 %8144, %v334_v31   ;;  %v3500_v5 = vld [vmem:[#allocation2 + $0x58] sm:$0xff]  ;;  %v9740_v14 = vpop.permute.xlu1 %1060 }
 0x161   : > { %v2318_v21 = vadd.f32 %v1981_v46, %v1605_v58  ;;  %v9720_v63 = vmul.f32 %v9421_v28, %v9551_v30  ;;  %v1730_v25 = vmul.f32 %v9397_v48, %v9568_v32  ;;  %v9724_v29 = vmax.f32 %v3911_v41, %v4029_v8  ;;  %915 = vperm.xlu0 %8143, %v333_v19   ;;  %v336_v12 = vld [vmem:[%s8480_s10 + $0x1c8] sm:$0xff]  ;;  %v2616_v54 = vld [vmem:[#allocation2 + $0x260] sm:$0xff]  ;;  %v9752_v8 = vpop.permute.xlu0 %1055  ;;  %v3967_v58 = vld [vmem:[#allocation2 + $0x31] ss:$2 sm:$0xff] }
 0x162   : > { %3799 = vst.msk [vmem:[#allocation2 + $0x250] sm:$0xff] %vm404_vm0, %v3681_v61  ;;  %v3618_v37 = vmax.f32 %v3500_v5, 0.0  ;;  %v2109_v56 = vsel %vm1950_vm2, %v2106_v22, %v2108_v6  ;;  %2499 = vst.msk [vmem:[#allocation2 + $0x268] sm:$0xff] %vm404_vm0, %v2381_v26  ;;  %v9735_v30 = vsel %vm2899_vm3, %v3053_v4, %v3055_v27  ;;  %v1318_v46 = vmul.f32 %v9370_v10, %v9619_v0  ;;  %v335_v31 = vld [vmem:[%s8480_s10 + $0x1c0] sm:$0xff]  ;;  %v1606_v22 = vld [vmem:[#allocation2 + $0x78] sm:$0xff] }
 0x163   : > { %13458 = vst [vmem:[#allocation18_spill] sm:$0xff] %v9724_v29  ;;  %1489 = vst.msk [vmem:[#allocation2 + $0x80] sm:$0xff] %vm404_vm0, %v1371_v18  ;;  %v3329_v39 = vadd.f32 %v3054_v2, %v2616_v54  ;;  %v2553_v42 = vld [vmem:[#allocation2 + $0x68] sm:$0xff]  ;;  %v1982_v53 = vrot.slane %v1730_v25, 1  ;;  %v9746_v16 = vmul.f32 %v9421_v28, %v9568_v32  ;;  %7620 = vmatmul.mubr.msk.f32.gmra.mrb[8].mxu1 %vm404_vm0, %v9724_v29  ;;  %v604_v4 = vld [vmem:[#allocation2 + $0x280] sm:$0xff]  ;;  %v1984_v32 = vrot.slane %v9716_v47, 1 }
 0x164   : > { %2436 = vst.msk [vmem:[#allocation2 + $0x70] sm:$0xff] %vm404_vm0, %v2318_v21  ;;  %v1317_v41 = vmul.f32 %v9370_v10, %v9627_v50  ;;  %3736 = vst.msk [vmem:[#allocation2 + $0x58] sm:$0xff] %vm404_vm0, %v3618_v37  ;;  %v3266_v2 = vadd.f32 %v2928_v59, %v2553_v42  ;;  %v1669_v19 = vld [vmem:[#allocation2 + $0x270] sm:$0xff]  ;;  %v9758_v24 = vsel %vm2899_vm3, %v3055_v27, %v3057_v57  ;;  %7622 = vmatprep.mubr.msk.f32.mxu1 %vm8300_vm1, %v13343_v43  ;;  %v338_v5 = vld [vmem:[%s8480_s10 + $0x1d8] sm:$0xff] }
 0x165   : > { %v1436_v23 = vadd.f32 %v1318_v46, %v605_v20  ;;  %v3849_v61 = vld [vmem:[#allocation2 + $0x30] ss:$2 sm:$0xff]  ;;  %930 = vperm.xlu1 %8144, %v336_v12   ;;  %3447 = vst.msk [vmem:[#allocation2 + $0x260] sm:$0xff] %vm404_vm0, %v3329_v39  ;;  %v2382_v26 = vadd.f32 %v2109_v56, %v1669_v19  ;;  %v2933_v59 = vrot.slane %v9720_v63, 2  ;;  %v1983_v27 = vsel %vm1950_vm2, %v1980_v40, %v1982_v53 }
 0x166   : > { %v9770_v18 = vmul.f32 %v9397_v48, %v9619_v0  ;;  %925 = vperm.xlu0 %8143, %v335_v31   ;;  %v3501_v21 = vld [vmem:[#allocation2 + $0x60] sm:$0xff]  ;;  %3384 = vst.msk [vmem:[#allocation2 + $0x68] sm:$0xff] %vm404_vm0, %v3266_v2  ;;  %v2319_v25 = vadd.f32 %v1983_v27, %v1606_v22  ;;  %v9777_v20 = vmul.f32 %v9421_v28, %v9619_v0  ;;  %v543_v40 = vld [vmem:[#allocation2 + $0x98] sm:$0xff]  ;;  %v337_v37 = vld [vmem:[%s8480_s10 + $0x1d0] sm:$0xff]  ;;  %v2931_v46 = vrot.slane %v9746_v16, 2 }
 0x167   : > { %1554 = vst.msk [vmem:[#allocation2 + $0x288] sm:$0xff] %vm404_vm0, %v1436_v23  ;;  %v1435_v12 = vadd.f32 %v1317_v41, %v604_v4  ;;  %v9781_v49 = vmul.f32 %v9397_v48, %v9627_v50  ;;  %v3619_v54 = vmax.f32 %v3501_v21, 0.0  ;;  %v3564_v56 = vld [vmem:[#allocation2 + $0x258] sm:$0xff]  ;;  %2500 = vst.msk [vmem:[#allocation2 + $0x270] sm:$0xff] %vm404_vm0, %v2382_v26  ;;  %v9786_v31 = vmax.f32 %v3849_v61, %v3967_v58  ;;  %v9800_v41 = vpop.permute.xlu1 %750  ;;  %v542_v61 = vld [vmem:[#allocation2 + $0x90] sm:$0xff]  ;;  %v9812_v26 = vpop.permute.xlu0 %745 }
 0x168   : > { %v1256_v39 = vmul.f32 %v9370_v10, %v9678_v36  ;;  %v3682_v0 = vmax.f32 %v3564_v56, 0.0  ;;  %v1985_v42 = vsel %vm1950_vm2, %v1982_v53, %v1984_v32  ;;  %2437 = vst.msk [vmem:[#allocation2 + $0x78] sm:$0xff] %vm404_vm0, %v2319_v25  ;;  %v1670_v22 = vld [vmem:[#allocation2 + $0x278] sm:$0xff]  ;;  %v9798_v16 = vmul.f32 %v9421_v28, %v9627_v50 }
 0x169   : > { %1553 = vst.msk [vmem:[#allocation2 + $0x280] sm:$0xff] %vm404_vm0, %v1435_v12  ;;  %v2110_v4 = vrot.slane %v9781_v49, 1  ;;  %940 = vperm.xlu1 %8144, %v338_v5   ;;  %3737 = vst.msk [vmem:[#allocation2 + $0x60] sm:$0xff] %vm404_vm0, %v3619_v54  ;;  %v2617_v2 = vld [vmem:[#allocation2 + $0x268] sm:$0xff]  ;;  %v2112_v53 = vrot.slane %v9770_v18, 1  ;;  %7527 = vmatmul.mubr.msk.f32.gmra.mrb[6].mxu0 %vm404_vm0, %v9786_v31  ;;  %v1255_v58 = vmul.f32 %v9370_v10, %v9687_v62  ;;  %v3061_v25 = vrot.slane %v9777_v20, 2 }
 0x16a   : > { %v1607_v19 = vld [vmem:[#allocation2 + $0x80] sm:$0xff]  ;;  %v1374_v23 = vadd.f32 %v1256_v39, %v543_v40  ;;  %v9810_v50 = vmul.f32 %v9397_v48, %v9687_v62  ;;  %935 = vperm.xlu0 %8143, %v337_v37   ;;  %3800 = vst.msk [vmem:[#allocation2 + $0x258] sm:$0xff] %vm404_vm0, %v3682_v0  ;;  %v3330_v5 = vadd.f32 %v9735_v30, %v2617_v2  ;;  %v3913_v49 = vld [vmem:[#allocation2 + $0x230] ss:$2 sm:$0xff]  ;;  %v4031_v40 = vld [vmem:[#allocation2 + $0x231] ss:$2 sm:$0xff] }
 0x16b   : > { %v2554_v27 = vld [vmem:[#allocation2 + $0x70] sm:$0xff]  ;;  %v2320_v21 = vadd.f32 %v1985_v42, %v1607_v19  ;;  %v2111_v12 = vsel %vm1950_vm2, %v2108_v6, %v2110_v4  ;;  %7529 = vmatprep.mubr.msk.f32.mxu0 %vm8300_vm1, %v13343_v43  ;;  %v2932_v37 = vsel %vm2899_vm3, %v2929_v60, %v2931_v46  ;;  %v9829_v30 = vmul.f32 %v9397_v48, %v9678_v36  ;;  %v607_v0 = vld [vmem:[#allocation2 + $0x298] sm:$0xff]  ;;  %v9866_v47 = vpop.permute.xlu0 %1065 }
 0x16c   : > { %v3267_v54 = vadd.f32 %v9704_v3, %v2554_v27  ;;  %v2383_v56 = vadd.f32 %v2111_v12, %v1670_v22  ;;  %1492 = vst.msk [vmem:[#allocation2 + $0x98] sm:$0xff] %vm404_vm0, %v1374_v23  ;;  %v3565_v33 = vld [vmem:[#allocation2 + $0x260] sm:$0xff]  ;;  %3448 = vst.msk [vmem:[#allocation2 + $0x268] sm:$0xff] %vm404_vm0, %v3330_v5  ;;  %v2934_v6 = vsel %vm2899_vm3, %v2931_v46, %v2933_v59  ;;  %v3059_v1 = vrot.slane %v9798_v16, 2  ;;  %v1608_v3 = vld [vmem:[#allocation2 + $0x88] sm:$0xff]  ;;  %v9859_v27 = vpop.permute.xlu1 %1070 }
 0x16d   : > { %2438 = vst.msk [vmem:[#allocation2 + $0x80] sm:$0xff] %vm404_vm0, %v2320_v21  ;;  %v1373_v60 = vadd.f32 %v1255_v58, %v542_v61  ;;  %v1986_v39 = vrot.slane %v9810_v50, 1  ;;  %v3683_v42 = vmax.f32 %v3565_v33, 0.0  ;;  %v3502_v22 = vld [vmem:[#allocation2 + $0x68] sm:$0xff]  ;;  %v9842_v2 = vmul.f32 %v9421_v28, %v9687_v62  ;;  %v606_v33 = vld [vmem:[#allocation2 + $0x290] sm:$0xff] }
 0x16e   : > { %3385 = vst.msk [vmem:[#allocation2 + $0x70] sm:$0xff] %vm404_vm0, %v3267_v54  ;;  %2501 = vst.msk [vmem:[#allocation2 + $0x278] sm:$0xff] %vm404_vm0, %v2383_v56  ;;  %v9844_v19 = vmax.f32 %v3913_v49, %v4031_v40  ;;  %v1320_v46 = vmul.f32 %v9370_v10, %v9740_v14  ;;  %v3620_v16 = vmax.f32 %v3502_v22, 0.0  ;;  %v2618_v23 = vld [vmem:[#allocation2 + $0x270] sm:$0xff]  ;;  %v2113_v61 = vsel %vm1950_vm2, %v2110_v4, %v2112_v53  ;;  %v3851_v50 = vld [vmem:[#allocation2 + $0x40] ss:$2 sm:$0xff] }
 0x16f   : > { %v9853_v58 = vmul.f32 %v9421_v28, %v9678_v36  ;;  %1491 = vst.msk [vmem:[#allocation2 + $0x90] sm:$0xff] %vm404_vm0, %v1373_v60  ;;  %v1987_v62 = vsel %vm1950_vm2, %v1984_v32, %v1986_v39  ;;  %3801 = vst.msk [vmem:[#allocation2 + $0x260] sm:$0xff] %vm404_vm0, %v3683_v42  ;;  %v3331_v5 = vadd.f32 %v9758_v24, %v2618_v23  ;;  %v2555_v21 = vld [vmem:[#allocation2 + $0x78] sm:$0xff]  ;;  %v1988_v4 = vrot.slane %v9829_v30, 1  ;;  %v3969_v40 = vld [vmem:[#allocation2 + $0x41] ss:$2 sm:$0xff] }
 0x170   : > { %13459 = vst [vmem:[#allocation19_spill] sm:$0xff] %v9844_v19  ;;  %v1671_v12 = vld [vmem:[#allocation2 + $0x280] sm:$0xff]  ;;  %v2321_v49 = vadd.f32 %v1987_v62, %v1608_v3  ;;  %7623 = vmatmul.mubr.msk.f32.gmra.mrb[10].mxu1 %vm404_vm0, %v9844_v19  ;;  %v1438_v36 = vadd.f32 %v1320_v46, %v607_v0  ;;  %3738 = vst.msk [vmem:[#allocation2 + $0x68] sm:$0xff] %vm404_vm0, %v3620_v16  ;;  %v3268_v32 = vadd.f32 %v2932_v37, %v2555_v21  ;;  %v545_v60 = vld [vmem:[#allocation2 + $0xa8] sm:$0xff] }
 0x171   : > { %v2384_v54 = vadd.f32 %v2113_v61, %v1671_v12  ;;  %v3060_v24 = vsel %vm2899_vm3, %v3057_v57, %v3059_v1  ;;  %v9874_v56 = vmul.f32 %v9397_v48, %v9740_v14  ;;  %7625 = vmatprep.mubr.msk.f32.mxu1 %vm8300_vm1, %v13343_v43  ;;  %3449 = vst.msk [vmem:[#allocation2 + $0x270] sm:$0xff] %vm404_vm0, %v3331_v5  ;;  %v2935_v11 = vrot.slane %v9842_v2, 2  ;;  %v1672_v23 = vld [vmem:[#allocation2 + $0x288] sm:$0xff] }
 0x172   : > { %v9882_v3 = vsel %vm2899_vm3, %v3059_v1, %v3061_v25  ;;  %2439 = vst.msk [vmem:[#allocation2 + $0x88] sm:$0xff] %vm404_vm0, %v2321_v49  ;;  %1556 = vst.msk [vmem:[#allocation2 + $0x298] sm:$0xff] %vm404_vm0, %v1438_v36  ;;  %v1319_v57 = vmul.f32 %v9370_v10, %v9752_v8  ;;  %v9891_v37 = vmul.f32 %v9397_v48, %v9752_v8  ;;  %v2937_v1 = vrot.slane %v9853_v58, 2 }
 0x173   : > { %3386 = vst.msk [vmem:[#allocation2 + $0x78] sm:$0xff] %vm404_vm0, %v3268_v32  ;;  %2502 = vst.msk [vmem:[#allocation2 + $0x280] sm:$0xff] %vm404_vm0, %v2384_v54  ;;  %v9898_v0 = vmul.f32 %v9421_v28, %v9740_v14  ;;  %v9900_v42 = vmax.f32 %v3851_v50, %v3969_v40  ;;  %v1258_v22 = vmul.f32 %v9370_v10, %v9800_v41  ;;  %v3566_v2 = vld [vmem:[#allocation2 + $0x268] sm:$0xff]  ;;  %v2116_v49 = vrot.slane %v9874_v56, 1  ;;  %v9915_v40 = vpop.permute.xlu1 %760 }
 0x174   : > { %v2556_v46 = vld [vmem:[#allocation2 + $0x80] sm:$0xff]  ;;  %v1989_v16 = vsel %vm1950_vm2, %v1986_v39, %v1988_v4  ;;  %v1437_v61 = vadd.f32 %v1319_v57, %v606_v33  ;;  %v2114_v62 = vrot.slane %v9891_v37, 1  ;;  %v9910_v5 = vmul.f32 %v9421_v28, %v9752_v8  ;;  %v9926_v37 = vpop.permute.xlu0 %755 }
 0x175   : > { %v3503_v14 = vld [vmem:[#allocation2 + $0x70] sm:$0xff]  ;;  %v3684_v50 = vmax.f32 %v3566_v2, 0.0  ;;  %v3269_v21 = vadd.f32 %v2934_v6, %v2556_v46  ;;  %v2619_v12 = vld [vmem:[#allocation2 + $0x278] sm:$0xff]  ;;  %7530 = vmatmul.mubr.msk.f32.gmra.mrb[8].mxu0 %vm404_vm0, %v9900_v42  ;;  %v1376_v36 = vadd.f32 %v1258_v22, %v545_v60  ;;  %v2936_v8 = vsel %vm2899_vm3, %v2933_v59, %v2935_v11  ;;  %v3915_v33 = vld [vmem:[#allocation2 + $0x240] ss:$2 sm:$0xff] }
 0x176   : > { %v3621_v39 = vmax.f32 %v3503_v14, 0.0  ;;  %v3332_v32 = vadd.f32 %v3060_v24, %v2619_v12  ;;  %v1609_v54 = vld [vmem:[#allocation2 + $0x90] sm:$0xff]  ;;  %1555 = vst.msk [vmem:[#allocation2 + $0x290] sm:$0xff] %vm404_vm0, %v1437_v61  ;;  %v2115_v6 = vsel %vm1950_vm2, %v2112_v53, %v2114_v62  ;;  %v4033_v57 = vld [vmem:[#allocation2 + $0x241] ss:$2 sm:$0xff]  ;;  %7532 = vmatprep.mubr.msk.f32.mxu0 %vm8300_vm1, %v13343_v43  ;;  %v9933_v59 = vsel %vm2899_vm3, %v2935_v11, %v2937_v1 }
 0x177   : > { %3802 = vst.msk [vmem:[#allocation2 + $0x268] sm:$0xff] %vm404_vm0, %v3684_v50  ;;  %3387 = vst.msk [vmem:[#allocation2 + $0x80] sm:$0xff] %vm404_vm0, %v3269_v21  ;;  %v2322_v63 = vadd.f32 %v1989_v16, %v1609_v54  ;;  %v3065_v18 = vrot.slane %v9898_v0, 2  ;;  %v2385_v53 = vadd.f32 %v2115_v6, %v1672_v23  ;;  %v544_v24 = vld [vmem:[#allocation2 + $0xa0] sm:$0xff]  ;;  %v3063_v60 = vrot.slane %v9910_v5, 2  ;;  %v609_v46 = vld [vmem:[#allocation2 + $0x2a8] sm:$0xff] }
 0x178   : > { %1494 = vst.msk [vmem:[#allocation2 + $0xa8] sm:$0xff] %vm404_vm0, %v1376_v36  ;;  %3739 = vst.msk [vmem:[#allocation2 + $0x70] sm:$0xff] %vm404_vm0, %v3621_v39  ;;  %v9942_v22 = vmul.f32 %v9397_v48, %v9800_v41  ;;  %v1257_v11 = vmul.f32 %v9370_v10, %v9812_v26  ;;  %v1734_v2 = vmul.f32 %v9397_v48, %v9812_v26  ;;  %v3567_v16 = vld [vmem:[#allocation2 + $0x270] sm:$0xff]  ;;  %v9986_v20 = vpop.permute.xlu0 %1075 }
 0x179   : > { %3450 = vst.msk [vmem:[#allocation2 + $0x278] sm:$0xff] %vm404_vm0, %v3332_v32  ;;  %2440 = vst.msk [vmem:[#allocation2 + $0x90] sm:$0xff] %vm404_vm0, %v2322_v63  ;;  %v2557_v23 = vld [vmem:[#allocation2 + $0x88] sm:$0xff]  ;;  %v9952_v61 = vmul.f32 %v9421_v28, %v9800_v41  ;;  %v9956_v5 = vmul.f32 %v9421_v28, %v9812_v26  ;;  %v9958_v14 = vmax.f32 %v3915_v33, %v4033_v57  ;;  %v3685_v21 = vmax.f32 %v3567_v16, 0.0  ;;  %v1610_v32 = vld [vmem:[#allocation2 + $0x98] sm:$0xff]  ;;  %v9968_v57 = vpop.permute.xlu1 %1080 }
 0x17a   : > { %2503 = vst.msk [vmem:[#allocation2 + $0x288] sm:$0xff] %vm404_vm0, %v2385_v53  ;;  %v1322_v50 = vmul.f32 %v9370_v10, %v9859_v27  ;;  %v3504_v12 = vld [vmem:[#allocation2 + $0x78] sm:$0xff]  ;;  %v2620_v36 = vld [vmem:[#allocation2 + $0x280] sm:$0xff]  ;;  %v3270_v39 = vadd.f32 %v2936_v8, %v2557_v23  ;;  %v1375_v54 = vadd.f32 %v1257_v11, %v544_v24  ;;  %v1990_v6 = vrot.slane %v1734_v2, 1 }
 0x17b   : > { %13460 = vst [vmem:[#allocation20_spill] sm:$0xff] %v9958_v14  ;;  %v3622_v63 = vmax.f32 %v3504_v12, 0.0  ;;  %v3333_v41 = vadd.f32 %v9882_v3, %v2620_v36  ;;  %v2117_v26 = vsel %vm1950_vm2, %v2114_v62, %v2116_v49  ;;  %7626 = vmatmul.mubr.msk.f32.gmra.mrb[12].mxu1 %vm404_vm0, %v9958_v14  ;;  %3803 = vst.msk [vmem:[#allocation2 + $0x270] sm:$0xff] %vm404_vm0, %v3685_v21  ;;  %v1992_v3 = vrot.slane %v9942_v22, 1  ;;  %v608_v53 = vld [vmem:[#allocation2 + $0x2a0] sm:$0xff]  ;;  %v547_v36 = vld [vmem:[#allocation2 + $0xb8] sm:$0xff] }
 0x17c   : > { %v1440_v33 = vadd.f32 %v1322_v50, %v609_v46  ;;  %3388 = vst.msk [vmem:[#allocation2 + $0x88] sm:$0xff] %vm404_vm0, %v3270_v39  ;;  %v3064_v10 = vsel %vm2899_vm3, %v3061_v25, %v3063_v60  ;;  %1493 = vst.msk [vmem:[#allocation2 + $0xa0] sm:$0xff] %vm404_vm0, %v1375_v54  ;;  %v1991_v62 = vsel %vm1950_vm2, %v1988_v4, %v1990_v6  ;;  %v3853_v24 = vld [vmem:[#allocation2 + $0x50] ss:$2 sm:$0xff]  ;;  %v3971_v11 = vld [vmem:[#allocation2 + $0x51] ss:$2 sm:$0xff]  ;;  %7628 = vmatprep.mubr.msk.f32.mxu1 %vm8300_vm1, %v13343_v43 }
 0x17d   : > { %v9982_v8 = vmul.f32 %v9397_v48, %v9859_v27  ;;  %3740 = vst.msk [vmem:[#allocation2 + $0x78] sm:$0xff] %vm404_vm0, %v3622_v63  ;;  %3451 = vst.msk [vmem:[#allocation2 + $0x280] sm:$0xff] %vm404_vm0, %v3333_v41  ;;  %v1673_v25 = vld [vmem:[#allocation2 + $0x290] sm:$0xff]  ;;  %v9993_v30 = vsel %vm2899_vm3, %v3063_v60, %v3065_v18  ;;  %v2323_v4 = vadd.f32 %v1991_v62, %v1610_v32  ;;  %v2939_v2 = vrot.slane %v9956_v5, 2  ;;  %v9997_v46 = vld [vmem:[#allocation4] ss:$0 sm:$0xff] }
 0x17e   : > { %1558 = vst.msk [vmem:[#allocation2 + $0x2a8] sm:$0xff] %vm404_vm0, %v1440_v33  ;;  %v1321_v16 = vmul.f32 %v9997_v46, %v9866_v47  ;;  %v3505_v23 = vld [vmem:[#allocation2 + $0x80] sm:$0xff]  ;;  %v2386_v50 = vadd.f32 %v2117_v26, %v1673_v25  ;;  %v2941_v21 = vrot.slane %v9952_v61, 2  ;;  %v10004_v12 = vmul.f32 %v9421_v28, %v9859_v27  ;;  %v1674_v62 = vld [vmem:[#allocation2 + $0x298] sm:$0xff]  ;;  %v549_v22 = vld [vmem:[#allocation2 + $0xc8] sm:$0xff] }
 0x17f   : > { %v1798_v60 = vmul.f32 %v9397_v48, %v9866_v47  ;;  %v3623_v5 = vmax.f32 %v3505_v23, 0.0  ;;  %2441 = vst.msk [vmem:[#allocation2 + $0x98] sm:$0xff] %vm404_vm0, %v2323_v4  ;;  %v10009_v54 = vmax.f32 %v3853_v24, %v3971_v11  ;;  %v1260_v63 = vmul.f32 %v9997_v46, %v9915_v40  ;;  %v3917_v23 = vld [vmem:[#allocation2 + $0x250] ss:$2 sm:$0xff] }
 0x180   : > { %v3568_v39 = vld [vmem:[#allocation2 + $0x278] sm:$0xff]  ;;  %v1439_v32 = vadd.f32 %v1321_v16, %v608_v53  ;;  %v2558_v26 = vld [vmem:[#allocation2 + $0x90] sm:$0xff]  ;;  %2504 = vst.msk [vmem:[#allocation2 + $0x290] sm:$0xff] %vm404_vm0, %v2386_v50  ;;  %v1993_v48 = vsel %vm1950_vm2, %v1990_v6, %v1992_v3  ;;  %v2120_v33 = vrot.slane %v9982_v8, 1  ;;  %v2940_v11 = vsel %vm2899_vm3, %v2937_v1, %v2939_v2  ;;  %v10026_v6 = vpop.permute.xlu1 %770 }
 0x181   : > { %v3686_v41 = vmax.f32 %v3568_v39, 0.0  ;;  %v2621_v27 = vld [vmem:[#allocation2 + $0x288] sm:$0xff]  ;;  %v2118_v25 = vrot.slane %v1798_v60, 1  ;;  %3741 = vst.msk [vmem:[#allocation2 + $0x80] sm:$0xff] %vm404_vm0, %v3623_v5  ;;  %v3271_v53 = vadd.f32 %v9933_v59, %v2558_v26  ;;  %7533 = vmatmul.mubr.msk.f32.gmra.mrb[10].mxu0 %vm404_vm0, %v10009_v54  ;;  %v1378_v4 = vadd.f32 %v1260_v63, %v547_v36  ;;  %v4035_v50 = vld [vmem:[#allocation2 + $0x251] ss:$2 sm:$0xff]  ;;  %v10044_v60 = vpop.permute.xlu0 %765 }
 0x182   : > { %v3334_v24 = vadd.f32 %v3064_v10, %v2621_v27  ;;  %1557 = vst.msk [vmem:[#allocation2 + $0x2a0] sm:$0xff] %vm404_vm0, %v1439_v32  ;;  %v10032_v16 = vsel %vm2899_vm3, %v2939_v2, %v2941_v21  ;;  %v3069_v59 = vrot.slane %v10004_v12, 2  ;;  %v10040_v1 = vmul.f32 %v9421_v28, %v9866_v47  ;;  %v546_v10 = vld [vmem:[#allocation2 + $0xb0] sm:$0xff]  ;;  %7535 = vmatprep.mubr.msk.f32.mxu0 %vm8300_vm1, %v13343_v43  ;;  %v10055_v47 = vld [vmem:[#allocation4 + $0x2] ss:$0 sm:$0xff] }
 0x183   : > { %3804 = vst.msk [vmem:[#allocation2 + $0x278] sm:$0xff] %vm404_vm0, %v3686_v41  ;;  %v2119_v58 = vsel %vm1950_vm2, %v2116_v49, %v2118_v25  ;;  %3389 = vst.msk [vmem:[#allocation2 + $0x90] sm:$0xff] %vm404_vm0, %v3271_v53  ;;  %v3506_v2 = vld [vmem:[#allocation2 + $0x88] sm:$0xff]  ;;  %v1611_v56 = vld [vmem:[#allocation2 + $0xa0] sm:$0xff]  ;;  %v10059_v5 = vmul.f32 %v10055_v47, %v9915_v40  ;;  %v1259_v39 = vmul.f32 %v9997_v46, %v9926_v37 }
 0x184   : > { %3452 = vst.msk [vmem:[#allocation2 + $0x288] sm:$0xff] %vm404_vm0, %v3334_v24  ;;  %v2387_v36 = vadd.f32 %v2119_v58, %v1674_v62  ;;  %1496 = vst.msk [vmem:[#allocation2 + $0xb8] sm:$0xff] %vm404_vm0, %v1378_v4  ;;  %v10049_v49 = vld [vmem:[#allocation4 + $0x1] ss:$0 sm:$0xff]  ;;  %v3569_v32 = vld [vmem:[#allocation2 + $0x280] sm:$0xff]  ;;  %v3624_v63 = vmax.f32 %v3506_v2, 0.0  ;;  %v2324_v41 = vadd.f32 %v1993_v48, %v1611_v56  ;;  %v10067_v27 = vmul.f32 %v10055_v47, %v9926_v37 }
 0x185   : > { %v10053_v28 = vmul.f32 %v10049_v49, %v9915_v40  ;;  %v1736_v26 = vmul.f32 %v10049_v49, %v9926_v37  ;;  %v611_v62 = vld [vmem:[#allocation2 + $0x2b8] sm:$0xff]  ;;  %v3687_v53 = vmax.f32 %v3569_v32, 0.0  ;;  %v1377_v24 = vadd.f32 %v1259_v39, %v546_v10  ;;  %v1612_v2 = vld [vmem:[#allocation2 + $0xa8] sm:$0xff]  ;;  %v610_v39 = vld [vmem:[#allocation2 + $0x2b0] sm:$0xff] }
 0x186   : > { %2505 = vst.msk [vmem:[#allocation2 + $0x298] sm:$0xff] %vm404_vm0, %v2387_v36  ;;  %v10070_v40 = vmax.f32 %v3917_v23, %v4035_v50  ;;  %v1324_v4 = vmul.f32 %v9997_v46, %v9968_v57  ;;  %3742 = vst.msk [vmem:[#allocation2 + $0x88] sm:$0xff] %vm404_vm0, %v3624_v63  ;;  %v2559_v48 = vld [vmem:[#allocation2 + $0x98] sm:$0xff]  ;;  %v2121_v37 = vsel %vm1950_vm2, %v2118_v25, %v2120_v33  ;;  %v3067_v58 = vrot.slane %v10040_v1, 2  ;;  %v3855_v32 = vld [vmem:[#allocation2 + $0x60] ss:$2 sm:$0xff]  ;;  %v10092_v63 = vpop.permute.xlu1 %1090 }
 0x187   : > { %2442 = vst.msk [vmem:[#allocation2 + $0xa0] sm:$0xff] %vm404_vm0, %v2324_v41  ;;  %v1994_v56 = vrot.slane %v1736_v26, 1  ;;  %v10082_v10 = vmul.f32 %v10049_v49, %v9968_v57  ;;  %3805 = vst.msk [vmem:[#allocation2 + $0x280] sm:$0xff] %vm404_vm0, %v3687_v53  ;;  %v2622_v23 = vld [vmem:[#allocation2 + $0x290] sm:$0xff]  ;;  %v3272_v50 = vadd.f32 %v2940_v11, %v2559_v48  ;;  %v1323_v25 = vmul.f32 %v9997_v46, %v9986_v20 }
 0x188   : > { %13461 = vst [vmem:[#allocation21_spill] sm:$0xff] %v10070_v40  ;;  %1495 = vst.msk [vmem:[#allocation2 + $0xb0] sm:$0xff] %vm404_vm0, %v1377_v24  ;;  %7629 = vmatmul.mubr.msk.f32.gmra.mrb[14].mxu1 %vm404_vm0, %v10070_v40  ;;  %v1442_v36 = vadd.f32 %v1324_v4, %v611_v62  ;;  %v1800_v1 = vmul.f32 %v10049_v49, %v9986_v20  ;;  %v3335_v41 = vadd.f32 %v9993_v30, %v2622_v23  ;;  %v3973_v24 = vld [vmem:[#allocation2 + $0x61] ss:$2 sm:$0xff]  ;;  %v10102_v4 = vpop.permute.xlu0 %1085 }
 0x189   : > { %v1675_v26 = vld [vmem:[#allocation2 + $0x2a0] sm:$0xff]  ;;  %v1996_v11 = vrot.slane %v10053_v28, 1  ;;  %v1995_v62 = vsel %vm1950_vm2, %v1992_v3, %v1994_v56  ;;  %7631 = vmatprep.mubr.msk.f32.mxu1 %vm8300_vm1, %v13343_v43  ;;  %3390 = vst.msk [vmem:[#allocation2 + $0x98] sm:$0xff] %vm404_vm0, %v3272_v50  ;;  %v2943_v30 = vrot.slane %v10067_v27, 2  ;;  %v10109_v23 = vmul.f32 %v10055_v47, %v9968_v57  ;;  %v1676_v43 = vld [vmem:[#allocation2 + $0x2a8] sm:$0xff] }
 0x18a   : > { %v2388_v48 = vadd.f32 %v2121_v37, %v1675_v26  ;;  %v2325_v9 = vadd.f32 %v1995_v62, %v1612_v2  ;;  %1560 = vst.msk [vmem:[#allocation2 + $0x2b8] sm:$0xff] %vm404_vm0, %v1442_v36  ;;  %v3507_v3 = vld [vmem:[#allocation2 + $0x90] sm:$0xff]  ;;  %3453 = vst.msk [vmem:[#allocation2 + $0x290] sm:$0xff] %vm404_vm0, %v3335_v41  ;;  %v2124_v34 = vrot.slane %v10082_v10, 1  ;;  %v1441_v53 = vadd.f32 %v1323_v25, %v610_v39  ;;  %v10143_v8 = vpop.permute.xlu1 %780  ;;  %v612_v28 = vld [vmem:[#allocation2 + $0x2c0] sm:$0xff] }
 0x18b   : > { %v3570_v51 = vld [vmem:[#allocation2 + $0x288] sm:$0xff]  ;;  %v2122_v50 = vrot.slane %v1800_v1, 1  ;;  %v10115_v37 = vmul.f32 %v10055_v47, %v9986_v20  ;;  %v3625_v27 = vmax.f32 %v3507_v3, 0.0  ;;  %v10119_v57 = vmax.f32 %v3855_v32, %v3973_v24 }
 0x18c   : > { %v3688_v2 = vmax.f32 %v3570_v51, 0.0  ;;  %2506 = vst.msk [vmem:[#allocation2 + $0x2a0] sm:$0xff] %vm404_vm0, %v2388_v48  ;;  %2443 = vst.msk [vmem:[#allocation2 + $0xa8] sm:$0xff] %vm404_vm0, %v2325_v9  ;;  %v1262_v36 = vmul.f32 %v9997_v46, %v10026_v6  ;;  %v3068_v39 = vsel %vm2899_vm3, %v3065_v18, %v3067_v58  ;;  %v3070_v20 = vsel %vm2899_vm3, %v3067_v58, %v3069_v59  ;;  %v3919_v1 = vld [vmem:[#allocation2 + $0x260] ss:$2 sm:$0xff]  ;;  %v10155_v48 = vpop.permute.xlu0 %775 }
 0x18d   : > { %v2623_v41 = vld [vmem:[#allocation2 + $0x298] sm:$0xff]  ;;  %v1997_v51 = vsel %vm1950_vm2, %v1994_v56, %v1996_v11  ;;  %1559 = vst.msk [vmem:[#allocation2 + $0x2b0] sm:$0xff] %vm404_vm0, %v1441_v53  ;;  %v2123_v9 = vsel %vm1950_vm2, %v2120_v33, %v2122_v50  ;;  %3743 = vst.msk [vmem:[#allocation2 + $0x90] sm:$0xff] %vm404_vm0, %v3625_v27  ;;  %v2944_v58 = vsel %vm2899_vm3, %v2941_v21, %v2943_v30  ;;  %7536 = vmatmul.mubr.msk.f32.gmra.mrb[12].mxu0 %vm404_vm0, %v10119_v57  ;;  %v4037_v32 = vld [vmem:[#allocation2 + $0x261] ss:$2 sm:$0xff]  ;;  %v13463_v24 = vmov 0.0  }
 0x18e   : > { %3806 = vst.msk [vmem:[#allocation2 + $0x288] sm:$0xff] %vm404_vm0, %v3688_v2  ;;  %v2560_v0 = vld [vmem:[#allocation2 + $0xa0] sm:$0xff]  ;;  %v3336_v18 = vadd.f32 %v3068_v39, %v2623_v41  ;;  %v2389_v25 = vadd.f32 %v2123_v9, %v1676_v43  ;;  %v1380_v56 = vadd.f32 %v1262_v36, %v549_v22  ;;  %v13462_v53 = vrot.slane %v10059_v5, 2  ;;  %7538 = vmatprep.mubr.msk.f32.mxu0 %vm8300_vm1, %v13463_v24  ;;  %v1614_v9 = vld [vmem:[#allocation2 + $0xb8] sm:$0xff] }
 0x18f   : > { %v3273_v33 = vadd.f32 %v10032_v16, %v2560_v0  ;;  %v1613_v26 = vld [vmem:[#allocation2 + $0xb0] sm:$0xff]  ;;  %v13345_v61 = vrot.slane %v10109_v23, 2  ;;  %v3071_v43 = vrot.slane %v10115_v37, 2  ;;  %v548_v21 = vld [vmem:[#allocation2 + $0xc0] sm:$0xff]  ;;  %v2125_v16 = vsel %vm1950_vm2, %v2122_v50, %v2124_v34  ;;  %v613_v37 = vld [vmem:[#allocation2 + $0x2c8] sm:$0xff] }
 0x190   : > { %v10149_v62 = vsel %vm2899_vm3, %v2943_v30, %v13462_v53  ;;  %3454 = vst.msk [vmem:[#allocation2 + $0x298] sm:$0xff] %vm404_vm0, %v3336_v18  ;;  %v2326_v22 = vadd.f32 %v1997_v51, %v1613_v26  ;;  %2507 = vst.msk [vmem:[#allocation2 + $0x2a8] sm:$0xff] %vm404_vm0, %v2389_v25  ;;  %v1261_v30 = vmul.f32 %v9997_v46, %v10044_v60  ;;  %v3508_v27 = vld [vmem:[#allocation2 + $0x98] sm:$0xff] }
 0x191   : > { %1498 = vst.msk [vmem:[#allocation2 + $0xc8] sm:$0xff] %vm404_vm0, %v1380_v56  ;;  %v10167_v3 = vmul.f32 %v10049_v49, %v10044_v60  ;;  %3391 = vst.msk [vmem:[#allocation2 + $0xa0] sm:$0xff] %vm404_vm0, %v3273_v33  ;;  %v10172_v2 = vmul.f32 %v10049_v49, %v10026_v6  ;;  %v10176_v50 = vmul.f32 %v10055_v47, %v10026_v6  ;;  %v3571_v39 = vld [vmem:[#allocation2 + $0x290] sm:$0xff]  ;;  %v3626_v51 = vmax.f32 %v3508_v27, 0.0  ;;  %v10213_v27 = vpop.permute.xlu0 %1095 }
 0x192   : > { %v10178_v36 = vmax.f32 %v3919_v1, %v4037_v32  ;;  %v1326_v41 = vmul.f32 %v9997_v46, %v10092_v63  ;;  %2444 = vst.msk [vmem:[#allocation2 + $0xb0] sm:$0xff] %vm404_vm0, %v2326_v22  ;;  %v1379_v0 = vadd.f32 %v1261_v30, %v548_v21  ;;  %v2687_v25 = vmul.f32 %v10055_v47, %v10044_v60  ;;  %v3975_v30 = vld [vmem:[#allocation2 + $0x71] ss:$2 sm:$0xff] }
 0x193   : > { %v1998_v18 = vrot.slane %v10167_v3, 1  ;;  %v3689_v56 = vmax.f32 %v3571_v39, 0.0  ;;  %v2624_v33 = vld [vmem:[#allocation2 + $0x2a0] sm:$0xff]  ;;  %v2561_v6 = vld [vmem:[#allocation2 + $0xa8] sm:$0xff]  ;;  %v3072_v1 = vsel %vm2899_vm3, %v3069_v59, %v3071_v43  ;;  %v10193_v26 = vmul.f32 %v10049_v49, %v10092_v63  ;;  %3744 = vst.msk [vmem:[#allocation2 + $0x98] sm:$0xff] %vm404_vm0, %v3626_v51  ;;  %v10207_v3 = vpop.permute.xlu1 %1100  ;;  %v551_v51 = vld [vmem:[#allocation2 + $0xd8] sm:$0xff] }
 0x194   : > { %13464 = vst [vmem:[#allocation22_spill] sm:$0xff] %v10178_v36  ;;  %7632 = vmatmul.mubr.msk.f32.gmra.mrb[16].mxu1 %vm404_vm0, %v10178_v36  ;;  %v1444_v32 = vadd.f32 %v1326_v41, %v613_v37  ;;  %v3337_v53 = vadd.f32 %v3070_v20, %v2624_v33  ;;  %v3274_v21 = vadd.f32 %v2944_v58, %v2561_v6  ;;  %v1677_v60 = vld [vmem:[#allocation2 + $0x2b0] sm:$0xff]  ;;  %1497 = vst.msk [vmem:[#allocation2 + $0xc0] sm:$0xff] %vm404_vm0, %v1379_v0 }
 0x195   : > { %v10199_v22 = vsel %vm2899_vm3, %v3071_v43, %v13345_v61  ;;  %v1999_v12 = vsel %vm1950_vm2, %v1996_v11, %v1998_v18  ;;  %v3857_v59 = vld [vmem:[#allocation2 + $0x70] ss:$2 sm:$0xff]  ;;  %7634 = vmatprep.mubr.msk.f32.mxu1 %vm8300_vm1, %v13463_v24  ;;  %3807 = vst.msk [vmem:[#allocation2 + $0x290] sm:$0xff] %vm404_vm0, %v3689_v56  ;;  %v2390_v20 = vadd.f32 %v2125_v16, %v1677_v60  ;;  %v2000_v58 = vrot.slane %v10172_v2, 1  ;;  %v10273_v10 = vpop.permute.xlu0 %785 }
 0x196   : > { %v2949_v43 = vrot.slane %v10176_v50, 2  ;;  %v2327_v37 = vadd.f32 %v1999_v12, %v1614_v9  ;;  %1562 = vst.msk [vmem:[#allocation2 + $0x2c8] sm:$0xff] %vm404_vm0, %v1444_v32  ;;  %3455 = vst.msk [vmem:[#allocation2 + $0x2a0] sm:$0xff] %vm404_vm0, %v3337_v53  ;;  %v2947_v11 = vrot.slane %v2687_v25, 2  ;;  %v10219_v41 = vmul.f32 %v10055_v47, %v10092_v63 }
 0x197   : > { %3392 = vst.msk [vmem:[#allocation2 + $0xa8] sm:$0xff] %vm404_vm0, %v3274_v21  ;;  %v1325_v16 = vmul.f32 %v9997_v46, %v10102_v4  ;;  %v1802_v39 = vmul.f32 %v10049_v49, %v10102_v4  ;;  %v3572_v9 = vld [vmem:[#allocation2 + $0x298] sm:$0xff]  ;;  %2508 = vst.msk [vmem:[#allocation2 + $0x2b0] sm:$0xff] %vm404_vm0, %v2390_v20  ;;  %v2625_v0 = vld [vmem:[#allocation2 + $0x2a8] sm:$0xff]  ;;  %v2128_v56 = vrot.slane %v10193_v26, 1  ;;  %v10230_v25 = vmul.f32 %v10055_v47, %v10102_v4 }
 0x198   : > { %2445 = vst.msk [vmem:[#allocation2 + $0xb8] sm:$0xff] %vm404_vm0, %v2327_v37  ;;  %v10232_v63 = vmax.f32 %v3857_v59, %v3975_v30  ;;  %v1264_v33 = vmul.f32 %v9997_v46, %v10143_v8  ;;  %v3509_v6 = vld [vmem:[#allocation2 + $0xa0] sm:$0xff]  ;;  %v3690_v32 = vmax.f32 %v3572_v9, 0.0  ;;  %v3338_v53 = vadd.f32 %v3072_v1, %v2625_v0  ;;  %v1678_v21 = vld [vmem:[#allocation2 + $0x2b8] sm:$0xff] }
 0x199   : > { %v1443_v60 = vadd.f32 %v1325_v16, %v612_v28  ;;  %v2126_v12 = vrot.slane %v1802_v39, 1  ;;  %v3627_v20 = vmax.f32 %v3509_v6, 0.0  ;;  %v2562_v61 = vld [vmem:[#allocation2 + $0xb0] sm:$0xff]  ;;  %v2001_v37 = vsel %vm1950_vm2, %v1998_v18, %v2000_v58 }
 0x19a   : > { %7539 = vmatmul.mubr.msk.f32.gmra.mrb[14].mxu0 %vm404_vm0, %v10232_v63  ;;  %v1382_v4 = vadd.f32 %v1264_v33, %v551_v51  ;;  %v10243_v59 = vmul.f32 %v10049_v49, %v10143_v8  ;;  %v3921_v30 = vld [vmem:[#allocation2 + $0x270] ss:$2 sm:$0xff]  ;;  %v4039_v9 = vld [vmem:[#allocation2 + $0x271] ss:$2 sm:$0xff]  ;;  %3808 = vst.msk [vmem:[#allocation2 + $0x298] sm:$0xff] %vm404_vm0, %v3690_v32  ;;  %v3275_v1 = vadd.f32 %v10149_v62, %v2562_v61  ;;  %3456 = vst.msk [vmem:[#allocation2 + $0x2a8] sm:$0xff] %vm404_vm0, %v3338_v53  ;;  %v10262_v62 = vpop.permute.xlu1 %790 }
 0x19b   : > { %v13465_v28 = vrot.slane %v10059_v5, 2  ;;  %v10254_v16 = vsel %vm2899_vm3, %v2947_v11, %v2949_v43  ;;  %1561 = vst.msk [vmem:[#allocation2 + $0x2c0] sm:$0xff] %vm404_vm0, %v1443_v60  ;;  %v2127_v39 = vsel %vm1950_vm2, %v2124_v34, %v2126_v12  ;;  %v550_v51 = vld [vmem:[#allocation2 + $0xd0] sm:$0xff]  ;;  %7541 = vmatprep.mubr.msk.f32.mxu0 %vm8300_vm1, %v13463_v24  ;;  %3745 = vst.msk [vmem:[#allocation2 + $0xa0] sm:$0xff] %vm404_vm0, %v3627_v20  ;;  %v1615_v5 = vld [vmem:[#allocation2 + $0xc0] sm:$0xff]  ;;  %v13346_v61 = vrot.slane %v10219_v41, 2 }
 0x19c   : > { %v2391_v0 = vadd.f32 %v2127_v39, %v1678_v21  ;;  %1500 = vst.msk [vmem:[#allocation2 + $0xd8] sm:$0xff] %vm404_vm0, %v1382_v4  ;;  %v1263_v34 = vmul.f32 %v9997_v46, %v10155_v48  ;;  %3393 = vst.msk [vmem:[#allocation2 + $0xb0] sm:$0xff] %vm404_vm0, %v3275_v1  ;;  %v2328_v33 = vadd.f32 %v2001_v37, %v1615_v5  ;;  %v3075_v6 = vrot.slane %v10230_v25, 2  ;;  %v615_v21 = vld [vmem:[#allocation2 + $0x2d8] sm:$0xff]  ;;  %v1616_v5 = vld [vmem:[#allocation2 + $0xc8] sm:$0xff] }
 0x19d   : > { %v2948_v18 = vsel %vm2899_vm3, %v13465_v28, %v2947_v11  ;;  %v10269_v11 = vmul.f32 %v10055_v47, %v10143_v8  ;;  %v10279_v32 = vmul.f32 %v10049_v49, %v10155_v48  ;;  %v10281_v53 = vmax.f32 %v3921_v30, %v4039_v9  ;;  %v3573_v60 = vld [vmem:[#allocation2 + $0x2a0] sm:$0xff] }
 0x19e   : > { %v3510_v8 = vld [vmem:[#allocation2 + $0xa8] sm:$0xff]  ;;  %2509 = vst.msk [vmem:[#allocation2 + $0x2b8] sm:$0xff] %vm404_vm0, %v2391_v0  ;;  %v2004_v20 = vrot.slane %v10243_v59, 1  ;;  %v1381_v4 = vadd.f32 %v1263_v34, %v550_v51  ;;  %v10287_v1 = vmul.f32 %v10055_v47, %v10155_v48  ;;  %v1328_v25 = vmul.f32 %v9997_v46, %v10207_v3  ;;  %v2626_v39 = vld [vmem:[#allocation2 + $0x2b0] sm:$0xff]  ;;  %2446 = vst.msk [vmem:[#allocation2 + $0xc0] sm:$0xff] %vm404_vm0, %v2328_v33 }
 0x19f   : > { %13466 = vst [vmem:[#allocation23_spill] sm:$0xff] %v10281_v53  ;;  %v3691_v37 = vmax.f32 %v3573_v60, 0.0  ;;  %v3628_v28 = vmax.f32 %v3510_v8, 0.0  ;;  %v2563_v30 = vld [vmem:[#allocation2 + $0xb8] sm:$0xff]  ;;  %v2129_v9 = vsel %vm1950_vm2, %v2126_v12, %v2128_v56  ;;  %v2002_v51 = vrot.slane %v10279_v32, 1  ;;  %7635 = vmatmul.mubr.msk.f32.gmra.mrb[18].mxu1 %vm404_vm0, %v10281_v53 }
 0x1a0   : > { %v3339_v48 = vadd.f32 %v10199_v22, %v2626_v39  ;;  %v3276_v0 = vadd.f32 %v2948_v18, %v2563_v30  ;;  %1499 = vst.msk [vmem:[#allocation2 + $0xd0] sm:$0xff] %vm404_vm0, %v1381_v4  ;;  %v1446_v60 = vadd.f32 %v1328_v25, %v615_v21  ;;  %v3859_v33 = vld [vmem:[#allocation2 + $0x80] ss:$2 sm:$0xff]  ;;  %v3977_v8 = vld [vmem:[#allocation2 + $0x81] ss:$2 sm:$0xff]  ;;  %7637 = vmatprep.mubr.msk.f32.mxu1 %vm8300_vm1, %v13463_v24  ;;  %v13467_v12 = vrot.slane %v10109_v23, 2  ;;  %v10320_v25 = vpop.permute.xlu1 %1110  ;;  %v10330_v39 = vpop.permute.xlu0 %1105 }
 0x1a1   : > { %3809 = vst.msk [vmem:[#allocation2 + $0x2a0] sm:$0xff] %vm404_vm0, %v3691_v37  ;;  %3746 = vst.msk [vmem:[#allocation2 + $0xa8] sm:$0xff] %vm404_vm0, %v3628_v28  ;;  %v10311_v22 = vsel %vm2899_vm3, %v3075_v6, %v13346_v61  ;;  %v2003_v18 = vsel %vm1950_vm2, %v2000_v58, %v2002_v51  ;;  %v10318_v21 = vmul.f32 %v10049_v49, %v10207_v3  ;;  %v614_v4 = vld [vmem:[#allocation2 + $0x2d0] sm:$0xff]  ;;  %v3574_v23 = vld [vmem:[#allocation2 + $0x2a8] sm:$0xff]  ;;  %v13468_v50 = vrot.slane %v10269_v11, 2 }
 0x1a2   : > { %v3076_v32 = vsel %vm2899_vm3, %v13467_v12, %v3075_v6  ;;  %3457 = vst.msk [vmem:[#allocation2 + $0x2b0] sm:$0xff] %vm404_vm0, %v3339_v48  ;;  %3394 = vst.msk [vmem:[#allocation2 + $0xb8] sm:$0xff] %vm404_vm0, %v3276_v0  ;;  %v1679_v37 = vld [vmem:[#allocation2 + $0x2c0] sm:$0xff]  ;;  %v2329_v28 = vadd.f32 %v2003_v18, %v1616_v5  ;;  %v2951_v6 = vrot.slane %v10287_v1, 2  ;;  %v1327_v2 = vmul.f32 %v9997_v46, %v10213_v27  ;;  %v553_v5 = vld [vmem:[#allocation2 + $0xe8] sm:$0xff] }
 0x1a3   : > { %1564 = vst.msk [vmem:[#allocation2 + $0x2d8] sm:$0xff] %vm404_vm0, %v1446_v60  ;;  %v1804_v58 = vmul.f32 %v10049_v49, %v10213_v27  ;;  %v3692_v30 = vmax.f32 %v3574_v23, 0.0  ;;  %v2392_v12 = vadd.f32 %v2129_v9, %v1679_v37  ;;  %v10334_v48 = vmul.f32 %v10055_v47, %v10213_v27  ;;  %v3511_v1 = vld [vmem:[#allocation2 + $0xb0] sm:$0xff]  ;;  %v1680_v18 = vld [vmem:[#allocation2 + $0x2c8] sm:$0xff] }
 0x1a4   : > { %v10336_v0 = vmax.f32 %v3859_v33, %v3977_v8  ;;  %2447 = vst.msk [vmem:[#allocation2 + $0xc8] sm:$0xff] %vm404_vm0, %v2329_v28  ;;  %v10341_v60 = vmul.f32 %v10055_v47, %v10207_v3  ;;  %v1445_v61 = vadd.f32 %v1327_v2, %v614_v4  ;;  %v1266_v9 = vmul.f32 %v9997_v46, %v10262_v62  ;;  %v552_v3 = vld [vmem:[#allocation2 + $0xe0] sm:$0xff] }
 0x1a5   : > { %v2130_v34 = vrot.slane %v1804_v58, 1  ;;  %v3629_v23 = vmax.f32 %v3511_v1, 0.0  ;;  %3810 = vst.msk [vmem:[#allocation2 + $0x2a8] sm:$0xff] %vm404_vm0, %v3692_v30  ;;  %2510 = vst.msk [vmem:[#allocation2 + $0x2c0] sm:$0xff] %vm404_vm0, %v2392_v12  ;;  %v2627_v27 = vld [vmem:[#allocation2 + $0x2b8] sm:$0xff]  ;;  %v2005_v33 = vsel %vm1950_vm2, %v2002_v51, %v2004_v20  ;;  %v13348_v8 = vrot.slane %v10318_v21, 1 }
 0x1a6   : > { %7542 = vmatmul.mubr.msk.f32.gmra.mrb[16].mxu0 %vm404_vm0, %v10336_v0  ;;  %v1265_v4 = vmul.f32 %v9997_v46, %v10273_v10  ;;  %v2564_v37 = vld [vmem:[#allocation2 + $0xc0] sm:$0xff]  ;;  %v3340_v28 = vadd.f32 %v3076_v32, %v2627_v27  ;;  %v2952_v2 = vsel %vm2899_vm3, %v2949_v43, %v2951_v6  ;;  %1563 = vst.msk [vmem:[#allocation2 + $0x2d0] sm:$0xff] %vm404_vm0, %v1445_v61  ;;  %v13347_v26 = vrot.slane %v10334_v48, 2  ;;  %v617_v27 = vld [vmem:[#allocation2 + $0x2e8] sm:$0xff] }
 0x1a7   : > { %v2131_v51 = vsel %vm1950_vm2, %v2128_v56, %v2130_v34  ;;  %v1384_v58 = vadd.f32 %v1266_v9, %v553_v5  ;;  %v3923_v30 = vld [vmem:[#allocation2 + $0x280] ss:$2 sm:$0xff]  ;;  %v4041_v12 = vld [vmem:[#allocation2 + $0x281] ss:$2 sm:$0xff]  ;;  %7544 = vmatprep.mubr.msk.f32.mxu0 %vm8300_vm1, %v13463_v24  ;;  %3747 = vst.msk [vmem:[#allocation2 + $0xb0] sm:$0xff] %vm404_vm0, %v3629_v23  ;;  %v3277_v32 = vadd.f32 %v10254_v16, %v2564_v37  ;;  %v1617_v1 = vld [vmem:[#allocation2 + $0xd0] sm:$0xff]  ;;  %v10372_v56 = vpop.permute.xlu1 %800 }
 0x1a8   : > { %v10369_v43 = vsel %vm2899_vm3, %v2951_v6, %v13468_v50  ;;  %v2393_v61 = vadd.f32 %v2131_v51, %v1680_v18  ;;  %3458 = vst.msk [vmem:[#allocation2 + $0x2b8] sm:$0xff] %vm404_vm0, %v3340_v28  ;;  %v2330_v5 = vadd.f32 %v2005_v33, %v1617_v1  ;;  %v10379_v16 = vmul.f32 %v10049_v49, %v10262_v62  ;;  %v10381_v6 = vpop.permute.xlu0 %795  ;;  %v1618_v50 = vld [vmem:[#allocation2 + $0xd8] sm:$0xff] }
 0x1a9   : > { %1502 = vst.msk [vmem:[#allocation2 + $0xe8] sm:$0xff] %vm404_vm0, %v1384_v58  ;;  %v1383_v23 = vadd.f32 %v1265_v4, %v552_v3  ;;  %v3575_v18 = vld [vmem:[#allocation2 + $0x2b0] sm:$0xff]  ;;  %3395 = vst.msk [vmem:[#allocation2 + $0xc0] sm:$0xff] %vm404_vm0, %v3277_v32  ;;  %v3512_v37 = vld [vmem:[#allocation2 + $0xb8] sm:$0xff]  ;;  %v10387_v33 = vmul.f32 %v10055_v47, %v10262_v62  ;;  %v1742_v28 = vmul.f32 %v10049_v49, %v10273_v10 }
 0x1aa   : > { %2511 = vst.msk [vmem:[#allocation2 + $0x2c8] sm:$0xff] %vm404_vm0, %v2393_v61  ;;  %v10391_v51 = vmax.f32 %v3923_v30, %v4041_v12  ;;  %v1330_v3 = vmul.f32 %v9997_v46, %v10320_v25  ;;  %v3693_v4 = vmax.f32 %v3575_v18, 0.0  ;;  %v3630_v58 = vmax.f32 %v3512_v37, 0.0  ;;  %2448 = vst.msk [vmem:[#allocation2 + $0xd0] sm:$0xff] %vm404_vm0, %v2330_v5 }
 0x1ab   : > { %v2133_v32 = vsel %vm1950_vm2, %v2130_v34, %v13348_v8  ;;  %1501 = vst.msk [vmem:[#allocation2 + $0xe0] sm:$0xff] %vm404_vm0, %v1383_v23  ;;  %v10402_v62 = vmul.f32 %v10055_v47, %v10273_v10  ;;  %v2565_v1 = vld [vmem:[#allocation2 + $0xc8] sm:$0xff]  ;;  %v13470_v30 = vrot.slane %v10219_v41, 2  ;;  %v2006_v61 = vrot.slane %v1742_v28, 1  ;;  %v616_v34 = vld [vmem:[#allocation2 + $0x2e0] sm:$0xff] }
 0x1ac   : > { %13469 = vst [vmem:[#allocation24_spill] sm:$0xff] %v10391_v51  ;;  %7638 = vmatmul.mubr.msk.f32.gmra.mrb[20].mxu1 %vm404_vm0, %v10391_v51  ;;  %v1448_v5 = vadd.f32 %v1330_v3, %v617_v27  ;;  %v1329_v23 = vmul.f32 %v9997_v46, %v10330_v39  ;;  %3811 = vst.msk [vmem:[#allocation2 + $0x2b0] sm:$0xff] %vm404_vm0, %v3693_v4  ;;  %v2628_v10 = vld [vmem:[#allocation2 + $0x2c0] sm:$0xff]  ;;  %v3278_v18 = vadd.f32 %v2952_v2, %v2565_v1  ;;  %v3861_v27 = vld [vmem:[#allocation2 + $0x90] ss:$2 sm:$0xff]  ;;  %v10440_v2 = vpop.permute.xlu0 %1115 }
 0x1ad   : > { %v3080_v12 = vsel %vm2899_vm3, %v13470_v30, %v13347_v26  ;;  %3748 = vst.msk [vmem:[#allocation2 + $0xb8] sm:$0xff] %vm404_vm0, %v3630_v58  ;;  %v10418_v37 = vmul.f32 %v10049_v49, %v10320_v25  ;;  %v10422_v28 = vmul.f32 %v10049_v49, %v10330_v39  ;;  %v3979_v3 = vld [vmem:[#allocation2 + $0x91] ss:$2 sm:$0xff]  ;;  %7640 = vmatprep.mubr.msk.f32.mxu1 %vm8300_vm1, %v13463_v24  ;;  %v10436_v26 = vpop.permute.xlu1 %1120 }
 0x1ae   : > { %v3341_v4 = vadd.f32 %v10311_v22, %v2628_v10  ;;  %v1681_v58 = vld [vmem:[#allocation2 + $0x2d0] sm:$0xff]  ;;  %v2007_v1 = vsel %vm1950_vm2, %v2004_v20, %v2006_v61  ;;  %1566 = vst.msk [vmem:[#allocation2 + $0x2e8] sm:$0xff] %vm404_vm0, %v1448_v5  ;;  %v10434_v30 = vmul.f32 %v10055_v47, %v10320_v25  ;;  %3396 = vst.msk [vmem:[#allocation2 + $0xc8] sm:$0xff] %vm404_vm0, %v3278_v18  ;;  %v2955_v22 = vrot.slane %v10402_v62, 2  ;;  %v1682_v20 = vld [vmem:[#allocation2 + $0x2d8] sm:$0xff] }
 0x1af   : > { %v2394_v9 = vadd.f32 %v2133_v32, %v1681_v58  ;;  %v2331_v8 = vadd.f32 %v2007_v1, %v1618_v50  ;;  %v1447_v10 = vadd.f32 %v1329_v23, %v616_v34  ;;  %v3576_v59 = vld [vmem:[#allocation2 + $0x2b8] sm:$0xff]  ;;  %v2134_v5 = vrot.slane %v10422_v28, 1  ;;  %v554_v28 = vld [vmem:[#allocation2 + $0xf0] sm:$0xff] }
 0x1b0   : > { %3459 = vst.msk [vmem:[#allocation2 + $0x2c0] sm:$0xff] %vm404_vm0, %v3341_v4  ;;  %v10446_v25 = vmul.f32 %v10055_v47, %v10330_v39  ;;  %v10448_v41 = vmax.f32 %v3861_v27, %v3979_v3  ;;  %v555_v18 = vld [vmem:[#allocation2 + $0xf8] sm:$0xff]  ;;  %v1268_v32 = vmul.f32 %v9997_v46, %v10372_v56  ;;  %v3513_v62 = vld [vmem:[#allocation2 + $0xc0] sm:$0xff]  ;;  %v3694_v50 = vmax.f32 %v3576_v59, 0.0 }
 0x1b1   : > { %2512 = vst.msk [vmem:[#allocation2 + $0x2d0] sm:$0xff] %vm404_vm0, %v2394_v9  ;;  %v2629_v34 = vld [vmem:[#allocation2 + $0x2c8] sm:$0xff]  ;;  %v13471_v23 = vrot.slane %v10379_v16, 1  ;;  %2449 = vst.msk [vmem:[#allocation2 + $0xd8] sm:$0xff] %vm404_vm0, %v2331_v8  ;;  %v13351_v39 = vrot.slane %v10418_v37, 1  ;;  %v1267_v27 = vmul.f32 %v9997_v46, %v10381_v6  ;;  %v3631_v3 = vmax.f32 %v3513_v62, 0.0 }
 0x1b2   : > { %1565 = vst.msk [vmem:[#allocation2 + $0x2e0] sm:$0xff] %vm404_vm0, %v1447_v10  ;;  %v2566_v58 = vld [vmem:[#allocation2 + $0xd0] sm:$0xff]  ;;  %v3342_v1 = vadd.f32 %v3080_v12, %v2629_v34  ;;  %v1619_v59 = vld [vmem:[#allocation2 + $0xe0] sm:$0xff]  ;;  %v13472_v9 = vrot.slane %v10318_v21, 1  ;;  %7545 = vmatmul.mubr.msk.f32.gmra.mrb[18].mxu0 %vm404_vm0, %v10448_v41  ;;  %v10468_v8 = vmul.f32 %v10049_v49, %v10372_v56  ;;  %3812 = vst.msk [vmem:[#allocation2 + $0x2b8] sm:$0xff] %vm404_vm0, %v3694_v50  ;;  %v13473_v10 = vrot.slane %v10341_v60, 2 }
 0x1b3   : > { %v2009_v4 = vsel %vm1950_vm2, %v2006_v61, %v13471_v23  ;;  %v3279_v61 = vadd.f32 %v10369_v43, %v2566_v58  ;;  %v13474_v12 = vrot.slane %v10334_v48, 2  ;;  %v3925_v23 = vld [vmem:[#allocation2 + $0x290] ss:$2 sm:$0xff]  ;;  %7547 = vmatprep.mubr.msk.f32.mxu0 %vm8300_vm1, %v13463_v24  ;;  %3749 = vst.msk [vmem:[#allocation2 + $0xc0] sm:$0xff] %vm404_vm0, %v3631_v3  ;;  %v3083_v50 = vrot.slane %v10446_v25, 2 }
 0x1b4   : > { %v2135_v51 = vsel %vm1950_vm2, %v13472_v9, %v2134_v5  ;;  %v2332_v21 = vadd.f32 %v2009_v4, %v1619_v59  ;;  %v4043_v9 = vld [vmem:[#allocation2 + $0x291] ss:$2 sm:$0xff]  ;;  %3460 = vst.msk [vmem:[#allocation2 + $0x2c8] sm:$0xff] %vm404_vm0, %v3342_v1  ;;  %v1386_v43 = vadd.f32 %v1268_v32, %v555_v18  ;;  %v10484_v58 = vmul.f32 %v10055_v47, %v10372_v56 }
 0x1b5   : > { %v3082_v62 = vsel %vm2899_vm3, %v13474_v12, %v13473_v10  ;;  %v2395_v34 = vadd.f32 %v2135_v51, %v1682_v20  ;;  %v1385_v48 = vadd.f32 %v1267_v27, %v554_v28  ;;  %v10486_v10 = vpop.permute.xlu1 %810  ;;  %3397 = vst.msk [vmem:[#allocation2 + $0xd0] sm:$0xff] %vm404_vm0, %v3279_v61  ;;  %v13475_v51 = vrot.slane %v10269_v11, 2  ;;  %v619_v32 = vld [vmem:[#allocation2 + $0x2f8] sm:$0xff]  ;;  %v10500_v28 = vpop.permute.xlu0 %805  ;;  %v3514_v27 = vld [vmem:[#allocation2 + $0xc8] sm:$0xff]  ;;  %v618_v59 = vld [vmem:[#allocation2 + $0x2f0] sm:$0xff] }
 0x1b6   : > { %2450 = vst.msk [vmem:[#allocation2 + $0xe0] sm:$0xff] %vm404_vm0, %v2332_v21  ;;  %v13476_v4 = vrot.slane %v10387_v33, 2  ;;  %v1744_v56 = vmul.f32 %v10049_v49, %v10381_v6  ;;  %v2137_v11 = vsel %vm1950_vm2, %v2134_v5, %v13351_v39  ;;  %1504 = vst.msk [vmem:[#allocation2 + $0xf8] sm:$0xff] %vm404_vm0, %v1386_v43  ;;  %v1332_v1 = vmul.f32 %v9997_v46, %v10436_v26  ;;  %v3863_v61 = vld [vmem:[#allocation2 + $0xa0] ss:$2 sm:$0xff] }
 0x1b7   : > { %v2956_v20 = vsel %vm2899_vm3, %v13475_v51, %v2955_v22  ;;  %2513 = vst.msk [vmem:[#allocation2 + $0x2d8] sm:$0xff] %vm404_vm0, %v2395_v34  ;;  %1503 = vst.msk [vmem:[#allocation2 + $0xf0] sm:$0xff] %vm404_vm0, %v1385_v48  ;;  %v3577_v12 = vld [vmem:[#allocation2 + $0x2c0] sm:$0xff]  ;;  %v3632_v21 = vmax.f32 %v3514_v27, 0.0  ;;  %v1620_v34 = vld [vmem:[#allocation2 + $0xe8] sm:$0xff]  ;;  %v10514_v5 = vmul.f32 %v10055_v47, %v10381_v6  ;;  %v1331_v43 = vmul.f32 %v9997_v46, %v10440_v2 }
 0x1b8   : > { %v2958_v25 = vsel %vm2899_vm3, %v2955_v22, %v13476_v4  ;;  %v10508_v22 = vmax.f32 %v3925_v23, %v4043_v9  ;;  %v2010_v51 = vrot.slane %v1744_v56, 1  ;;  %v3981_v4 = vld [vmem:[#allocation2 + $0xa1] ss:$2 sm:$0xff]  ;;  %v3695_v48 = vmax.f32 %v3577_v12, 0.0  ;;  %v2630_v23 = vld [vmem:[#allocation2 + $0x2d0] sm:$0xff]  ;;  %v2567_v9 = vld [vmem:[#allocation2 + $0xd8] sm:$0xff] }
 0x1b9   : > { %v1683_v39 = vld [vmem:[#allocation2 + $0x2e0] sm:$0xff]  ;;  %v13478_v3 = vrot.slane %v10341_v60, 2  ;;  %v13358_v27 = vrot.slane %v10484_v58, 2  ;;  %v1450_v56 = vadd.f32 %v1332_v1, %v619_v32  ;;  %3750 = vst.msk [vmem:[#allocation2 + $0xc8] sm:$0xff] %vm404_vm0, %v3632_v21  ;;  %v3343_v6 = vadd.f32 %v3082_v62, %v2630_v23  ;;  %v10545_v62 = vpop.permute.xlu1 %1130  ;;  %v10557_v21 = vpop.permute.xlu0 %1125 }
 0x1ba   : > { %13477 = vst [vmem:[#allocation25_spill] sm:$0xff] %v10508_v22  ;;  %7641 = vmatmul.mubr.msk.f32.gmra.mrb[22].mxu1 %vm404_vm0, %v10508_v22  ;;  %v3280_v53 = vadd.f32 %v2956_v20, %v2567_v9  ;;  %v2396_v36 = vadd.f32 %v2137_v11, %v1683_v39  ;;  %v13479_v12 = vrot.slane %v10379_v16, 1  ;;  %3813 = vst.msk [vmem:[#allocation2 + $0x2c0] sm:$0xff] %vm404_vm0, %v3695_v48  ;;  %v13480_v60 = vrot.slane %v10434_v30, 2 }
 0x1bb   : > { %v3084_v18 = vsel %vm2899_vm3, %v13478_v3, %v3083_v50  ;;  %7643 = vmatprep.mubr.msk.f32.mxu1 %vm8300_vm1, %v13463_v24  ;;  %1568 = vst.msk [vmem:[#allocation2 + $0x2f8] sm:$0xff] %vm404_vm0, %v1450_v56  ;;  %v10539_v39 = vmul.f32 %v10049_v49, %v10436_v26  ;;  %v10543_v16 = vmul.f32 %v10055_v47, %v10436_v26  ;;  %3461 = vst.msk [vmem:[#allocation2 + $0x2d0] sm:$0xff] %vm404_vm0, %v3343_v6  ;;  %v3578_v20 = vld [vmem:[#allocation2 + $0x2c8] sm:$0xff] }
 0x1bc   : > { %v2011_v40 = vsel %vm1950_vm2, %v13479_v12, %v2010_v51  ;;  %v10534_v3 = vsel %vm2899_vm3, %v3083_v50, %v13480_v60  ;;  %3398 = vst.msk [vmem:[#allocation2 + $0xd8] sm:$0xff] %vm404_vm0, %v3280_v53  ;;  %2514 = vst.msk [vmem:[#allocation2 + $0x2e0] sm:$0xff] %vm404_vm0, %v2396_v36  ;;  %v1449_v50 = vadd.f32 %v1331_v43, %v618_v59  ;;  %v557_v26 = vld [vmem:[#allocation2 + $0x108] sm:$0xff]  ;;  %v3696_v48 = vmax.f32 %v3578_v20, 0.0 }
 0x1bd   : > { %v2333_v32 = vadd.f32 %v2011_v40, %v1620_v34  ;;  %v2959_v40 = vrot.slane %v10514_v5, 2  ;;  %v10553_v11 = vmul.f32 %v10049_v49, %v10440_v2  ;;  %v10555_v1 = vmax.f32 %v3863_v61, %v3981_v4  ;;  %v3515_v34 = vld [vmem:[#allocation2 + $0xd0] sm:$0xff]  ;;  %v2568_v23 = vld [vmem:[#allocation2 + $0xe0] sm:$0xff]  ;;  %v1684_v6 = vld [vmem:[#allocation2 + $0x2e8] sm:$0xff] }
 0x1be   : > { %v2631_v9 = vld [vmem:[#allocation2 + $0x2d8] sm:$0xff]  ;;  %v13482_v53 = vrot.slane %v10468_v8, 1  ;;  %v10565_v59 = vmul.f32 %v10055_v47, %v10440_v2  ;;  %v1270_v61 = vmul.f32 %v9997_v46, %v10486_v10  ;;  %v3633_v5 = vmax.f32 %v3515_v34, 0.0  ;;  %v1621_v56 = vld [vmem:[#allocation2 + $0xf0] sm:$0xff]  ;;  %1567 = vst.msk [vmem:[#allocation2 + $0x2f0] sm:$0xff] %vm404_vm0, %v1449_v50  ;;  %3814 = vst.msk [vmem:[#allocation2 + $0x2c8] sm:$0xff] %vm404_vm0, %v3696_v48 }
 0x1bf   : > { %13481 = vst [vmem:[#allocation26_spill] sm:$0xff] %v10555_v1  ;;  %2451 = vst.msk [vmem:[#allocation2 + $0xe8] sm:$0xff] %vm404_vm0, %v2333_v32  ;;  %v3281_v43 = vadd.f32 %v2958_v25, %v2568_v23  ;;  %v3344_v4 = vadd.f32 %v3084_v18, %v2631_v9  ;;  %v2138_v12 = vrot.slane %v10553_v11, 1  ;;  %7548 = vmatmul.mubr.msk.f32.gmra.mrb[20].mxu0 %vm404_vm0, %v10555_v1  ;;  %v2140_v2 = vrot.slane %v10539_v39, 1  ;;  %v556_v25 = vld [vmem:[#allocation2 + $0x100] sm:$0xff] }
 0x1c0   : > { %v2013_v36 = vsel %vm1950_vm2, %v2010_v51, %v13482_v53  ;;  %v1388_v60 = vadd.f32 %v1270_v61, %v557_v26  ;;  %v10577_v32 = vmul.f32 %v10049_v49, %v10486_v10  ;;  %v3927_v18 = vld [vmem:[#allocation2 + $0x2a0] ss:$2 sm:$0xff]  ;;  %v4045_v20 = vld [vmem:[#allocation2 + $0x2a1] ss:$2 sm:$0xff]  ;;  %7550 = vmatprep.mubr.msk.f32.mxu0 %vm8300_vm1, %v13463_v24  ;;  %3751 = vst.msk [vmem:[#allocation2 + $0xd0] sm:$0xff] %vm404_vm0, %v3633_v5  ;;  %v13483_v50 = vrot.slane %v10387_v33, 2 }
 0x1c1   : > { %v2334_v51 = vadd.f32 %v2013_v36, %v1621_v56  ;;  %3399 = vst.msk [vmem:[#allocation2 + $0xe0] sm:$0xff] %vm404_vm0, %v3281_v43  ;;  %3462 = vst.msk [vmem:[#allocation2 + $0x2d8] sm:$0xff] %vm404_vm0, %v3344_v4  ;;  %v13484_v34 = vrot.slane %v10418_v37, 1  ;;  %v1269_v23 = vmul.f32 %v9997_v46, %v10500_v28  ;;  %v3087_v53 = vrot.slane %v10565_v59, 2  ;;  %v10604_v37 = vpop.permute.xlu1 %820  ;;  %v1622_v61 = vld [vmem:[#allocation2 + $0xf8] sm:$0xff]  ;;  %v621_v59 = vld [vmem:[#allocation2 + $0x308] sm:$0xff] }
 0x1c2   : > { %v2960_v11 = vsel %vm2899_vm3, %v13483_v50, %v2959_v40  ;;  %1506 = vst.msk [vmem:[#allocation2 + $0x108] sm:$0xff] %vm404_vm0, %v1388_v60  ;;  %v10598_v33 = vmul.f32 %v10055_v47, %v10486_v10  ;;  %v10602_v36 = vmul.f32 %v10049_v49, %v10500_v28  ;;  %v10608_v43 = vmul.f32 %v10055_v47, %v10500_v28  ;;  %v10614_v10 = vpop.permute.xlu0 %815  ;;  %v3983_v26 = vld [vmem:[#allocation2 + $0xb1] ss:$2 sm:$0xff] }
 0x1c3   : > { %v2139_v48 = vsel %vm1950_vm2, %v13484_v34, %v2138_v12  ;;  %2452 = vst.msk [vmem:[#allocation2 + $0xf0] sm:$0xff] %vm404_vm0, %v2334_v51  ;;  %v1387_v5 = vadd.f32 %v1269_v23, %v556_v25  ;;  %v10610_v4 = vmax.f32 %v3927_v18, %v4045_v20  ;;  %v1334_v56 = vmul.f32 %v9997_v46, %v10545_v62  ;;  %v3516_v51 = vld [vmem:[#allocation2 + $0xd8] sm:$0xff]  ;;  %v2632_v60 = vld [vmem:[#allocation2 + $0x2e0] sm:$0xff]  ;;  %v10622_v18 = vld [vmem:[#allocation4] ss:$0 sm:$0xff] }
 0x1c4   : > { %v2397_v9 = vadd.f32 %v2139_v48, %v1684_v6  ;;  %v3579_v6 = vld [vmem:[#allocation2 + $0x2d0] sm:$0xff]  ;;  %v2962_v50 = vsel %vm2899_vm3, %v2959_v40, %v13358_v27  ;;  %v2014_v25 = vrot.slane %v10602_v36, 1  ;;  %v1333_v46 = vmul.f32 %v10622_v18, %v10557_v21 }
 0x1c5   : > { %13485 = vst [vmem:[#allocation27_spill] sm:$0xff] %v10610_v4  ;;  %v3697_v20 = vmax.f32 %v3579_v6, 0.0  ;;  %v3634_v34 = vmax.f32 %v3516_v51, 0.0  ;;  %v3345_v48 = vadd.f32 %v10534_v3, %v2632_v60  ;;  %v2141_v40 = vsel %vm1950_vm2, %v2138_v12, %v2140_v2  ;;  %1505 = vst.msk [vmem:[#allocation2 + $0x100] sm:$0xff] %vm404_vm0, %v1387_v5  ;;  %7644 = vmatmul.mubr.msk.f32.gmra.mrb[24].mxu1 %vm404_vm0, %v10610_v4  ;;  %v1685_v27 = vld [vmem:[#allocation2 + $0x2f0] sm:$0xff] }
 0x1c6   : > { %2515 = vst.msk [vmem:[#allocation2 + $0x2e8] sm:$0xff] %vm404_vm0, %v2397_v9  ;;  %v2569_v23 = vld [vmem:[#allocation2 + $0xe8] sm:$0xff]  ;;  %v620_v9 = vld [vmem:[#allocation2 + $0x300] sm:$0xff]  ;;  %v13359_v28 = vrot.slane %v10598_v33, 2  ;;  %v13486_v6 = vrot.slane %v10468_v8, 1  ;;  %v1452_v3 = vadd.f32 %v1334_v56, %v621_v59  ;;  %7646 = vmatprep.mubr.msk.f32.mxu1 %vm8300_vm1, %v13463_v24  ;;  %v2398_v12 = vadd.f32 %v2141_v40, %v1685_v27 }
 0x1c7   : > { %v3282_v36 = vadd.f32 %v2960_v11, %v2569_v23  ;;  %v3865_v60 = vld [vmem:[#allocation2 + $0xb0] ss:$2 sm:$0xff]  ;;  %3815 = vst.msk [vmem:[#allocation2 + $0x2d0] sm:$0xff] %vm404_vm0, %v3697_v20  ;;  %3752 = vst.msk [vmem:[#allocation2 + $0xd8] sm:$0xff] %vm404_vm0, %v3634_v34  ;;  %v13487_v11 = vrot.slane %v10434_v30, 2  ;;  %v2963_v23 = vrot.slane %v10608_v43, 2  ;;  %v10655_v27 = vmul.f32 %v10049_v49, %v10545_v62  ;;  %v10661_v43 = vpop.permute.xlu1 %1140 }
 0x1c8   : > { %v2015_v51 = vsel %vm1950_vm2, %v13486_v6, %v2014_v25  ;;  %3463 = vst.msk [vmem:[#allocation2 + $0x2e0] sm:$0xff] %vm404_vm0, %v3345_v48  ;;  %v3517_v59 = vld [vmem:[#allocation2 + $0xe0] sm:$0xff]  ;;  %v3580_v56 = vld [vmem:[#allocation2 + $0x2d8] sm:$0xff]  ;;  %v13488_v6 = vrot.slane %v10543_v16, 2  ;;  %1570 = vst.msk [vmem:[#allocation2 + $0x308] sm:$0xff] %vm404_vm0, %v1452_v3  ;;  %v1451_v30 = vadd.f32 %v1333_v46, %v620_v9  ;;  %v10671_v9 = vpop.permute.xlu0 %1135  ;;  %v13498_v14 = vrot.slane %v10598_v33, 2 }
 0x1c9   : > { %v3088_v5 = vsel %vm2899_vm3, %v13487_v11, %v3087_v53  ;;  %v2335_v8 = vadd.f32 %v2015_v51, %v1622_v61  ;;  %3400 = vst.msk [vmem:[#allocation2 + $0xe8] sm:$0xff] %vm404_vm0, %v3282_v36  ;;  %v10659_v61 = vmul.f32 %v10049_v49, %v10557_v21  ;;  %v3635_v34 = vmax.f32 %v3517_v59, 0.0  ;;  %2516 = vst.msk [vmem:[#allocation2 + $0x2f0] sm:$0xff] %vm404_vm0, %v2398_v12  ;;  %v559_v46 = vld [vmem:[#allocation2 + $0x118] sm:$0xff]  ;;  %v10693_v59 = vld [vmem:[#allocation4 + $0x1] ss:$0 sm:$0xff] }
 0x1ca   : > { %v10650_v20 = vsel %vm2899_vm3, %v3087_v53, %v13488_v6  ;;  %v3698_v48 = vmax.f32 %v3580_v56, 0.0  ;;  %v2570_v40 = vld [vmem:[#allocation2 + $0xf0] sm:$0xff]  ;;  %v10667_v53 = vmul.f32 %v10055_v47, %v10557_v21  ;;  %v10669_v36 = vmax.f32 %v3865_v60, %v3983_v26  ;;  %v1686_v3 = vld [vmem:[#allocation2 + $0x2f8] sm:$0xff]  ;;  %1569 = vst.msk [vmem:[#allocation2 + $0x300] sm:$0xff] %vm404_vm0, %v1451_v30  ;;  %v3985_v4 = vld [vmem:[#allocation2 + $0xc1] ss:$2 sm:$0xff] }
 0x1cb   : > { %2453 = vst.msk [vmem:[#allocation2 + $0xf8] sm:$0xff] %vm404_vm0, %v2335_v8  ;;  %v3283_v49 = vadd.f32 %v2962_v50, %v2570_v40  ;;  %v10675_v51 = vmul.f32 %v10055_v47, %v10545_v62  ;;  %v2142_v12 = vrot.slane %v10659_v61, 1  ;;  %v1272_v11 = vmul.f32 %v10622_v18, %v10604_v37  ;;  %3753 = vst.msk [vmem:[#allocation2 + $0xe0] sm:$0xff] %vm404_vm0, %v3635_v34  ;;  %v558_v60 = vld [vmem:[#allocation2 + $0x110] sm:$0xff]  ;;  %v4049_v19 = vld [vmem:[#allocation2 + $0x2c1] ss:$2 sm:$0xff] }
 0x1cc   : > { %13489 = vst [vmem:[#allocation28_spill] sm:$0xff] %v10669_v36  ;;  %3816 = vst.msk [vmem:[#allocation2 + $0x2d8] sm:$0xff] %vm404_vm0, %v3698_v48  ;;  %v13490_v26 = vrot.slane %v10577_v32, 1  ;;  %v13491_v47 = vrot.slane %v10484_v58, 2  ;;  %7551 = vmatmul.mubr.msk.f32.gmra.mrb[22].mxu0 %vm404_vm0, %v10669_v36  ;;  %v1271_v8 = vmul.f32 %v10622_v18, %v10614_v10  ;;  %v10697_v56 = vmul.f32 %v10693_v59, %v10614_v10  ;;  %v1623_v6 = vld [vmem:[#allocation2 + $0x100] sm:$0xff] }
 0x1cd   : > { %v2633_v21 = vld [vmem:[#allocation2 + $0x2e8] sm:$0xff]  ;;  %3401 = vst.msk [vmem:[#allocation2 + $0xf0] sm:$0xff] %vm404_vm0, %v3283_v49  ;;  %v13360_v58 = vrot.slane %v10655_v27, 1  ;;  %v2143_v30 = vsel %vm1950_vm2, %v2140_v2, %v2142_v12  ;;  %v1390_v61 = vadd.f32 %v1272_v11, %v559_v46  ;;  %v3929_v34 = vld [vmem:[#allocation2 + $0x2b0] ss:$2 sm:$0xff]  ;;  %7553 = vmatprep.mubr.msk.f32.mxu0 %vm8300_vm1, %v13463_v24  ;;  %v3091_v49 = vrot.slane %v10667_v53, 2 }
 0x1ce   : > { %v2017_v50 = vsel %vm1950_vm2, %v2014_v25, %v13490_v26  ;;  %v2964_v62 = vsel %vm2899_vm3, %v13491_v47, %v2963_v23  ;;  %v3346_v25 = vadd.f32 %v3088_v5, %v2633_v21  ;;  %v4047_v48 = vld [vmem:[#allocation2 + $0x2b1] ss:$2 sm:$0xff]  ;;  %v10709_v26 = vsel %vm2899_vm3, %v2963_v23, %v13359_v28  ;;  %v1624_v46 = vld [vmem:[#allocation2 + $0x108] sm:$0xff]  ;;  %v10720_v23 = vpop.permute.xlu1 %830 }
 0x1cf   : > { %v2336_v40 = vadd.f32 %v2017_v50, %v1623_v6  ;;  %v2399_v5 = vadd.f32 %v2143_v30, %v1686_v3  ;;  %v3581_v21 = vld [vmem:[#allocation2 + $0x2e0] sm:$0xff]  ;;  %1508 = vst.msk [vmem:[#allocation2 + $0x118] sm:$0xff] %vm404_vm0, %v1390_v61  ;;  %v10717_v2 = vmul.f32 %v10693_v59, %v10604_v37  ;;  %v1389_v11 = vadd.f32 %v1271_v8, %v558_v60  ;;  %v10724_v53 = vld [vmem:[#allocation4 + $0x2] ss:$0 sm:$0xff]  ;;  %v623_v30 = vld [vmem:[#allocation2 + $0x318] sm:$0xff]  ;;  %v10734_v8 = vpop.permute.xlu0 %825 }
 0x1d0   : > { %3464 = vst.msk [vmem:[#allocation2 + $0x2e8] sm:$0xff] %vm404_vm0, %v3346_v25  ;;  %v2018_v50 = vrot.slane %v10697_v56, 1  ;;  %v3699_v3 = vmax.f32 %v3581_v21, 0.0  ;;  %v3518_v47 = vld [vmem:[#allocation2 + $0xe8] sm:$0xff]  ;;  %v10728_v25 = vmul.f32 %v10724_v53, %v10614_v10  ;;  %v10730_v6 = vmax.f32 %v3929_v34, %v4047_v48  ;;  %v2634_v21 = vld [vmem:[#allocation2 + $0x2f0] sm:$0xff] }
 0x1d1   : > { %2454 = vst.msk [vmem:[#allocation2 + $0x100] sm:$0xff] %vm404_vm0, %v2336_v40  ;;  %2517 = vst.msk [vmem:[#allocation2 + $0x2f8] sm:$0xff] %vm404_vm0, %v2399_v5  ;;  %v1336_v60 = vmul.f32 %v10622_v18, %v10661_v43  ;;  %v3636_v61 = vmax.f32 %v3518_v47, 0.0  ;;  %v2145_v40 = vsel %vm1950_vm2, %v2142_v12, %v13360_v58  ;;  %v10741_v5 = vmul.f32 %v10724_v53, %v10604_v37  ;;  %v1687_v39 = vld [vmem:[#allocation2 + $0x300] sm:$0xff] }
 0x1d2   : > { %13492 = vst [vmem:[#allocation29_spill] sm:$0xff] %v10730_v6  ;;  %v2571_v28 = vld [vmem:[#allocation2 + $0xf8] sm:$0xff]  ;;  %1507 = vst.msk [vmem:[#allocation2 + $0x110] sm:$0xff] %vm404_vm0, %v1389_v11  ;;  %v13493_v10 = vrot.slane %v10577_v32, 1  ;;  %v3347_v48 = vadd.f32 %v10650_v20, %v2634_v21  ;;  %v13494_v12 = vrot.slane %v10543_v16, 2  ;;  %7647 = vmatmul.mubr.msk.f32.gmra.mrb[26].mxu1 %vm404_vm0, %v10730_v6  ;;  %v2400_v32 = vadd.f32 %v2145_v40, %v1687_v39  ;;  %v622_v20 = vld [vmem:[#allocation2 + $0x310] sm:$0xff] }
 0x1d3   : > { %3817 = vst.msk [vmem:[#allocation2 + $0x2e0] sm:$0xff] %vm404_vm0, %v3699_v3  ;;  %v3284_v47 = vadd.f32 %v2964_v62, %v2571_v28  ;;  %v3867_v11 = vld [vmem:[#allocation2 + $0xc0] ss:$2 sm:$0xff]  ;;  %3754 = vst.msk [vmem:[#allocation2 + $0xe8] sm:$0xff] %vm404_vm0, %v3636_v61  ;;  %v1454_v3 = vadd.f32 %v1336_v60, %v623_v30  ;;  %v10760_v28 = vmul.f32 %v10693_v59, %v10661_v43  ;;  %7649 = vmatprep.mubr.msk.f32.mxu1 %vm8300_vm1, %v13463_v24  ;;  %v10797_v21 = vpop.permute.xlu0 %1145 }
 0x1d4   : > { %v2019_v34 = vsel %vm1950_vm2, %v13493_v10, %v2018_v50  ;;  %v3092_v58 = vsel %vm2899_vm3, %v13494_v12, %v3091_v49  ;;  %v13369_v10 = vrot.slane %v10717_v2, 1  ;;  %v3519_v16 = vld [vmem:[#allocation2 + $0xf0] sm:$0xff]  ;;  %3465 = vst.msk [vmem:[#allocation2 + $0x2f0] sm:$0xff] %vm404_vm0, %v3347_v48  ;;  %v13495_v62 = vrot.slane %v10675_v51, 2  ;;  %2518 = vst.msk [vmem:[#allocation2 + $0x300] sm:$0xff] %vm404_vm0, %v2400_v32  ;;  %v560_v48 = vld [vmem:[#allocation2 + $0x120] sm:$0xff] }
 0x1d5   : > { %v2337_v37 = vadd.f32 %v2019_v34, %v1624_v46  ;;  %3402 = vst.msk [vmem:[#allocation2 + $0xf8] sm:$0xff] %vm404_vm0, %v3284_v47  ;;  %v1335_v30 = vmul.f32 %v10622_v18, %v10671_v9  ;;  %v10777_v60 = vmul.f32 %v10693_v59, %v10671_v9  ;;  %v3637_v61 = vmax.f32 %v3519_v16, 0.0  ;;  %1572 = vst.msk [vmem:[#allocation2 + $0x318] sm:$0xff] %vm404_vm0, %v1454_v3  ;;  %v561_v34 = vld [vmem:[#allocation2 + $0x128] sm:$0xff]  ;;  %v10788_v47 = vpop.permute.xlu1 %1150 }
 0x1d6   : > { %v10769_v39 = vsel %vm2899_vm3, %v3091_v49, %v13495_v62  ;;  %v10784_v49 = vmul.f32 %v10724_v53, %v10661_v43  ;;  %v10786_v40 = vmax.f32 %v3867_v11, %v3985_v4  ;;  %v10793_v32 = vmul.f32 %v10724_v53, %v10671_v9  ;;  %v4983_v43 = vld [vmem:[#allocation8 + $0x20] sm:$0xff] }
 0x1d7   : > { %2455 = vst.msk [vmem:[#allocation2 + $0x108] sm:$0xff] %vm404_vm0, %v2337_v37  ;;  %v3582_v12 = vld [vmem:[#allocation2 + $0x2e8] sm:$0xff]  ;;  %v1453_v62 = vadd.f32 %v1335_v30, %v622_v20  ;;  %v2146_v16 = vrot.slane %v10777_v60, 1  ;;  %v1274_v3 = vmul.f32 %v10622_v18, %v10720_v23  ;;  %3755 = vst.msk [vmem:[#allocation2 + $0xf0] sm:$0xff] %vm404_vm0, %v3637_v61  ;;  %v2021_v20 = vsel %vm1950_vm2, %v2018_v50, %v13369_v10  ;;  %v4984_v60 = vld [vmem:[#allocation8 + $0x28] sm:$0xff] }
 0x1d8   : > { %13496 = vst [vmem:[#allocation30_spill] sm:$0xff] %v10786_v40  ;;  %v1688_v37 = vld [vmem:[#allocation2 + $0x308] sm:$0xff]  ;;  %v3700_v4 = vmax.f32 %v3582_v12, 0.0  ;;  %v2572_v11 = vld [vmem:[#allocation2 + $0x100] sm:$0xff]  ;;  %v2635_v46 = vld [vmem:[#allocation2 + $0x2f8] sm:$0xff]  ;;  %7554 = vmatmul.mubr.msk.f32.gmra.mrb[24].mxu0 %vm404_vm0, %v10786_v40  ;;  %v1273_v30 = vmul.f32 %v10622_v18, %v10734_v8  ;;  %v13497_v22 = vrot.slane %v10728_v25, 2 }
 0x1d9   : > { %v3285_v61 = vadd.f32 %v10709_v26, %v2572_v11  ;;  %v3348_v12 = vadd.f32 %v3092_v58, %v2635_v46  ;;  %v1625_v6 = vld [vmem:[#allocation2 + $0x110] sm:$0xff]  ;;  %1571 = vst.msk [vmem:[#allocation2 + $0x310] sm:$0xff] %vm404_vm0, %v1453_v62  ;;  %v13499_v50 = vrot.slane %v10655_v27, 1  ;;  %v3931_v9 = vld [vmem:[#allocation2 + $0x2c0] ss:$2 sm:$0xff]  ;;  %7556 = vmatprep.mubr.msk.f32.mxu0 %vm8300_vm1, %v13463_v24  ;;  %v13372_v26 = vrot.slane %v10784_v49, 2 }
 0x1da   : > { %v2968_v56 = vsel %vm2899_vm3, %v13498_v14, %v13497_v22  ;;  %3818 = vst.msk [vmem:[#allocation2 + $0x2e8] sm:$0xff] %vm404_vm0, %v3700_v4  ;;  %v2338_v58 = vadd.f32 %v2021_v20, %v1625_v6  ;;  %v10826_v14 = vmul.f32 %v10693_v59, %v10720_v23  ;;  %v3095_v22 = vrot.slane %v10793_v32, 2  ;;  %v625_v6 = vld [vmem:[#allocation2 + $0x328] sm:$0xff] }
 0x1db   : > { %v2147_v10 = vsel %vm1950_vm2, %v13499_v50, %v2146_v16  ;;  %3403 = vst.msk [vmem:[#allocation2 + $0x100] sm:$0xff] %vm404_vm0, %v3285_v61  ;;  %3466 = vst.msk [vmem:[#allocation2 + $0x2f8] sm:$0xff] %vm404_vm0, %v3348_v12  ;;  %v1392_v33 = vadd.f32 %v1274_v3, %v561_v34  ;;  %v10833_v27 = vmul.f32 %v10724_v53, %v10720_v23  ;;  %v3583_v4 = vld [vmem:[#allocation2 + $0x2f0] sm:$0xff]  ;;  %v10853_v50 = vpop.permute.xlu0 %835 }
 0x1dc   : > { %v2401_v46 = vadd.f32 %v2147_v10, %v1688_v37  ;;  %v1391_v62 = vadd.f32 %v1273_v30, %v560_v48  ;;  %v3520_v11 = vld [vmem:[#allocation2 + $0xf8] sm:$0xff]  ;;  %2456 = vst.msk [vmem:[#allocation2 + $0x110] sm:$0xff] %vm404_vm0, %v2338_v58  ;;  %v10839_v37 = vmul.f32 %v10693_v59, %v10734_v8  ;;  %v10843_v34 = vmul.f32 %v10724_v53, %v10734_v8  ;;  %v10847_v48 = vpop.permute.xlu1 %840  ;;  %v2636_v30 = vld [vmem:[#allocation2 + $0x300] sm:$0xff] }
 0x1dd   : > { %v10845_v32 = vmax.f32 %v3931_v9, %v4049_v19  ;;  %v8071_v23 = vpack.c.bf16 %v4984_v60, %v4983_v43  ;;  %v3701_v3 = vmax.f32 %v3583_v4, 0.0  ;;  %v3638_v20 = vmax.f32 %v3520_v11, 0.0  ;;  %1510 = vst.msk [vmem:[#allocation2 + $0x128] sm:$0xff] %vm404_vm0, %v1392_v33  ;;  %v1626_v60 = vld [vmem:[#allocation2 + $0x118] sm:$0xff] }
 0x1de   : > { %v2573_v10 = vld [vmem:[#allocation2 + $0x108] sm:$0xff]  ;;  %2519 = vst.msk [vmem:[#allocation2 + $0x308] sm:$0xff] %vm404_vm0, %v2401_v46  ;;  %1509 = vst.msk [vmem:[#allocation2 + $0x120] sm:$0xff] %vm404_vm0, %v1391_v62  ;;  %v1338_v12 = vmul.f32 %v10622_v18, %v10788_v47  ;;  %v3349_v8 = vadd.f32 %v10769_v39, %v2636_v30  ;;  %v13501_v19 = vrot.slane %v10741_v5, 2  ;;  %v13502_v43 = vrot.slane %v10728_v25, 2  ;;  %v624_v46 = vld [vmem:[#allocation2 + $0x320] sm:$0xff] }
 0x1df   : > { %13500 = vst [vmem:[#allocation31_spill] sm:$0xff] %v10845_v32  ;;  %v3286_v61 = vadd.f32 %v2968_v56, %v2573_v10  ;;  %v2022_v56 = vrot.slane %v10839_v37, 1  ;;  %7650 = vmatmul.mubr.msk.f32.gmra.mrb[28].mxu1 %vm404_vm0, %v10845_v32  ;;  %3819 = vst.msk [vmem:[#allocation2 + $0x2f0] sm:$0xff] %vm404_vm0, %v3701_v3  ;;  %v13503_v39 = vrot.slane %v10760_v28, 1  ;;  %v1337_v33 = vmul.f32 %v10622_v18, %v10797_v21  ;;  %v3869_v4 = vld [vmem:[#allocation2 + $0xd0] ss:$2 sm:$0xff] }
 0x1e0   : > { %v2970_v9 = vsel %vm2899_vm3, %v13502_v43, %v13501_v19  ;;  %3756 = vst.msk [vmem:[#allocation2 + $0xf8] sm:$0xff] %vm404_vm0, %v3638_v20  ;;  %8072 = vmatpush3.bf16.msra.mxu1 %v8071_v23  ;;  %v1456_v25 = vadd.f32 %v1338_v12, %v625_v6  ;;  %v10874_v62 = vmul.f32 %v10693_v59, %v10797_v21  ;;  %v3987_v11 = vld [vmem:[#allocation2 + $0xd1] ss:$2 sm:$0xff]  ;;  %3467 = vst.msk [vmem:[#allocation2 + $0x300] sm:$0xff] %vm404_vm0, %v3349_v8 }
 0x1e1   : > { %3404 = vst.msk [vmem:[#allocation2 + $0x108] sm:$0xff] %vm404_vm0, %v3286_v61  ;;  %v2149_v58 = vsel %vm1950_vm2, %v2146_v16, %v13503_v39  ;;  %v1689_v10 = vld [vmem:[#allocation2 + $0x310] sm:$0xff]  ;;  %v13504_v37 = vrot.slane %v10675_v51, 2  ;;  %v10883_v16 = vsel %vm2899_vm3, %v3095_v22, %v13372_v26  ;;  %v13373_v6 = vrot.slane %v10826_v14, 1  ;;  %7652 = vmatprep.mubr.msk.f32.mxu1 %vm8300_vm1, %v13463_v24  ;;  %v563_v8 = vld [vmem:[#allocation2 + $0x138] sm:$0xff] }
 0x1e2   : > { %v13505_v23 = vrot.slane %v10717_v2, 1  ;;  %v2402_v30 = vadd.f32 %v2149_v58, %v1689_v10  ;;  %1574 = vst.msk [vmem:[#allocation2 + $0x328] sm:$0xff] %vm404_vm0, %v1456_v25  ;;  %v3521_v19 = vld [vmem:[#allocation2 + $0x100] sm:$0xff]  ;;  %v3584_v43 = vld [vmem:[#allocation2 + $0x2f8] sm:$0xff]  ;;  %v10897_v2 = vmul.f32 %v10693_v59, %v10788_v47  ;;  %v13374_v58 = vrot.slane %v10874_v62, 1 }
 0x1e3   : > { %v3096_v3 = vsel %vm2899_vm3, %v13504_v37, %v3095_v22  ;;  %v13506_v22 = vmov 0.0|0.0   ;;  %v1690_v39 = vld [vmem:[#allocation2 + $0x318] sm:$0xff]  ;;  %v1455_v37 = vadd.f32 %v1337_v33, %v624_v46  ;;  %v10900_v10 = vmax.f32 %v3869_v4, %v3987_v11  ;;  %v2574_v25 = vld [vmem:[#allocation2 + $0x110] sm:$0xff]  ;;  %v10912_v33 = vpop.permute.xlu0 %1155 }
 0x1e4   : > { %v2023_v20 = vsel %vm1950_vm2, %v13505_v23, %v2022_v56  ;;  %8073 = vmatprep.subr.bf16.mxu1 %v13506_v22  ;;  %v3639_v23 = vmax.f32 %v3521_v19, 0.0  ;;  %2520 = vst.msk [vmem:[#allocation2 + $0x310] sm:$0xff] %vm404_vm0, %v2402_v30  ;;  %v10908_v61 = vmul.f32 %v10724_v53, %v10797_v21  ;;  %v1276_v46 = vmul.f32 %v10622_v18, %v10847_v48 }
 0x1e5   : > { %v2339_v51 = vadd.f32 %v2023_v20, %v1626_v60  ;;  %13507 = vst [vmem:[#allocation32_spill] sm:$0xff] %v10900_v10  ;;  %v10902_v60 = vpop.permute.xlu1 %1160  ;;  %v3702_v20 = vmax.f32 %v3584_v43, 0.0  ;;  %v2637_v26 = vld [vmem:[#allocation2 + $0x308] sm:$0xff]  ;;  %v3287_v4 = vadd.f32 %v2970_v9, %v2574_v25  ;;  %v1627_v12 = vld [vmem:[#allocation2 + $0x120] sm:$0xff]  ;;  %v2025_v19 = vsel %vm1950_vm2, %v2022_v56, %v13373_v6  ;;  %1573 = vst.msk [vmem:[#allocation2 + $0x320] sm:$0xff] %vm404_vm0, %v1455_v37 }
 0x1e6   : > { %v3350_v11 = vadd.f32 %v3096_v3, %v2637_v26  ;;  %v13508_v30 = vrot.slane %v10760_v28, 1  ;;  %7557 = vmatmul.mubr.msk.f32.gmra.mrb[26].mxu0 %vm404_vm0, %v10900_v10  ;;  %3757 = vst.msk [vmem:[#allocation2 + $0x100] sm:$0xff] %vm404_vm0, %v3639_v23  ;;  %v2340_v26 = vadd.f32 %v2025_v19, %v1627_v12  ;;  %v10929_v9 = vmul.f32 %v10724_v53, %v10788_v47  ;;  %v5760_v43 = vld [vmem:[#allocation8 + $0x40] sm:$0xff]  ;;  %v5761_v37 = vld [vmem:[#allocation8 + $0x48] sm:$0xff] }
 0x1e7   : > { %2457 = vst.msk [vmem:[#allocation2 + $0x118] sm:$0xff] %vm404_vm0, %v2339_v51  ;;  %3820 = vst.msk [vmem:[#allocation2 + $0x2f8] sm:$0xff] %vm404_vm0, %v3702_v20  ;;  %v1394_v3 = vadd.f32 %v1276_v46, %v563_v8  ;;  %v562_v51 = vld [vmem:[#allocation2 + $0x130] sm:$0xff]  ;;  %7559 = vmatprep.mubr.msk.f32.mxu0 %vm8300_vm1, %v13463_v24  ;;  %v13377_v23 = vrot.slane %v10897_v2, 1  ;;  %v10938_v12 = vmul.f32 %v10693_v59, %v10847_v48  ;;  %v3585_v25 = vld [vmem:[#allocation2 + $0x300] sm:$0xff]  ;;  %v13517_v32 = vrot.slane %v10908_v61, 2 }
 0x1e8   : > { %v2151_v21 = vsel %vm1950_vm2, %v13508_v30, %v13374_v58  ;;  %3405 = vst.msk [vmem:[#allocation2 + $0x110] sm:$0xff] %vm404_vm0, %v3287_v4  ;;  %v3522_v28 = vld [vmem:[#allocation2 + $0x108] sm:$0xff]  ;;  %3468 = vst.msk [vmem:[#allocation2 + $0x308] sm:$0xff] %vm404_vm0, %v3350_v11  ;;  %v1275_v47 = vmul.f32 %v10622_v18, %v10853_v50  ;;  %v10944_v8 = vmul.f32 %v10693_v59, %v10853_v50  ;;  %v4051_v20 = vld [vmem:[#allocation2 + $0x2d1] ss:$2 sm:$0xff]  ;;  %v13509_v4 = vrot.slane %v10843_v34, 2  ;;  %v10976_v30 = vpop.permute.xlu0 %845 }
 0x1e9   : > { %v2403_v56 = vadd.f32 %v2151_v21, %v1690_v39  ;;  %v3933_v39 = vld [vmem:[#allocation2 + $0x2d0] ss:$2 sm:$0xff]  ;;  %v3640_v46 = vmax.f32 %v3522_v28, 0.0  ;;  %2458 = vst.msk [vmem:[#allocation2 + $0x120] sm:$0xff] %vm404_vm0, %v2340_v26  ;;  %v13510_v11 = vrot.slane %v10741_v5, 2  ;;  %1512 = vst.msk [vmem:[#allocation2 + $0x138] sm:$0xff] %vm404_vm0, %v1394_v3  ;;  %v10957_v21 = vmul.f32 %v10724_v53, %v10847_v48 }
 0x1ea   : > { %v3703_v6 = vmax.f32 %v3585_v25, 0.0  ;;  %v1628_v28 = vld [vmem:[#allocation2 + $0x128] sm:$0xff]  ;;  %v1393_v58 = vadd.f32 %v1275_v47, %v562_v51  ;;  %v10962_v5 = vmul.f32 %v10724_v53, %v10853_v50  ;;  %v13512_v3 = vrot.slane %v10843_v34, 2  ;;  %v627_v51 = vld [vmem:[#allocation2 + $0x338] sm:$0xff] }
 0x1eb   : > { %v2972_v19 = vsel %vm2899_vm3, %v13510_v11, %v13509_v4  ;;  %2521 = vst.msk [vmem:[#allocation2 + $0x318] sm:$0xff] %vm404_vm0, %v2403_v56  ;;  %v10964_v4 = vpop.permute.xlu1 %850  ;;  %3758 = vst.msk [vmem:[#allocation2 + $0x108] sm:$0xff] %vm404_vm0, %v3640_v46  ;;  %v13511_v56 = vrot.slane %v10833_v27, 2  ;;  %v8077_v11 = vpack.c.bf16 %v5761_v37, %v5760_v43  ;;  %v10972_v25 = vmax.f32 %v3933_v39, %v4051_v20  ;;  %v2638_v50 = vld [vmem:[#allocation2 + $0x310] sm:$0xff]  ;;  %v3871_v37 = vld [vmem:[#allocation2 + $0xe0] ss:$2 sm:$0xff] }
 0x1ec   : > { %v1340_v47 = vmul.f32 %v10622_v18, %v10902_v60  ;;  %3821 = vst.msk [vmem:[#allocation2 + $0x300] sm:$0xff] %vm404_vm0, %v3703_v6  ;;  %v13514_v34 = vrot.slane %v10874_v62, 1  ;;  %1511 = vst.msk [vmem:[#allocation2 + $0x130] sm:$0xff] %vm404_vm0, %v1393_v58  ;;  %v13515_v39 = vrot.slane %v10944_v8, 1  ;;  %v13516_v20 = vrot.slane %v10826_v14, 1  ;;  %v1691_v46 = vld [vmem:[#allocation2 + $0x320] sm:$0xff] }
 0x1ed   : > { %v2974_v48 = vsel %vm2899_vm3, %v13512_v3, %v13511_v56  ;;  %13513 = vst [vmem:[#allocation33_spill] sm:$0xff] %v10972_v25  ;;  %v3351_v56 = vadd.f32 %v10883_v16, %v2638_v50  ;;  %v13518_v62 = vrot.slane %v10784_v49, 2  ;;  %8078 = vmatpush3.bf16.msra.mxu0 %v8077_v11  ;;  %v3989_v58 = vld [vmem:[#allocation2 + $0xe1] ss:$2 sm:$0xff]  ;;  %v13383_v55 = vrot.slane %v10957_v21, 2  ;;  %7653 = vmatmul.mubr.msk.f32.gmra.mrb[30].mxu1 %vm404_vm0, %v10972_v25 }
 0x1ee   : > { %v2575_v26 = vld [vmem:[#allocation2 + $0x118] sm:$0xff]  ;;  %v2153_v43 = vsel %vm1950_vm2, %v13514_v34, %v13377_v23  ;;  %v2027_v6 = vsel %vm1950_vm2, %v13516_v20, %v13515_v39  ;;  %v2975_v14 = vrot.slane %v10962_v5, 2  ;;  %v1458_v16 = vadd.f32 %v1340_v47, %v627_v51  ;;  %8079 = vmatprep.subr.bf16.mxu0 %v13506_v22  ;;  %v565_v11 = vld [vmem:[#allocation2 + $0x148] sm:$0xff]  ;;  %7655 = vmatprep.mubr.msk.f32.mxu1 %vm8300_vm1, %v13463_v24 }
 0x1ef   : > { %v3288_v3 = vadd.f32 %v2972_v19, %v2575_v26  ;;  %v3100_v34 = vsel %vm2899_vm3, %v13518_v62, %v13517_v32  ;;  %v2341_v23 = vadd.f32 %v2027_v6, %v1628_v28  ;;  %v2404_v29 = vadd.f32 %v2153_v43, %v1691_v46  ;;  %v626_v19 = vld [vmem:[#allocation2 + $0x330] sm:$0xff]  ;;  %3469 = vst.msk [vmem:[#allocation2 + $0x310] sm:$0xff] %vm404_vm0, %v3351_v56  ;;  %v3586_v49 = vld [vmem:[#allocation2 + $0x308] sm:$0xff]  ;;  %v11028_v39 = vpop.permute.xlu1 %1170  ;;  %v11031_v62 = vpop.permute.xlu0 %1165 }
 0x1f0   : > { %v3523_v26 = vld [vmem:[#allocation2 + $0x110] sm:$0xff]  ;;  %v11008_v32 = vmul.f32 %v10693_v59, %v10902_v60  ;;  %v1339_v28 = vmul.f32 %v10622_v18, %v10912_v33  ;;  %v11014_v5 = vmul.f32 %v10693_v59, %v10912_v33  ;;  %v11018_v22 = vmul.f32 %v10724_v53, %v10912_v33  ;;  %v2576_v47 = vld [vmem:[#allocation2 + $0x120] sm:$0xff]  ;;  %1576 = vst.msk [vmem:[#allocation2 + $0x338] sm:$0xff] %vm404_vm0, %v1458_v16  ;;  %v1692_v6 = vld [vmem:[#allocation2 + $0x328] sm:$0xff] }
 0x1f1   : > { %3406 = vst.msk [vmem:[#allocation2 + $0x118] sm:$0xff] %vm404_vm0, %v3288_v3  ;;  %2459 = vst.msk [vmem:[#allocation2 + $0x128] sm:$0xff] %vm404_vm0, %v2341_v23  ;;  %v3641_v23 = vmax.f32 %v3523_v26, 0.0  ;;  %v3704_v51 = vmax.f32 %v3586_v49, 0.0  ;;  %v11024_v46 = vmax.f32 %v3871_v37, %v3989_v58  ;;  %v1278_v43 = vmul.f32 %v10622_v18, %v10964_v4  ;;  %v564_v49 = vld [vmem:[#allocation2 + $0x140] sm:$0xff] }
 0x1f2   : > { %2522 = vst.msk [vmem:[#allocation2 + $0x320] sm:$0xff] %vm404_vm0, %v2404_v29  ;;  %v2639_v50 = vld [vmem:[#allocation2 + $0x318] sm:$0xff]  ;;  %v3289_v33 = vadd.f32 %v2974_v48, %v2576_v47  ;;  %v1457_v56 = vadd.f32 %v1339_v28, %v626_v19  ;;  %v2154_v3 = vrot.slane %v11014_v5, 1  ;;  %v13520_v29 = vrot.slane %v10929_v9, 2  ;;  %v4053_v47 = vld [vmem:[#allocation2 + $0x2e1] ss:$2 sm:$0xff] }
 0x1f3   : > { %13519 = vst [vmem:[#allocation34_spill] sm:$0xff] %v11024_v46  ;;  %v3352_v20 = vadd.f32 %v3100_v34, %v2639_v50  ;;  %3759 = vst.msk [vmem:[#allocation2 + $0x110] sm:$0xff] %vm404_vm0, %v3641_v23  ;;  %v13521_v37 = vrot.slane %v10908_v61, 2  ;;  %v13522_v16 = vrot.slane %v10938_v12, 1  ;;  %v13523_v48 = vrot.slane %v10944_v8, 1  ;;  %7560 = vmatmul.mubr.msk.f32.gmra.mrb[28].mxu0 %vm404_vm0, %v11024_v46  ;;  %v1629_v61 = vld [vmem:[#allocation2 + $0x130] sm:$0xff] }
 0x1f4   : > { %3822 = vst.msk [vmem:[#allocation2 + $0x308] sm:$0xff] %vm404_vm0, %v3704_v51  ;;  %v11047_v19 = vmul.f32 %v10724_v53, %v10902_v60  ;;  %v1396_v26 = vadd.f32 %v1278_v43, %v565_v11  ;;  %3407 = vst.msk [vmem:[#allocation2 + $0x120] sm:$0xff] %vm404_vm0, %v3289_v33  ;;  %v13524_v28 = vrot.slane %v10833_v27, 2  ;;  %v13525_v5 = vrot.slane %v10897_v2, 1  ;;  %v3935_v51 = vld [vmem:[#allocation2 + $0x2e0] ss:$2 sm:$0xff]  ;;  %7562 = vmatprep.mubr.msk.f32.mxu0 %vm8300_vm1, %v13463_v24 }
 0x1f5   : > { %v3102_v58 = vsel %vm2899_vm3, %v13521_v37, %v13520_v29  ;;  %v2029_v34 = vsel %vm1950_vm2, %v13523_v48, %v13522_v16  ;;  %3470 = vst.msk [vmem:[#allocation2 + $0x318] sm:$0xff] %vm404_vm0, %v3352_v20  ;;  %1575 = vst.msk [vmem:[#allocation2 + $0x330] sm:$0xff] %vm404_vm0, %v1457_v56  ;;  %v1277_v23 = vmul.f32 %v10622_v18, %v10976_v30  ;;  %v13384_v2 = vrot.slane %v11008_v32, 1  ;;  %v1630_v56 = vld [vmem:[#allocation2 + $0x138] sm:$0xff]  ;;  %v629_v16 = vld [vmem:[#allocation2 + $0x348] sm:$0xff] }
 0x1f6   : > { %v2976_v8 = vsel %vm2899_vm3, %v13524_v28, %v2975_v14  ;;  %v2155_v60 = vsel %vm1950_vm2, %v13525_v5, %v2154_v3  ;;  %v11064_v11 = vmul.f32 %v10693_v59, %v10976_v30  ;;  %v2342_v27 = vadd.f32 %v2029_v34, %v1629_v61  ;;  %1514 = vst.msk [vmem:[#allocation2 + $0x148] sm:$0xff] %vm404_vm0, %v1396_v26  ;;  %v3587_v48 = vld [vmem:[#allocation2 + $0x310] sm:$0xff]  ;;  %v11092_v61 = vpop.permute.xlu1 %860 }
 0x1f7   : > { %v11071_v50 = vsel %vm2899_vm3, %v2975_v14, %v13383_v55  ;;  %v2405_v43 = vadd.f32 %v2155_v60, %v1692_v6  ;;  %v3103_v33 = vrot.slane %v11018_v22, 2  ;;  %v11078_v20 = vmul.f32 %v10693_v59, %v10964_v4 }
 0x1f8   : > { %v1395_v29 = vadd.f32 %v1277_v23, %v564_v49  ;;  %v2030_v37 = vrot.slane %v11064_v11, 1  ;;  %v3524_v34 = vld [vmem:[#allocation2 + $0x118] sm:$0xff]  ;;  %2460 = vst.msk [vmem:[#allocation2 + $0x130] sm:$0xff] %vm404_vm0, %v2342_v27  ;;  %v2577_v14 = vld [vmem:[#allocation2 + $0x128] sm:$0xff]  ;;  %v13382_v6 = vrot.slane %v11047_v19, 2  ;;  %v11086_v22 = vmul.f32 %v10724_v53, %v10976_v30 }
 0x1f9   : > { %2523 = vst.msk [vmem:[#allocation2 + $0x328] sm:$0xff] %vm404_vm0, %v2405_v43  ;;  %v11088_v26 = vmax.f32 %v3935_v51, %v4053_v47  ;;  %v1342_v49 = vmul.f32 %v10622_v18, %v11028_v39  ;;  %v3705_v28 = vmax.f32 %v3587_v48, 0.0  ;;  %v3642_v5 = vmax.f32 %v3524_v34, 0.0  ;;  %v2640_v60 = vld [vmem:[#allocation2 + $0x320] sm:$0xff]  ;;  %v11100_v43 = vpop.permute.xlu0 %855 }
 0x1fa   : > { %v3290_v23 = vadd.f32 %v2976_v8, %v2577_v14  ;;  %1513 = vst.msk [vmem:[#allocation2 + $0x140] sm:$0xff] %vm404_vm0, %v1395_v29  ;;  %v13527_v27 = vrot.slane %v10938_v12, 1  ;;  %v3353_v51 = vadd.f32 %v3102_v58, %v2640_v60  ;;  %v2157_v47 = vsel %vm1950_vm2, %v2154_v3, %v13384_v2  ;;  %v628_v34 = vld [vmem:[#allocation2 + $0x340] sm:$0xff]  ;;  %v3991_v14 = vld [vmem:[#allocation2 + $0xf1] ss:$2 sm:$0xff] }
 0x1fb   : > { %13526 = vst [vmem:[#allocation35_spill] sm:$0xff] %v11088_v26  ;;  %v11107_v48 = vmul.f32 %v10724_v53, %v10964_v4  ;;  %7656 = vmatmul.mubr.msk.f32.gmra.mrb[32].mxu1 %vm404_vm0, %v11088_v26  ;;  %3823 = vst.msk [vmem:[#allocation2 + $0x310] sm:$0xff] %vm404_vm0, %v3705_v28  ;;  %v13528_v12 = vrot.slane %v10929_v9, 2  ;;  %v13385_v3 = vrot.slane %v11078_v20, 1  ;;  %v1460_v29 = vadd.f32 %v1342_v49, %v629_v16  ;;  %v3525_v28 = vld [vmem:[#allocation2 + $0x120] sm:$0xff]  ;;  %v567_v2 = vld [vmem:[#allocation2 + $0x158] sm:$0xff] }
 0x1fc   : > { %v2031_v30 = vsel %vm1950_vm2, %v13527_v27, %v2030_v37  ;;  %3760 = vst.msk [vmem:[#allocation2 + $0x118] sm:$0xff] %vm404_vm0, %v3642_v5  ;;  %3408 = vst.msk [vmem:[#allocation2 + $0x128] sm:$0xff] %vm404_vm0, %v3290_v23  ;;  %v1341_v4 = vmul.f32 %v10622_v18, %v11031_v62  ;;  %7658 = vmatprep.mubr.msk.f32.mxu1 %vm8300_vm1, %v13463_v24  ;;  %v3588_v5 = vld [vmem:[#allocation2 + $0x318] sm:$0xff]  ;;  %v1693_v60 = vld [vmem:[#allocation2 + $0x330] sm:$0xff]  ;;  %v11126_v9 = vsel %vm2899_vm3, %v3103_v33, %v13382_v6 }
 0x1fd   : > { %v2343_v8 = vadd.f32 %v2031_v30, %v1630_v56  ;;  %v3104_v58 = vsel %vm2899_vm3, %v13528_v12, %v3103_v33  ;;  %v3873_v56 = vld [vmem:[#allocation2 + $0xf0] ss:$2 sm:$0xff]  ;;  %3471 = vst.msk [vmem:[#allocation2 + $0x320] sm:$0xff] %vm404_vm0, %v3353_v51  ;;  %v11132_v49 = vmul.f32 %v10693_v59, %v11028_v39  ;;  %v11136_v23 = vmul.f32 %v10693_v59, %v11031_v62 }
 0x1fe   : > { %v3643_v27 = vmax.f32 %v3525_v28, 0.0  ;;  %v3706_v30 = vmax.f32 %v3588_v5, 0.0  ;;  %v2406_v51 = vadd.f32 %v2157_v47, %v1693_v60  ;;  %1578 = vst.msk [vmem:[#allocation2 + $0x348] sm:$0xff] %vm404_vm0, %v1460_v29  ;;  %v11141_v33 = vmul.f32 %v10724_v53, %v11028_v39  ;;  %v11150_v28 = vpop.permute.xlu1 %1180 }
 0x1ff   : > { %2461 = vst.msk [vmem:[#allocation2 + $0x138] sm:$0xff] %vm404_vm0, %v2343_v8  ;;  %v1694_v8 = vld [vmem:[#allocation2 + $0x338] sm:$0xff]  ;;  %v1459_v12 = vadd.f32 %v1341_v4, %v628_v34  ;;  %v2158_v6 = vrot.slane %v11136_v23, 1  ;;  %v11146_v55 = vmul.f32 %v10724_v53, %v11031_v62  ;;  %v11148_v16 = vmax.f32 %v3873_v56, %v3991_v14  ;;  %v2578_v47 = vld [vmem:[#allocation2 + $0x130] sm:$0xff]  ;;  %v11165_v14 = vpop.permute.xlu0 %1175 }
 0x200   : > { %3761 = vst.msk [vmem:[#allocation2 + $0x120] sm:$0xff] %vm404_vm0, %v3643_v27  ;;  %3824 = vst.msk [vmem:[#allocation2 + $0x318] sm:$0xff] %vm404_vm0, %v3706_v30  ;;  %v2641_v39 = vld [vmem:[#allocation2 + $0x328] sm:$0xff]  ;;  %v2033_v62 = vsel %vm1950_vm2, %v2030_v37, %v13385_v3  ;;  %v1280_v34 = vmul.f32 %v10622_v18, %v11092_v61  ;;  %v566_v4 = vld [vmem:[#allocation2 + $0x150] sm:$0xff]  ;;  %v1279_v56 = vmul.f32 %v10622_v18, %v11100_v43  ;;  %v13387_v27 = vrot.slane %v11132_v49, 1 }
 0x201   : > { %13529 = vst [vmem:[#allocation36_spill] sm:$0xff] %v11148_v16  ;;  %2524 = vst.msk [vmem:[#allocation2 + $0x330] sm:$0xff] %vm404_vm0, %v2406_v51  ;;  %v3291_v5 = vadd.f32 %v11071_v50, %v2578_v47  ;;  %v3354_v60 = vadd.f32 %v3104_v58, %v2641_v39  ;;  %v1631_v23 = vld [vmem:[#allocation2 + $0x140] sm:$0xff]  ;;  %v13530_v11 = vrot.slane %v11008_v32, 1  ;;  %7563 = vmatmul.mubr.msk.f32.gmra.mrb[30].mxu0 %vm404_vm0, %v11148_v16  ;;  %v3937_v30 = vld [vmem:[#allocation2 + $0x2f0] ss:$2 sm:$0xff] }
 0x202   : > { %1577 = vst.msk [vmem:[#allocation2 + $0x340] sm:$0xff] %vm404_vm0, %v1459_v12  ;;  %v4055_v51 = vld [vmem:[#allocation2 + $0x2f1] ss:$2 sm:$0xff]  ;;  %v2344_v3 = vadd.f32 %v2033_v62, %v1631_v23  ;;  %v13531_v29 = vrot.slane %v11086_v22, 2  ;;  %v13532_v50 = vrot.slane %v10957_v21, 2  ;;  %v13386_v47 = vrot.slane %v11141_v33, 2  ;;  %7565 = vmatprep.mubr.msk.f32.mxu0 %vm8300_vm1, %v13463_v24 }
 0x203   : > { %v2159_v37 = vsel %vm1950_vm2, %v13530_v11, %v2158_v6  ;;  %3409 = vst.msk [vmem:[#allocation2 + $0x130] sm:$0xff] %vm404_vm0, %v3291_v5  ;;  %v3526_v32 = vld [vmem:[#allocation2 + $0x128] sm:$0xff]  ;;  %3472 = vst.msk [vmem:[#allocation2 + $0x328] sm:$0xff] %vm404_vm0, %v3354_v60  ;;  %v3107_v12 = vrot.slane %v11146_v55, 2  ;;  %v1398_v62 = vadd.f32 %v1280_v34, %v567_v2  ;;  %v11188_v23 = vmul.f32 %v10693_v59, %v11092_v61  ;;  %v631_v34 = vld [vmem:[#allocation2 + $0x358] sm:$0xff] }
 0x204   : > { %v2980_v58 = vsel %vm2899_vm3, %v13532_v50, %v13531_v29  ;;  %v2407_v39 = vadd.f32 %v2159_v37, %v1694_v8  ;;  %v1397_v21 = vadd.f32 %v1279_v56, %v566_v4  ;;  %v3589_v29 = vld [vmem:[#allocation2 + $0x320] sm:$0xff]  ;;  %v3644_v11 = vmax.f32 %v3526_v32, 0.0  ;;  %2462 = vst.msk [vmem:[#allocation2 + $0x140] sm:$0xff] %vm404_vm0, %v2344_v3  ;;  %v11208_v4 = vpop.permute.xlu1 %870 }
 0x205   : > { %v11194_v5 = vmul.f32 %v10724_v53, %v11092_v61  ;;  %v1756_v55 = vmul.f32 %v10693_v59, %v11100_v43  ;;  %v11198_v2 = vmax.f32 %v3937_v30, %v4055_v51  ;;  %v3707_v60 = vmax.f32 %v3589_v29, 0.0  ;;  %1516 = vst.msk [vmem:[#allocation2 + $0x158] sm:$0xff] %vm404_vm0, %v1398_v62  ;;  %v11223_v62 = vpop.permute.xlu0 %865 }
 0x206   : > { %v2579_v8 = vld [vmem:[#allocation2 + $0x138] sm:$0xff]  ;;  %2525 = vst.msk [vmem:[#allocation2 + $0x338] sm:$0xff] %vm404_vm0, %v2407_v39  ;;  %1515 = vst.msk [vmem:[#allocation2 + $0x150] sm:$0xff] %vm404_vm0, %v1397_v21  ;;  %v11204_v3 = vmul.f32 %v10724_v53, %v11100_v43  ;;  %v1344_v61 = vmul.f32 %v10622_v18, %v11150_v28  ;;  %v13534_v56 = vrot.slane %v11107_v48, 2  ;;  %v13535_v30 = vrot.slane %v11086_v22, 2  ;;  %v630_v39 = vld [vmem:[#allocation2 + $0x350] sm:$0xff] }
 0x207   : > { %13533 = vst [vmem:[#allocation37_spill] sm:$0xff] %v11198_v2  ;;  %v3292_v37 = vadd.f32 %v2980_v58, %v2579_v8  ;;  %3762 = vst.msk [vmem:[#allocation2 + $0x128] sm:$0xff] %vm404_vm0, %v3644_v11  ;;  %v2161_v50 = vsel %vm1950_vm2, %v2158_v6, %v13387_v27  ;;  %v1632_v58 = vld [vmem:[#allocation2 + $0x148] sm:$0xff]  ;;  %v2034_v43 = vrot.slane %v1756_v55, 1  ;;  %7659 = vmatmul.mubr.msk.f32.gmra.mrb[34].mxu1 %vm404_vm0, %v11198_v2  ;;  %v13536_v21 = vrot.slane %v11047_v19, 2 }
 0x208   : > { %v2982_v51 = vsel %vm2899_vm3, %v13535_v30, %v13534_v56  ;;  %v1343_v32 = vmul.f32 %v10622_v18, %v11165_v14  ;;  %3825 = vst.msk [vmem:[#allocation2 + $0x320] sm:$0xff] %vm404_vm0, %v3707_v60  ;;  %v2642_v22 = vld [vmem:[#allocation2 + $0x330] sm:$0xff]  ;;  %v11233_v29 = vsel %vm2899_vm3, %v3107_v12, %v13386_v47  ;;  %v1462_v11 = vadd.f32 %v1344_v61, %v631_v34  ;;  %v3875_v55 = vld [vmem:[#allocation2 + $0x100] ss:$2 sm:$0xff]  ;;  %v3993_v56 = vld [vmem:[#allocation2 + $0x101] ss:$2 sm:$0xff] }
 0x209   : > { %3410 = vst.msk [vmem:[#allocation2 + $0x138] sm:$0xff] %vm404_vm0, %v3292_v37  ;;  %v3108_v6 = vsel %vm2899_vm3, %v13536_v21, %v3107_v12  ;;  %v11237_v8 = vmul.f32 %v10693_v59, %v11165_v14  ;;  %7661 = vmatprep.mubr.msk.f32.mxu1 %vm8300_vm1, %v13463_v24  ;;  %v3355_v60 = vadd.f32 %v11126_v9, %v2642_v22  ;;  %v1695_v19 = vld [vmem:[#allocation2 + $0x340] sm:$0xff]  ;;  %v13537_v12 = vrot.slane %v11078_v20, 1  ;;  %v1696_v37 = vld [vmem:[#allocation2 + $0x348] sm:$0xff] }
 0x20a   : > { %v2408_v61 = vadd.f32 %v2161_v50, %v1695_v19  ;;  %v2983_v47 = vrot.slane %v11204_v3, 2  ;;  %1580 = vst.msk [vmem:[#allocation2 + $0x358] sm:$0xff] %vm404_vm0, %v1462_v11  ;;  %v11251_v27 = vmul.f32 %v10693_v59, %v11150_v28  ;;  %v3527_v9 = vld [vmem:[#allocation2 + $0x130] sm:$0xff]  ;;  %v3590_v22 = vld [vmem:[#allocation2 + $0x328] sm:$0xff]  ;;  %v1461_v30 = vadd.f32 %v1343_v32, %v630_v39 }
 0x20b   : > { %v2035_v34 = vsel %vm1950_vm2, %v13537_v12, %v2034_v43  ;;  %3473 = vst.msk [vmem:[#allocation2 + $0x330] sm:$0xff] %vm404_vm0, %v3355_v60  ;;  %v2162_v20 = vrot.slane %v11237_v8, 1  ;;  %v11257_v50 = vmul.f32 %v10724_v53, %v11165_v14  ;;  %v3645_v3 = vmax.f32 %v3527_v9, 0.0  ;;  %v2580_v19 = vld [vmem:[#allocation2 + $0x140] sm:$0xff]  ;;  %v569_v39 = vld [vmem:[#allocation2 + $0x168] sm:$0xff]  ;;  %v11269_v14 = vpop.permute.xlu1 %1190 }
 0x20c   : > { %v2345_v21 = vadd.f32 %v2035_v34, %v1632_v58  ;;  %v11259_v58 = vmax.f32 %v3875_v55, %v3993_v56  ;;  %v3708_v11 = vmax.f32 %v3590_v22, 0.0  ;;  %2526 = vst.msk [vmem:[#allocation2 + $0x340] sm:$0xff] %vm404_vm0, %v2408_v61  ;;  %v11265_v60 = vmul.f32 %v10724_v53, %v11150_v28  ;;  %1579 = vst.msk [vmem:[#allocation2 + $0x350] sm:$0xff] %vm404_vm0, %v1461_v30  ;;  %v3939_v9 = vld [vmem:[#allocation2 + $0x300] ss:$2 sm:$0xff]  ;;  %v11280_v22 = vpop.permute.xlu0 %1185 }
 0x20d   : > { %v2643_v12 = vld [vmem:[#allocation2 + $0x338] sm:$0xff]  ;;  %v1282_v32 = vmul.f32 %v10622_v18, %v11208_v4  ;;  %v3293_v8 = vadd.f32 %v2982_v51, %v2580_v19  ;;  %v1633_v56 = vld [vmem:[#allocation2 + $0x150] sm:$0xff]  ;;  %v13539_v34 = vrot.slane %v11188_v23, 1  ;;  %v4057_v18 = vld [vmem:[#allocation2 + $0x301] ss:$2 sm:$0xff]  ;;  %3763 = vst.msk [vmem:[#allocation2 + $0x130] sm:$0xff] %vm404_vm0, %v3645_v3 }
 0x20e   : > { %13538 = vst [vmem:[#allocation38_spill] sm:$0xff] %v11259_v58  ;;  %2463 = vst.msk [vmem:[#allocation2 + $0x148] sm:$0xff] %vm404_vm0, %v2345_v21  ;;  %v3356_v55 = vadd.f32 %v3108_v6, %v2643_v12  ;;  %v13540_v21 = vrot.slane %v11132_v49, 1  ;;  %7566 = vmatmul.mubr.msk.f32.gmra.mrb[32].mxu0 %vm404_vm0, %v11259_v58  ;;  %v13388_v49 = vrot.slane %v11251_v27, 1  ;;  %v568_v19 = vld [vmem:[#allocation2 + $0x160] sm:$0xff]  ;;  %v13542_v3 = vrot.slane %v11194_v5, 2 }
 0x20f   : > { %v2037_v61 = vsel %vm1950_vm2, %v2034_v43, %v13539_v34  ;;  %3826 = vst.msk [vmem:[#allocation2 + $0x328] sm:$0xff] %vm404_vm0, %v3708_v11  ;;  %v13541_v43 = vrot.slane %v11107_v48, 2  ;;  %7568 = vmatprep.mubr.msk.f32.mxu0 %vm8300_vm1, %v13463_v24  ;;  %3411 = vst.msk [vmem:[#allocation2 + $0x140] sm:$0xff] %vm404_vm0, %v3293_v8  ;;  %v13393_v48 = vrot.slane %v11257_v50, 2  ;;  %v11298_v34 = vld [vmem:[#allocation4] ss:$0 sm:$0xff]  ;;  %v11306_v8 = vmul.f32 %v10693_v59, %v11208_v4 }
 0x210   : > { %v2163_v28 = vsel %vm1950_vm2, %v13540_v21, %v2162_v20  ;;  %v2346_v51 = vadd.f32 %v2037_v61, %v1633_v56  ;;  %v3528_v12 = vld [vmem:[#allocation2 + $0x138] sm:$0xff]  ;;  %3474 = vst.msk [vmem:[#allocation2 + $0x338] sm:$0xff] %vm404_vm0, %v3356_v55  ;;  %v11295_v11 = vsel %vm2899_vm3, %v2983_v47, %v13542_v3  ;;  %v1400_v56 = vadd.f32 %v1282_v32, %v569_v39  ;;  %v633_v39 = vld [vmem:[#allocation2 + $0x368] sm:$0xff]  ;;  %v632_v32 = vld [vmem:[#allocation2 + $0x360] sm:$0xff] }
 0x211   : > { %v2984_v6 = vsel %vm2899_vm3, %v13541_v43, %v2983_v47  ;;  %v2409_v30 = vadd.f32 %v2163_v28, %v1696_v37  ;;  %v1281_v37 = vmul.f32 %v11298_v34, %v11223_v62  ;;  %v3646_v61 = vmax.f32 %v3528_v12, 0.0 }
 0x212   : > { %2464 = vst.msk [vmem:[#allocation2 + $0x150] sm:$0xff] %vm404_vm0, %v2346_v51  ;;  %v11310_v47 = vmul.f32 %v10693_v59, %v11223_v62  ;;  %v11312_v55 = vmax.f32 %v3939_v9, %v4057_v18  ;;  %1518 = vst.msk [vmem:[#allocation2 + $0x168] sm:$0xff] %vm404_vm0, %v1400_v56  ;;  %v11318_v21 = vmul.f32 %v10724_v53, %v11208_v4  ;;  %v3591_v43 = vld [vmem:[#allocation2 + $0x330] sm:$0xff]  ;;  %v1634_v18 = vld [vmem:[#allocation2 + $0x158] sm:$0xff] }
 0x213   : > { %2527 = vst.msk [vmem:[#allocation2 + $0x348] sm:$0xff] %vm404_vm0, %v2409_v30  ;;  %v1399_v28 = vadd.f32 %v1281_v37, %v568_v19  ;;  %v1346_v51 = vmul.f32 %v11298_v34, %v11269_v14  ;;  %3764 = vst.msk [vmem:[#allocation2 + $0x138] sm:$0xff] %vm404_vm0, %v3646_v61  ;;  %v2165_v9 = vsel %vm1950_vm2, %v2162_v20, %v13388_v49  ;;  %v11335_v19 = vpop.permute.xlu1 %880  ;;  %v3709_v3 = vmax.f32 %v3591_v43, 0.0  ;;  %v2644_v56 = vld [vmem:[#allocation2 + $0x340] sm:$0xff]  ;;  %v11347_v30 = vpop.permute.xlu0 %875  ;;  %v1697_v2 = vld [vmem:[#allocation2 + $0x350] sm:$0xff] }
 0x214   : > { %13543 = vst [vmem:[#allocation39_spill] sm:$0xff] %v11312_v55  ;;  %v11329_v12 = vmul.f32 %v10724_v53, %v11223_v62  ;;  %7662 = vmatmul.mubr.msk.f32.gmra.mrb[36].mxu1 %vm404_vm0, %v11312_v55  ;;  %v1345_v4 = vmul.f32 %v11298_v34, %v11280_v22  ;;  %v13544_v20 = vrot.slane %v11141_v33, 2  ;;  %v11345_v49 = vmul.f32 %v10693_v59, %v11280_v22  ;;  %v3995_v59 = vld [vmem:[#allocation2 + $0x111] ss:$2 sm:$0xff] }
 0x215   : > { %v2581_v37 = vld [vmem:[#allocation2 + $0x148] sm:$0xff]  ;;  %1517 = vst.msk [vmem:[#allocation2 + $0x160] sm:$0xff] %vm404_vm0, %v1399_v28  ;;  %v1464_v62 = vadd.f32 %v1346_v51, %v633_v39  ;;  %7664 = vmatprep.mubr.msk.f32.mxu1 %vm8300_vm1, %v13463_v24  ;;  %v3357_v43 = vadd.f32 %v11233_v29, %v2644_v56  ;;  %v2040_v33 = vrot.slane %v11306_v8, 1  ;;  %v13546_v39 = vrot.slane %v11188_v23, 1  ;;  %v3877_v51 = vld [vmem:[#allocation2 + $0x110] ss:$2 sm:$0xff] }
 0x216   : > { %v3112_v61 = vsel %vm2899_vm3, %v13544_v20, %v13393_v48  ;;  %v3294_v55 = vadd.f32 %v2984_v6, %v2581_v37  ;;  %v13545_v20 = vrot.slane %v11310_v47, 1  ;;  %3827 = vst.msk [vmem:[#allocation2 + $0x330] sm:$0xff] %vm404_vm0, %v3709_v3  ;;  %v2410_v48 = vadd.f32 %v2165_v9, %v1697_v2  ;;  %v11361_v29 = vld [vmem:[#allocation4 + $0x1] ss:$0 sm:$0xff]  ;;  %v571_v56 = vld [vmem:[#allocation2 + $0x178] sm:$0xff]  ;;  %v3529_v23 = vld [vmem:[#allocation2 + $0x140] sm:$0xff] }
 0x217   : > { %1582 = vst.msk [vmem:[#allocation2 + $0x368] sm:$0xff] %vm404_vm0, %v1464_v62  ;;  %v11365_v6 = vmul.f32 %v11361_v29, %v11269_v14  ;;  %3475 = vst.msk [vmem:[#allocation2 + $0x340] sm:$0xff] %vm404_vm0, %v3357_v43  ;;  %v3592_v37 = vld [vmem:[#allocation2 + $0x338] sm:$0xff]  ;;  %v2987_v2 = vrot.slane %v11329_v12, 2  ;;  %v1463_v3 = vadd.f32 %v1345_v4, %v632_v32  ;;  %v11373_v62 = vmul.f32 %v10724_v53, %v11280_v22  ;;  %v11386_v12 = vpop.permute.xlu1 %1200 }
 0x218   : > { %v2039_v28 = vsel %vm1950_vm2, %v13546_v39, %v13545_v20  ;;  %3412 = vst.msk [vmem:[#allocation2 + $0x148] sm:$0xff] %vm404_vm0, %v3294_v55  ;;  %v1698_v9 = vld [vmem:[#allocation2 + $0x358] sm:$0xff]  ;;  %v3647_v20 = vmax.f32 %v3529_v23, 0.0  ;;  %v3710_v39 = vmax.f32 %v3592_v37, 0.0  ;;  %2528 = vst.msk [vmem:[#allocation2 + $0x350] sm:$0xff] %vm404_vm0, %v2410_v48  ;;  %v11377_v43 = vmax.f32 %v3877_v51, %v3995_v59  ;;  %v570_v51 = vld [vmem:[#allocation2 + $0x170] sm:$0xff]  ;;  %v11403_v59 = vpop.permute.xlu0 %1195 }
 0x219   : > { %v2347_v25 = vadd.f32 %v2039_v28, %v1634_v18  ;;  %v2166_v18 = vrot.slane %v11345_v49, 1  ;;  %v2582_v28 = vld [vmem:[#allocation2 + $0x150] sm:$0xff]  ;;  %v1284_v55 = vmul.f32 %v11298_v34, %v11335_v19  ;;  %1581 = vst.msk [vmem:[#allocation2 + $0x360] sm:$0xff] %vm404_vm0, %v1463_v3  ;;  %v13548_v53 = vrot.slane %v11251_v27, 1 }
 0x21a   : > { %v2645_v26 = vld [vmem:[#allocation2 + $0x348] sm:$0xff]  ;;  %13547 = vst [vmem:[#allocation40_spill] sm:$0xff] %v11377_v43  ;;  %v3295_v32 = vadd.f32 %v11295_v11, %v2582_v28  ;;  %3765 = vst.msk [vmem:[#allocation2 + $0x140] sm:$0xff] %vm404_vm0, %v3647_v20  ;;  %v13550_v48 = vrot.slane %v11257_v50, 2  ;;  %7569 = vmatmul.mubr.msk.f32.gmra.mrb[34].mxu0 %vm404_vm0, %v11377_v43  ;;  %v13551_v23 = vrot.slane %v11310_v47, 1  ;;  %v13400_v37 = vrot.slane %v11365_v6, 1 }
 0x21b   : > { %2465 = vst.msk [vmem:[#allocation2 + $0x158] sm:$0xff] %vm404_vm0, %v2347_v25  ;;  %v3358_v49 = vadd.f32 %v3112_v61, %v2645_v26  ;;  %v2167_v22 = vsel %vm1950_vm2, %v13548_v53, %v2166_v18  ;;  %3828 = vst.msk [vmem:[#allocation2 + $0x338] sm:$0xff] %vm404_vm0, %v3710_v39  ;;  %v13549_v25 = vrot.slane %v11265_v60, 2  ;;  %v11395_v11 = vld [vmem:[#allocation4 + $0x2] ss:$0 sm:$0xff]  ;;  %v1402_v61 = vadd.f32 %v1284_v55, %v571_v56 }
 0x21c   : > { %v11399_v26 = vmul.f32 %v11395_v11, %v11269_v14  ;;  %v2411_v27 = vadd.f32 %v2167_v22, %v1698_v9  ;;  %3413 = vst.msk [vmem:[#allocation2 + $0x150] sm:$0xff] %vm404_vm0, %v3295_v32  ;;  %v1635_v50 = vld [vmem:[#allocation2 + $0x160] sm:$0xff]  ;;  %v2041_v14 = vsel %vm1950_vm2, %v13551_v23, %v2040_v33  ;;  %v1283_v9 = vmul.f32 %v11298_v34, %v11347_v30  ;;  %v3941_v3 = vld [vmem:[#allocation2 + $0x310] ss:$2 sm:$0xff]  ;;  %v4059_v20 = vld [vmem:[#allocation2 + $0x311] ss:$2 sm:$0xff]  ;;  %v11469_v8 = vpop.permute.xlu0 %885 }
 0x21d   : > { %v3114_v4 = vsel %vm2899_vm3, %v13550_v48, %v13549_v25  ;;  %3476 = vst.msk [vmem:[#allocation2 + $0x348] sm:$0xff] %vm404_vm0, %v3358_v49  ;;  %v11417_v56 = vmul.f32 %v11361_v29, %v11347_v30  ;;  %7571 = vmatprep.mubr.msk.f32.mxu0 %vm8300_vm1, %v13463_v24  ;;  %v2348_v39 = vadd.f32 %v2041_v14, %v1635_v50  ;;  %v13552_v28 = vrot.slane %v11194_v5, 2  ;;  %v1636_v22 = vld [vmem:[#allocation2 + $0x168] sm:$0xff]  ;;  %v635_v14 = vld [vmem:[#allocation2 + $0x378] sm:$0xff] }
 0x21e   : > { %v13553_v55 = vrot.slane %v11318_v21, 2  ;;  %2529 = vst.msk [vmem:[#allocation2 + $0x358] sm:$0xff] %vm404_vm0, %v2411_v27  ;;  %v13402_v49 = vrot.slane %v11373_v62, 2  ;;  %1520 = vst.msk [vmem:[#allocation2 + $0x178] sm:$0xff] %vm404_vm0, %v1402_v61  ;;  %v11434_v53 = vmul.f32 %v11361_v29, %v11335_v19  ;;  %v11438_v5 = vmul.f32 %v11395_v11, %v11335_v19 }
 0x21f   : > { %v2988_v47 = vsel %vm2899_vm3, %v13552_v28, %v2987_v2  ;;  %v1401_v25 = vadd.f32 %v1283_v9, %v570_v51  ;;  %v13401_v48 = vrot.slane %v11417_v56, 1  ;;  %v3530_v50 = vld [vmem:[#allocation2 + $0x148] sm:$0xff]  ;;  %2466 = vst.msk [vmem:[#allocation2 + $0x160] sm:$0xff] %vm404_vm0, %v2348_v39  ;;  %v11445_v61 = vmul.f32 %v11395_v11, %v11347_v30  ;;  %v2646_v9 = vld [vmem:[#allocation2 + $0x350] sm:$0xff] }
 0x220   : > { %v11427_v32 = vsel %vm2899_vm3, %v2987_v2, %v13553_v55  ;;  %v3593_v2 = vld [vmem:[#allocation2 + $0x340] sm:$0xff]  ;;  %v11447_v23 = vmax.f32 %v3941_v3, %v4059_v20  ;;  %v1348_v19 = vmul.f32 %v11298_v34, %v11386_v12  ;;  %v3648_v51 = vmax.f32 %v3530_v50, 0.0  ;;  %v11460_v3 = vpop.permute.xlu1 %890 }
 0x221   : > { %v3711_v28 = vmax.f32 %v3593_v2, 0.0  ;;  %v2169_v39 = vsel %vm1950_vm2, %v2166_v18, %v13400_v37  ;;  %1519 = vst.msk [vmem:[#allocation2 + $0x170] sm:$0xff] %vm404_vm0, %v1401_v25  ;;  %v2043_v30 = vsel %vm1950_vm2, %v2040_v33, %v13401_v48  ;;  %v3359_v20 = vadd.f32 %v3114_v4, %v2646_v9  ;;  %v1699_v2 = vld [vmem:[#allocation2 + $0x360] sm:$0xff]  ;;  %v634_v9 = vld [vmem:[#allocation2 + $0x370] sm:$0xff]  ;;  %v1700_v48 = vld [vmem:[#allocation2 + $0x368] sm:$0xff] }
 0x222   : > { %13554 = vst [vmem:[#allocation41_spill] sm:$0xff] %v11447_v23  ;;  %v2583_v55 = vld [vmem:[#allocation2 + $0x158] sm:$0xff]  ;;  %v13555_v50 = vrot.slane %v11265_v60, 2  ;;  %v2349_v18 = vadd.f32 %v2043_v30, %v1636_v22  ;;  %7665 = vmatmul.mubr.msk.f32.gmra.mrb[38].mxu1 %vm404_vm0, %v11447_v23  ;;  %v3879_v25 = vld [vmem:[#allocation2 + $0x120] ss:$2 sm:$0xff]  ;;  %3766 = vst.msk [vmem:[#allocation2 + $0x148] sm:$0xff] %vm404_vm0, %v3648_v51  ;;  %v2412_v33 = vadd.f32 %v2169_v39, %v1699_v2 }
 0x223   : > { %v3296_v27 = vadd.f32 %v2988_v47, %v2583_v55  ;;  %v3997_v37 = vld [vmem:[#allocation2 + $0x121] ss:$2 sm:$0xff]  ;;  %3829 = vst.msk [vmem:[#allocation2 + $0x340] sm:$0xff] %vm404_vm0, %v3711_v28  ;;  %v1466_v60 = vadd.f32 %v1348_v19, %v635_v14  ;;  %7667 = vmatprep.mubr.msk.f32.mxu1 %vm8300_vm1, %v13463_v24  ;;  %v11477_v22 = vpop.f32.mrb[0].mxu1  ;;  %v3531_v55 = vld [vmem:[#allocation2 + $0x150] sm:$0xff]  ;;  %3477 = vst.msk [vmem:[#allocation2 + $0x350] sm:$0xff] %vm404_vm0, %v3359_v20  ;;  %v11485_v51 = vmul.f32 %v11361_v29, %v11386_v12 }
 0x224   : > { %v3116_v17 = vsel %vm2899_vm3, %v13555_v50, %v13402_v49  ;;  %v3594_v30 = vld [vmem:[#allocation2 + $0x348] sm:$0xff]  ;;  %2467 = vst.msk [vmem:[#allocation2 + $0x168] sm:$0xff] %vm404_vm0, %v2349_v18  ;;  %v2991_v28 = vrot.slane %v11445_v61, 2  ;;  %v1347_v14 = vmul.f32 %v11298_v34, %v11403_v59  ;;  %v11491_v19 = vmul.f32 %v11361_v29, %v11403_v59  ;;  %v7609_v20 = vpop.f32.mrb[1].mxu1  ;;  %2530 = vst.msk [vmem:[#allocation2 + $0x360] sm:$0xff] %vm404_vm0, %v2412_v33 }
 0x225   : > { %3414 = vst.msk [vmem:[#allocation2 + $0x158] sm:$0xff] %vm404_vm0, %v3296_v27  ;;  %v573_v39 = vld [vmem:[#allocation2 + $0x188] sm:$0xff]  ;;  %v3649_v2 = vmax.f32 %v3531_v55, 0.0  ;;  %v3712_v50 = vmax.f32 %v3594_v30, 0.0  ;;  %v2647_v27 = vld [vmem:[#allocation2 + $0x358] sm:$0xff]  ;;  %1584 = vst.msk [vmem:[#allocation2 + $0x378] sm:$0xff] %vm404_vm0, %v1466_v60  ;;  %v11495_v61 = vmax.f32 %v3879_v25, %v3997_v37  ;;  %v1286_v18 = vmul.f32 %v11298_v34, %v11460_v3  ;;  %v11519_v30 = vpop.permute.xlu1 %1210 }
 0x226   : > { %v3360_v47 = vadd.f32 %v3116_v17, %v2647_v27  ;;  %v1465_v4 = vadd.f32 %v1347_v14, %v634_v9  ;;  %v2170_v49 = vrot.slane %v11491_v19, 1  ;;  %v11502_v20 = vmul.f32 %v11395_v11, %v11403_v59  ;;  %v2584_v33 = vld [vmem:[#allocation2 + $0x160] sm:$0xff] }
 0x227   : > { %13556 = vst [vmem:[#allocation42_spill] sm:$0xff] %v11495_v61  ;;  %3767 = vst.msk [vmem:[#allocation2 + $0x150] sm:$0xff] %vm404_vm0, %v3649_v2  ;;  %v13557_v37 = vrot.slane %v11399_v26, 2  ;;  %v13558_v25 = vrot.slane %v11373_v62, 2  ;;  %v11513_v17 = vmul.f32 %v11395_v11, %v11386_v12  ;;  %7572 = vmatmul.mubr.msk.f32.gmra.mrb[36].mxu0 %vm404_vm0, %v11495_v61  ;;  %v1404_v59 = vadd.f32 %v1286_v18, %v573_v39  ;;  %v572_v9 = vld [vmem:[#allocation2 + $0x180] sm:$0xff] }
 0x228   : > { %3830 = vst.msk [vmem:[#allocation2 + $0x348] sm:$0xff] %vm404_vm0, %v3712_v50  ;;  %v1285_v55 = vmul.f32 %v11298_v34, %v11469_v8  ;;  %v3297_v14 = vadd.f32 %v11427_v32, %v2584_v33  ;;  %3478 = vst.msk [vmem:[#allocation2 + $0x358] sm:$0xff] %vm404_vm0, %v3360_v47  ;;  %v1637_v62 = vld [vmem:[#allocation2 + $0x170] sm:$0xff]  ;;  %v13559_v19 = vrot.slane %v11434_v53, 1  ;;  %v13560_v12 = vrot.slane %v11417_v56, 1  ;;  %v11535_v47 = vpop.permute.xlu0 %1205  ;;  %7574 = vmatprep.mubr.msk.f32.mxu0 %vm8300_vm1, %v13463_v24 }
 0x229   : > { %v3118_v60 = vsel %vm2899_vm3, %v13558_v25, %v13557_v37  ;;  %v13561_v50 = vrot.slane %v11318_v21, 2  ;;  %1583 = vst.msk [vmem:[#allocation2 + $0x370] sm:$0xff] %vm404_vm0, %v1465_v4  ;;  %v13562_v27 = vrot.slane %v11365_v6, 1  ;;  %v3943_v32 = vld [vmem:[#allocation2 + $0x320] ss:$2 sm:$0xff]  ;;  %v13563_v37 = vrot.slane %v11438_v5, 2 }
 0x22a   : > { %v2045_v2 = vsel %vm1950_vm2, %v13560_v12, %v13559_v19  ;;  %v4061_v33 = vld [vmem:[#allocation2 + $0x321] ss:$2 sm:$0xff]  ;;  %1522 = vst.msk [vmem:[#allocation2 + $0x188] sm:$0xff] %vm404_vm0, %v1404_v59  ;;  %v11546_v6 = vpop.f32.mrb[2].mxu1  ;;  %v11548_v19 = vpop.f32.mrb[0].mxu0  ;;  %3415 = vst.msk [vmem:[#allocation2 + $0x160] sm:$0xff] %vm404_vm0, %v3297_v14 }
 0x22b   : > { %v2992_v39 = vsel %vm2899_vm3, %v13561_v50, %v2991_v28  ;;  %v2171_v18 = vsel %vm1950_vm2, %v13562_v27, %v2170_v49  ;;  %v2350_v56 = vadd.f32 %v2045_v2, %v1637_v62  ;;  %v11542_v21 = vsel %vm2899_vm3, %v2991_v28, %v13563_v37  ;;  %v7612_v50 = vpop.f32.mrb[3].mxu1  ;;  %v3595_v59 = vld [vmem:[#allocation2 + $0x350] sm:$0xff]  ;;  %v7519_v12 = vpop.f32.mrb[1].mxu0  ;;  %v2648_v23 = vld [vmem:[#allocation2 + $0x360] sm:$0xff] }
 0x22c   : > { %v2413_v4 = vadd.f32 %v2171_v18, %v1700_v48  ;;  %v11554_v62 = vmul.f32 %v11361_v29, %v11460_v3  ;;  %v1403_v2 = vadd.f32 %v1285_v55, %v572_v9  ;;  %v11558_v28 = vmul.f32 %v11361_v29, %v11469_v8  ;;  %v637_v48 = vld [vmem:[#allocation2 + $0x388] sm:$0xff]  ;;  %v3532_v27 = vld [vmem:[#allocation2 + $0x158] sm:$0xff]  ;;  %v636_v12 = vld [vmem:[#allocation2 + $0x380] sm:$0xff] }
 0x22d   : > { %2468 = vst.msk [vmem:[#allocation2 + $0x170] sm:$0xff] %vm404_vm0, %v2350_v56  ;;  %v2585_v18 = vld [vmem:[#allocation2 + $0x168] sm:$0xff]  ;;  %v11565_v37 = vmul.f32 %v11395_v11, %v11469_v8  ;;  %v11567_v9 = vmax.f32 %v3943_v32, %v4061_v33  ;;  %v1350_v55 = vmul.f32 %v11298_v34, %v11519_v30  ;;  %v3713_v50 = vmax.f32 %v3595_v59, 0.0  ;;  %v1638_v56 = vld [vmem:[#allocation2 + $0x178] sm:$0xff] }
 0x22e   : > { %2531 = vst.msk [vmem:[#allocation2 + $0x368] sm:$0xff] %vm404_vm0, %v2413_v4  ;;  %v3650_v25 = vmax.f32 %v3532_v27, 0.0  ;;  %v3298_v15 = vadd.f32 %v2992_v39, %v2585_v18  ;;  %1521 = vst.msk [vmem:[#allocation2 + $0x180] sm:$0xff] %vm404_vm0, %v1403_v2  ;;  %v2046_v14 = vrot.slane %v11558_v28, 1  ;;  %v3361_v4 = vadd.f32 %v3118_v60, %v2648_v23  ;;  %v11582_v39 = vpop.permute.xlu1 %900  ;;  %v3999_v59 = vld [vmem:[#allocation2 + $0x131] ss:$2 sm:$0xff] }
 0x22f   : > { %13564 = vst [vmem:[#allocation43_spill] sm:$0xff] %v11567_v9  ;;  %v13565_v45 = vrot.slane %v11485_v51, 1  ;;  %v11578_v32 = vmul.f32 %v11395_v11, %v11460_v3  ;;  %7668 = vmatmul.mubr.msk.f32.gmra.mrb[40].mxu1 %vm404_vm0, %v11567_v9  ;;  %v1468_v33 = vadd.f32 %v1350_v55, %v637_v48  ;;  %3831 = vst.msk [vmem:[#allocation2 + $0x350] sm:$0xff] %vm404_vm0, %v3713_v50  ;;  %v13566_v23 = vrot.slane %v11502_v20, 2  ;;  %v3881_v48 = vld [vmem:[#allocation2 + $0x130] ss:$2 sm:$0xff]  ;;  %v11614_v55 = vpop.permute.xlu0 %895 }
 0x230   : > { %3768 = vst.msk [vmem:[#allocation2 + $0x158] sm:$0xff] %vm404_vm0, %v3650_v25  ;;  %3416 = vst.msk [vmem:[#allocation2 + $0x168] sm:$0xff] %vm404_vm0, %v3298_v15  ;;  %v13568_v60 = vrot.slane %v11434_v53, 1  ;;  %v1349_v28 = vmul.f32 %v11298_v34, %v11535_v47  ;;  %7670 = vmatprep.mubr.msk.f32.mxu1 %vm8300_vm1, %v13463_v24  ;;  %v3596_v15 = vld [vmem:[#allocation2 + $0x358] sm:$0xff]  ;;  %v11604_v53 = vmul.f32 %v11361_v29, %v11519_v30  ;;  %v4001_v58 = vld [vmem:[#allocation2 + $0x141] ss:$2 sm:$0xff] }
 0x231   : > { %v2173_v8 = vsel %vm1950_vm2, %v2170_v49, %v13565_v45  ;;  %v13567_v45 = vrot.slane %v11399_v26, 2  ;;  %3479 = vst.msk [vmem:[#allocation2 + $0x360] sm:$0xff] %vm404_vm0, %v3361_v4  ;;  %v1701_v26 = vld [vmem:[#allocation2 + $0x370] sm:$0xff]  ;;  %1586 = vst.msk [vmem:[#allocation2 + $0x388] sm:$0xff] %vm404_vm0, %v1468_v33  ;;  %v11608_v27 = vmul.f32 %v11395_v11, %v11519_v30  ;;  %v11612_v18 = vmul.f32 %v11361_v29, %v11535_v47  ;;  %v11617_v33 = vpop.f32.mrb[4].mxu1  ;;  %v575_v9 = vld [vmem:[#allocation2 + $0x198] sm:$0xff] }
 0x232   : > { %v2047_v2 = vsel %vm1950_vm2, %v13568_v60, %v2046_v14  ;;  %v3714_v50 = vmax.f32 %v3596_v15, 0.0  ;;  %v2414_v4 = vadd.f32 %v2173_v8, %v1701_v26  ;;  %v1702_v60 = vld [vmem:[#allocation2 + $0x378] sm:$0xff]  ;;  %v11625_v3 = vmax.f32 %v3881_v48, %v3999_v59  ;;  %v574_v59 = vld [vmem:[#allocation2 + $0x190] sm:$0xff]  ;;  %v11651_v48 = vpop.permute.xlu1 %1220 }
 0x233   : > { %v3120_v49 = vsel %vm2899_vm3, %v13567_v45, %v13566_v23  ;;  %v2351_v25 = vadd.f32 %v2047_v2, %v1638_v56  ;;  %v2995_v56 = vrot.slane %v11565_v37, 2  ;;  %v1467_v23 = vadd.f32 %v1349_v28, %v636_v12  ;;  %v3533_v45 = vld [vmem:[#allocation2 + $0x160] sm:$0xff]  ;;  %v7615_v37 = vpop.f32.mrb[5].mxu1 }
 0x234   : > { %v2174_v30 = vrot.slane %v11612_v18, 1  ;;  %v11623_v2 = vmul.f32 %v11395_v11, %v11535_v47  ;;  %13569 = vst [vmem:[#allocation44_spill] sm:$0xff] %v11625_v3  ;;  %v1288_v8 = vmul.f32 %v11298_v34, %v11582_v39  ;;  %v3651_v12 = vmax.f32 %v3533_v45, 0.0  ;;  %3832 = vst.msk [vmem:[#allocation2 + $0x358] sm:$0xff] %vm404_vm0, %v3714_v50  ;;  %v2586_v28 = vld [vmem:[#allocation2 + $0x170] sm:$0xff]  ;;  %7575 = vmatmul.mubr.msk.f32.gmra.mrb[38].mxu0 %vm404_vm0, %v11625_v3 }
 0x235   : > { %2469 = vst.msk [vmem:[#allocation2 + $0x178] sm:$0xff] %vm404_vm0, %v2351_v25  ;;  %2532 = vst.msk [vmem:[#allocation2 + $0x370] sm:$0xff] %vm404_vm0, %v2414_v4  ;;  %v2649_v15 = vld [vmem:[#allocation2 + $0x368] sm:$0xff]  ;;  %v13570_v26 = vrot.slane %v11513_v17, 2  ;;  %v13571_v25 = vrot.slane %v11502_v20, 2  ;;  %v1287_v18 = vmul.f32 %v11298_v34, %v11614_v55  ;;  %v3299_v50 = vadd.f32 %v11542_v21, %v2586_v28  ;;  %v1639_v4 = vld [vmem:[#allocation2 + $0x180] sm:$0xff]  ;;  %7577 = vmatprep.mubr.msk.f32.mxu0 %vm8300_vm1, %v13463_v24 }
 0x236   : > { %1585 = vst.msk [vmem:[#allocation2 + $0x380] sm:$0xff] %vm404_vm0, %v1467_v23  ;;  %v3362_v45 = vadd.f32 %v3120_v49, %v2649_v15  ;;  %v13572_v37 = vrot.slane %v11554_v62, 1  ;;  %v13573_v20 = vrot.slane %v11485_v51, 1  ;;  %v3945_v23 = vld [vmem:[#allocation2 + $0x330] ss:$2 sm:$0xff]  ;;  %3769 = vst.msk [vmem:[#allocation2 + $0x160] sm:$0xff] %vm404_vm0, %v3651_v12  ;;  %v11714_v16 = vpop.permute.xlu1 %910 }
 0x237   : > { %v11636_v47 = vsel %vm2899_vm3, %v13571_v25, %v13570_v26  ;;  %v4063_v25 = vld [vmem:[#allocation2 + $0x331] ss:$2 sm:$0xff]  ;;  %v13415_v49 = vrot.slane %v11604_v53, 1  ;;  %3417 = vst.msk [vmem:[#allocation2 + $0x170] sm:$0xff] %vm404_vm0, %v3299_v50  ;;  %v3534_v51 = vld [vmem:[#allocation2 + $0x168] sm:$0xff]  ;;  %v11666_v28 = vpop.f32.mrb[2].mxu0  ;;  %v11672_v50 = vmul.f32 %v11361_v29, %v11582_v39 }
 0x238   : > { %v2049_v61 = vsel %vm1950_vm2, %v2046_v14, %v13572_v37  ;;  %v2175_v26 = vsel %vm1950_vm2, %v13573_v20, %v2174_v30  ;;  %3480 = vst.msk [vmem:[#allocation2 + $0x368] sm:$0xff] %vm404_vm0, %v3362_v45  ;;  %v13574_v14 = vrot.slane %v11438_v5, 2  ;;  %v11664_v20 = vpop.permute.xlu0 %1215  ;;  %v11676_v5 = vmul.f32 %v11361_v29, %v11614_v55 }
 0x239   : > { %v2352_v21 = vadd.f32 %v2049_v61, %v1639_v4  ;;  %v2415_v15 = vadd.f32 %v2175_v26, %v1702_v60  ;;  %v1406_v61 = vadd.f32 %v1288_v8, %v575_v9  ;;  %v1405_v4 = vadd.f32 %v1287_v18, %v574_v59  ;;  %v3597_v60 = vld [vmem:[#allocation2 + $0x360] sm:$0xff]  ;;  %v639_v8 = vld [vmem:[#allocation2 + $0x398] sm:$0xff]  ;;  %v7522_v59 = vpop.f32.mrb[3].mxu0 }
 0x23a   : > { %v2996_v37 = vsel %vm2899_vm3, %v13574_v14, %v2995_v56  ;;  %v3652_v26 = vmax.f32 %v3534_v51, 0.0  ;;  %v11678_v9 = vmax.f32 %v3945_v23, %v4063_v25  ;;  %v3715_v18 = vmax.f32 %v3597_v60, 0.0  ;;  %v638_v23 = vld [vmem:[#allocation2 + $0x390] sm:$0xff]  ;;  %v4985_v25 = vld [vmem:[#allocation8 + $0x30] sm:$0xff]  ;;  %v4986_v14 = vld [vmem:[#allocation8 + $0x38] sm:$0xff] }
 0x23b   : > { %2470 = vst.msk [vmem:[#allocation2 + $0x180] sm:$0xff] %vm404_vm0, %v2352_v21  ;;  %2533 = vst.msk [vmem:[#allocation2 + $0x378] sm:$0xff] %vm404_vm0, %v2415_v15  ;;  %v13576_v45 = vrot.slane %v11578_v32, 2  ;;  %v11686_v21 = vmul.f32 %v11395_v11, %v11582_v39  ;;  %v1352_v15 = vmul.f32 %v11298_v34, %v11651_v48  ;;  %v2050_v59 = vrot.slane %v11676_v5, 1 }
 0x23c   : > { %13575 = vst [vmem:[#allocation45_spill] sm:$0xff] %v11678_v9  ;;  %1524 = vst.msk [vmem:[#allocation2 + $0x198] sm:$0xff] %vm404_vm0, %v1406_v61  ;;  %v2587_v60 = vld [vmem:[#allocation2 + $0x178] sm:$0xff]  ;;  %v1640_v61 = vld [vmem:[#allocation2 + $0x188] sm:$0xff]  ;;  %7671 = vmatmul.mubr.msk.f32.gmra.mrb[42].mxu1 %vm404_vm0, %v11678_v9  ;;  %v1351_v39 = vmul.f32 %v11298_v34, %v11664_v20  ;;  %v13578_v5 = vrot.slane %v11513_v17, 2  ;;  %v11712_v9 = vmul.f32 %v11395_v11, %v11614_v55  ;;  %v13579_v17 = vrot.slane %v11554_v62, 1 }
 0x23d   : > { %v2998_v51 = vsel %vm2899_vm3, %v2995_v56, %v13576_v45  ;;  %1523 = vst.msk [vmem:[#allocation2 + $0x190] sm:$0xff] %vm404_vm0, %v1405_v4  ;;  %3770 = vst.msk [vmem:[#allocation2 + $0x168] sm:$0xff] %vm404_vm0, %v3652_v26  ;;  %v2177_v56 = vsel %vm1950_vm2, %v2174_v30, %v13415_v49  ;;  %v11702_v4 = vmul.f32 %v11361_v29, %v11664_v20  ;;  %v3883_v45 = vld [vmem:[#allocation2 + $0x140] ss:$2 sm:$0xff]  ;;  %v2650_v26 = vld [vmem:[#allocation2 + $0x370] sm:$0xff]  ;;  %v13577_v30 = vrot.slane %v11623_v2, 2 }
 0x23e   : > { %3833 = vst.msk [vmem:[#allocation2 + $0x360] sm:$0xff] %vm404_vm0, %v3715_v18  ;;  %v3300_v12 = vadd.f32 %v2996_v37, %v2587_v60  ;;  %v1703_v3 = vld [vmem:[#allocation2 + $0x380] sm:$0xff]  ;;  %v1470_v43 = vadd.f32 %v1352_v15, %v639_v8  ;;  %7673 = vmatprep.mubr.msk.f32.mxu1 %vm8300_vm1, %v13463_v24  ;;  %v3363_v37 = vadd.f32 %v11636_v47, %v2650_v26  ;;  %v577_v47 = vld [vmem:[#allocation2 + $0x1a8] sm:$0xff]  ;;  %v3535_v62 = vld [vmem:[#allocation2 + $0x170] sm:$0xff] }
 0x23f   : > { %v3124_v49 = vsel %vm2899_vm3, %v13578_v5, %v13577_v30  ;;  %v2416_v18 = vadd.f32 %v2177_v56, %v1703_v3  ;;  %v2051_v30 = vsel %vm1950_vm2, %v13579_v17, %v2050_v59  ;;  %v11728_v15 = vmul.f32 %v11361_v29, %v11651_v48  ;;  %v11730_v3 = vpop.permute.xlu0 %905  ;;  %v11732_v56 = vpop.f32.mrb[6].mxu1  ;;  %v3598_v26 = vld [vmem:[#allocation2 + $0x368] sm:$0xff] }
 0x240   : > { %3418 = vst.msk [vmem:[#allocation2 + $0x178] sm:$0xff] %vm404_vm0, %v3300_v12  ;;  %v2353_v8 = vadd.f32 %v2051_v30, %v1640_v61  ;;  %1588 = vst.msk [vmem:[#allocation2 + $0x398] sm:$0xff] %vm404_vm0, %v1470_v43  ;;  %v1469_v5 = vadd.f32 %v1351_v39, %v638_v23  ;;  %v11738_v12 = vmul.f32 %v11395_v11, %v11651_v48  ;;  %v1704_v43 = vld [vmem:[#allocation2 + $0x388] sm:$0xff]  ;;  %v2178_v61 = vrot.slane %v11702_v4, 1  ;;  %v7618_v39 = vpop.f32.mrb[7].mxu1 }
 0x241   : > { %3481 = vst.msk [vmem:[#allocation2 + $0x370] sm:$0xff] %vm404_vm0, %v3363_v37  ;;  %2534 = vst.msk [vmem:[#allocation2 + $0x380] sm:$0xff] %vm404_vm0, %v2416_v18  ;;  %v8074_v17 = vpack.c.bf16 %v4986_v14, %v4985_v25  ;;  %v11741_v23 = vmax.f32 %v3883_v45, %v4001_v58  ;;  %v3653_v30 = vmax.f32 %v3535_v62, 0.0  ;;  %v3716_v55 = vmax.f32 %v3598_v26, 0.0  ;;  %v4065_v62 = vld [vmem:[#allocation2 + $0x341] ss:$2 sm:$0xff] }
 0x242   : > { %v2588_v60 = vld [vmem:[#allocation2 + $0x180] sm:$0xff]  ;;  %v2651_v46 = vld [vmem:[#allocation2 + $0x378] sm:$0xff]  ;;  %2471 = vst.msk [vmem:[#allocation2 + $0x188] sm:$0xff] %vm404_vm0, %v2353_v8  ;;  %v2999_v37 = vrot.slane %v11712_v9, 2  ;;  %1587 = vst.msk [vmem:[#allocation2 + $0x390] sm:$0xff] %vm404_vm0, %v1469_v5  ;;  %v1290_v48 = vmul.f32 %v11298_v34, %v11714_v16  ;;  %v13580_v58 = vrot.slane %v11672_v50, 1  ;;  %v11771_v5 = vmul.f32 %v11361_v29, %v11730_v3 }
 0x243   : > { %v3301_v18 = vadd.f32 %v2998_v51, %v2588_v60  ;;  %v3364_v10 = vadd.f32 %v3124_v49, %v2651_v46  ;;  %v13581_v14 = vrot.slane %v11604_v53, 1  ;;  %8075 = vmatpush3.bf16.msra.mxu1 %v8074_v17  ;;  %v3947_v8 = vld [vmem:[#allocation2 + $0x340] ss:$2 sm:$0xff]  ;;  %3771 = vst.msk [vmem:[#allocation2 + $0x170] sm:$0xff] %vm404_vm0, %v3653_v30  ;;  %3834 = vst.msk [vmem:[#allocation2 + $0x368] sm:$0xff] %vm404_vm0, %v3716_v55  ;;  %v13428_v51 = vrot.slane %v11728_v15, 1  ;;  %v11759_v60 = vpop.permute.xlu1 %1230  ;;  %v11787_v39 = vpop.permute.xlu0 %1225 }
 0x244   : > { %v1641_v4 = vld [vmem:[#allocation2 + $0x190] sm:$0xff]  ;;  %v2053_v25 = vsel %vm1950_vm2, %v2050_v59, %v13580_v58  ;;  %7578 = vmatmul.mubr.msk.f32.gmra.mrb[40].mxu0 %vm404_vm0, %v11741_v23  ;;  %v1408_v49 = vadd.f32 %v1290_v48, %v577_v47  ;;  %v576_v59 = vld [vmem:[#allocation2 + $0x1a0] sm:$0xff]  ;;  %v11765_v53 = vmul.f32 %v11395_v11, %v11664_v20  ;;  %v1289_v55 = vmul.f32 %v11298_v34, %v11730_v3 }
 0x245   : > { %v2179_v45 = vsel %vm1950_vm2, %v13581_v14, %v2178_v61  ;;  %v2354_v9 = vadd.f32 %v2053_v25, %v1641_v4  ;;  %3419 = vst.msk [vmem:[#allocation2 + $0x180] sm:$0xff] %vm404_vm0, %v3301_v18  ;;  %3482 = vst.msk [vmem:[#allocation2 + $0x378] sm:$0xff] %vm404_vm0, %v3364_v10  ;;  %7580 = vmatprep.mubr.msk.f32.mxu0 %vm8300_vm1, %v13463_v24  ;;  %v13582_v26 = vrot.slane %v11608_v27, 2  ;;  %v13583_v10 = vrot.slane %v11623_v2, 2  ;;  %v1642_v2 = vld [vmem:[#allocation2 + $0x198] sm:$0xff]  ;;  %v5763_v25 = vld [vmem:[#allocation8 + $0x58] sm:$0xff] }
 0x246   : > { %v2417_v46 = vadd.f32 %v2179_v45, %v1704_v43  ;;  %1526 = vst.msk [vmem:[#allocation2 + $0x1a8] sm:$0xff] %vm404_vm0, %v1408_v49  ;;  %v11785_v17 = vmax.f32 %v3947_v8, %v4065_v62  ;;  %v11791_v48 = vmul.f32 %v11361_v29, %v11714_v16  ;;  %v1407_v18 = vadd.f32 %v1289_v55, %v576_v59  ;;  %v5762_v58 = vld [vmem:[#allocation8 + $0x50] sm:$0xff]  ;;  %v11794_v14 = vpop.f32.mrb[4].mxu0 }
 0x247   : > { %v3126_v43 = vsel %vm2899_vm3, %v13583_v10, %v13582_v26  ;;  %2472 = vst.msk [vmem:[#allocation2 + $0x190] sm:$0xff] %vm404_vm0, %v2354_v9  ;;  %v3536_v30 = vld [vmem:[#allocation2 + $0x178] sm:$0xff]  ;;  %v13429_v4 = vrot.slane %v11771_v5, 1  ;;  %v13585_v62 = vrot.slane %v11578_v32, 2  ;;  %v13586_v49 = vrot.slane %v11686_v21, 2  ;;  %v7525_v10 = vpop.f32.mrb[5].mxu0 }
 0x248   : > { %2535 = vst.msk [vmem:[#allocation2 + $0x388] sm:$0xff] %vm404_vm0, %v2417_v46  ;;  %13584 = vst [vmem:[#allocation46_spill] sm:$0xff] %v11785_v17  ;;  %v3599_v45 = vld [vmem:[#allocation2 + $0x370] sm:$0xff]  ;;  %v3654_v9 = vmax.f32 %v3536_v30, 0.0  ;;  %v2652_v8 = vld [vmem:[#allocation2 + $0x380] sm:$0xff]  ;;  %v2181_v59 = vsel %vm1950_vm2, %v2178_v61, %v13428_v51  ;;  %7674 = vmatmul.mubr.msk.f32.gmra.mrb[44].mxu1 %vm404_vm0, %v11785_v17  ;;  %v3127_v20 = vrot.slane %v11765_v53, 2  ;;  %v11821_v53 = vmul.f32 %v11395_v11, %v11730_v3 }
 0x249   : > { %v3000_v46 = vsel %vm2899_vm3, %v13585_v62, %v2999_v37  ;;  %v3002_v26 = vsel %vm2899_vm3, %v2999_v37, %v13586_v49  ;;  %v3885_v55 = vld [vmem:[#allocation2 + $0x150] ss:$2 sm:$0xff]  ;;  %v3717_v30 = vmax.f32 %v3599_v45, 0.0  ;;  %v3365_v32 = vadd.f32 %v3126_v43, %v2652_v8  ;;  %v2589_v47 = vld [vmem:[#allocation2 + $0x188] sm:$0xff]  ;;  %1525 = vst.msk [vmem:[#allocation2 + $0x1a0] sm:$0xff] %vm404_vm0, %v1407_v18  ;;  %7676 = vmatprep.mubr.msk.f32.mxu1 %vm8300_vm1, %v13463_v24  ;;  %v640_v18 = vld [vmem:[#allocation2 + $0x3a0] sm:$0xff]  ;;  %v11823_v8 = vpop.permute.xlu1 %920 }
 0x24a   : > { %v1705_v62 = vld [vmem:[#allocation2 + $0x390] sm:$0xff]  ;;  %v13587_v61 = vrot.slane %v11672_v50, 1  ;;  %3772 = vst.msk [vmem:[#allocation2 + $0x178] sm:$0xff] %vm404_vm0, %v3654_v9  ;;  %v3302_v13 = vadd.f32 %v3000_v46, %v2589_v47  ;;  %v11830_v10 = vmul.f32 %v11395_v11, %v11714_v16  ;;  %v1354_v47 = vmul.f32 %v11298_v34, %v11759_v60 }
 0x24b   : > { %v4003_v49 = vld [vmem:[#allocation2 + $0x151] ss:$2 sm:$0xff]  ;;  %v2418_v43 = vadd.f32 %v2181_v59, %v1705_v62  ;;  %3835 = vst.msk [vmem:[#allocation2 + $0x370] sm:$0xff] %vm404_vm0, %v3717_v30  ;;  %3483 = vst.msk [vmem:[#allocation2 + $0x380] sm:$0xff] %vm404_vm0, %v3365_v32  ;;  %v1353_v3 = vmul.f32 %v11298_v34, %v11787_v39  ;;  %v11841_v46 = vmul.f32 %v11361_v29, %v11759_v60  ;;  %v11849_v32 = vpop.permute.xlu0 %915  ;;  %v11851_v62 = vpop.f32.mrb[8].mxu1  ;;  %v13434_v40 = vrot.slane %v11821_v53, 2 }
 0x24c   : > { %v2055_v37 = vsel %vm1950_vm2, %v13587_v61, %v13429_v4  ;;  %v3600_v9 = vld [vmem:[#allocation2 + $0x378] sm:$0xff]  ;;  %3420 = vst.msk [vmem:[#allocation2 + $0x188] sm:$0xff] %vm404_vm0, %v3302_v13  ;;  %v11845_v16 = vmul.f32 %v11361_v29, %v11787_v39  ;;  %v8080_v59 = vpack.c.bf16 %v5763_v25, %v5762_v58  ;;  %v11847_v30 = vmax.f32 %v3885_v55, %v4003_v49  ;;  %v7621_v49 = vpop.f32.mrb[9].mxu1 }
 0x24d   : > { %v2355_v45 = vadd.f32 %v2055_v37, %v1642_v2  ;;  %v3537_v2 = vld [vmem:[#allocation2 + $0x180] sm:$0xff]  ;;  %2536 = vst.msk [vmem:[#allocation2 + $0x390] sm:$0xff] %vm404_vm0, %v2418_v43  ;;  %v3718_v37 = vmax.f32 %v3600_v9, 0.0  ;;  %v1471_v4 = vadd.f32 %v1353_v3, %v640_v18  ;;  %v1706_v58 = vld [vmem:[#allocation2 + $0x398] sm:$0xff]  ;;  %v13590_v18 = vrot.slane %v11791_v48, 1  ;;  %v11885_v49 = vpop.permute.xlu1 %930 }
 0x24e   : > { %v3655_v61 = vmax.f32 %v3537_v2, 0.0  ;;  %v2590_v13 = vld [vmem:[#allocation2 + $0x190] sm:$0xff]  ;;  %v2182_v25 = vrot.slane %v11845_v16, 1  ;;  %8081 = vmatpush3.bf16.msra.mxu0 %v8080_v59  ;;  %v579_v55 = vld [vmem:[#allocation2 + $0x1b8] sm:$0xff]  ;;  %v13589_v2 = vrot.slane %v11738_v12, 2  ;;  %v1292_v9 = vmul.f32 %v11298_v34, %v11823_v8 }
 0x24f   : > { %2473 = vst.msk [vmem:[#allocation2 + $0x198] sm:$0xff] %vm404_vm0, %v2355_v45  ;;  %v2653_v43 = vld [vmem:[#allocation2 + $0x388] sm:$0xff]  ;;  %v13588_v45 = vrot.slane %v11608_v27, 2  ;;  %v3303_v50 = vadd.f32 %v3002_v26, %v2590_v13  ;;  %3836 = vst.msk [vmem:[#allocation2 + $0x378] sm:$0xff] %vm404_vm0, %v3718_v37  ;;  %7581 = vmatmul.mubr.msk.f32.gmra.mrb[42].mxu0 %vm404_vm0, %v11847_v30  ;;  %v578_v16 = vld [vmem:[#allocation2 + $0x1b0] sm:$0xff]  ;;  %v1291_v59 = vmul.f32 %v11298_v34, %v11849_v32 }
 0x250   : > { %3773 = vst.msk [vmem:[#allocation2 + $0x180] sm:$0xff] %vm404_vm0, %v3655_v61  ;;  %v3130_v27 = vsel %vm2899_vm3, %v3127_v20, %v13589_v2  ;;  %v641_v3 = vld [vmem:[#allocation2 + $0x3a8] sm:$0x3]  ;;  %1589 = vst.msk [vmem:[#allocation2 + $0x3a0] sm:$0xff] %vm404_vm0, %v1471_v4  ;;  %v13435_v61 = vrot.slane %v11841_v46, 1  ;;  %v13592_v4 = vrot.slane %v11728_v15, 1  ;;  %v11883_v13 = vmul.f32 %v11395_v11, %v11787_v39  ;;  %7583 = vmatprep.mubr.msk.f32.mxu0 %vm8300_vm1, %v13463_v24 }
 0x251   : > { %v3128_v51 = vsel %vm2899_vm3, %v13588_v45, %v3127_v20  ;;  %3421 = vst.msk [vmem:[#allocation2 + $0x190] sm:$0xff] %vm404_vm0, %v3303_v50  ;;  %v1472_v20 = vadd.f32 %v1354_v47, %v641_v3  ;;  %v4067_v45 = vld [vmem:[#allocation2 + $0x351] ss:$2 sm:$0xff]  ;;  %v1410_v47 = vadd.f32 %v1292_v9, %v579_v55  ;;  %v11891_v2 = vmul.f32 %v11361_v29, %v11823_v8  ;;  %v581_v55 = vld [vmem:[#allocation2 + $0x1c8] sm:$0xff] }
 0x252   : > { %v3366_v17 = vadd.f32 %v3128_v51, %v2653_v43  ;;  %v13591_v51 = vrot.slane %v11771_v5, 1  ;;  %v1643_v5 = vld [vmem:[#allocation2 + $0x1a0] sm:$0xff]  ;;  %v2183_v37 = vsel %vm1950_vm2, %v13592_v4, %v2182_v25  ;;  %v3949_v43 = vld [vmem:[#allocation2 + $0x350] ss:$2 sm:$0xff]  ;;  %v13593_v39 = vrot.slane %v11686_v21, 2 }
 0x253   : > { %v2419_v50 = vadd.f32 %v2183_v37, %v1706_v58  ;;  %v3601_v15 = vld [vmem:[#allocation2 + $0x380] sm:$0xff]  ;;  %1590 = vst.msk [vmem:[#allocation2 + $0x3a8] sm:$0x3] %vm522_vm4, %v1472_v20  ;;  %v1409_v3 = vadd.f32 %v1291_v59, %v578_v16  ;;  %v11902_v58 = vmul.f32 %v11361_v29, %v11849_v32  ;;  %v11909_v21 = vmul.f32 %v11395_v11, %v11759_v60  ;;  %v11917_v20 = vpop.permute.xlu0 %925 }
 0x254   : > { %v2057_v26 = vsel %vm1950_vm2, %v13591_v51, %v13590_v18  ;;  %3484 = vst.msk [vmem:[#allocation2 + $0x388] sm:$0xff] %vm404_vm0, %v3366_v17  ;;  %v3004_v51 = vsel %vm2899_vm3, %v13593_v39, %v13434_v40  ;;  %v3719_v9 = vmax.f32 %v3601_v15, 0.0  ;;  %v2654_v4 = vld [vmem:[#allocation2 + $0x390] sm:$0xff]  ;;  %1528 = vst.msk [vmem:[#allocation2 + $0x1b8] sm:$0xff] %vm404_vm0, %v1410_v47  ;;  %v11913_v16 = vmax.f32 %v3949_v43, %v4067_v45  ;;  %v1644_v18 = vld [vmem:[#allocation2 + $0x1a8] sm:$0xff] }
 0x255   : > { %v2356_v17 = vadd.f32 %v2057_v26, %v1643_v5  ;;  %v11904_v26 = vpop.f32.mrb[6].mxu0  ;;  %v3538_v5 = vld [vmem:[#allocation2 + $0x188] sm:$0xff]  ;;  %2537 = vst.msk [vmem:[#allocation2 + $0x398] sm:$0xff] %vm404_vm0, %v2419_v50  ;;  %v1294_v59 = vmul.f32 %v11298_v34, %v11885_v49  ;;  %v3367_v40 = vadd.f32 %v3130_v27, %v2654_v4  ;;  %1527 = vst.msk [vmem:[#allocation2 + $0x1b0] sm:$0xff] %vm404_vm0, %v1409_v3  ;;  %v2058_v60 = vrot.slane %v11902_v58, 1  ;;  %v580_v47 = vld [vmem:[#allocation2 + $0x1c0] sm:$0xff] }
 0x256   : > { %v2591_v37 = vld [vmem:[#allocation2 + $0x198] sm:$0xff]  ;;  %13594 = vst [vmem:[#allocation47_spill] sm:$0xff] %v11913_v16  ;;  %v7528_v15 = vpop.f32.mrb[7].mxu0  ;;  %v3656_v39 = vmax.f32 %v3538_v5, 0.0  ;;  %3837 = vst.msk [vmem:[#allocation2 + $0x380] sm:$0xff] %vm404_vm0, %v3719_v9  ;;  %v2185_v43 = vsel %vm1950_vm2, %v2182_v25, %v13435_v61  ;;  %v2060_v50 = vrot.slane %v11891_v2, 1  ;;  %7677 = vmatmul.mubr.msk.f32.gmra.mrb[46].mxu1 %vm404_vm0, %v11913_v16  ;;  %v11937_v58 = vmul.f32 %v11395_v11, %v11849_v32 }
 0x257   : > { %2474 = vst.msk [vmem:[#allocation2 + $0x1a0] sm:$0xff] %vm404_vm0, %v2356_v17  ;;  %v3304_v17 = vadd.f32 %v3004_v51, %v2591_v37  ;;  %v1412_v27 = vadd.f32 %v1294_v59, %v581_v55  ;;  %3485 = vst.msk [vmem:[#allocation2 + $0x390] sm:$0xff] %vm404_vm0, %v3367_v40  ;;  %v1707_v51 = vld [vmem:[#allocation2 + $0x3a0] sm:$0xff]  ;;  %v13595_v3 = vrot.slane %v11791_v48, 1  ;;  %v1293_v2 = vmul.f32 %v11298_v34, %v11917_v20 }
 0x258   : > { %3774 = vst.msk [vmem:[#allocation2 + $0x188] sm:$0xff] %vm404_vm0, %v3656_v39  ;;  %v11943_v55 = vmul.f32 %v11361_v29, %v11917_v20  ;;  %v3887_v9 = vld [vmem:[#allocation2 + $0x160] ss:$2 sm:$0xff]  ;;  %v4005_v40 = vld [vmem:[#allocation2 + $0x161] ss:$2 sm:$0xff]  ;;  %7679 = vmatprep.mubr.msk.f32.mxu1 %vm8300_vm1, %v13463_v24  ;;  %v3539_v5 = vld [vmem:[#allocation2 + $0x190] sm:$0xff]  ;;  %v2420_v59 = vadd.f32 %v2185_v43, %v1707_v51  ;;  %v11955_v34 = vmul.f32 %v11361_v29, %v11885_v49  ;;  %v11957_v39 = vpop.permute.xlu1 %940 }
 0x259   : > { %3422 = vst.msk [vmem:[#allocation2 + $0x198] sm:$0xff] %vm404_vm0, %v3304_v17  ;;  %v2059_v25 = vsel %vm1950_vm2, %v13595_v3, %v2058_v60  ;;  %v13596_v4 = vrot.slane %v11830_v10, 2  ;;  %v13597_v37 = vrot.slane %v11821_v53, 2  ;;  %1530 = vst.msk [vmem:[#allocation2 + $0x1c8] sm:$0xff] %vm404_vm0, %v1412_v27  ;;  %v3657_v17 = vmax.f32 %v3539_v5, 0.0  ;;  %v11964_v53 = vpop.f32.mrb[10].mxu1 }
 0x25a   : > { %v2357_v15 = vadd.f32 %v2059_v25, %v1644_v18  ;;  %v13439_v61 = vrot.slane %v11909_v21, 2  ;;  %v11962_v45 = vmul.f32 %v11395_v11, %v11823_v8  ;;  %v1708_v43 = vld [vmem:[#allocation2 + $0x3a8] sm:$0x3]  ;;  %2538 = vst.msk [vmem:[#allocation2 + $0x3a0] sm:$0xff] %vm404_vm0, %v2420_v59  ;;  %v13598_v18 = vrot.slane %v11883_v13, 2  ;;  %v583_v8 = vld [vmem:[#allocation2 + $0x1d8] sm:$0xff] }
 0x25b   : > { %v3602_v48 = vld [vmem:[#allocation2 + $0x388] sm:$0xff]  ;;  %v3006_v32 = vsel %vm2899_vm3, %v13597_v37, %v13596_v4  ;;  %v13599_v29 = vrot.slane %v11738_v12, 2  ;;  %v1411_v51 = vadd.f32 %v1293_v2, %v580_v47  ;;  %v13436_v25 = vrot.slane %v11943_v55, 1  ;;  %3775 = vst.msk [vmem:[#allocation2 + $0x190] sm:$0xff] %vm404_vm0, %v3657_v17  ;;  %v1646_v47 = vld [vmem:[#allocation2 + $0x1b8] sm:$0xff] }
 0x25c   : > { %v3720_v3 = vmax.f32 %v3602_v48, 0.0  ;;  %2475 = vst.msk [vmem:[#allocation2 + $0x1a8] sm:$0xff] %vm404_vm0, %v2357_v15  ;;  %v11974_v5 = vmax.f32 %v3887_v9, %v4005_v40  ;;  %v7624_v48 = vpop.f32.mrb[11].mxu1  ;;  %v13600_v37 = vrot.slane %v11841_v46, 1  ;;  %v2655_v12 = vld [vmem:[#allocation2 + $0x398] sm:$0xff]  ;;  %v11983_v40 = vpop.permute.xlu0 %935  ;;  %v1645_v17 = vld [vmem:[#allocation2 + $0x1b0] sm:$0xff] }
 0x25d   : > { %v3132_v27 = vsel %vm2899_vm3, %v13599_v29, %v13598_v18  ;;  %v2061_v18 = vsel %vm1950_vm2, %v2058_v60, %v2060_v50  ;;  %v8157_v2 = vld [vmem:[#allocation4] ss:$0 sm:$0xff]  ;;  %1529 = vst.msk [vmem:[#allocation2 + $0x1c0] sm:$0xff] %vm404_vm0, %v1411_v51  ;;  %v2063_v46 = vsel %vm1950_vm2, %v2060_v50, %v13436_v25  ;;  %v582_v60 = vld [vmem:[#allocation2 + $0x1d0] sm:$0xff] }
 0x25e   : > { %3838 = vst.msk [vmem:[#allocation2 + $0x388] sm:$0xff] %vm404_vm0, %v3720_v3  ;;  %v2592_v4 = vld [vmem:[#allocation2 + $0x1a0] sm:$0xff]  ;;  %v2421_v59 = vadd.f32 %v13600_v37, %v1708_v43  ;;  %v1296_v9 = vmul.f32 %v8157_v2, %v11957_v39  ;;  %v3368_v48 = vadd.f32 %v3132_v27, %v2655_v12  ;;  %v2064_v3 = vrot.slane %v11955_v34, 1  ;;  %7584 = vmatmul.mubr.msk.f32.gmra.mrb[44].mxu0 %vm404_vm0, %v11974_v5  ;;  %v3889_v51 = vld [vmem:[#allocation2 + $0x170] ss:$2 sm:$0xff] }
 0x25f   : > { %v3305_v29 = vadd.f32 %v3006_v32, %v2592_v4  ;;  %v3951_v43 = vld [vmem:[#allocation2 + $0x360] ss:$2 sm:$0xff]  ;;  %v2358_v37 = vadd.f32 %v2061_v18, %v1645_v17  ;;  %v2359_v15 = vadd.f32 %v2063_v46, %v1646_v47  ;;  %v11995_v32 = vmul.f32 %v11395_v11, %v11917_v20  ;;  %v4069_v27 = vld [vmem:[#allocation2 + $0x361] ss:$2 sm:$0xff]  ;;  %7586 = vmatprep.mubr.msk.f32.mxu0 %vm8300_vm1, %v13463_v24  ;;  %v4007_v50 = vld [vmem:[#allocation2 + $0x171] ss:$2 sm:$0xff] }
 0x260   : > { %2539 = vst.msk [vmem:[#allocation2 + $0x3a8] sm:$0x3] %vm522_vm4, %v2421_v59  ;;  %v1414_v34 = vadd.f32 %v1296_v9, %v583_v8  ;;  %v3603_v12 = vld [vmem:[#allocation2 + $0x390] sm:$0xff]  ;;  %v3540_v25 = vld [vmem:[#allocation2 + $0x198] sm:$0xff]  ;;  %v8158_v59 = vld [vmem:[#allocation4 + $0x1] ss:$0 sm:$0xff]  ;;  %v1295_v11 = vmul.f32 %v8157_v2, %v11983_v40  ;;  %v12033_v1 = vmax.f32 %v3951_v43, %v4069_v27 }
 0x261   : > { %3423 = vst.msk [vmem:[#allocation2 + $0x1a0] sm:$0xff] %vm404_vm0, %v3305_v29  ;;  %3486 = vst.msk [vmem:[#allocation2 + $0x398] sm:$0xff] %vm404_vm0, %v3368_v48  ;;  %v12003_v18 = vmul.f32 %v8158_v59, %v11957_v39  ;;  %v12007_v20 = vmul.f32 %v8158_v59, %v11983_v40  ;;  %v3953_v8 = vld [vmem:[#allocation2 + $0x370] ss:$2 sm:$0xff]  ;;  %v4071_v47 = vld [vmem:[#allocation2 + $0x371] ss:$2 sm:$0xff] }
 0x262   : > { %v3721_v17 = vmax.f32 %v3603_v12, 0.0  ;;  %v3658_v46 = vmax.f32 %v3540_v25, 0.0  ;;  %v13601_v29 = vrot.slane %v11883_v13, 2  ;;  %2476 = vst.msk [vmem:[#allocation2 + $0x1b0] sm:$0xff] %vm404_vm0, %v2358_v37  ;;  %2477 = vst.msk [vmem:[#allocation2 + $0x1b8] sm:$0xff] %vm404_vm0, %v2359_v15  ;;  %v12018_v59 = vpop.f32.mrb[8].mxu0  ;;  %v1413_v16 = vadd.f32 %v1295_v11, %v582_v60  ;;  %7680 = vmatmul.mubr.msk.f32.gmra.mrb[48].mxu1 %vm404_vm0, %v12033_v1 }
 0x263   : > { %1532 = vst.msk [vmem:[#allocation2 + $0x1d8] sm:$0xff] %vm404_vm0, %v1414_v34  ;;  %v3891_v2 = vld [vmem:[#allocation2 + $0x180] ss:$2 sm:$0xff]  ;;  %v3009_v4 = vrot.slane %v11962_v45, 2  ;;  %v13602_v12 = vrot.slane %v11937_v58, 2  ;;  %v13603_v25 = vrot.slane %v11830_v10, 2  ;;  %v12049_v43 = vmax.f32 %v3953_v8, %v4071_v47  ;;  %7682 = vmatprep.mubr.msk.f32.mxu1 %vm8300_vm1, %v13463_v24 }
 0x264   : > { %v3134_v48 = vsel %vm2899_vm3, %v13601_v29, %v13439_v61  ;;  %v1648_v13 = vld [vmem:[#allocation2 + $0x1c8] sm:$0xff]  ;;  %v2066_v29 = vrot.slane %v12007_v20, 1  ;;  %v7531_v61 = vpop.f32.mrb[9].mxu0  ;;  %3839 = vst.msk [vmem:[#allocation2 + $0x390] sm:$0xff] %vm404_vm0, %v3721_v17  ;;  %3776 = vst.msk [vmem:[#allocation2 + $0x198] sm:$0xff] %vm404_vm0, %v3658_v46  ;;  %v2656_v15 = vld [vmem:[#allocation2 + $0x3a0] sm:$0xff] }
 0x265   : > { %v3008_v9 = vsel %vm2899_vm3, %v13603_v25, %v13602_v12  ;;  %v4009_v37 = vld [vmem:[#allocation2 + $0x181] ss:$2 sm:$0xff]  ;;  %v13604_v45 = vrot.slane %v11943_v55, 1  ;;  %v3011_v10 = vrot.slane %v11995_v32, 2  ;;  %v12035_v12 = vmax.f32 %v3889_v51, %v4007_v50  ;;  %1531 = vst.msk [vmem:[#allocation2 + $0x1d0] sm:$0xff] %vm404_vm0, %v1413_v16 }
 0x266   : > { %v2593_v34 = vld [vmem:[#allocation2 + $0x1a8] sm:$0xff]  ;;  %v3369_v60 = vadd.f32 %v3134_v48, %v2656_v15  ;;  %v2068_v61 = vrot.slane %v12003_v18, 1  ;;  %v2067_v17 = vsel %vm1950_vm2, %v2064_v3, %v2066_v29  ;;  %v5765_v55 = vrot.slane %v9542_v44, 2  ;;  %v1647_v25 = vld [vmem:[#allocation2 + $0x1c0] sm:$0xff]  ;;  %7683 = vmatmul.mubr.msk.f32.gmra.mrb[50].mxu1 %vm404_vm0, %v12049_v43 }
 0x267   : > { %v2065_v36 = vsel %vm1950_vm2, %v13604_v45, %v2064_v3  ;;  %v3306_v11 = vadd.f32 %v3008_v9, %v2593_v34  ;;  %v12042_v46 = vld [vmem:[#allocation9] ss:$0 sm:$0xff]  ;;  %v2361_v45 = vadd.f32 %v2067_v17, %v1648_v13  ;;  %7587 = vmatmul.mubr.msk.f32.gmra.mrb[46].mxu0 %vm404_vm0, %v12035_v12  ;;  %v12051_v27 = vmax.f32 %v3891_v2, %v4009_v37  ;;  %v12055_v51 = vld [vmem:[#allocation2 + $0x381] ss:$2 sm:$0xff]  ;;  %v12061_v9 = vld [vmem:[#allocation4 + $0x2] ss:$0 sm:$0xff] }
 0x268   : > { %v12053_v16 = vld [vmem:[#allocation2 + $0x380] ss:$2 sm:$0xff]  ;;  %3487 = vst.msk [vmem:[#allocation2 + $0x3a0] sm:$0xff] %vm404_vm0, %v3369_v60  ;;  %v12059_v50 = vadd.f32 %v2065_v36, %v1647_v25  ;;  %v12065_v48 = vmul.f32 %v12061_v9, %v11983_v40  ;;  %7589 = vmatprep.mubr.msk.f32.mxu0 %vm8300_vm1, %v13463_v24  ;;  %v13605_v8 = vrot.slane %v9542_v44, 1  ;;  %v13606_v47 = vrot.slane %v9411_v38, 1  ;;  %v12078_v2 = vpop.f32.mrb[12].mxu1  ;;  %7685 = vmatprep.mubr.msk.f32.mxu1 %vm8300_vm1, %v13463_v24 }
 0x269   : > { %v2657_v3 = vld [vmem:[#allocation2 + $0x3a8] sm:$0x3]  ;;  %3424 = vst.msk [vmem:[#allocation2 + $0x1a8] sm:$0xff] %vm404_vm0, %v3306_v11  ;;  %v12080_v13 = vld [vmem:[#allocation2 + $0x1a0] sm:$0xff]  ;;  %v13607_v40 = vrot.slane %v11909_v21, 2  ;;  %v12086_v15 = vld [vmem:[#allocation2 + $0x398] sm:$0xff]  ;;  %v12095_v11 = vmul.f32 %v12061_v9, %v11885_v49  ;;  %v12100_v17 = vsel %vm2899_vm3, %v3009_v4, %v3011_v10 }
 0x26a   : > { %v12076_v36 = vsel %vm1950_vm2, %v13606_v47, %v13605_v8  ;;  %v13608_v34 = vrot.slane %v11937_v58, 2  ;;  %2479 = vst.msk [vmem:[#allocation2 + $0x1c8] sm:$0xff] %vm404_vm0, %v2361_v45  ;;  %v7627_v49 = vpop.f32.mrb[13].mxu1  ;;  %v3659_v21 = vmax.f32 %v12080_v13, 0.0  ;;  %v3722_v58 = vmax.f32 %v12086_v15, 0.0  ;;  %2478 = vst.msk [vmem:[#allocation2 + $0x1c0] sm:$0xff] %vm404_vm0, %v12059_v50 }
 0x26b   : > { %v12084_v37 = vadd.f32 %v13607_v40, %v2657_v3  ;;  %4175 = vst.msk [vmem:[#allocation3 + $0xf0] sm:$0xff] %vm4144_vm5, %v12042_v46  ;;  %4145 = vst.msk [vmem:[#allocation3] sm:$0xff] %vm4144_vm5, %v12042_v46  ;;  %v2595_v25 = vld [vmem:[#allocation2 + $0x1b8] sm:$0xff]  ;;  %v13609_v3 = vrot.slane %v8821_v35, 1  ;;  %v12230_v47 = vmax.f32 %v12053_v16, %v12055_v51  ;;  %7590 = vmatmul.mubr.msk.f32.gmra.mrb[48].mxu0 %vm404_vm0, %v12051_v27  ;;  %v3015_v16 = vrot.slane %v12065_v48, 2  ;;  %v12269_v49 = vpop.f32.mrb[10].mxu0 }
 0x26c   : > { %v12091_v60 = vsel %vm2899_vm3, %v13608_v34, %v3009_v4  ;;  %4146 = vst.msk [vmem:[#allocation3 + $0x8] sm:$0xff] %vm4144_vm5, %v12042_v46  ;;  %4147 = vst.msk [vmem:[#allocation3 + $0x10] sm:$0xff] %vm4144_vm5, %v12042_v46  ;;  %v2594_v4 = vld [vmem:[#allocation2 + $0x1b0] sm:$0xff]  ;;  %v1650_v45 = vld [vmem:[#allocation2 + $0x1d8] sm:$0xff]  ;;  %v3308_v40 = vadd.f32 %v12100_v17, %v2595_v25  ;;  %v12244_v35 = vmul.f32 %v12061_v9, %v11957_v39  ;;  %7592 = vmatprep.mubr.msk.f32.mxu0 %vm8300_vm1, %v13463_v24 }
 0x26d   : > { %4148 = vst.msk [vmem:[#allocation3 + $0x18] sm:$0xff] %vm4144_vm5, %v12042_v46  ;;  %4149 = vst.msk [vmem:[#allocation3 + $0x20] sm:$0xff] %vm4144_vm5, %v12042_v46  ;;  %v2071_v8 = vsel %vm1950_vm2, %v2068_v61, %v13609_v3  ;;  %v3307_v13 = vadd.f32 %v12091_v60, %v2594_v4  ;;  %v3893_v51 = vld [vmem:[#allocation2 + $0x190] ss:$2 sm:$0xff]  ;;  %v13610_v15 = vrot.slane %v9411_v38, 2  ;;  %v3013_v39 = vrot.slane %v12095_v11, 2  ;;  %7686 = vmatmul.mubr.msk.f32.gmra.mrb[52].mxu1 %vm404_vm0, %v12230_v47 }
 0x26e   : > { %4150 = vst.msk [vmem:[#allocation3 + $0x28] sm:$0xff] %vm4144_vm5, %v12042_v46  ;;  %4151 = vst.msk [vmem:[#allocation3 + $0x30] sm:$0xff] %vm4144_vm5, %v12042_v46  ;;  %v2363_v50 = vadd.f32 %v2071_v8, %v1650_v45  ;;  %v1649_v9 = vld [vmem:[#allocation2 + $0x1d0] sm:$0xff]  ;;  %v2069_v60 = vsel %vm1950_vm2, %v2066_v29, %v2068_v61  ;;  %v7534_v11 = vpop.f32.mrb[11].mxu0  ;;  %v3017_v20 = vrot.slane %v12244_v35, 2  ;;  %7688 = vmatprep.mubr.msk.f32.mxu1 %vm8300_vm1, %v13463_v24 }
 0x26f   : > { %4152 = vst.msk [vmem:[#allocation3 + $0x38] sm:$0xff] %vm4144_vm5, %v12042_v46  ;;  %4153 = vst.msk [vmem:[#allocation3 + $0x40] sm:$0xff] %vm4144_vm5, %v12042_v46  ;;  %v12256_v34 = vsel %vm2899_vm3, %v13610_v15, %v5765_v55  ;;  %v2362_v38 = vadd.f32 %v2069_v60, %v1649_v9  ;;  %v3016_v61 = vsel %vm2899_vm3, %v3013_v39, %v3015_v16 }
 0x270   : > { %4154 = vst.msk [vmem:[#allocation3 + $0x48] sm:$0xff] %vm4144_vm5, %v12042_v46  ;;  %4155 = vst.msk [vmem:[#allocation3 + $0x50] sm:$0xff] %vm4144_vm5, %v12042_v46  ;;  %v3014_v8 = vsel %vm2899_vm3, %v3011_v10, %v3013_v39 }
 0x271   : > { %4156 = vst.msk [vmem:[#allocation3 + $0x58] sm:$0xff] %vm4144_vm5, %v12042_v46  ;;  %4157 = vst.msk [vmem:[#allocation3 + $0x60] sm:$0xff] %vm4144_vm5, %v12042_v46  ;;  %v2597_v29 = vld [vmem:[#allocation2 + $0x1c8] sm:$0xff]  ;;  %v2596_v3 = vld [vmem:[#allocation2 + $0x1c0] sm:$0xff] }
 0x272   : > { %4158 = vst.msk [vmem:[#allocation3 + $0x68] sm:$0xff] %vm4144_vm5, %v12042_v46  ;;  %4159 = vst.msk [vmem:[#allocation3 + $0x70] sm:$0xff] %vm4144_vm5, %v12042_v46  ;;  %v4235_v25 = vld [vmem:[#allocation3 + $0xf0] sm:$0xff]  ;;  %v3309_v9 = vadd.f32 %v3014_v8, %v2596_v3 }
 0x273   : > { %4160 = vst.msk [vmem:[#allocation3 + $0x78] sm:$0xff] %vm4144_vm5, %v12042_v46  ;;  %4161 = vst.msk [vmem:[#allocation3 + $0x80] sm:$0xff] %vm4144_vm5, %v12042_v46  ;;  %v4206_v32 = vld [vmem:[#allocation3 + $0x8] sm:$0xff]  ;;  %v4207_v11 = vld [vmem:[#allocation3 + $0x10] sm:$0xff] }
 0x274   : > { %4162 = vst.msk [vmem:[#allocation3 + $0x88] sm:$0xff] %vm4144_vm5, %v12042_v46  ;;  %4163 = vst.msk [vmem:[#allocation3 + $0x90] sm:$0xff] %vm4144_vm5, %v12042_v46  ;;  %v4208_v8 = vld [vmem:[#allocation3 + $0x18] sm:$0xff] }
 0x275   : > { %4164 = vst.msk [vmem:[#allocation3 + $0x98] sm:$0xff] %vm4144_vm5, %v12042_v46  ;;  %4165 = vst.msk [vmem:[#allocation3 + $0xa0] sm:$0xff] %vm4144_vm5, %v12042_v46  ;;  %v4211_v35 = vld [vmem:[#allocation3 + $0x30] sm:$0xff] }
 0x276   : > { %4166 = vst.msk [vmem:[#allocation3 + $0xa8] sm:$0xff] %vm4144_vm5, %v12042_v46  ;;  %4167 = vst.msk [vmem:[#allocation3 + $0xb0] sm:$0xff] %vm4144_vm5, %v12042_v46 }
 0x277   : > { %4168 = vst.msk [vmem:[#allocation3 + $0xb8] sm:$0xff] %vm4144_vm5, %v12042_v46  ;;  %4169 = vst.msk [vmem:[#allocation3 + $0xc0] sm:$0xff] %vm4144_vm5, %v12042_v46 }
 0x278   : > { %4170 = vst.msk [vmem:[#allocation3 + $0xc8] sm:$0xff] %vm4144_vm5, %v12042_v46  ;;  %4171 = vst.msk [vmem:[#allocation3 + $0xd0] sm:$0xff] %vm4144_vm5, %v12042_v46 }
 0x279   : > { %4172 = vst.msk [vmem:[#allocation3 + $0xd8] sm:$0xff] %vm4144_vm5, %v12042_v46  ;;  %4173 = vst.msk [vmem:[#allocation3 + $0xe0] sm:$0xff] %vm4144_vm5, %v12042_v46 }
 0x27a   : > { %4174 = vst.msk [vmem:[#allocation3 + $0xe8] sm:$0xff] %vm4144_vm5, %v12042_v46  ;;  %4176 = vst.msk [vmem:[#allocation3 + $0xf8] sm:$0xff] %vm4144_vm5, %v12042_v46 }
 0x27b   : > { %4177 = vst.msk [vmem:[#allocation3 + $0x100] sm:$0xff] %vm4144_vm5, %v12042_v46  ;;  %4178 = vst.msk [vmem:[#allocation3 + $0x108] sm:$0xff] %vm4144_vm5, %v12042_v46 }
 0x27c   : > { %4179 = vst.msk [vmem:[#allocation3 + $0x110] sm:$0xff] %vm4144_vm5, %v12042_v46  ;;  %4180 = vst.msk [vmem:[#allocation3 + $0x118] sm:$0xff] %vm4144_vm5, %v12042_v46 }
 0x27d   : > { %4181 = vst.msk [vmem:[#allocation3 + $0x120] sm:$0xff] %vm4144_vm5, %v12042_v46  ;;  %4182 = vst.msk [vmem:[#allocation3 + $0x128] sm:$0xff] %vm4144_vm5, %v12042_v46 }
 0x27e   : > { %4183 = vst.msk [vmem:[#allocation3 + $0x130] sm:$0xff] %vm4144_vm5, %v12042_v46  ;;  %4184 = vst.msk [vmem:[#allocation3 + $0x138] sm:$0xff] %vm4144_vm5, %v12042_v46 }
 0x27f   : > { %4185 = vst.msk [vmem:[#allocation3 + $0x140] sm:$0xff] %vm4144_vm5, %v12042_v46  ;;  %4186 = vst.msk [vmem:[#allocation3 + $0x148] sm:$0xff] %vm4144_vm5, %v12042_v46 }
 0x280   : > { %4187 = vst.msk [vmem:[#allocation3 + $0x150] sm:$0xff] %vm4144_vm5, %v12042_v46  ;;  %4188 = vst.msk [vmem:[#allocation3 + $0x158] sm:$0xff] %vm4144_vm5, %v12042_v46 }
 0x281   : > { %4189 = vst.msk [vmem:[#allocation3 + $0x160] sm:$0xff] %vm4144_vm5, %v12042_v46  ;;  %4190 = vst.msk [vmem:[#allocation3 + $0x168] sm:$0xff] %vm4144_vm5, %v12042_v46  ;;  %v4236_v45 = vld [vmem:[#allocation3 + $0xf8] sm:$0xff] }
 0x282   : > { %4191 = vst.msk [vmem:[#allocation3 + $0x170] sm:$0xff] %vm4144_vm5, %v12042_v46  ;;  %4192 = vst.msk [vmem:[#allocation3 + $0x178] sm:$0xff] %vm4144_vm5, %v12042_v46 }
 0x283   : > { %4193 = vst.msk [vmem:[#allocation3 + $0x180] sm:$0xff] %vm4144_vm5, %v12042_v46  ;;  %4194 = vst.msk [vmem:[#allocation3 + $0x188] sm:$0xff] %vm4144_vm5, %v12042_v46 }
 0x284   : > { %4195 = vst.msk [vmem:[#allocation3 + $0x190] sm:$0xff] %vm4144_vm5, %v12042_v46  ;;  %4196 = vst.msk [vmem:[#allocation3 + $0x198] sm:$0xff] %vm4144_vm5, %v12042_v46 }
 0x285   : > { %4197 = vst.msk [vmem:[#allocation3 + $0x1a0] sm:$0xff] %vm4144_vm5, %v12042_v46  ;;  %4198 = vst.msk [vmem:[#allocation3 + $0x1a8] sm:$0xff] %vm4144_vm5, %v12042_v46 }
 0x286   : > { %4199 = vst.msk [vmem:[#allocation3 + $0x1b0] sm:$0xff] %vm4144_vm5, %v12042_v46  ;;  %4200 = vst.msk [vmem:[#allocation3 + $0x1b8] sm:$0xff] %vm4144_vm5, %v12042_v46 }
 0x287   : > { %4201 = vst.msk [vmem:[#allocation3 + $0x1c0] sm:$0xff] %vm4144_vm5, %v12042_v46  ;;  %4202 = vst.msk [vmem:[#allocation3 + $0x1c8] sm:$0xff] %vm4144_vm5, %v12042_v46 }
 0x288   : > { %3488 = vst.msk [vmem:[#allocation2 + $0x3a8] sm:$0x3] %vm522_vm4, %v12084_v37  ;;  %v4011_v37 = vld [vmem:[#allocation2 + $0x191] ss:$2 sm:$0xff] }
 0x289   : > { %3777 = vst.msk [vmem:[#allocation2 + $0x1a0] sm:$0xff] %vm404_vm0, %v3659_v21  ;;  %3840 = vst.msk [vmem:[#allocation2 + $0x398] sm:$0xff] %vm404_vm0, %v3722_v58  ;;  %v12267_v17 = vmax.f32 %v3893_v51, %v4011_v37  ;;  %v3605_v21 = vld [vmem:[#allocation2 + $0x3a0] sm:$0xff]  ;;  %v3542_v58 = vld [vmem:[#allocation2 + $0x1a8] sm:$0xff] }
 0x28a   : > { %3425 = vst.msk [vmem:[#allocation2 + $0x1b0] sm:$0xff] %vm404_vm0, %v3307_v13  ;;  %3426 = vst.msk [vmem:[#allocation2 + $0x1b8] sm:$0xff] %vm404_vm0, %v3308_v40  ;;  %v3723_v4 = vmax.f32 %v3605_v21, 0.0  ;;  %v3660_v18 = vmax.f32 %v3542_v58, 0.0  ;;  %v3310_v13 = vadd.f32 %v3016_v61, %v2597_v29  ;;  %v4835_v40 = vadd.f32 %v11477_v22, %v4235_v25  ;;  %v4205_v51 = vld [vmem:[#allocation3] sm:$0xff]  ;;  %v4238_v21 = vld [vmem:[#allocation3 + $0x108] sm:$0xff] }
 0x28b   : > { %2481 = vst.msk [vmem:[#allocation2 + $0x1d8] sm:$0xff] %vm404_vm0, %v2363_v50  ;;  %7593 = vmatmul.mubr.msk.f32.gmra.mrb[50].mxu0 %vm404_vm0, %v12267_v17  ;;  %2480 = vst.msk [vmem:[#allocation2 + $0x1d0] sm:$0xff] %vm404_vm0, %v2362_v38  ;;  %v4836_v50 = vadd.f32 %v11546_v6, %v4236_v45  ;;  %v4237_v37 = vld [vmem:[#allocation3 + $0x100] sm:$0xff]  ;;  %v4805_v60 = vadd.f32 %v11548_v19, %v4205_v51  ;;  %v4806_v6 = vadd.f32 %v11666_v28, %v4206_v32  ;;  %v4242_v32 = vld [vmem:[#allocation3 + $0x128] sm:$0xff] }
 0x28c   : > { %7595 = vmatprep.mubr.msk.f32.mxu0 %vm8300_vm1, %v13463_v24  ;;  %3841 = vst.msk [vmem:[#allocation2 + $0x3a0] sm:$0xff] %vm404_vm0, %v3723_v4  ;;  %3778 = vst.msk [vmem:[#allocation2 + $0x1a8] sm:$0xff] %vm404_vm0, %v3660_v18  ;;  %v4837_v38 = vadd.f32 %v11617_v33, %v4237_v37  ;;  %v4838_v58 = vadd.f32 %v11732_v56, %v4238_v21  ;;  %v13611_v18 = vrot.slane %v8842_v52, 2  ;;  %v4696_v56 = vpop.f32.mrb[14].mxu1  ;;  %v4239_v52 = vld [vmem:[#allocation3 + $0x110] sm:$0xff]  ;;  %v4209_v51 = vld [vmem:[#allocation3 + $0x20] sm:$0xff] }
 0x28d   : > { %3428 = vst.msk [vmem:[#allocation2 + $0x1c8] sm:$0xff] %vm404_vm0, %v3310_v13  ;;  %3427 = vst.msk [vmem:[#allocation2 + $0x1c0] sm:$0xff] %vm404_vm0, %v3309_v9  ;;  %v4807_v28 = vadd.f32 %v11794_v14, %v4207_v11  ;;  %v4240_v13 = vld [vmem:[#allocation3 + $0x118] sm:$0xff]  ;;  %v4839_v14 = vadd.f32 %v11851_v62, %v4239_v52  ;;  %v4241_v37 = vld [vmem:[#allocation3 + $0x120] sm:$0xff]  ;;  %v7630_v9 = vpop.f32.mrb[15].mxu1  ;;  %v3018_v62 = vsel %vm2899_vm3, %v3015_v16, %v3017_v20 }
 0x28e   : > { %4894 = vst.msk [vmem:[#allocation3 + $0xf0] sm:$0xff] %vm4144_vm5, %v4835_v40  ;;  %4895 = vst.msk [vmem:[#allocation3 + $0xf8] sm:$0xff] %vm4144_vm5, %v4836_v50  ;;  %v3020_v29 = vsel %vm2899_vm3, %v3017_v20, %v13611_v18  ;;  %v4808_v40 = vadd.f32 %v11904_v26, %v4208_v8  ;;  %v4840_v50 = vadd.f32 %v11964_v53, %v4240_v13  ;;  %v4992_v9 = vrot.slane %v9786_v31, 1 }
 0x28f   : > { %v3606_v15 = vld [vmem:[#allocation2 + $0x3a8] sm:$0x3]  ;;  %4864 = vst.msk [vmem:[#allocation3] sm:$0xff] %vm4144_vm5, %v4805_v60  ;;  %4896 = vst.msk [vmem:[#allocation3 + $0x100] sm:$0xff] %vm4144_vm5, %v4837_v38  ;;  %v4809_v26 = vadd.f32 %v12018_v59, %v4209_v51  ;;  %v4841_v53 = vadd.f32 %v12078_v2, %v4241_v37  ;;  %v4842_v48 = vadd.f32 %v4696_v56, %v4242_v32  ;;  %v5028_v32 = vrot.slane %v11847_v30, 1 }
 0x290   : > { %v3724_v10 = vmax.f32 %v3606_v15, 0.0  ;;  %v3957_v22 = vld [vmem:[#allocation2 + $0x390] ss:$2 sm:$0xff]  ;;  %v4075_v39 = vld [vmem:[#allocation2 + $0x391] ss:$2 sm:$0xff]  ;;  %4865 = vst.msk [vmem:[#allocation3 + $0x8] sm:$0xff] %vm4144_vm5, %v4806_v6 }
 0x291   : > { %v3543_v4 = vld [vmem:[#allocation2 + $0x1b0] sm:$0xff]  ;;  %v3544_v19 = vld [vmem:[#allocation2 + $0x1b8] sm:$0xff]  ;;  %v12304_v61 = vmax.f32 %v3957_v22, %v4075_v39  ;;  %4897 = vst.msk [vmem:[#allocation3 + $0x108] sm:$0xff] %vm4144_vm5, %v4838_v58  ;;  %4866 = vst.msk [vmem:[#allocation3 + $0x10] sm:$0xff] %vm4144_vm5, %v4807_v28 }
 0x292   : > { %v2599_v33 = vld [vmem:[#allocation2 + $0x1d8] sm:$0xff]  ;;  %3842 = vst.msk [vmem:[#allocation2 + $0x3a8] sm:$0x3] %vm522_vm4, %v3724_v10  ;;  %v3661_v25 = vmax.f32 %v3543_v4, 0.0  ;;  %v3662_v45 = vmax.f32 %v3544_v19, 0.0  ;;  %v2598_v60 = vld [vmem:[#allocation2 + $0x1d0] sm:$0xff] }
 0x293   : > { %v3312_v3 = vadd.f32 %v3020_v29, %v2599_v33  ;;  %7689 = vmatmul.mubr.msk.f32.gmra.mrb[54].mxu1 %vm404_vm0, %v12304_v61  ;;  %v4210_v15 = vld [vmem:[#allocation3 + $0x28] sm:$0xff]  ;;  %v3311_v21 = vadd.f32 %v3018_v62, %v2598_v60  ;;  %4898 = vst.msk [vmem:[#allocation3 + $0x110] sm:$0xff] %vm4144_vm5, %v4839_v14  ;;  %4867 = vst.msk [vmem:[#allocation3 + $0x18] sm:$0xff] %vm4144_vm5, %v4808_v40  ;;  %v3895_v16 = vld [vmem:[#allocation2 + $0x1a0] ss:$2 sm:$0xff]  ;;  %v4990_v14 = vrot.slane %v9674_v7, 1 }
 0x294   : > { %3779 = vst.msk [vmem:[#allocation2 + $0x1b0] sm:$0xff] %vm404_vm0, %v3661_v25  ;;  %3780 = vst.msk [vmem:[#allocation2 + $0x1b8] sm:$0xff] %vm404_vm0, %v3662_v45  ;;  %7691 = vmatprep.mubr.msk.f32.mxu1 %vm8300_vm1, %v13463_v24  ;;  %v4810_v38 = vadd.f32 %v12269_v49, %v4210_v15  ;;  %v4013_v20 = vld [vmem:[#allocation2 + $0x1a1] ss:$2 sm:$0xff]  ;;  %v4541_v49 = vpop.f32.mrb[12].mxu0  ;;  %v4701_v45 = vpop.f32.mrb[16].mxu1 }
 0x295   : > { %3430 = vst.msk [vmem:[#allocation2 + $0x1d8] sm:$0xff] %vm404_vm0, %v3312_v3  ;;  %3429 = vst.msk [vmem:[#allocation2 + $0x1d0] sm:$0xff] %vm404_vm0, %v3311_v21  ;;  %v3546_v59 = vld [vmem:[#allocation2 + $0x1c8] sm:$0xff]  ;;  %v12338_v2 = vmax.f32 %v3895_v16, %v4013_v20  ;;  %v3545_v10 = vld [vmem:[#allocation2 + $0x1c0] sm:$0xff]  ;;  %v4811_v39 = vadd.f32 %v4541_v49, %v4211_v35  ;;  %v7537_v6 = vpop.f32.mrb[13].mxu0  ;;  %v7633_v52 = vpop.f32.mrb[17].mxu1  ;;  %v4993_v49 = vsel %vm1950_vm2, %v4990_v14, %v4992_v9 }
 0x296   : > { %4899 = vst.msk [vmem:[#allocation3 + $0x118] sm:$0xff] %vm4144_vm5, %v4840_v50  ;;  %4868 = vst.msk [vmem:[#allocation3 + $0x20] sm:$0xff] %vm4144_vm5, %v4809_v26  ;;  %v3664_v22 = vmax.f32 %v3546_v59, 0.0  ;;  %v3663_v58 = vmax.f32 %v3545_v10, 0.0  ;;  %v4243_v19 = vld [vmem:[#allocation3 + $0x130] sm:$0xff]  ;;  %v4212_v40 = vld [vmem:[#allocation3 + $0x38] sm:$0xff] }
 0x297   : > { %4900 = vst.msk [vmem:[#allocation3 + $0x120] sm:$0xff] %vm4144_vm5, %v4841_v53  ;;  %4869 = vst.msk [vmem:[#allocation3 + $0x28] sm:$0xff] %vm4144_vm5, %v4810_v38  ;;  %7596 = vmatmul.mubr.msk.f32.gmra.mrb[52].mxu0 %vm404_vm0, %v12338_v2  ;;  %v4843_v3 = vadd.f32 %v4701_v45, %v4243_v19  ;;  %v4546_v37 = vpop.f32.mrb[14].mxu0  ;;  %v13612_v26 = vrot.slane %v9542_v44, 1  ;;  %v4994_v38 = vrot.slane %v9900_v42, 1  ;;  %v4244_v21 = vld [vmem:[#allocation3 + $0x138] sm:$0xff] }
 0x298   : > { %4901 = vst.msk [vmem:[#allocation3 + $0x128] sm:$0xff] %vm4144_vm5, %v4842_v48  ;;  %7598 = vmatprep.mubr.msk.f32.mxu0 %vm8300_vm1, %v13463_v24  ;;  %4870 = vst.msk [vmem:[#allocation3 + $0x30] sm:$0xff] %vm4144_vm5, %v4811_v39  ;;  %v4812_v60 = vadd.f32 %v4546_v37, %v4212_v40  ;;  %v7540_v62 = vpop.f32.mrb[15].mxu0  ;;  %v5030_v48 = vrot.slane %v11974_v5, 1  ;;  %v5032_v35 = vrot.slane %v12035_v12, 1  ;;  %v4996_v16 = vrot.slane %v10009_v54, 1 }
 0x299   : > { %v3959_v11 = vld [vmem:[#allocation2 + $0x3a0] ss:$2 sm:$0x1f]  ;;  %3782 = vst.msk [vmem:[#allocation2 + $0x1c8] sm:$0xff] %vm404_vm0, %v3664_v22  ;;  %3781 = vst.msk [vmem:[#allocation2 + $0x1c0] sm:$0xff] %vm404_vm0, %v3663_v58  ;;  %v4991_v53 = vsel %vm1950_vm2, %v13612_v26, %v4990_v14  ;;  %v5034_v59 = vrot.slane %v12051_v27, 1 }
 0x29a   : > { %v4077_v4 = vld [vmem:[#allocation2 + $0x3a1] ss:$2 sm:$0x1f]  ;;  %4902 = vst.msk [vmem:[#allocation3 + $0x130] sm:$0xff] %vm4144_vm5, %v4843_v3  ;;  %4871 = vst.msk [vmem:[#allocation3 + $0x38] sm:$0xff] %vm4144_vm5, %v4812_v60  ;;  %v4706_v10 = vpop.f32.mrb[18].mxu1  ;;  %v12396_v22 = vsel %vm1950_vm2, %v5028_v32, %v5030_v48  ;;  %v12399_v39 = vsel %vm1950_vm2, %v5030_v48, %v5032_v35 }
 0x29b   : > { %v12348_v18 = vmax.f32 %v3959_v11, %v4077_v4  ;;  %v3897_v29 = vld [vmem:[#allocation2 + $0x1b0] ss:$2 sm:$0xff]  ;;  %v4015_v28 = vld [vmem:[#allocation2 + $0x1b1] ss:$2 sm:$0xff]  ;;  %v5803_v6 = vrot.slane %v11741_v23, 2  ;;  %v4995_v4 = vsel %vm1950_vm2, %v4992_v9, %v4994_v38  ;;  %v4844_v19 = vadd.f32 %v4706_v10, %v4244_v21  ;;  %v4551_v62 = vpop.f32.mrb[16].mxu0 }
 0x29c   : > { %v3548_v33 = vld [vmem:[#allocation2 + $0x1d8] sm:$0xff]  ;;  %v12350_v25 = vmax.f32 %v3897_v29, %v4015_v28  ;;  %v3547_v8 = vld [vmem:[#allocation2 + $0x1d0] sm:$0xff]  ;;  %v12406_v29 = vsel %vm1950_vm2, %v5032_v35, %v5034_v59  ;;  %v5805_v28 = vrot.slane %v11847_v30, 2  ;;  %v5036_v45 = vrot.slane %v12267_v17, 1  ;;  %v7543_v35 = vpop.f32.mrb[17].mxu0 }
 0x29d   : > { %v3666_v56 = vmax.f32 %v3548_v33, 0.0  ;;  %7692 = vmatmul.mubr.msk.f32.gmra.mrb[56].mxu1 %vm404_vm0, %v12348_v18  ;;  %v3665_v13 = vmax.f32 %v3547_v8, 0.0  ;;  %v7636_v33 = vpop.f32.mrb[19].mxu1  ;;  %v5807_v3 = vrot.slane %v11974_v5, 2  ;;  %v5038_v52 = vrot.slane %v12338_v2, 1  ;;  %4903 = vst.msk [vmem:[#allocation3 + $0x138] sm:$0xff] %vm4144_vm5, %v4844_v19 }
 0x29e   : > { %7702 = vmatprep.mubr.msk.f32.mxu1 %vm8300_vm1, %v13463_v24  ;;  %7599 = vmatmul.mubr.msk.f32.gmra.mrb[54].mxu0 %vm404_vm0, %v12350_v25  ;;  %v12421_v8 = vsel %vm2899_vm3, %v5803_v6, %v5805_v28  ;;  %v5809_v30 = vrot.slane %v12035_v12, 2  ;;  %v5811_v14 = vrot.slane %v12051_v27, 2  ;;  %v4213_v5 = vld [vmem:[#allocation3 + $0x40] sm:$0xff]  ;;  %v12429_v40 = vsel %vm1950_vm2, %v5034_v59, %v5036_v45  ;;  %v4711_v33 = vpop.f32.mrb[20].mxu1  ;;  %4204 = vst.msk [vmem:[#allocation3 + $0x1d0] sm:$0x7] %vm4203_vm6, %v12042_v46 }
 0x29f   : > { %3784 = vst.msk [vmem:[#allocation2 + $0x1d8] sm:$0xff] %vm404_vm0, %v3666_v56  ;;  %7601 = vmatprep.mubr.msk.f32.mxu0 %vm8300_vm1, %v13463_v24  ;;  %3783 = vst.msk [vmem:[#allocation2 + $0x1d0] sm:$0xff] %vm404_vm0, %v3665_v13  ;;  %v5040_v13 = vrot.slane %v12350_v25, 1  ;;  %v5813_v60 = vrot.slane %v12267_v17, 2  ;;  %v5767_v21 = vrot.slane %v9674_v7, 2  ;;  %v4813_v48 = vadd.f32 %v4551_v62, %v4213_v5 }
 0x2a0   : > { %v3899_v50 = vld [vmem:[#allocation2 + $0x1c0] ss:$2 sm:$0xff]  ;;  %v4017_v51 = vld [vmem:[#allocation2 + $0x1c1] ss:$2 sm:$0xff]  ;;  %v12441_v12 = vsel %vm2899_vm3, %v5807_v3, %v5809_v30  ;;  %v12447_v9 = vsel %vm2899_vm3, %v5809_v30, %v5811_v14  ;;  %v5817_v17 = vrot.slane %v12350_v25, 2  ;;  %v4997_v25 = vsel %vm1950_vm2, %v4994_v38, %v4996_v16 }
 0x2a1   : > { %7703 = vmatmul.mubr.msk.f32.vlgmr.msra.gmra.mrb[58].mxu1 %vm404_vm0, %v12076_v36  ;;  %v12368_v15 = vmax.f32 %v3899_v50, %v4017_v51  ;;  %v5026_v36 = vrot.slane %v11741_v23, 1  ;;  %v12432_v50 = vsel %vm2899_vm3, %v5805_v28, %v5807_v3  ;;  %v12435_v51 = vsel %vm1950_vm2, %v5036_v45, %v5038_v52  ;;  %4872 = vst.msk [vmem:[#allocation3 + $0x40] sm:$0xff] %vm4144_vm5, %v4813_v48  ;;  %v7639_v45 = vpop.f32.mrb[21].mxu1 }
 0x2a2   : > { %7705 = vmatprep.mubr.msk.f32.mxu1 %vm8300_vm1, %v13463_v24  ;;  %v12444_v27 = vsel %vm1950_vm2, %v5038_v52, %v5040_v13  ;;  %v12460_v59 = vsel %vm2899_vm3, %v5811_v14, %v5813_v60  ;;  %v5769_v38 = vrot.slane %v9786_v31, 2  ;;  %v5771_v3 = vrot.slane %v9900_v42, 2  ;;  %v4214_v52 = vld [vmem:[#allocation3 + $0x48] sm:$0xff]  ;;  %v4716_v48 = vpop.f32.mrb[22].mxu1 }
 0x2a3   : > { %7602 = vmatmul.mubr.msk.f32.gmra.mrb[56].mxu0 %vm404_vm0, %v12368_v15  ;;  %v12391_v20 = vsel %vm1950_vm2, %v5026_v36, %v5028_v32  ;;  %v5042_v37 = vrot.slane %v12368_v15, 1  ;;  %v5815_v32 = vrot.slane %v12338_v2, 2  ;;  %v5819_v7 = vrot.slane %v12368_v15, 2  ;;  %v4245_v15 = vld [vmem:[#allocation3 + $0x140] sm:$0xff] }
 0x2a4   : > { %7604 = vmatprep.mubr.msk.f32.mxu0 %vm8300_vm1, %v13463_v24  ;;  %v4845_v28 = vadd.f32 %v4711_v33, %v4245_v15  ;;  %v5770_v31 = vsel %vm2899_vm3, %v5767_v21, %v5769_v38  ;;  %v5002_v30 = vrot.slane %v10336_v0, 1  ;;  %v5772_v14 = vsel %vm2899_vm3, %v5769_v38, %v5771_v3  ;;  %v13614_v33 = vld [vmem:[#allocation28_spill] sm:$0xff] }
 0x2a5   : > { %7706 = vmatmul.mubr.msk.f32.gmra.mrb[60].mxu1 %vm404_vm0, %v4991_v53  ;;  %v12452_v26 = vsel %vm1950_vm2, %v5040_v13, %v5042_v37  ;;  %v12471_v2 = vsel %vm2899_vm3, %v5813_v60, %v5815_v32  ;;  %v12484_v10 = vsel %vm2899_vm3, %v5815_v32, %v5817_v17  ;;  %v4556_v13 = vpop.f32.mrb[18].mxu0  ;;  %v5773_v42 = vrot.slane %v10009_v54, 2  ;;  %v4246_v32 = vld [vmem:[#allocation3 + $0x148] sm:$0xff] }
 0x2a6   : > { %7708 = vmatprep.mubr.msk.f32.mxu1 %vm8300_vm1, %v13463_v24  ;;  %v3901_v58 = vld [vmem:[#allocation2 + $0x1d0] ss:$2 sm:$0xff]  ;;  %v4019_v11 = vld [vmem:[#allocation2 + $0x1d1] ss:$2 sm:$0xff]  ;;  %4904 = vst.msk [vmem:[#allocation3 + $0x140] sm:$0xff] %vm4144_vm5, %v4845_v28  ;;  %v4814_v5 = vadd.f32 %v4556_v13, %v4214_v52  ;;  %v5004_v62 = vrot.slane %v10448_v41, 1 }
 0x2a7   : > { %v12409_v56 = vmax.f32 %v3901_v58, %v4019_v11  ;;  %v12489_v11 = vsel %vm2899_vm3, %v5817_v17, %v5819_v7  ;;  %v5775_v54 = vrot.slane %v10119_v57, 2  ;;  %v13613_v17 = vld [vmem:[#allocation26_spill] sm:$0xff] }
 0x2a8   : > { %4873 = vst.msk [vmem:[#allocation3 + $0x48] sm:$0xff] %vm4144_vm5, %v4814_v5  ;;  %v5005_v35 = vsel %vm1950_vm2, %v5002_v30, %v5004_v62  ;;  %v13615_v52 = vld [vmem:[#allocation30_spill] sm:$0xff] }
 0x2a9   : > { %7709 = vmatmul.mubr.msk.f32.gmra.mrb[62].mxu1 %vm404_vm0, %v4993_v49  ;;  %7605 = vmatmul.mubr.msk.f32.gmra.mrb[58].mxu0 %vm404_vm0, %v12409_v56  ;;  %v5044_v53 = vrot.slane %v12409_v56, 1  ;;  %v5821_v58 = vrot.slane %v12409_v56, 2  ;;  %v5776_v15 = vsel %vm2899_vm3, %v5773_v42, %v5775_v54  ;;  %v4255_v56 = vld [vmem:[#allocation3 + $0x190] sm:$0xff] }
 0x2aa   : > { %7711 = vmatprep.mubr.msk.f32.mxu1 %vm8300_vm1, %v13463_v24  ;;  %7887 = vmatprep.mubr.msk.f32.mxu0 %vm8300_vm1, %v13463_v24 }
 0x2ab   : > { %v12468_v49 = vsel %vm1950_vm2, %v5042_v37, %v5044_v53  ;;  %v12500_v19 = vsel %vm2899_vm3, %v5819_v7, %v5821_v58  ;;  %v7546_v37 = vpop.f32.mrb[19].mxu0  ;;  %v5006_v7 = vrot.slane %v13613_v17, 1 }
 0x2ad   : > { %7712 = vmatmul.mubr.msk.f32.gmra.mrb[64].mxu1 %vm404_vm0, %v4995_v4  ;;  %7888 = vmatmul.mubr.msk.f32.vlgmr.msra.gmra.mrb[60].mxu0 %vm404_vm0, %v12256_v34  ;;  %v4998_v34 = vrot.slane %v10119_v57, 1  ;;  %v5768_v4 = vsel %vm2899_vm3, %v5765_v55, %v5767_v21  ;;  %v5000_v55 = vrot.slane %v10232_v63, 1  ;;  %v5774_v21 = vsel %vm2899_vm3, %v5771_v3, %v5773_v42 }
 0x2ae   : > { %7714 = vmatprep.mubr.msk.f32.mxu1 %vm8300_vm1, %v13463_v24  ;;  %7890 = vmatprep.mubr.msk.f32.mxu0 %vm8300_vm1, %v13463_v24  ;;  %v5777_v57 = vrot.slane %v10232_v63, 2  ;;  %v5007_v38 = vsel %vm1950_vm2, %v5004_v62, %v5006_v7  ;;  %v5779_v63 = vrot.slane %v10336_v0, 2  ;;  %v5781_v0 = vrot.slane %v10448_v41, 2 }
 0x2af   : > { %v4999_v44 = vsel %vm1950_vm2, %v4996_v16, %v4998_v34  ;;  %v5001_v16 = vsel %vm1950_vm2, %v4998_v34, %v5000_v55  ;;  %v5003_v60 = vsel %vm1950_vm2, %v5000_v55, %v5002_v30  ;;  %v7642_v34 = vpop.f32.mrb[23].mxu1  ;;  %v4561_v55 = vpop.f32.mrb[20].mxu0  ;;  %v4247_v30 = vld [vmem:[#allocation3 + $0x150] sm:$0xff]  ;;  %v5783_v41 = vrot.slane %v13613_v17, 2 }
 0x2b0   : > { %v7549_v45 = vpop.f32.mrb[21].mxu0  ;;  %v5780_v13 = vsel %vm2899_vm3, %v5777_v57, %v5779_v63  ;;  %v5785_v17 = vrot.slane %v13614_v33, 2 }
 0x2b1   : > { %7715 = vmatmul.mubr.msk.f32.gmra.mrb[66].mxu1 %vm404_vm0, %v4997_v25  ;;  %7891 = vmatmul.mubr.msk.f32.gmra.mrb[62].mxu0 %vm404_vm0, %v5768_v4  ;;  %v4846_v25 = vadd.f32 %v4716_v48, %v4246_v32  ;;  %v4215_v4 = vld [vmem:[#allocation3 + $0x50] sm:$0xff]  ;;  %v5782_v32 = vsel %vm2899_vm3, %v5779_v63, %v5781_v0  ;;  %v13617_v48 = vld [vmem:[#allocation34_spill] sm:$0xff] }
 0x2b2   : > { %7717 = vmatprep.mubr.msk.f32.mxu1 %vm8300_vm1, %v13463_v24  ;;  %7893 = vmatprep.mubr.msk.f32.mxu0 %vm8300_vm1, %v13463_v24  ;;  %v4815_v28 = vadd.f32 %v4561_v55, %v4215_v4  ;;  %v13618_v4 = vld [vmem:[#allocation36_spill] sm:$0xff]  ;;  %v5786_v55 = vsel %vm2899_vm3, %v5783_v41, %v5785_v17 }
 0x2b3   : > { %4905 = vst.msk [vmem:[#allocation3 + $0x148] sm:$0xff] %vm4144_vm5, %v4846_v25 }
 0x2b4   : > { %4874 = vst.msk [vmem:[#allocation3 + $0x50] sm:$0xff] %vm4144_vm5, %v4815_v28 }
 0x2b5   : > { %7718 = vmatmul.mubr.msk.f32.gmra.mrb[68].mxu1 %vm404_vm0, %v4999_v44  ;;  %7894 = vmatmul.mubr.msk.f32.gmra.mrb[64].mxu0 %vm404_vm0, %v5770_v31  ;;  %v5008_v44 = vrot.slane %v13614_v33, 1  ;;  %v5778_v31 = vsel %vm2899_vm3, %v5775_v54, %v5777_v57  ;;  %v5787_v33 = vrot.slane %v13615_v52, 2 }
 0x2b6   : > { %7720 = vmatprep.mubr.msk.f32.mxu1 %vm8300_vm1, %v13463_v24  ;;  %7896 = vmatprep.mubr.msk.f32.mxu0 %vm8300_vm1, %v13463_v24 }
 0x2b7   : > { %v5009_v3 = vsel %vm1950_vm2, %v5006_v7, %v5008_v44  ;;  %v4566_v7 = vpop.f32.mrb[22].mxu0 }
 0x2b8   : > { %v7552_v34 = vpop.f32.mrb[23].mxu0 }
 0x2b9   : > { %7721 = vmatmul.mubr.msk.f32.gmra.mrb[70].mxu1 %vm404_vm0, %v5001_v16  ;;  %7897 = vmatmul.mubr.msk.f32.gmra.mrb[66].mxu0 %vm404_vm0, %v5772_v14  ;;  %v5010_v16 = vrot.slane %v13615_v52, 1  ;;  %v4721_v14 = vpop.f32.mrb[24].mxu1 }
 0x2ba   : > { %7723 = vmatprep.mubr.msk.f32.mxu1 %vm8300_vm1, %v13463_v24  ;;  %7899 = vmatprep.mubr.msk.f32.mxu0 %vm8300_vm1, %v13463_v24  ;;  %v4847_v42 = vadd.f32 %v4721_v14, %v4247_v30  ;;  %v7645_v5 = vpop.f32.mrb[25].mxu1  ;;  %v4217_v30 = vld [vmem:[#allocation3 + $0x60] sm:$0xff] }
 0x2bb   : > { %v5011_v37 = vsel %vm1950_vm2, %v5008_v44, %v5010_v16  ;;  %v4248_v44 = vld [vmem:[#allocation3 + $0x158] sm:$0xff]  ;;  %v4726_v28 = vpop.f32.mrb[26].mxu1 }
 0x2bc   : > { %4906 = vst.msk [vmem:[#allocation3 + $0x150] sm:$0xff] %vm4144_vm5, %v4847_v42  ;;  %v4848_v45 = vadd.f32 %v4726_v28, %v4248_v44  ;;  %v13620_v42 = vld [vmem:[#allocation40_spill] sm:$0xff]  ;;  %v4218_v44 = vld [vmem:[#allocation3 + $0x68] sm:$0xff] }
 0x2bd   : > { %7724 = vmatmul.mubr.msk.f32.gmra.mrb[72].mxu1 %vm404_vm0, %v5003_v60  ;;  %7900 = vmatmul.mubr.msk.f32.gmra.mrb[68].mxu0 %vm404_vm0, %v5774_v21  ;;  %v13616_v60 = vld [vmem:[#allocation32_spill] sm:$0xff]  ;;  %v4216_v21 = vld [vmem:[#allocation3 + $0x58] sm:$0xff]  ;;  %v5020_v5 = vrot.slane %v13620_v42, 1 }
 0x2be   : > { %7726 = vmatprep.mubr.msk.f32.mxu1 %vm8300_vm1, %v13463_v24  ;;  %7902 = vmatprep.mubr.msk.f32.mxu0 %vm8300_vm1, %v13463_v24  ;;  %v5012_v62 = vrot.slane %v13616_v60, 1  ;;  %v4816_v25 = vadd.f32 %v4566_v7, %v4216_v21  ;;  %4907 = vst.msk [vmem:[#allocation3 + $0x158] sm:$0xff] %vm4144_vm5, %v4848_v45  ;;  %v5789_v52 = vrot.slane %v13616_v60, 2  ;;  %v5791_v60 = vrot.slane %v13617_v48, 2 }
 0x2c0   : > { %v5013_v54 = vsel %vm1950_vm2, %v5010_v16, %v5012_v62  ;;  %4875 = vst.msk [vmem:[#allocation3 + $0x58] sm:$0xff] %vm4144_vm5, %v4816_v25  ;;  %v5792_v25 = vsel %vm2899_vm3, %v5789_v52, %v5791_v60 }
 0x2c1   : > { %7727 = vmatmul.mubr.msk.f32.gmra.mrb[74].mxu1 %vm404_vm0, %v5005_v35  ;;  %7903 = vmatmul.mubr.msk.f32.gmra.mrb[70].mxu0 %vm404_vm0, %v5776_v15  ;;  %v5014_v35 = vrot.slane %v13617_v48, 1  ;;  %v5784_v15 = vsel %vm2899_vm3, %v5781_v0, %v5783_v41  ;;  %v4571_v0 = vpop.f32.mrb[24].mxu0  ;;  %v4249_v41 = vld [vmem:[#allocation3 + $0x160] sm:$0xff]  ;;  %v5793_v48 = vrot.slane %v13618_v4, 2 }
 0x2c2   : > { %7729 = vmatprep.mubr.msk.f32.mxu1 %vm8300_vm1, %v13463_v24  ;;  %7905 = vmatprep.mubr.msk.f32.mxu0 %vm8300_vm1, %v13463_v24 }
 0x2c3   : > { %v5015_v57 = vsel %vm1950_vm2, %v5012_v62, %v5014_v35  ;;  %v7555_v62 = vpop.f32.mrb[25].mxu0 }
 0x2c5   : > { %7730 = vmatmul.mubr.msk.f32.gmra.mrb[76].mxu1 %vm404_vm0, %v5007_v38  ;;  %7906 = vmatmul.mubr.msk.f32.gmra.mrb[72].mxu0 %vm404_vm0, %v5778_v31  ;;  %v5016_v38 = vrot.slane %v13618_v4, 1  ;;  %v7648_v31 = vpop.f32.mrb[27].mxu1 }
 0x2c6   : > { %7732 = vmatprep.mubr.msk.f32.mxu1 %vm8300_vm1, %v13463_v24  ;;  %7908 = vmatprep.mubr.msk.f32.mxu0 %vm8300_vm1, %v13463_v24  ;;  %v4731_v7 = vpop.f32.mrb[28].mxu1 }
 0x2c7   : > { %v5017_v63 = vsel %vm1950_vm2, %v5014_v35, %v5016_v38  ;;  %v4849_v34 = vadd.f32 %v4731_v7, %v4249_v41 }
 0x2c9   : > { %7733 = vmatmul.mubr.msk.f32.gmra.mrb[78].mxu1 %vm404_vm0, %v5009_v3  ;;  %7909 = vmatmul.mubr.msk.f32.gmra.mrb[74].mxu0 %vm404_vm0, %v5780_v13  ;;  %v13619_v3 = vld [vmem:[#allocation38_spill] sm:$0xff]  ;;  %v5788_v13 = vsel %vm2899_vm3, %v5785_v17, %v5787_v33  ;;  %4908 = vst.msk [vmem:[#allocation3 + $0x160] sm:$0xff] %vm4144_vm5, %v4849_v34 }
 0x2ca   : > { %7735 = vmatprep.mubr.msk.f32.mxu1 %vm8300_vm1, %v13463_v24  ;;  %7911 = vmatprep.mubr.msk.f32.mxu0 %vm8300_vm1, %v13463_v24  ;;  %v5018_v16 = vrot.slane %v13619_v3, 1  ;;  %v5795_v4 = vrot.slane %v13619_v3, 2 }
 0x2cc   : > { %v5019_v14 = vsel %vm1950_vm2, %v5016_v38, %v5018_v16  ;;  %v5021_v21 = vsel %vm1950_vm2, %v5018_v16, %v5020_v5  ;;  %v5797_v16 = vrot.slane %v13620_v42, 2 }
 0x2cd   : > { %7736 = vmatmul.mubr.msk.f32.gmra.mrb[80].mxu1 %vm404_vm0, %v5011_v37  ;;  %7912 = vmatmul.mubr.msk.f32.gmra.mrb[76].mxu0 %vm404_vm0, %v5782_v32  ;;  %v4817_v37 = vadd.f32 %v4571_v0, %v4217_v30  ;;  %v5790_v32 = vsel %vm2899_vm3, %v5787_v33, %v5789_v52  ;;  %v4576_v33 = vpop.f32.mrb[26].mxu0  ;;  %v4250_v30 = vld [vmem:[#allocation3 + $0x168] sm:$0xff] }
 0x2ce   : > { %7738 = vmatprep.mubr.msk.f32.mxu1 %vm8300_vm1, %v13463_v24  ;;  %7914 = vmatprep.mubr.msk.f32.mxu0 %vm8300_vm1, %v13463_v24  ;;  %v4818_v45 = vadd.f32 %v4576_v33, %v4218_v44  ;;  %v7558_v31 = vpop.f32.mrb[27].mxu0  ;;  %v4254_v33 = vld [vmem:[#allocation3 + $0x188] sm:$0xff] }
 0x2cf   : > { %4876 = vst.msk [vmem:[#allocation3 + $0x60] sm:$0xff] %vm4144_vm5, %v4817_v37  ;;  %v4581_v62 = vpop.f32.mrb[28].mxu0 }
 0x2d0   : > { %4877 = vst.msk [vmem:[#allocation3 + $0x68] sm:$0xff] %vm4144_vm5, %v4818_v45 }
 0x2d1   : > { %7739 = vmatmul.mubr.msk.f32.gmra.mrb[82].mxu1 %vm404_vm0, %v5013_v54  ;;  %7915 = vmatmul.mubr.msk.f32.gmra.mrb[78].mxu0 %vm404_vm0, %v5784_v15  ;;  %v13621_v54 = vld [vmem:[#allocation42_spill] sm:$0xff]  ;;  %v7651_v15 = vpop.f32.mrb[29].mxu1 }
 0x2d2   : > { %7741 = vmatprep.mubr.msk.f32.mxu1 %vm8300_vm1, %v13463_v24  ;;  %7917 = vmatprep.mubr.msk.f32.mxu0 %vm8300_vm1, %v13463_v24  ;;  %v5022_v35 = vrot.slane %v13621_v54, 1  ;;  %v5799_v52 = vrot.slane %v13621_v54, 2  ;;  %v4736_v0 = vpop.f32.mrb[30].mxu1 }
 0x2d3   : > { %v7654_v42 = vpop.f32.mrb[31].mxu1 }
 0x2d4   : > { %v5023_v17 = vsel %vm1950_vm2, %v5020_v5, %v5022_v35  ;;  %v5800_v5 = vsel %vm2899_vm3, %v5797_v16, %v5799_v52  ;;  %v4741_v41 = vpop.f32.mrb[32].mxu1 }
 0x2d5   : > { %7742 = vmatmul.mubr.msk.f32.gmra.mrb[84].mxu1 %vm404_vm0, %v5015_v57  ;;  %7918 = vmatmul.mubr.msk.f32.gmra.mrb[80].mxu0 %vm404_vm0, %v5786_v55  ;;  %v13622_v57 = vld [vmem:[#allocation44_spill] sm:$0xff]  ;;  %v5794_v55 = vsel %vm2899_vm3, %v5791_v60, %v5793_v48  ;;  %v7657_v54 = vpop.f32.mrb[33].mxu1 }
 0x2d6   : > { %7744 = vmatprep.mubr.msk.f32.mxu1 %vm8300_vm1, %v13463_v24  ;;  %7920 = vmatprep.mubr.msk.f32.mxu0 %vm8300_vm1, %v13463_v24  ;;  %v5024_v38 = vrot.slane %v13622_v57, 1  ;;  %v5801_v37 = vrot.slane %v13622_v57, 2  ;;  %v4251_v60 = vld [vmem:[#allocation3 + $0x170] sm:$0xff] }
 0x2d8   : > { %v5025_v28 = vsel %vm1950_vm2, %v5022_v35, %v5024_v38  ;;  %v5027_v3 = vsel %vm1950_vm2, %v5024_v38, %v5026_v36  ;;  %v4219_v36 = vld [vmem:[#allocation3 + $0x70] sm:$0xff] }
 0x2d9   : > { %7745 = vmatmul.mubr.msk.f32.gmra.mrb[86].mxu1 %vm404_vm0, %v5017_v63  ;;  %7921 = vmatmul.mubr.msk.f32.gmra.mrb[82].mxu0 %vm404_vm0, %v5788_v13  ;;  %v5796_v63 = vsel %vm2899_vm3, %v5793_v48, %v5795_v4  ;;  %v5798_v13 = vsel %vm2899_vm3, %v5795_v4, %v5797_v16  ;;  %v4819_v46 = vadd.f32 %v4581_v62, %v4219_v36 }
 0x2da   : > { %7747 = vmatprep.mubr.msk.f32.mxu1 %vm8300_vm1, %v13463_v24  ;;  %7923 = vmatprep.mubr.msk.f32.mxu0 %vm8300_vm1, %v13463_v24 }
 0x2db   : > { %4878 = vst.msk [vmem:[#allocation3 + $0x70] sm:$0xff] %vm4144_vm5, %v4819_v46 }
 0x2dd   : > { %7748 = vmatmul.mubr.msk.f32.gmra.mrb[88].mxu1 %vm404_vm0, %v5019_v14  ;;  %7924 = vmatmul.mubr.msk.f32.gmra.mrb[84].mxu0 %vm404_vm0, %v5790_v32  ;;  %v4850_v14 = vadd.f32 %v4736_v0, %v4250_v30  ;;  %v7561_v32 = vpop.f32.mrb[29].mxu0 }
 0x2de   : > { %7750 = vmatprep.mubr.msk.f32.mxu1 %vm8300_vm1, %v13463_v24  ;;  %7926 = vmatprep.mubr.msk.f32.mxu0 %vm8300_vm1, %v13463_v24  ;;  %v4586_v23 = vpop.f32.mrb[30].mxu0 }
 0x2df   : > { %4909 = vst.msk [vmem:[#allocation3 + $0x168] sm:$0xff] %vm4144_vm5, %v4850_v14  ;;  %v7564_v35 = vpop.f32.mrb[31].mxu0 }
 0x2e0   : > { %v13630_v35 = vld [vmem:[#allocation21_spill] sm:$0xff] }
 0x2e1   : > { %7751 = vmatmul.mubr.msk.f32.gmra.mrb[90].mxu1 %vm404_vm0, %v5021_v21  ;;  %7927 = vmatmul.mubr.msk.f32.gmra.mrb[86].mxu0 %vm404_vm0, %v5792_v25  ;;  %v4851_v21 = vadd.f32 %v4741_v41, %v4251_v60  ;;  %v13629_v60 = vld [vmem:[#allocation20_spill] sm:$0xff] }
 0x2e2   : > { %7753 = vmatprep.mubr.msk.f32.mxu1 %vm8300_vm1, %v13463_v24  ;;  %7929 = vmatprep.mubr.msk.f32.mxu0 %vm8300_vm1, %v13463_v24  ;;  %v5058_v41 = vrot.slane %v13629_v60, 1 }
 0x2e3   : > { %4910 = vst.msk [vmem:[#allocation3 + $0x170] sm:$0xff] %vm4144_vm5, %v4851_v21 }
 0x2e5   : > { %7754 = vmatmul.mubr.msk.f32.gmra.mrb[92].mxu1 %vm404_vm0, %v5023_v17  ;;  %7930 = vmatmul.mubr.msk.f32.gmra.mrb[88].mxu0 %vm404_vm0, %v5794_v55  ;;  %v13624_v17 = vld [vmem:[#allocation15_spill] sm:$0xff] }
 0x2e6   : > { %7756 = vmatprep.mubr.msk.f32.mxu1 %vm8300_vm1, %v13463_v24  ;;  %7932 = vmatprep.mubr.msk.f32.mxu0 %vm8300_vm1, %v13463_v24  ;;  %v5048_v57 = vrot.slane %v13624_v17, 1 }
 0x2e9   : > { %7757 = vmatmul.mubr.msk.f32.gmra.mrb[94].mxu1 %vm404_vm0, %v5025_v28  ;;  %7933 = vmatmul.mubr.msk.f32.gmra.mrb[90].mxu0 %vm404_vm0, %v5796_v63  ;;  %v13626_v28 = vld [vmem:[#allocation17_spill] sm:$0xff] }
 0x2ea   : > { %7759 = vmatprep.mubr.msk.f32.mxu1 %vm8300_vm1, %v13463_v24  ;;  %7935 = vmatprep.mubr.msk.f32.mxu0 %vm8300_vm1, %v13463_v24  ;;  %v5052_v45 = vrot.slane %v13626_v28, 1 }
 0x2ed   : > { %7760 = vmatmul.mubr.msk.f32.gmra.mrb[96].mxu1 %vm404_vm0, %v5027_v3  ;;  %7936 = vmatmul.mubr.msk.f32.gmra.mrb[92].mxu0 %vm404_vm0, %v5798_v13  ;;  %v13627_v13 = vld [vmem:[#allocation18_spill] sm:$0xff] }
 0x2ee   : > { %7762 = vmatprep.mubr.msk.f32.mxu1 %vm8300_vm1, %v13463_v24  ;;  %7938 = vmatprep.mubr.msk.f32.mxu0 %vm8300_vm1, %v13463_v24 }
 0x2f1   : > { %7763 = vmatmul.mubr.msk.f32.gmra.mrb[98].mxu1 %vm404_vm0, %v12391_v20  ;;  %7939 = vmatmul.mubr.msk.f32.gmra.mrb[94].mxu0 %vm404_vm0, %v5800_v5  ;;  %v5802_v20 = vsel %vm2899_vm3, %v5799_v52, %v5801_v37  ;;  %v5054_v52 = vrot.slane %v13627_v13, 1 }
 0x2f2   : > { %7765 = vmatprep.mubr.msk.f32.mxu1 %vm8300_vm1, %v13463_v24  ;;  %7941 = vmatprep.mubr.msk.f32.mxu0 %vm8300_vm1, %v13463_v24 }
 0x2f3   : > { %v5055_v5 = vsel %vm1950_vm2, %v5052_v45, %v5054_v52 }
 0x2f5   : > { %7766 = vmatmul.mubr.msk.f32.gmra.mrb[100].mxu1 %vm404_vm0, %v12396_v22  ;;  %7942 = vmatmul.mubr.msk.f32.gmra.mrb[96].mxu0 %vm404_vm0, %v5802_v20  ;;  %v5804_v22 = vsel %vm2899_vm3, %v5801_v37, %v5803_v6  ;;  %v13628_v37 = vld [vmem:[#allocation19_spill] sm:$0xff] }
 0x2f6   : > { %7768 = vmatprep.mubr.msk.f32.mxu1 %vm8300_vm1, %v13463_v24  ;;  %7944 = vmatprep.mubr.msk.f32.mxu0 %vm8300_vm1, %v13463_v24  ;;  %v5056_v62 = vrot.slane %v13628_v37, 1 }
 0x2f8   : > { %v5057_v20 = vsel %vm1950_vm2, %v5054_v52, %v5056_v62 }
 0x2f9   : > { %7769 = vmatmul.mubr.msk.f32.gmra.mrb[102].mxu1 %vm404_vm0, %v12399_v39  ;;  %7945 = vmatmul.mubr.msk.f32.gmra.mrb[98].mxu0 %vm404_vm0, %v5804_v22  ;;  %v4220_v39 = vld [vmem:[#allocation3 + $0x78] sm:$0xff] }
 0x2fa   : > { %7771 = vmatprep.mubr.msk.f32.mxu1 %vm8300_vm1, %v13463_v24  ;;  %7947 = vmatprep.mubr.msk.f32.mxu0 %vm8300_vm1, %v13463_v24  ;;  %v4820_v6 = vadd.f32 %v4586_v23, %v4220_v39  ;;  %v5829_v39 = vrot.slane %v13626_v28, 2  ;;  %v4224_v23 = vld [vmem:[#allocation3 + $0x98] sm:$0xff] }
 0x2fc   : > { %4879 = vst.msk [vmem:[#allocation3 + $0x78] sm:$0xff] %vm4144_vm5, %v4820_v6  ;;  %v5059_v6 = vsel %vm1950_vm2, %v5056_v62, %v5058_v41 }
 0x2fd   : > { %7772 = vmatmul.mubr.msk.f32.gmra.mrb[104].mxu1 %vm404_vm0, %v12406_v29  ;;  %7948 = vmatmul.mubr.msk.f32.gmra.mrb[100].mxu0 %vm404_vm0, %v12421_v8  ;;  %v4252_v29 = vld [vmem:[#allocation3 + $0x178] sm:$0xff]  ;;  %v4746_v8 = vpop.f32.mrb[34].mxu1 }
 0x2fe   : > { %7774 = vmatprep.mubr.msk.f32.mxu1 %vm8300_vm1, %v13463_v24  ;;  %7950 = vmatprep.mubr.msk.f32.mxu0 %vm8300_vm1, %v13463_v24  ;;  %v4852_v7 = vadd.f32 %v4746_v8, %v4252_v29  ;;  %v7660_v25 = vpop.f32.mrb[35].mxu1  ;;  %v5060_v29 = vrot.slane %v13630_v35, 1 }
 0x2ff   : > { %v5831_v25 = vrot.slane %v13627_v13, 2 }
 0x300   : > { %4911 = vst.msk [vmem:[#allocation3 + $0x178] sm:$0xff] %vm4144_vm5, %v4852_v7 }
 0x301   : > { %7775 = vmatmul.mubr.msk.f32.gmra.mrb[106].mxu1 %vm404_vm0, %v12429_v40  ;;  %7951 = vmatmul.mubr.msk.f32.gmra.mrb[102].mxu0 %vm404_vm0, %v12432_v50  ;;  %v4221_v40 = vld [vmem:[#allocation3 + $0x80] sm:$0xff]  ;;  %v4591_v50 = vpop.f32.mrb[32].mxu0 }
 0x302   : > { %7777 = vmatprep.mubr.msk.f32.mxu1 %vm8300_vm1, %v13463_v24  ;;  %7953 = vmatprep.mubr.msk.f32.mxu0 %vm8300_vm1, %v13463_v24  ;;  %v7567_v48 = vpop.f32.mrb[33].mxu0 }
 0x303   : > { %v4596_v38 = vpop.f32.mrb[34].mxu0  ;;  %v13631_v48 = vld [vmem:[#allocation22_spill] sm:$0xff] }
 0x304   : > { %v7570_v44 = vpop.f32.mrb[35].mxu0 }
 0x305   : > { %7778 = vmatmul.mubr.msk.f32.gmra.mrb[108].mxu1 %vm404_vm0, %v12435_v51  ;;  %7954 = vmatmul.mubr.msk.f32.gmra.mrb[104].mxu0 %vm404_vm0, %v12441_v12  ;;  %v4821_v51 = vadd.f32 %v4591_v50, %v4221_v40  ;;  %v4253_v12 = vld [vmem:[#allocation3 + $0x180] sm:$0xff]  ;;  %v4601_v0 = vpop.f32.mrb[36].mxu0 }
 0x306   : > { %7780 = vmatprep.mubr.msk.f32.mxu1 %vm8300_vm1, %v13463_v24  ;;  %7956 = vmatprep.mubr.msk.f32.mxu0 %vm8300_vm1, %v13463_v24  ;;  %v7573_v36 = vpop.f32.mrb[37].mxu0  ;;  %v4225_v44 = vld [vmem:[#allocation3 + $0xa0] sm:$0xff] }
 0x307   : > { %4880 = vst.msk [vmem:[#allocation3 + $0x80] sm:$0xff] %vm4144_vm5, %v4821_v51  ;;  %v4606_v8 = vpop.f32.mrb[38].mxu0  ;;  %v5061_v51 = vsel %vm1950_vm2, %v5058_v41, %v5060_v29 }
 0x308   : > { %v4824_v40 = vadd.f32 %v4606_v8, %v4224_v23  ;;  %v7576_v50 = vpop.f32.mrb[39].mxu0 }
 0x309   : > { %7781 = vmatmul.mubr.msk.f32.gmra.mrb[110].mxu1 %vm404_vm0, %v12444_v27  ;;  %7957 = vmatmul.mubr.msk.f32.gmra.mrb[106].mxu0 %vm404_vm0, %v12447_v9  ;;  %v4751_v27 = vpop.f32.mrb[36].mxu1 }
 0x30a   : > { %7783 = vmatprep.mubr.msk.f32.mxu1 %vm8300_vm1, %v13463_v24  ;;  %7959 = vmatprep.mubr.msk.f32.mxu0 %vm8300_vm1, %v13463_v24  ;;  %v4853_v9 = vadd.f32 %v4751_v27, %v4253_v12  ;;  %v7663_v34 = vpop.f32.mrb[37].mxu1  ;;  %4883 = vst.msk [vmem:[#allocation3 + $0x98] sm:$0xff] %vm4144_vm5, %v4824_v40  ;;  %v5062_v12 = vrot.slane %v13631_v48, 1  ;;  %v4256_v27 = vld [vmem:[#allocation3 + $0x198] sm:$0xff] }
 0x30b   : > { %v4756_v31 = vpop.f32.mrb[38].mxu1  ;;  %v5833_v34 = vrot.slane %v13628_v37, 2  ;;  %v4226_v37 = vld [vmem:[#allocation3 + $0xa8] sm:$0xff]  ;;  %v13638_v40 = vld [vmem:[#allocation33_spill] sm:$0xff] }
 0x30c   : > { %4912 = vst.msk [vmem:[#allocation3 + $0x180] sm:$0xff] %vm4144_vm5, %v4853_v9  ;;  %v4854_v63 = vadd.f32 %v4756_v31, %v4254_v33  ;;  %v7666_v16 = vpop.f32.mrb[39].mxu1  ;;  %v5832_v9 = vsel %vm2899_vm3, %v5829_v39, %v5831_v25  ;;  %v5076_v50 = vrot.slane %v13638_v40, 1 }
 0x30d   : > { %7784 = vmatmul.mubr.msk.f32.gmra.mrb[112].mxu1 %vm404_vm0, %v12452_v26  ;;  %7960 = vmatmul.mubr.msk.f32.gmra.mrb[108].mxu0 %vm404_vm0, %v12460_v59  ;;  %v13623_v26 = vld [vmem:[#allocation14_spill] sm:$0xff]  ;;  %v4761_v32 = vpop.f32.mrb[40].mxu1 }
 0x30e   : > { %7786 = vmatprep.mubr.msk.f32.mxu1 %vm8300_vm1, %v13463_v24  ;;  %7962 = vmatprep.mubr.msk.f32.mxu0 %vm8300_vm1, %v13463_v24  ;;  %v5046_v15 = vrot.slane %v13623_v26, 1  ;;  %4913 = vst.msk [vmem:[#allocation3 + $0x188] sm:$0xff] %vm4144_vm5, %v4854_v63  ;;  %v5823_v30 = vrot.slane %v13623_v26, 2  ;;  %v4855_v22 = vadd.f32 %v4761_v32, %v4255_v56  ;;  %v7669_v21 = vpop.f32.mrb[41].mxu1  ;;  %v4257_v63 = vld [vmem:[#allocation3 + $0x1a0] sm:$0xff] }
 0x30f   : > { %v4766_v26 = vpop.f32.mrb[42].mxu1  ;;  %v4258_v21 = vld [vmem:[#allocation3 + $0x1a8] sm:$0xff] }
 0x310   : > { %v5047_v59 = vsel %vm1950_vm2, %v5044_v53, %v5046_v15  ;;  %v5049_v55 = vsel %vm1950_vm2, %v5046_v15, %v5048_v57  ;;  %v13625_v53 = vld [vmem:[#allocation16_spill] sm:$0xff]  ;;  %v5824_v14 = vsel %vm2899_vm3, %v5821_v58, %v5823_v30  ;;  %4914 = vst.msk [vmem:[#allocation3 + $0x190] sm:$0xff] %vm4144_vm5, %v4855_v22  ;;  %v4856_v15 = vadd.f32 %v4766_v26, %v4256_v27 }
 0x311   : > { %7787 = vmatmul.mubr.msk.f32.gmra.mrb[114].mxu1 %vm404_vm0, %v12468_v49  ;;  %7963 = vmatmul.mubr.msk.f32.gmra.mrb[110].mxu0 %vm404_vm0, %v12471_v2  ;;  %v4222_v49 = vld [vmem:[#allocation3 + $0x88] sm:$0xff]  ;;  %v5050_v4 = vrot.slane %v13625_v53, 1  ;;  %v5827_v46 = vrot.slane %v13625_v53, 2  ;;  %v13633_v53 = vld [vmem:[#allocation24_spill] sm:$0xff] }
 0x312   : > { %7789 = vmatprep.mubr.msk.f32.mxu1 %vm8300_vm1, %v13463_v24  ;;  %7965 = vmatprep.mubr.msk.f32.mxu0 %vm8300_vm1, %v13463_v24  ;;  %v4822_v2 = vadd.f32 %v4596_v38, %v4222_v49  ;;  %4915 = vst.msk [vmem:[#allocation3 + $0x198] sm:$0xff] %vm4144_vm5, %v4856_v15  ;;  %v5834_v38 = vsel %vm2899_vm3, %v5831_v25, %v5833_v34  ;;  %v5843_v22 = vrot.slane %v13633_v53, 2 }
 0x313   : > { %v5053_v3 = vsel %vm1950_vm2, %v5050_v4, %v5052_v45  ;;  %v5830_v7 = vsel %vm2899_vm3, %v5827_v46, %v5829_v39  ;;  %v5837_v45 = vrot.slane %v13630_v35, 2  ;;  %v13637_v39 = vld [vmem:[#allocation31_spill] sm:$0xff] }
 0x314   : > { %4881 = vst.msk [vmem:[#allocation3 + $0x88] sm:$0xff] %vm4144_vm5, %v4822_v2  ;;  %v5835_v2 = vrot.slane %v13629_v60, 2  ;;  %v5074_v23 = vrot.slane %v13637_v39, 1 }
 0x315   : > { %7790 = vmatmul.mubr.msk.f32.gmra.mrb[116].mxu1 %vm404_vm0, %v5047_v59  ;;  %7966 = vmatmul.mubr.msk.f32.gmra.mrb[112].mxu0 %vm404_vm0, %v12484_v10  ;;  %v5051_v10 = vsel %vm1950_vm2, %v5048_v57, %v5050_v4  ;;  %v7672_v59 = vpop.f32.mrb[43].mxu1  ;;  %v13632_v57 = vld [vmem:[#allocation23_spill] sm:$0xff]  ;;  %v5066_v4 = vrot.slane %v13633_v53, 1 }
 0x316   : > { %7792 = vmatprep.mubr.msk.f32.mxu1 %vm8300_vm1, %v13463_v24  ;;  %7968 = vmatprep.mubr.msk.f32.mxu0 %vm8300_vm1, %v13463_v24  ;;  %v5064_v49 = vrot.slane %v13632_v57, 1  ;;  %v5838_v13 = vsel %vm2899_vm3, %v5835_v2, %v5837_v45  ;;  %v5841_v62 = vrot.slane %v13632_v57, 2 }
 0x317   : > { %v4611_v33 = vpop.f32.mrb[40].mxu0 }
 0x318   : > { %v4825_v28 = vadd.f32 %v4611_v33, %v4225_v44  ;;  %v7579_v31 = vpop.f32.mrb[41].mxu0  ;;  %v5067_v16 = vsel %vm1950_vm2, %v5064_v49, %v5066_v4  ;;  %v5844_v35 = vsel %vm2899_vm3, %v5841_v62, %v5843_v22  ;;  %v4259_v44 = vld [vmem:[#allocation3 + $0x1b0] sm:$0xff] }
 0x319   : > { %7793 = vmatmul.mubr.msk.f32.gmra.mrb[118].mxu1 %vm404_vm0, %v5049_v55  ;;  %7969 = vmatmul.mubr.msk.f32.gmra.mrb[114].mxu0 %vm404_vm0, %v12489_v11  ;;  %v4223_v11 = vld [vmem:[#allocation3 + $0x90] sm:$0xff]  ;;  %v5065_v55 = vsel %vm1950_vm2, %v5062_v12, %v5064_v49 }
 0x31a   : > { %7795 = vmatprep.mubr.msk.f32.mxu1 %vm8300_vm1, %v13463_v24  ;;  %7971 = vmatprep.mubr.msk.f32.mxu0 %vm8300_vm1, %v13463_v24  ;;  %v4823_v42 = vadd.f32 %v4601_v0, %v4223_v11  ;;  %4884 = vst.msk [vmem:[#allocation3 + $0xa0] sm:$0xff] %vm4144_vm5, %v4825_v28  ;;  %v13634_v11 = vld [vmem:[#allocation25_spill] sm:$0xff]  ;;  %v5839_v0 = vrot.slane %v13631_v48, 2 }
 0x31c   : > { %4882 = vst.msk [vmem:[#allocation3 + $0x90] sm:$0xff] %vm4144_vm5, %v4823_v42  ;;  %v13635_v42 = vld [vmem:[#allocation27_spill] sm:$0xff]  ;;  %v5842_v41 = vsel %vm2899_vm3, %v5839_v0, %v5841_v62 }
 0x31d   : > { %7796 = vmatmul.mubr.msk.f32.gmra.mrb[120].mxu1 %vm404_vm0, %v5051_v10  ;;  %7972 = vmatmul.mubr.msk.f32.gmra.mrb[116].mxu0 %vm404_vm0, %v12500_v19  ;;  %v5825_v19 = vrot.slane %v13624_v17, 2  ;;  %v5063_v17 = vsel %vm1950_vm2, %v5060_v29, %v5062_v12  ;;  %v5836_v10 = vsel %vm2899_vm3, %v5833_v34, %v5835_v2  ;;  %v5070_v36 = vrot.slane %v13635_v42, 1  ;;  %v13639_v34 = vld [vmem:[#allocation35_spill] sm:$0xff] }
 0x31e   : > { %7798 = vmatprep.mubr.msk.f32.mxu1 %vm8300_vm1, %v13463_v24  ;;  %7974 = vmatprep.mubr.msk.f32.mxu0 %vm8300_vm1, %v13463_v24  ;;  %v5845_v29 = vrot.slane %v13634_v11, 2  ;;  %v5847_v12 = vrot.slane %v13635_v42, 2  ;;  %v5078_v26 = vrot.slane %v13639_v34, 1 }
 0x31f   : > { %v5826_v58 = vsel %vm2899_vm3, %v5823_v30, %v5825_v19  ;;  %v5828_v54 = vsel %vm2899_vm3, %v5825_v19, %v5827_v46  ;;  %v4771_v30 = vpop.f32.mrb[44].mxu1  ;;  %v13636_v46 = vld [vmem:[#allocation29_spill] sm:$0xff] }
 0x320   : > { %v4857_v52 = vadd.f32 %v4771_v30, %v4257_v63  ;;  %v5072_v32 = vrot.slane %v13636_v46, 1  ;;  %v5846_v48 = vsel %vm2899_vm3, %v5843_v22, %v5845_v29  ;;  %v5849_v57 = vrot.slane %v13636_v46, 2  ;;  %v4260_v30 = vld [vmem:[#allocation3 + $0x1b8] sm:$0xff]  ;;  %v4261_v46 = vld [vmem:[#allocation3 + $0x1c0] sm:$0xff] }
 0x321   : > { %7799 = vmatmul.mubr.msk.f32.gmra.mrb[122].mxu1 %vm404_vm0, %v5053_v3  ;;  %7975 = vmatmul.mubr.msk.f32.gmra.mrb[118].mxu0 %vm404_vm0, %v5824_v14  ;;  %v5068_v3 = vrot.slane %v13634_v11, 1  ;;  %v7675_v14 = vpop.f32.mrb[45].mxu1  ;;  %v5079_v49 = vsel %vm1950_vm2, %v5076_v50, %v5078_v26  ;;  %v13641_v11 = vld [vmem:[#allocation39_spill] sm:$0xff] }
 0x322   : > { %7801 = vmatprep.mubr.msk.f32.mxu1 %vm8300_vm1, %v13463_v24  ;;  %7977 = vmatprep.mubr.msk.f32.mxu0 %vm8300_vm1, %v13463_v24  ;;  %4916 = vst.msk [vmem:[#allocation3 + $0x1a0] sm:$0xff] %vm4144_vm5, %v4857_v52  ;;  %v4616_v56 = vpop.f32.mrb[42].mxu0  ;;  %v5075_v25 = vsel %vm1950_vm2, %v5072_v32, %v5074_v23  ;;  %v5850_v53 = vsel %vm2899_vm3, %v5847_v12, %v5849_v57 }
 0x323   : > { %v5069_v19 = vsel %vm1950_vm2, %v5066_v4, %v5068_v3  ;;  %v7582_v60 = vpop.f32.mrb[43].mxu0  ;;  %v5851_v4 = vrot.slane %v13637_v39, 2 }
 0x324   : > { %v5855_v60 = vrot.slane %v13639_v34, 2 }
 0x325   : > { %7802 = vmatmul.mubr.msk.f32.gmra.mrb[124].mxu1 %vm404_vm0, %v5055_v5  ;;  %7978 = vmatmul.mubr.msk.f32.gmra.mrb[120].mxu0 %vm404_vm0, %v5826_v58  ;;  %v5840_v5 = vsel %vm2899_vm3, %v5837_v45, %v5839_v0  ;;  %v5071_v58 = vsel %vm1950_vm2, %v5068_v3, %v5070_v36  ;;  %v5082_v3 = vrot.slane %v13641_v11, 1  ;;  %v5852_v52 = vsel %vm2899_vm3, %v5849_v57, %v5851_v4  ;;  %v4231_v57 = vld [vmem:[#allocation3 + $0xd0] sm:$0xff] }
 0x326   : > { %7804 = vmatprep.mubr.msk.f32.mxu1 %vm8300_vm1, %v13463_v24  ;;  %7980 = vmatprep.mubr.msk.f32.mxu0 %vm8300_vm1, %v13463_v24  ;;  %v5853_v0 = vrot.slane %v13638_v40, 2  ;;  %v4262_v40 = vld [vmem:[#allocation3 + $0x1c8] sm:$0xff] }
 0x329   : > { %7805 = vmatmul.mubr.msk.f32.gmra.mrb[126].mxu1 %vm404_vm0, %v5057_v20  ;;  %7981 = vmatmul.mubr.msk.f32.gmra.mrb[122].mxu0 %vm404_vm0, %v5828_v54  ;;  %v4826_v20 = vadd.f32 %v4616_v56, %v4226_v37  ;;  %v5073_v54 = vsel %vm1950_vm2, %v5070_v36, %v5072_v32  ;;  %v13642_v56 = vld [vmem:[#allocation41_spill] sm:$0xff]  ;;  %v4230_v32 = vld [vmem:[#allocation3 + $0xc8] sm:$0xff] }
 0x32a   : > { %7807 = vmatprep.mubr.msk.f32.mxu1 %vm8300_vm1, %v13463_v24  ;;  %7983 = vmatprep.mubr.msk.f32.mxu0 %vm8300_vm1, %v13463_v24 }
 0x32b   : > { %4885 = vst.msk [vmem:[#allocation3 + $0xa8] sm:$0xff] %vm4144_vm5, %v4826_v20  ;;  %v5854_v20 = vsel %vm2899_vm3, %v5851_v4, %v5853_v0 }
 0x32d   : > { %7808 = vmatmul.mubr.msk.f32.gmra.mrb[128].mxu1 %vm404_vm0, %v5059_v6  ;;  %7984 = vmatmul.mubr.msk.f32.gmra.mrb[124].mxu0 %vm404_vm0, %v5830_v7  ;;  %v4776_v6 = vpop.f32.mrb[46].mxu1 }
 0x32e   : > { %7810 = vmatprep.mubr.msk.f32.mxu1 %vm8300_vm1, %v13463_v24  ;;  %7986 = vmatprep.mubr.msk.f32.mxu0 %vm8300_vm1, %v13463_v24  ;;  %v4858_v8 = vadd.f32 %v4776_v6, %v4258_v21  ;;  %v7678_v7 = vpop.f32.mrb[47].mxu1  ;;  %v13643_v6 = vld [vmem:[#allocation43_spill] sm:$0xff] }
 0x330   : > { %4917 = vst.msk [vmem:[#allocation3 + $0x1a8] sm:$0xff] %vm4144_vm5, %v4858_v8  ;;  %v5856_v8 = vsel %vm2899_vm3, %v5853_v0, %v5855_v60 }
 0x331   : > { %7811 = vmatmul.mubr.msk.f32.gmra.mrb[130].mxu1 %vm404_vm0, %v5061_v51  ;;  %7987 = vmatmul.mubr.msk.f32.gmra.mrb[126].mxu0 %vm404_vm0, %v5832_v9  ;;  %v4227_v51 = vld [vmem:[#allocation3 + $0xb0] sm:$0xff]  ;;  %v4621_v27 = vpop.f32.mrb[44].mxu0  ;;  %v5077_v9 = vsel %vm1950_vm2, %v5074_v23, %v5076_v50  ;;  %v13644_v50 = vld [vmem:[#allocation45_spill] sm:$0xff] }
 0x332   : > { %7813 = vmatprep.mubr.msk.f32.mxu1 %vm8300_vm1, %v13463_v24  ;;  %7989 = vmatprep.mubr.msk.f32.mxu0 %vm8300_vm1, %v13463_v24  ;;  %v4827_v15 = vadd.f32 %v4621_v27, %v4227_v51  ;;  %v7585_v59 = vpop.f32.mrb[45].mxu0  ;;  %v5088_v51 = vrot.slane %v13644_v50, 1  ;;  %v5859_v27 = vrot.slane %v13641_v11, 2 }
 0x334   : > { %4886 = vst.msk [vmem:[#allocation3 + $0xb0] sm:$0xff] %vm4144_vm5, %v4827_v15  ;;  %v13645_v15 = vld [vmem:[#allocation46_spill] sm:$0xff] }
 0x335   : > { %7814 = vmatmul.mubr.msk.f32.gmra.mrb[132].mxu1 %vm404_vm0, %v5063_v17  ;;  %7990 = vmatmul.mubr.msk.f32.gmra.mrb[128].mxu0 %vm404_vm0, %v5834_v38  ;;  %v5848_v17 = vsel %vm2899_vm3, %v5845_v29, %v5847_v12  ;;  %v13640_v38 = vld [vmem:[#allocation37_spill] sm:$0xff]  ;;  %v4781_v33 = vpop.f32.mrb[48].mxu1  ;;  %v5090_v59 = vrot.slane %v13645_v15, 1 }
 0x336   : > { %7816 = vmatprep.mubr.msk.f32.mxu1 %vm8300_vm1, %v13463_v24  ;;  %7992 = vmatprep.mubr.msk.f32.mxu0 %vm8300_vm1, %v13463_v24  ;;  %v5080_v2 = vrot.slane %v13640_v38, 1  ;;  %v4859_v28 = vadd.f32 %v4781_v33, %v4259_v44  ;;  %v7681_v45 = vpop.f32.mrb[49].mxu1  ;;  %v5857_v7 = vrot.slane %v13640_v38, 2  ;;  %v13646_v44 = vld [vmem:[#allocation47_spill] sm:$0xff] }
 0x337   : > { %v4232_v45 = vld [vmem:[#allocation3 + $0xd8] sm:$0xff] }
 0x338   : > { %4918 = vst.msk [vmem:[#allocation3 + $0x1b0] sm:$0xff] %vm4144_vm5, %v4859_v28  ;;  %v5083_v37 = vsel %vm1950_vm2, %v5080_v2, %v5082_v3  ;;  %v5863_v28 = vrot.slane %v13643_v6, 2 }
 0x339   : > { %7817 = vmatmul.mubr.msk.f32.gmra.mrb[134].mxu1 %vm404_vm0, %v5065_v55  ;;  %7993 = vmatmul.mubr.msk.f32.gmra.mrb[130].mxu0 %vm404_vm0, %v5836_v10  ;;  %v4228_v55 = vld [vmem:[#allocation3 + $0xb8] sm:$0xff]  ;;  %v4786_v14 = vpop.f32.mrb[50].mxu1 }
 0x33a   : > { %7819 = vmatprep.mubr.msk.f32.mxu1 %vm8300_vm1, %v13463_v24  ;;  %7995 = vmatprep.mubr.msk.f32.mxu0 %vm8300_vm1, %v13463_v24  ;;  %v4626_v10 = vpop.f32.mrb[46].mxu0  ;;  %v4860_v42 = vadd.f32 %v4786_v14, %v4260_v30  ;;  %v7684_v36 = vpop.f32.mrb[51].mxu1  ;;  %v5865_v14 = vrot.slane %v13644_v50, 2 }
 0x33b   : > { %v4828_v31 = vadd.f32 %v4626_v10, %v4228_v55  ;;  %v7588_v63 = vpop.f32.mrb[47].mxu0  ;;  %v5092_v55 = vrot.slane %v13646_v44, 1  ;;  %v4263_v10 = vld [vmem:[#allocation3 + $0x1d0] sm:$0x7] }
 0x33c   : > { %4919 = vst.msk [vmem:[#allocation3 + $0x1b8] sm:$0xff] %vm4144_vm5, %v4860_v42 }
 0x33d   : > { %7820 = vmatmul.mubr.msk.f32.gmra.mrb[136].mxu1 %vm404_vm0, %v5067_v16  ;;  %7996 = vmatmul.mubr.msk.f32.gmra.mrb[132].mxu0 %vm404_vm0, %v5838_v13  ;;  %v5081_v16 = vsel %vm1950_vm2, %v5078_v26, %v5080_v2  ;;  %v4229_v13 = vld [vmem:[#allocation3 + $0xc0] sm:$0xff]  ;;  %4887 = vst.msk [vmem:[#allocation3 + $0xb8] sm:$0xff] %vm4144_vm5, %v4828_v31  ;;  %v5091_v2 = vsel %vm1950_vm2, %v5088_v51, %v5090_v59 }
 0x33e   : > { %7822 = vmatprep.mubr.msk.f32.mxu1 %vm8300_vm1, %v13463_v24  ;;  %7998 = vmatprep.mubr.msk.f32.mxu0 %vm8300_vm1, %v13463_v24  ;;  %v5093_v63 = vsel %vm1950_vm2, %v5090_v59, %v5092_v55 }
 0x341   : > { %7823 = vmatmul.mubr.msk.f32.gmra.mrb[138].mxu1 %vm404_vm0, %v5069_v19  ;;  %7999 = vmatmul.mubr.msk.f32.gmra.mrb[134].mxu0 %vm404_vm0, %v5840_v5  ;;  %v4631_v19 = vpop.f32.mrb[48].mxu0 }
 0x342   : > { %7825 = vmatprep.mubr.msk.f32.mxu1 %vm8300_vm1, %v13463_v24  ;;  %8001 = vmatprep.mubr.msk.f32.mxu0 %vm8300_vm1, %v13463_v24  ;;  %v4829_v5 = vadd.f32 %v4631_v19, %v4229_v13  ;;  %v7591_v62 = vpop.f32.mrb[49].mxu0  ;;  %v4923_v19 = vld [vmem:[#allocation3] sm:$0xff] }
 0x344   : > { %4888 = vst.msk [vmem:[#allocation3 + $0xc0] sm:$0xff] %vm4144_vm5, %v4829_v5  ;;  %v5096_v5 = vrot.slane %v12049_v43, 1 }
 0x345   : > { %7826 = vmatmul.mubr.msk.f32.gmra.mrb[140].mxu1 %vm404_vm0, %v5071_v58  ;;  %8002 = vmatmul.mubr.msk.f32.gmra.mrb[136].mxu0 %vm404_vm0, %v5842_v41  ;;  %v5084_v58 = vrot.slane %v13642_v56, 1  ;;  %v4791_v41 = vpop.f32.mrb[52].mxu1 }
 0x346   : > { %7828 = vmatprep.mubr.msk.f32.mxu1 %vm8300_vm1, %v13463_v24  ;;  %8004 = vmatprep.mubr.msk.f32.mxu0 %vm8300_vm1, %v13463_v24  ;;  %v4861_v21 = vadd.f32 %v4791_v41, %v4261_v46  ;;  %v7687_v39 = vpop.f32.mrb[53].mxu1  ;;  %v5867_v46 = vrot.slane %v13645_v15, 2 }
 0x348   : > { %4920 = vst.msk [vmem:[#allocation3 + $0x1c0] sm:$0xff] %vm4144_vm5, %v4861_v21 }
 0x349   : > { %7829 = vmatmul.mubr.msk.f32.gmra.mrb[142].mxu1 %vm404_vm0, %v5073_v54  ;;  %8005 = vmatmul.mubr.msk.f32.gmra.mrb[138].mxu0 %vm404_vm0, %v5844_v35  ;;  %v5085_v54 = vsel %vm1950_vm2, %v5082_v3, %v5084_v58  ;;  %v5086_v35 = vrot.slane %v13643_v6, 1  ;;  %v5868_v6 = vsel %vm2899_vm3, %v5865_v14, %v5867_v46 }
 0x34a   : > { %7831 = vmatprep.mubr.msk.f32.mxu1 %vm8300_vm1, %v13463_v24  ;;  %8007 = vmatprep.mubr.msk.f32.mxu0 %vm8300_vm1, %v13463_v24 }
 0x34b   : > { %v5089_v26 = vsel %vm1950_vm2, %v5086_v35, %v5088_v51 }
 0x34d   : > { %7832 = vmatmul.mubr.msk.f32.gmra.mrb[144].mxu1 %vm404_vm0, %v5075_v25  ;;  %8008 = vmatmul.mubr.msk.f32.gmra.mrb[140].mxu0 %vm404_vm0, %v5846_v48  ;;  %v5087_v25 = vsel %vm1950_vm2, %v5084_v58, %v5086_v35  ;;  %v5858_v48 = vsel %vm2899_vm3, %v5855_v60, %v5857_v7  ;;  %v4233_v58 = vld [vmem:[#allocation3 + $0xe0] sm:$0xff]  ;;  %v5869_v35 = vrot.slane %v13646_v44, 2  ;;  %v5873_v44 = vrot.slane %v12049_v43, 2 }
 0x34e   : > { %7834 = vmatprep.mubr.msk.f32.mxu1 %vm8300_vm1, %v13463_v24  ;;  %8010 = vmatprep.mubr.msk.f32.mxu0 %vm8300_vm1, %v13463_v24 }
 0x351   : > { %7835 = vmatmul.mubr.msk.f32.gmra.mrb[146].mxu1 %vm404_vm0, %v5077_v9  ;;  %8011 = vmatmul.mubr.msk.f32.gmra.mrb[142].mxu0 %vm404_vm0, %v5848_v17  ;;  %v5860_v17 = vsel %vm2899_vm3, %v5857_v7, %v5859_v27 }
 0x352   : > { %7837 = vmatprep.mubr.msk.f32.mxu1 %vm8300_vm1, %v13463_v24  ;;  %8013 = vmatprep.mubr.msk.f32.mxu0 %vm8300_vm1, %v13463_v24 }
 0x355   : > { %7838 = vmatmul.mubr.msk.f32.gmra.mrb[148].mxu1 %vm404_vm0, %v5079_v49  ;;  %8014 = vmatmul.mubr.msk.f32.gmra.mrb[144].mxu0 %vm404_vm0, %v5850_v53  ;;  %v5861_v49 = vrot.slane %v13642_v56, 2  ;;  %v5866_v56 = vsel %vm2899_vm3, %v5863_v28, %v5865_v14 }
 0x356   : > { %7840 = vmatprep.mubr.msk.f32.mxu1 %vm8300_vm1, %v13463_v24  ;;  %8016 = vmatprep.mubr.msk.f32.mxu0 %vm8300_vm1, %v13463_v24 }
 0x357   : > { %v5862_v33 = vsel %vm2899_vm3, %v5859_v27, %v5861_v49  ;;  %v5864_v13 = vsel %vm2899_vm3, %v5861_v49, %v5863_v28  ;;  %v5871_v27 = vrot.slane %v12033_v1, 2 }
 0x359   : > { %7841 = vmatmul.mubr.msk.f32.gmra.mrb[150].mxu1 %vm404_vm0, %v5081_v16  ;;  %8017 = vmatmul.mubr.msk.f32.gmra.mrb[146].mxu0 %vm404_vm0, %v5852_v52  ;;  %v5094_v16 = vrot.slane %v12033_v1, 1 }
 0x35a   : > { %7843 = vmatprep.mubr.msk.f32.mxu1 %vm8300_vm1, %v13463_v24  ;;  %8019 = vmatprep.mubr.msk.f32.mxu0 %vm8300_vm1, %v13463_v24 }
 0x35b   : > { %v5095_v36 = vsel %vm1950_vm2, %v5092_v55, %v5094_v16  ;;  %v5097_v41 = vsel %vm1950_vm2, %v5094_v16, %v5096_v5  ;;  %v5875_v16 = vrot.slane %v12230_v47, 2 }
 0x35d   : > { %7844 = vmatmul.mubr.msk.f32.gmra.mrb[152].mxu1 %vm404_vm0, %v5083_v37  ;;  %8020 = vmatmul.mubr.msk.f32.gmra.mrb[148].mxu0 %vm404_vm0, %v5854_v20  ;;  %v4924_v20 = vld [vmem:[#allocation3 + $0x8] sm:$0xff] }
 0x35e   : > { %7846 = vmatprep.mubr.msk.f32.mxu1 %vm8300_vm1, %v13463_v24  ;;  %v4636_v22 = vpop.f32.mrb[50].mxu0  ;;  %8022 = vmatprep.mubr.msk.f32.mxu0 %vm8300_vm1, %v13463_v24 }
 0x35f   : > { %v4830_v23 = vadd.f32 %v4636_v22, %v4230_v32  ;;  %v7594_v29 = vpop.f32.mrb[51].mxu0  ;;  %v5098_v22 = vrot.slane %v12230_v47, 1  ;;  %v5876_v47 = vsel %vm2899_vm3, %v5873_v44, %v5875_v16 }
 0x360   : > { %v4234_v29 = vld [vmem:[#allocation3 + $0xe8] sm:$0xff] }
 0x361   : > { %7847 = vmatmul.mubr.msk.f32.gmra.mrb[154].mxu1 %vm404_vm0, %v5085_v54  ;;  %4889 = vst.msk [vmem:[#allocation3 + $0xc8] sm:$0xff] %vm4144_vm5, %v4830_v23  ;;  %8023 = vmatmul.mubr.msk.f32.gmra.mrb[150].mxu0 %vm404_vm0, %v5856_v8  ;;  %v4925_v8 = vld [vmem:[#allocation3 + $0x10] sm:$0xff] }
 0x362   : > { %7849 = vmatprep.mubr.msk.f32.mxu1 %vm8300_vm1, %v13463_v24  ;;  %8025 = vmatprep.mubr.msk.f32.mxu0 %vm8300_vm1, %v13463_v24 }
 0x365   : > { %7850 = vmatmul.mubr.msk.f32.gmra.mrb[156].mxu1 %vm404_vm0, %v5087_v25  ;;  %8026 = vmatmul.mubr.msk.f32.gmra.mrb[152].mxu0 %vm404_vm0, %v5858_v48  ;;  %v5099_v25 = vsel %vm1950_vm2, %v5096_v5, %v5098_v22 }
 0x366   : > { %7852 = vmatprep.mubr.msk.f32.mxu1 %vm8300_vm1, %v13463_v24  ;;  %v4796_v12 = vpop.f32.mrb[54].mxu1  ;;  %8028 = vmatprep.mubr.msk.f32.mxu0 %vm8300_vm1, %v13463_v24 }
 0x367   : > { %v4862_v9 = vadd.f32 %v4796_v12, %v4262_v40  ;;  %v7690_v34 = vpop.f32.mrb[55].mxu1  ;;  %v5100_v40 = vrot.slane %v12304_v61, 1  ;;  %v5870_v12 = vsel %vm2899_vm3, %v5867_v46, %v5869_v35 }
 0x369   : > { %4921 = vst.msk [vmem:[#allocation3 + $0x1c8] sm:$0xff] %vm4144_vm5, %v4862_v9  ;;  %7853 = vmatmul.mubr.msk.f32.gmra.mrb[158].mxu1 %vm404_vm0, %v5089_v26  ;;  %8029 = vmatmul.mubr.msk.f32.gmra.mrb[154].mxu0 %vm404_vm0, %v5860_v17  ;;  %v4926_v26 = vld [vmem:[#allocation3 + $0x18] sm:$0xff]  ;;  %v5101_v59 = vsel %vm1950_vm2, %v5098_v22, %v5100_v40  ;;  %v5102_v17 = vrot.slane %v12348_v18, 1 }
 0x36a   : > { %7855 = vmatprep.mubr.msk.f32.mxu1 %vm8300_vm1, %v13463_v24  ;;  %8031 = vmatprep.mubr.msk.f32.mxu0 %vm8300_vm1, %v13463_v24  ;;  %v4641_v38 = vpop.f32.mrb[52].mxu0 }
 0x36b   : > { %v4831_v53 = vadd.f32 %v4641_v38, %v4231_v57  ;;  %v7597_v4 = vpop.f32.mrb[53].mxu0 }
 0x36c   : > { %v4927_v4 = vld [vmem:[#allocation3 + $0x20] sm:$0xff] }
 0x36d   : > { %7856 = vmatmul.mubr.msk.f32.gmra.mrb[160].mxu1 %vm404_vm0, %v5091_v2  ;;  %4890 = vst.msk [vmem:[#allocation3 + $0xd0] sm:$0xff] %vm4144_vm5, %v4831_v53  ;;  %8032 = vmatmul.mubr.msk.f32.gmra.mrb[156].mxu0 %vm404_vm0, %v5862_v33  ;;  %v5872_v2 = vsel %vm2899_vm3, %v5869_v35, %v5871_v27 }
 0x36e   : > { %7858 = vmatprep.mubr.msk.f32.mxu1 %vm8300_vm1, %v13463_v24  ;;  %8034 = vmatprep.mubr.msk.f32.mxu0 %vm8300_vm1, %v13463_v24 }
 0x370   : > { %v4801_v31 = vpop.f32.mrb[56].mxu1 }
 0x371   : > { %v4863_v11 = vadd.f32 %v4801_v31, %v4263_v10  ;;  %v7693_v3 = vpop.f32.mrb[57].mxu1  ;;  %7859 = vmatmul.mubr.msk.f32.gmra.mrb[162].mxu1 %vm404_vm0, %v5093_v63  ;;  %v4646_v30 = vpop.f32.mrb[54].mxu0  ;;  %8035 = vmatmul.mubr.msk.f32.gmra.mrb[158].mxu0 %vm404_vm0, %v5864_v13  ;;  %v5103_v10 = vsel %vm1950_vm2, %v5100_v40, %v5102_v17  ;;  %v5874_v63 = vsel %vm2899_vm3, %v5871_v27, %v5873_v44 }
 0x372   : > { %v4832_v52 = vadd.f32 %v4646_v30, %v4232_v45  ;;  %7861 = vmatprep.mubr.msk.f32.mxu1 %vm8300_vm1, %v13463_v24  ;;  %v7600_v0 = vpop.f32.mrb[55].mxu0  ;;  %8037 = vmatprep.mubr.msk.f32.mxu0 %vm8300_vm1, %v13463_v24  ;;  %v4928_v30 = vld [vmem:[#allocation3 + $0x28] sm:$0xff] }
 0x373   : > { %4922 = vst.msk [vmem:[#allocation3 + $0x1d0] sm:$0x7] %vm4203_vm6, %v4863_v11 }
 0x374   : > { %4891 = vst.msk [vmem:[#allocation3 + $0xd8] sm:$0xff] %vm4144_vm5, %v4832_v52  ;;  %v5288_v42 = vpop.f32.mrb[58].mxu1 }
 0x375   : > { %v5582_v37 = vadd.f32 %v5288_v42, %v4923_v19  ;;  %v7704_v62 = vpop.f32.mrb[59].mxu1  ;;  %7862 = vmatmul.mubr.msk.f32.gmra.mrb[164].mxu1 %vm404_vm0, %v5095_v36  ;;  %8038 = vmatmul.mubr.msk.f32.gmra.mrb[160].mxu0 %vm404_vm0, %v5866_v56  ;;  %v5877_v42 = vrot.slane %v12304_v61, 2 }
 0x376   : > { %7864 = vmatprep.mubr.msk.f32.mxu1 %vm8300_vm1, %v13463_v24  ;;  %v4651_v32 = vpop.f32.mrb[56].mxu0  ;;  %8040 = vmatprep.mubr.msk.f32.mxu0 %vm8300_vm1, %v13463_v24  ;;  %v4929_v62 = vld [vmem:[#allocation3 + $0x30] sm:$0xff] }
 0x377   : > { %5641 = vst.msk [vmem:[#allocation3] sm:$0xff] %vm4144_vm5, %v5582_v37  ;;  %v4833_v21 = vadd.f32 %v4651_v32, %v4233_v58  ;;  %v7603_v39 = vpop.f32.mrb[57].mxu0  ;;  %v5878_v61 = vsel %vm2899_vm3, %v5875_v16, %v5877_v42 }
 0x378   : > { %v5293_v60 = vpop.f32.mrb[60].mxu1  ;;  %v4930_v39 = vld [vmem:[#allocation3 + $0x38] sm:$0xff] }
 0x379   : > { %v5583_v54 = vadd.f32 %v5293_v60, %v4924_v20  ;;  %v7707_v23 = vpop.f32.mrb[61].mxu1  ;;  %7865 = vmatmul.mubr.msk.f32.gmra.mrb[166].mxu1 %vm404_vm0, %v5097_v41  ;;  %4892 = vst.msk [vmem:[#allocation3 + $0xe0] sm:$0xff] %vm4144_vm5, %v4833_v21  ;;  %8041 = vmatmul.mubr.msk.f32.gmra.mrb[162].mxu0 %vm404_vm0, %v5868_v6  ;;  %v5879_v41 = vrot.slane %v12348_v18, 2 }
 0x37a   : > { %7867 = vmatprep.mubr.msk.f32.mxu1 %vm8300_vm1, %v13463_v24  ;;  %8043 = vmatprep.mubr.msk.f32.mxu0 %vm8300_vm1, %v13463_v24 }
 0x37b   : > { %5642 = vst.msk [vmem:[#allocation3 + $0x8] sm:$0xff] %vm4144_vm5, %v5583_v54 }
 0x37c   : > { %v5298_v7 = vpop.f32.mrb[62].mxu1  ;;  %v4656_v48 = vpop.f32.mrb[58].mxu0 }
 0x37d   : > { %v5584_v50 = vadd.f32 %v5298_v7, %v4925_v8  ;;  %v7710_v51 = vpop.f32.mrb[63].mxu1  ;;  %7868 = vmatmul.mubr.msk.f32.gmra.mrb[168].mxu1 %vm404_vm0, %v5099_v25  ;;  %v4834_v9 = vadd.f32 %v4656_v48, %v4234_v29  ;;  %v7606_v34 = vpop.f32.mrb[59].mxu0  ;;  %8044 = vmatmul.mubr.msk.f32.gmra.mrb[164].mxu0 %vm404_vm0, %v5870_v12  ;;  %v5880_v7 = vsel %vm2899_vm3, %v5877_v42, %v5879_v41 }
 0x37e   : > { %7870 = vmatprep.mubr.msk.f32.mxu1 %vm8300_vm1, %v13463_v24  ;;  %8046 = vmatprep.mubr.msk.f32.mxu0 %vm8300_vm1, %v13463_v24  ;;  %v5700_v1 = vld [vmem:[#allocation3] sm:$0xff] }
 0x37f   : > { %5643 = vst.msk [vmem:[#allocation3 + $0x10] sm:$0xff] %vm4144_vm5, %v5584_v50  ;;  %4893 = vst.msk [vmem:[#allocation3 + $0xe8] sm:$0xff] %vm4144_vm5, %v4834_v9  ;;  %v4931_v51 = vld [vmem:[#allocation3 + $0x40] sm:$0xff] }
 0x380   : > { %v5303_v15 = vpop.f32.mrb[64].mxu1  ;;  %v6065_v38 = vpop.f32.mrb[60].mxu0 }
 0x381   : > { %v5585_v57 = vadd.f32 %v5303_v15, %v4926_v26  ;;  %v7713_v49 = vpop.f32.mrb[65].mxu1  ;;  %7871 = vmatmul.mubr.msk.f32.gmra.mrb[170].mxu1 %vm404_vm0, %v5101_v59  ;;  %v6359_v55 = vadd.f32 %v6065_v38, %v5700_v1  ;;  %v7889_v53 = vpop.f32.mrb[61].mxu0  ;;  %8047 = vmatmul.mubr.msk.f32.gmra.mrb[166].mxu0 %vm404_vm0, %v5872_v2 }
 0x382   : > { %7873 = vmatprep.mubr.msk.f32.mxu1 %vm8300_vm1, %v13463_v24  ;;  %8049 = vmatprep.mubr.msk.f32.mxu0 %vm8300_vm1, %v13463_v24  ;;  %v5701_v43 = vld [vmem:[#allocation3 + $0x8] sm:$0xff] }
 0x383   : > { %5644 = vst.msk [vmem:[#allocation3 + $0x18] sm:$0xff] %vm4144_vm5, %v5585_v57  ;;  %6418 = vst.msk [vmem:[#allocation3] sm:$0xff] %vm4144_vm5, %v6359_v55  ;;  %v4932_v57 = vld [vmem:[#allocation3 + $0x48] sm:$0xff] }
 0x384   : > { %v5308_v33 = vpop.f32.mrb[66].mxu1  ;;  %v6070_v31 = vpop.f32.mrb[62].mxu0 }
 0x385   : > { %v5586_v28 = vadd.f32 %v5308_v33, %v4927_v4  ;;  %v7716_v45 = vpop.f32.mrb[67].mxu1  ;;  %7874 = vmatmul.mubr.msk.f32.gmra.mrb[172].mxu1 %vm404_vm0, %v5103_v10  ;;  %v6360_v11 = vadd.f32 %v6070_v31, %v5701_v43  ;;  %v7892_v3 = vpop.f32.mrb[63].mxu0  ;;  %8050 = vmatmul.mubr.msk.f32.gmra.mrb[168].mxu0 %vm404_vm0, %v5874_v63 }
 0x386   : > { %7876 = vmatprep.mubr.msk.f32.mxu1 %vm8300_vm1, %v13463_v24  ;;  %8052 = vmatprep.mubr.msk.f32.mxu0 %vm8300_vm1, %v13463_v24  ;;  %v5702_v14 = vld [vmem:[#allocation3 + $0x10] sm:$0xff] }
 0x387   : > { %5645 = vst.msk [vmem:[#allocation3 + $0x20] sm:$0xff] %vm4144_vm5, %v5586_v28  ;;  %6419 = vst.msk [vmem:[#allocation3 + $0x8] sm:$0xff] %vm4144_vm5, %v6360_v11  ;;  %v4933_v45 = vld [vmem:[#allocation3 + $0x50] sm:$0xff] }
 0x388   : > { %v5313_v13 = vpop.f32.mrb[68].mxu1  ;;  %v6075_v19 = vpop.f32.mrb[64].mxu0 }
 0x389   : > { %v5587_v52 = vadd.f32 %v5313_v13, %v4928_v30  ;;  %v7719_v0 = vpop.f32.mrb[69].mxu1  ;;  %7877 = vmatmul.mubr.msk.f32.gmra.mrb[174].mxu1 %vm404_vm0, %v5102_v17  ;;  %v6361_v36 = vadd.f32 %v6075_v19, %v5702_v14  ;;  %v7895_v5 = vpop.f32.mrb[65].mxu0  ;;  %8053 = vmatmul.mubr.msk.f32.gmra.mrb[170].mxu0 %vm404_vm0, %v5876_v47  ;;  %v4934_v14 = vld [vmem:[#allocation3 + $0x58] sm:$0xff] }
 0x38a   : > { %v6477_v37 = vld [vmem:[#allocation3] sm:$0xff]  ;;  %8055 = vmatprep.mubr.msk.f32.mxu0 %vm8300_vm1, %v13463_v24  ;;  %v5703_v20 = vld [vmem:[#allocation3 + $0x18] sm:$0xff] }
 0x38b   : > { %5646 = vst.msk [vmem:[#allocation3 + $0x28] sm:$0xff] %vm4144_vm5, %v5587_v52  ;;  %v6536_v58 = vmax.f32 %v6477_v37, 0.0  ;;  %6420 = vst.msk [vmem:[#allocation3 + $0x10] sm:$0xff] %vm4144_vm5, %v6361_v36 }
 0x38c   : > { %v5318_v56 = vpop.f32.mrb[70].mxu1  ;;  %v6080_v60 = vpop.f32.mrb[66].mxu0 }
 0x38d   : > { %v5588_v46 = vadd.f32 %v5318_v56, %v4929_v62  ;;  %v7722_v32 = vpop.f32.mrb[71].mxu1  ;;  %6595 = vst.msk [vmem:[#allocation3] sm:$0xff] %vm4144_vm5, %v6536_v58  ;;  %v6362_v22 = vadd.f32 %v6080_v60, %v5703_v20  ;;  %v7898_v21 = vpop.f32.mrb[67].mxu0  ;;  %8056 = vmatmul.mubr.msk.f32.gmra.mrb[172].mxu0 %vm404_vm0, %v5878_v61  ;;  %v4935_v60 = vld [vmem:[#allocation3 + $0x60] sm:$0xff] }
 0x38e   : > { %v6478_v54 = vld [vmem:[#allocation3 + $0x8] sm:$0xff]  ;;  %8058 = vmatprep.mubr.msk.f32.mxu0 %vm8300_vm1, %v13463_v24  ;;  %v5704_v18 = vld [vmem:[#allocation3 + $0x20] sm:$0xff] }
 0x38f   : > { %5647 = vst.msk [vmem:[#allocation3 + $0x30] sm:$0xff] %vm4144_vm5, %v5588_v46  ;;  %v6537_v6 = vmax.f32 %v6478_v54, 0.0  ;;  %6421 = vst.msk [vmem:[#allocation3 + $0x18] sm:$0xff] %vm4144_vm5, %v6362_v22 }
 0x390   : > { %v5323_v23 = vpop.f32.mrb[72].mxu1  ;;  %v6085_v8 = vpop.f32.mrb[68].mxu0 }
 0x391   : > { %v5589_v35 = vadd.f32 %v5323_v23, %v4930_v39  ;;  %v7725_v29 = vpop.f32.mrb[73].mxu1  ;;  %6596 = vst.msk [vmem:[#allocation3 + $0x8] sm:$0xff] %vm4144_vm5, %v6537_v6  ;;  %v6363_v25 = vadd.f32 %v6085_v8, %v5704_v18  ;;  %v7901_v40 = vpop.f32.mrb[69].mxu0  ;;  %8059 = vmatmul.mubr.msk.f32.gmra.mrb[174].mxu0 %vm404_vm0, %v5880_v7  ;;  %v4936_v18 = vld [vmem:[#allocation3 + $0x68] sm:$0xff] }
 0x392   : > { %v6479_v50 = vld [vmem:[#allocation3 + $0x10] sm:$0xff]  ;;  %8061 = vmatprep.mubr.msk.f32.mxu0 %vm8300_vm1, %v13463_v24  ;;  %v5705_v34 = vld [vmem:[#allocation3 + $0x28] sm:$0xff] }
 0x393   : > { %5648 = vst.msk [vmem:[#allocation3 + $0x38] sm:$0xff] %vm4144_vm5, %v5589_v35  ;;  %v6538_v12 = vmax.f32 %v6479_v50, 0.0  ;;  %6422 = vst.msk [vmem:[#allocation3 + $0x20] sm:$0xff] %vm4144_vm5, %v6363_v25 }
 0x394   : > { %v5328_v48 = vpop.f32.mrb[74].mxu1  ;;  %v6090_v26 = vpop.f32.mrb[70].mxu0 }
 0x395   : > { %v5590_v27 = vadd.f32 %v5328_v48, %v4931_v51  ;;  %v7728_v9 = vpop.f32.mrb[75].mxu1  ;;  %6597 = vst.msk [vmem:[#allocation3 + $0x10] sm:$0xff] %vm4144_vm5, %v6538_v12  ;;  %v6364_v15 = vadd.f32 %v6090_v26, %v5705_v34  ;;  %v7904_v59 = vpop.f32.mrb[71].mxu0  ;;  %8062 = vmatmul.mubr.msk.f32.gmra.mrb[176].mxu0 %vm404_vm0, %v5879_v41 }
 0x396   : > { %v6480_v17 = vld [vmem:[#allocation3 + $0x18] sm:$0xff]  ;;  %v5706_v55 = vld [vmem:[#allocation3 + $0x30] sm:$0xff] }
 0x397   : > { %5649 = vst.msk [vmem:[#allocation3 + $0x40] sm:$0xff] %vm4144_vm5, %v5590_v27  ;;  %v6539_v24 = vmax.f32 %v6480_v17, 0.0  ;;  %6423 = vst.msk [vmem:[#allocation3 + $0x28] sm:$0xff] %vm4144_vm5, %v6364_v15  ;;  %v4937_v15 = vld [vmem:[#allocation3 + $0x70] sm:$0xff] }
 0x398   : > { %v5333_v49 = vpop.f32.mrb[76].mxu1  ;;  %v6654_v2 = vld [vmem:[#allocation3] ss:$2 sm:$0xff]  ;;  %v6714_v44 = vld [vmem:[#allocation3 + $0x1] ss:$2 sm:$0xff]  ;;  %v6095_v53 = vpop.f32.mrb[72].mxu0 }
 0x399   : > { %v5591_v1 = vadd.f32 %v5333_v49, %v4932_v57  ;;  %v7731_v38 = vpop.f32.mrb[77].mxu1  ;;  %v6773_v4 = vmax.f32 %v6654_v2, %v6714_v44  ;;  %6598 = vst.msk [vmem:[#allocation3 + $0x18] sm:$0xff] %vm4144_vm5, %v6539_v24  ;;  %v6365_v33 = vadd.f32 %v6095_v53, %v5706_v55  ;;  %v7907_v10 = vpop.f32.mrb[73].mxu0  ;;  %v4938_v53 = vld [vmem:[#allocation3 + $0x78] sm:$0xff] }
 0x39a   : > { %v6481_v28 = vld [vmem:[#allocation3 + $0x20] sm:$0xff]  ;;  %v5707_v3 = vld [vmem:[#allocation3 + $0x38] sm:$0xff] }
 0x39b   : > { %5650 = vst.msk [vmem:[#allocation3 + $0x48] sm:$0xff] %vm4144_vm5, %v5591_v1  ;;  %v7290_v31 = vpack.c.bf16 %v6773_v4, %v6773_v4  ;;  %v6540_v63 = vmax.f32 %v6481_v28, 0.0  ;;  %6424 = vst.msk [vmem:[#allocation3 + $0x30] sm:$0xff] %vm4144_vm5, %v6365_v33 }
 0x39c   : > { %v5338_v43 = vpop.f32.mrb[78].mxu1  ;;  %v6100_v30 = vpop.f32.mrb[74].mxu0 }
 0x39d   : > { %v5592_v16 = vadd.f32 %v5338_v43, %v4933_v45  ;;  %v7734_v11 = vpop.f32.mrb[79].mxu1  ;;  %6924 = vst.msk [vmem:[%s13106_s16] sm:$0xf] %vm6923_vm7, %v7290_v31  ;;  %v6366_v13 = vadd.f32 %v6100_v30, %v5707_v3  ;;  %v7910_v52 = vpop.f32.mrb[75].mxu0 }
 0x39e   : > { %6599 = vst.msk [vmem:[#allocation3 + $0x20] sm:$0xff] %vm4144_vm5, %v6540_v63  ;;  %v6482_v0 = vld [vmem:[#allocation3 + $0x28] sm:$0xff]  ;;  %v5708_v62 = vld [vmem:[#allocation3 + $0x40] sm:$0xff] }
 0x39f   : > { %5651 = vst.msk [vmem:[#allocation3 + $0x50] sm:$0xff] %vm4144_vm5, %v5592_v16  ;;  %v6541_v47 = vmax.f32 %v6482_v0, 0.0  ;;  %6425 = vst.msk [vmem:[#allocation3 + $0x38] sm:$0xff] %vm4144_vm5, %v6366_v13  ;;  %v4939_v13 = vld [vmem:[#allocation3 + $0x80] sm:$0xff] }
 0x3a0   : > { %v5343_v19 = vpop.f32.mrb[80].mxu1  ;;  %v6656_v5 = vld [vmem:[#allocation3 + $0x10] ss:$2 sm:$0xff]  ;;  %v6716_v37 = vld [vmem:[#allocation3 + $0x11] ss:$2 sm:$0xff]  ;;  %v6105_v56 = vpop.f32.mrb[76].mxu0 }
 0x3a1   : > { %v5593_v42 = vadd.f32 %v5343_v19, %v4934_v14  ;;  %v7737_v36 = vpop.f32.mrb[81].mxu1  ;;  %v6774_v58 = vmax.f32 %v6656_v5, %v6716_v37  ;;  %6600 = vst.msk [vmem:[#allocation3 + $0x28] sm:$0xff] %vm4144_vm5, %v6541_v47  ;;  %v6367_v46 = vadd.f32 %v6105_v56, %v5708_v62  ;;  %v7913_v32 = vpop.f32.mrb[77].mxu0  ;;  %v4940_v56 = vld [vmem:[#allocation3 + $0x88] sm:$0xff] }
 0x3a2   : > { %v6483_v20 = vld [vmem:[#allocation3 + $0x30] sm:$0xff]  ;;  %v5709_v39 = vld [vmem:[#allocation3 + $0x48] sm:$0xff] }
 0x3a3   : > { %5652 = vst.msk [vmem:[#allocation3 + $0x58] sm:$0xff] %vm4144_vm5, %v5593_v42  ;;  %v7291_v41 = vpack.c.bf16 %v6774_v58, %v6774_v58  ;;  %v6542_v22 = vmax.f32 %v6483_v20, 0.0  ;;  %6426 = vst.msk [vmem:[#allocation3 + $0x40] sm:$0xff] %vm4144_vm5, %v6367_v46 }
 0x3a4   : > { %v5348_v61 = vpop.f32.mrb[82].mxu1  ;;  %v6110_v23 = vpop.f32.mrb[78].mxu0 }
 0x3a5   : > { %v5594_v21 = vadd.f32 %v5348_v61, %v4935_v60  ;;  %v7740_v54 = vpop.f32.mrb[83].mxu1  ;;  %6925 = vst.msk [vmem:[%s13106_s16 + $0x4] sm:$0xf] %vm6923_vm7, %v7291_v41  ;;  %v6368_v6 = vadd.f32 %v6110_v23, %v5709_v39  ;;  %v7916_v35 = vpop.f32.mrb[79].mxu0 }
 0x3a6   : > { %6601 = vst.msk [vmem:[#allocation3 + $0x30] sm:$0xff] %vm4144_vm5, %v6542_v22  ;;  %v6484_v29 = vld [vmem:[#allocation3 + $0x38] sm:$0xff]  ;;  %v5710_v48 = vld [vmem:[#allocation3 + $0x50] sm:$0xff] }
 0x3a7   : > { %5653 = vst.msk [vmem:[#allocation3 + $0x60] sm:$0xff] %vm4144_vm5, %v5594_v21  ;;  %v6543_v7 = vmax.f32 %v6484_v29, 0.0  ;;  %6427 = vst.msk [vmem:[#allocation3 + $0x48] sm:$0xff] %vm4144_vm5, %v6368_v6  ;;  %v4941_v6 = vld [vmem:[#allocation3 + $0x90] sm:$0xff] }
 0x3a8   : > { %v5353_v8 = vpop.f32.mrb[84].mxu1  ;;  %v6658_v50 = vld [vmem:[#allocation3 + $0x20] ss:$2 sm:$0xff]  ;;  %v6718_v51 = vld [vmem:[#allocation3 + $0x21] ss:$2 sm:$0xff]  ;;  %v6115_v12 = vpop.f32.mrb[80].mxu0 }
 0x3a9   : > { %v5595_v25 = vadd.f32 %v5353_v8, %v4936_v18  ;;  %v7743_v40 = vpop.f32.mrb[85].mxu1  ;;  %v6775_v27 = vmax.f32 %v6658_v50, %v6718_v51  ;;  %6602 = vst.msk [vmem:[#allocation3 + $0x38] sm:$0xff] %vm4144_vm5, %v6543_v7  ;;  %v6369_v9 = vadd.f32 %v6115_v12, %v5710_v48  ;;  %v7919_v34 = vpop.f32.mrb[81].mxu0  ;;  %v4942_v12 = vld [vmem:[#allocation3 + $0x98] sm:$0xff] }
 0x3aa   : > { %v6485_v26 = vld [vmem:[#allocation3 + $0x40] sm:$0xff]  ;;  %v5711_v1 = vld [vmem:[#allocation3 + $0x58] sm:$0xff] }
 0x3ab   : > { %5654 = vst.msk [vmem:[#allocation3 + $0x68] sm:$0xff] %vm4144_vm5, %v5595_v25  ;;  %v7292_v17 = vpack.c.bf16 %v6775_v27, %v6775_v27  ;;  %v6544_v57 = vmax.f32 %v6485_v26, 0.0  ;;  %6428 = vst.msk [vmem:[#allocation3 + $0x50] sm:$0xff] %vm4144_vm5, %v6369_v9 }
 0x3ac   : > { %v5358_v59 = vpop.f32.mrb[86].mxu1  ;;  %v6120_v38 = vpop.f32.mrb[82].mxu0 }
 0x3ad   : > { %v5596_v49 = vadd.f32 %v5358_v59, %v4937_v15  ;;  %v7746_v24 = vpop.f32.mrb[87].mxu1  ;;  %6926 = vst.msk [vmem:[%s13106_s16 + $0x8] sm:$0xf] %vm6923_vm7, %v7292_v17  ;;  %v6370_v2 = vadd.f32 %v6120_v38, %v5711_v1  ;;  %v7922_v44 = vpop.f32.mrb[83].mxu0 }
 0x3ae   : > { %6603 = vst.msk [vmem:[#allocation3 + $0x40] sm:$0xff] %vm4144_vm5, %v6544_v57  ;;  %v6486_v55 = vld [vmem:[#allocation3 + $0x48] sm:$0xff]  ;;  %v5712_v31 = vld [vmem:[#allocation3 + $0x60] sm:$0xff] }
 0x3af   : > { %5655 = vst.msk [vmem:[#allocation3 + $0x70] sm:$0xff] %vm4144_vm5, %v5596_v49  ;;  %v6545_v33 = vmax.f32 %v6486_v55, 0.0  ;;  %6429 = vst.msk [vmem:[#allocation3 + $0x58] sm:$0xff] %vm4144_vm5, %v6370_v2  ;;  %v4943_v2 = vld [vmem:[#allocation3 + $0xa0] sm:$0xff] }
 0x3b0   : > { %v5363_v4 = vpop.f32.mrb[88].mxu1  ;;  %v6660_v45 = vld [vmem:[#allocation3 + $0x30] ss:$2 sm:$0xff]  ;;  %v6720_v43 = vld [vmem:[#allocation3 + $0x31] ss:$2 sm:$0xff]  ;;  %v6125_v63 = vpop.f32.mrb[84].mxu0 }
 0x3b1   : > { %v5597_v10 = vadd.f32 %v5363_v4, %v4938_v53  ;;  %v7749_v28 = vpop.f32.mrb[89].mxu1  ;;  %v6776_v16 = vmax.f32 %v6660_v45, %v6720_v43  ;;  %6604 = vst.msk [vmem:[#allocation3 + $0x48] sm:$0xff] %vm4144_vm5, %v6545_v33  ;;  %v6371_v11 = vadd.f32 %v6125_v63, %v5712_v31  ;;  %v7925_v3 = vpop.f32.mrb[85].mxu0  ;;  %v4944_v63 = vld [vmem:[#allocation3 + $0xa8] sm:$0xff] }
 0x3b2   : > { %v6487_v30 = vld [vmem:[#allocation3 + $0x50] sm:$0xff]  ;;  %v5713_v42 = vld [vmem:[#allocation3 + $0x68] sm:$0xff] }
 0x3b3   : > { %5656 = vst.msk [vmem:[#allocation3 + $0x78] sm:$0xff] %vm4144_vm5, %v5597_v10  ;;  %v7293_v0 = vpack.c.bf16 %v6776_v16, %v6776_v16  ;;  %v6546_v14 = vmax.f32 %v6487_v30, 0.0  ;;  %6430 = vst.msk [vmem:[#allocation3 + $0x60] sm:$0xff] %vm4144_vm5, %v6371_v11 }
 0x3b4   : > { %v5368_v52 = vpop.f32.mrb[90].mxu1  ;;  %v6130_v36 = vpop.f32.mrb[86].mxu0 }
 0x3b5   : > { %v5598_v19 = vadd.f32 %v5368_v52, %v4939_v13  ;;  %v7752_v47 = vpop.f32.mrb[91].mxu1  ;;  %6927 = vst.msk [vmem:[%s13106_s16 + $0xc] sm:$0xf] %vm6923_vm7, %v7293_v0  ;;  %v6372_v5 = vadd.f32 %v6130_v36, %v5713_v42  ;;  %v7928_v37 = vpop.f32.mrb[87].mxu0 }
 0x3b6   : > { %6605 = vst.msk [vmem:[#allocation3 + $0x50] sm:$0xff] %vm4144_vm5, %v6546_v14  ;;  %v6488_v62 = vld [vmem:[#allocation3 + $0x58] sm:$0xff]  ;;  %v5714_v41 = vld [vmem:[#allocation3 + $0x70] sm:$0xff] }
 0x3b7   : > { %5657 = vst.msk [vmem:[#allocation3 + $0x80] sm:$0xff] %vm4144_vm5, %v5598_v19  ;;  %v6547_v46 = vmax.f32 %v6488_v62, 0.0  ;;  %6431 = vst.msk [vmem:[#allocation3 + $0x68] sm:$0xff] %vm4144_vm5, %v6372_v5  ;;  %v4945_v5 = vld [vmem:[#allocation3 + $0xb0] sm:$0xff] }
 0x3b8   : > { %v5373_v58 = vpop.f32.mrb[92].mxu1  ;;  %v6662_v60 = vld [vmem:[#allocation3 + $0x40] ss:$2 sm:$0xff]  ;;  %v6722_v61 = vld [vmem:[#allocation3 + $0x41] ss:$2 sm:$0xff]  ;;  %v6135_v22 = vpop.f32.mrb[88].mxu0 }
 0x3b9   : > { %v5599_v32 = vadd.f32 %v5373_v58, %v4940_v56  ;;  %v7755_v20 = vpop.f32.mrb[93].mxu1  ;;  %v6777_v21 = vmax.f32 %v6662_v60, %v6722_v61  ;;  %6606 = vst.msk [vmem:[#allocation3 + $0x58] sm:$0xff] %vm4144_vm5, %v6547_v46  ;;  %v6373_v54 = vadd.f32 %v6135_v22, %v5714_v41  ;;  %v7931_v39 = vpop.f32.mrb[89].mxu0  ;;  %v4946_v22 = vld [vmem:[#allocation3 + $0xb8] sm:$0xff] }
 0x3ba   : > { %v6489_v23 = vld [vmem:[#allocation3 + $0x60] sm:$0xff]  ;;  %v5715_v25 = vld [vmem:[#allocation3 + $0x78] sm:$0xff] }
 0x3bb   : > { %5658 = vst.msk [vmem:[#allocation3 + $0x88] sm:$0xff] %vm4144_vm5, %v5599_v32  ;;  %v7294_v29 = vpack.c.bf16 %v6777_v21, %v6777_v21  ;;  %v6548_v18 = vmax.f32 %v6489_v23, 0.0  ;;  %6432 = vst.msk [vmem:[#allocation3 + $0x70] sm:$0xff] %vm4144_vm5, %v6373_v54 }
 0x3bc   : > { %v5378_v35 = vpop.f32.mrb[94].mxu1  ;;  %v6140_v40 = vpop.f32.mrb[90].mxu0 }
 0x3bd   : > { %v5600_v8 = vadd.f32 %v5378_v35, %v4941_v6  ;;  %v7758_v7 = vpop.f32.mrb[95].mxu1  ;;  %6928 = vst.msk [vmem:[%s13106_s16 + $0x10] sm:$0xf] %vm6923_vm7, %v7294_v29  ;;  %v6374_v50 = vadd.f32 %v6140_v40, %v5715_v25  ;;  %v7934_v51 = vpop.f32.mrb[91].mxu0 }
 0x3be   : > { %6607 = vst.msk [vmem:[#allocation3 + $0x60] sm:$0xff] %vm4144_vm5, %v6548_v18  ;;  %v6490_v48 = vld [vmem:[#allocation3 + $0x68] sm:$0xff]  ;;  %v5716_v17 = vld [vmem:[#allocation3 + $0x80] sm:$0xff] }
 0x3bf   : > { %5659 = vst.msk [vmem:[#allocation3 + $0x90] sm:$0xff] %vm4144_vm5, %v5600_v8  ;;  %v6549_v9 = vmax.f32 %v6490_v48, 0.0  ;;  %6433 = vst.msk [vmem:[#allocation3 + $0x78] sm:$0xff] %vm4144_vm5, %v6374_v50  ;;  %v4947_v50 = vld [vmem:[#allocation3 + $0xc0] sm:$0xff] }
 0x3c0   : > { %v5383_v27 = vpop.f32.mrb[96].mxu1  ;;  %v6664_v15 = vld [vmem:[#allocation3 + $0x50] ss:$2 sm:$0xff]  ;;  %v6724_v59 = vld [vmem:[#allocation3 + $0x51] ss:$2 sm:$0xff]  ;;  %v6145_v57 = vpop.f32.mrb[92].mxu0 }
 0x3c1   : > { %v5601_v34 = vadd.f32 %v5383_v27, %v4942_v12  ;;  %v7761_v26 = vpop.f32.mrb[97].mxu1  ;;  %v6778_v49 = vmax.f32 %v6664_v15, %v6724_v59  ;;  %6608 = vst.msk [vmem:[#allocation3 + $0x68] sm:$0xff] %vm4144_vm5, %v6549_v9  ;;  %v6375_v24 = vadd.f32 %v6145_v57, %v5716_v17  ;;  %v7937_v1 = vpop.f32.mrb[93].mxu0  ;;  %v4948_v57 = vld [vmem:[#allocation3 + $0xc8] sm:$0xff] }
 0x3c2   : > { %v6491_v38 = vld [vmem:[#allocation3 + $0x70] sm:$0xff]  ;;  %v5717_v10 = vld [vmem:[#allocation3 + $0x88] sm:$0xff] }
 0x3c3   : > { %5660 = vst.msk [vmem:[#allocation3 + $0x98] sm:$0xff] %vm4144_vm5, %v5601_v34  ;;  %v7295_v55 = vpack.c.bf16 %v6778_v49, %v6778_v49  ;;  %v6550_v53 = vmax.f32 %v6491_v38, 0.0  ;;  %6434 = vst.msk [vmem:[#allocation3 + $0x80] sm:$0xff] %vm4144_vm5, %v6375_v24 }
 0x3c4   : > { %v5388_v44 = vpop.f32.mrb[98].mxu1  ;;  %v6150_v28 = vpop.f32.mrb[94].mxu0 }
 0x3c5   : > { %v5602_v4 = vadd.f32 %v5388_v44, %v4943_v2  ;;  %v7764_v33 = vpop.f32.mrb[99].mxu1  ;;  %6929 = vst.msk [vmem:[%s13106_s16 + $0x14] sm:$0xf] %vm6923_vm7, %v7295_v55  ;;  %v6376_v45 = vadd.f32 %v6150_v28, %v5717_v10  ;;  %v7940_v43 = vpop.f32.mrb[95].mxu0 }
 0x3c6   : > { %6609 = vst.msk [vmem:[#allocation3 + $0x70] sm:$0xff] %vm4144_vm5, %v6550_v53  ;;  %v6492_v31 = vld [vmem:[#allocation3 + $0x78] sm:$0xff]  ;;  %v5718_v0 = vld [vmem:[#allocation3 + $0x90] sm:$0xff] }
 0x3c7   : > { %5661 = vst.msk [vmem:[#allocation3 + $0xa0] sm:$0xff] %vm4144_vm5, %v5602_v4  ;;  %v6551_v11 = vmax.f32 %v6492_v31, 0.0  ;;  %6435 = vst.msk [vmem:[#allocation3 + $0x88] sm:$0xff] %vm4144_vm5, %v6376_v45  ;;  %v4949_v45 = vld [vmem:[#allocation3 + $0xd0] sm:$0xff] }
 0x3c8   : > { %v5393_v16 = vpop.f32.mrb[100].mxu1  ;;  %v6666_v13 = vld [vmem:[#allocation3 + $0x60] ss:$2 sm:$0xff]  ;;  %v6726_v52 = vld [vmem:[#allocation3 + $0x61] ss:$2 sm:$0xff]  ;;  %v6155_v14 = vpop.f32.mrb[96].mxu0 }
 0x3c9   : > { %v5603_v3 = vadd.f32 %v5393_v16, %v4944_v63  ;;  %v7767_v30 = vpop.f32.mrb[101].mxu1  ;;  %v6779_v19 = vmax.f32 %v6666_v13, %v6726_v52  ;;  %6610 = vst.msk [vmem:[#allocation3 + $0x78] sm:$0xff] %vm4144_vm5, %v6551_v11  ;;  %v6377_v47 = vadd.f32 %v6155_v14, %v5718_v0  ;;  %v7943_v42 = vpop.f32.mrb[97].mxu0  ;;  %v4950_v14 = vld [vmem:[#allocation3 + $0xd8] sm:$0xff] }
 0x3ca   : > { %v6493_v36 = vld [vmem:[#allocation3 + $0x80] sm:$0xff]  ;;  %v5719_v32 = vld [vmem:[#allocation3 + $0x98] sm:$0xff] }
 0x3cb   : > { %5662 = vst.msk [vmem:[#allocation3 + $0xa8] sm:$0xff] %vm4144_vm5, %v5603_v3  ;;  %v7296_v62 = vpack.c.bf16 %v6779_v19, %v6779_v19  ;;  %v6552_v56 = vmax.f32 %v6493_v36, 0.0  ;;  %6436 = vst.msk [vmem:[#allocation3 + $0x90] sm:$0xff] %vm4144_vm5, %v6377_v47 }
 0x3cc   : > { %v5398_v37 = vpop.f32.mrb[102].mxu1  ;;  %v6160_v20 = vpop.f32.mrb[98].mxu0 }
 0x3cd   : > { %v5604_v58 = vadd.f32 %v5398_v37, %v4945_v5  ;;  %v7770_v46 = vpop.f32.mrb[103].mxu1  ;;  %6930 = vst.msk [vmem:[%s13106_s16 + $0x18] sm:$0xf] %vm6923_vm7, %v7296_v62  ;;  %v6378_v60 = vadd.f32 %v6160_v20, %v5719_v32  ;;  %v7946_v61 = vpop.f32.mrb[99].mxu0 }
 0x3ce   : > { %6611 = vst.msk [vmem:[#allocation3 + $0x80] sm:$0xff] %vm4144_vm5, %v6552_v56  ;;  %v6494_v41 = vld [vmem:[#allocation3 + $0x88] sm:$0xff]  ;;  %v5720_v29 = vld [vmem:[#allocation3 + $0xa0] sm:$0xff] }
 0x3cf   : > { %5663 = vst.msk [vmem:[#allocation3 + $0xb0] sm:$0xff] %vm4144_vm5, %v5604_v58  ;;  %v6553_v54 = vmax.f32 %v6494_v41, 0.0  ;;  %6437 = vst.msk [vmem:[#allocation3 + $0x98] sm:$0xff] %vm4144_vm5, %v6378_v60  ;;  %v4951_v60 = vld [vmem:[#allocation3 + $0xe0] sm:$0xff] }
 0x3d0   : > { %v5403_v21 = vpop.f32.mrb[104].mxu1  ;;  %v6668_v6 = vld [vmem:[#allocation3 + $0x70] ss:$2 sm:$0xff]  ;;  %v6728_v35 = vld [vmem:[#allocation3 + $0x71] ss:$2 sm:$0xff]  ;;  %v6165_v18 = vpop.f32.mrb[100].mxu0 }
 0x3d1   : > { %v5605_v39 = vadd.f32 %v5403_v21, %v4946_v22  ;;  %v7773_v23 = vpop.f32.mrb[105].mxu1  ;;  %v6780_v8 = vmax.f32 %v6668_v6, %v6728_v35  ;;  %6612 = vst.msk [vmem:[#allocation3 + $0x88] sm:$0xff] %vm4144_vm5, %v6553_v54  ;;  %v6379_v7 = vadd.f32 %v6165_v18, %v5720_v29  ;;  %v7949_v25 = vpop.f32.mrb[101].mxu0  ;;  %v4952_v18 = vld [vmem:[#allocation3 + $0xe8] sm:$0xff] }
 0x3d2   : > { %v6495_v40 = vld [vmem:[#allocation3 + $0x90] sm:$0xff]  ;;  %v5721_v34 = vld [vmem:[#allocation3 + $0xa8] sm:$0xff] }
 0x3d3   : > { %5664 = vst.msk [vmem:[#allocation3 + $0xb8] sm:$0xff] %vm4144_vm5, %v5605_v39  ;;  %v7297_v48 = vpack.c.bf16 %v6780_v8, %v6780_v8  ;;  %v6554_v12 = vmax.f32 %v6495_v40, 0.0  ;;  %6438 = vst.msk [vmem:[#allocation3 + $0xa0] sm:$0xff] %vm4144_vm5, %v6379_v7 }
 0x3d4   : > { %v5408_v51 = vpop.f32.mrb[106].mxu1  ;;  %v6170_v26 = vpop.f32.mrb[102].mxu0 }
 0x3d5   : > { %v5606_v27 = vadd.f32 %v5408_v51, %v4947_v50  ;;  %v7776_v9 = vpop.f32.mrb[107].mxu1  ;;  %6931 = vst.msk [vmem:[%s13106_s16 + $0x1c] sm:$0xf] %vm6923_vm7, %v7297_v48  ;;  %v6380_v15 = vadd.f32 %v6170_v26, %v5721_v34  ;;  %v7952_v59 = vpop.f32.mrb[103].mxu0 }
 0x3d6   : > { %6613 = vst.msk [vmem:[#allocation3 + $0x90] sm:$0xff] %vm4144_vm5, %v6554_v12  ;;  %v6496_v17 = vld [vmem:[#allocation3 + $0x98] sm:$0xff]  ;;  %v5722_v55 = vld [vmem:[#allocation3 + $0xb0] sm:$0xff] }
 0x3d7   : > { %5665 = vst.msk [vmem:[#allocation3 + $0xc0] sm:$0xff] %vm4144_vm5, %v5606_v27  ;;  %v6555_v24 = vmax.f32 %v6496_v17, 0.0  ;;  %6439 = vst.msk [vmem:[#allocation3 + $0xa8] sm:$0xff] %vm4144_vm5, %v6380_v15  ;;  %v4953_v15 = vld [vmem:[#allocation3 + $0xf0] sm:$0xff] }
 0x3d8   : > { %v5413_v49 = vpop.f32.mrb[108].mxu1  ;;  %v6670_v2 = vld [vmem:[#allocation3 + $0x80] ss:$2 sm:$0xff]  ;;  %v6730_v44 = vld [vmem:[#allocation3 + $0x81] ss:$2 sm:$0xff]  ;;  %v6175_v53 = vpop.f32.mrb[104].mxu0 }
 0x3d9   : > { %v5607_v1 = vadd.f32 %v5413_v49, %v4948_v57  ;;  %v7779_v38 = vpop.f32.mrb[109].mxu1  ;;  %v6781_v4 = vmax.f32 %v6670_v2, %v6730_v44  ;;  %6614 = vst.msk [vmem:[#allocation3 + $0x98] sm:$0xff] %vm4144_vm5, %v6555_v24  ;;  %v6381_v33 = vadd.f32 %v6175_v53, %v5722_v55  ;;  %v7955_v10 = vpop.f32.mrb[105].mxu0  ;;  %v4954_v53 = vld [vmem:[#allocation3 + $0xf8] sm:$0xff] }
 0x3da   : > { %v6497_v28 = vld [vmem:[#allocation3 + $0xa0] sm:$0xff]  ;;  %v5723_v3 = vld [vmem:[#allocation3 + $0xb8] sm:$0xff] }
 0x3db   : > { %5666 = vst.msk [vmem:[#allocation3 + $0xc8] sm:$0xff] %vm4144_vm5, %v5607_v1  ;;  %v7298_v31 = vpack.c.bf16 %v6781_v4, %v6781_v4  ;;  %v6556_v63 = vmax.f32 %v6497_v28, 0.0  ;;  %6440 = vst.msk [vmem:[#allocation3 + $0xb0] sm:$0xff] %vm4144_vm5, %v6381_v33 }
 0x3dc   : > { %v5418_v43 = vpop.f32.mrb[110].mxu1  ;;  %v6180_v30 = vpop.f32.mrb[106].mxu0 }
 0x3dd   : > { %v5608_v16 = vadd.f32 %v5418_v43, %v4949_v45  ;;  %v7782_v11 = vpop.f32.mrb[111].mxu1  ;;  %6932 = vst.msk [vmem:[%s13106_s16 + $0x20] sm:$0xf] %vm6923_vm7, %v7298_v31  ;;  %v6382_v13 = vadd.f32 %v6180_v30, %v5723_v3  ;;  %v7958_v52 = vpop.f32.mrb[107].mxu0 }
 0x3de   : > { %6615 = vst.msk [vmem:[#allocation3 + $0xa0] sm:$0xff] %vm4144_vm5, %v6556_v63  ;;  %v6498_v0 = vld [vmem:[#allocation3 + $0xa8] sm:$0xff]  ;;  %v5724_v62 = vld [vmem:[#allocation3 + $0xc0] sm:$0xff] }
 0x3df   : > { %5667 = vst.msk [vmem:[#allocation3 + $0xd0] sm:$0xff] %vm4144_vm5, %v5608_v16  ;;  %v6557_v47 = vmax.f32 %v6498_v0, 0.0  ;;  %6441 = vst.msk [vmem:[#allocation3 + $0xb8] sm:$0xff] %vm4144_vm5, %v6382_v13  ;;  %v4955_v13 = vld [vmem:[#allocation3 + $0x100] sm:$0xff] }
 0x3e0   : > { %v5423_v19 = vpop.f32.mrb[112].mxu1  ;;  %v6672_v5 = vld [vmem:[#allocation3 + $0x90] ss:$2 sm:$0xff]  ;;  %v6732_v37 = vld [vmem:[#allocation3 + $0x91] ss:$2 sm:$0xff]  ;;  %v6185_v56 = vpop.f32.mrb[108].mxu0 }
 0x3e1   : > { %v5609_v42 = vadd.f32 %v5423_v19, %v4950_v14  ;;  %v7785_v36 = vpop.f32.mrb[113].mxu1  ;;  %v6782_v58 = vmax.f32 %v6672_v5, %v6732_v37  ;;  %6616 = vst.msk [vmem:[#allocation3 + $0xa8] sm:$0xff] %vm4144_vm5, %v6557_v47  ;;  %v6383_v46 = vadd.f32 %v6185_v56, %v5724_v62  ;;  %v7961_v32 = vpop.f32.mrb[109].mxu0  ;;  %v4956_v56 = vld [vmem:[#allocation3 + $0x108] sm:$0xff] }
 0x3e2   : > { %v6499_v20 = vld [vmem:[#allocation3 + $0xb0] sm:$0xff]  ;;  %v5725_v39 = vld [vmem:[#allocation3 + $0xc8] sm:$0xff] }
 0x3e3   : > { %5668 = vst.msk [vmem:[#allocation3 + $0xd8] sm:$0xff] %vm4144_vm5, %v5609_v42  ;;  %v7299_v41 = vpack.c.bf16 %v6782_v58, %v6782_v58  ;;  %v6558_v22 = vmax.f32 %v6499_v20, 0.0  ;;  %6442 = vst.msk [vmem:[#allocation3 + $0xc0] sm:$0xff] %vm4144_vm5, %v6383_v46 }
 0x3e4   : > { %v5428_v61 = vpop.f32.mrb[114].mxu1  ;;  %v6190_v23 = vpop.f32.mrb[110].mxu0 }
 0x3e5   : > { %v5610_v21 = vadd.f32 %v5428_v61, %v4951_v60  ;;  %v7788_v54 = vpop.f32.mrb[115].mxu1  ;;  %6933 = vst.msk [vmem:[%s13106_s16 + $0x24] sm:$0xf] %vm6923_vm7, %v7299_v41  ;;  %v6384_v6 = vadd.f32 %v6190_v23, %v5725_v39  ;;  %v7964_v35 = vpop.f32.mrb[111].mxu0 }
 0x3e6   : > { %6617 = vst.msk [vmem:[#allocation3 + $0xb0] sm:$0xff] %vm4144_vm5, %v6558_v22  ;;  %v6500_v29 = vld [vmem:[#allocation3 + $0xb8] sm:$0xff]  ;;  %v5726_v48 = vld [vmem:[#allocation3 + $0xd0] sm:$0xff] }
 0x3e7   : > { %5669 = vst.msk [vmem:[#allocation3 + $0xe0] sm:$0xff] %vm4144_vm5, %v5610_v21  ;;  %v6559_v7 = vmax.f32 %v6500_v29, 0.0  ;;  %6443 = vst.msk [vmem:[#allocation3 + $0xc8] sm:$0xff] %vm4144_vm5, %v6384_v6  ;;  %v4957_v6 = vld [vmem:[#allocation3 + $0x110] sm:$0xff] }
 0x3e8   : > { %v5433_v8 = vpop.f32.mrb[116].mxu1  ;;  %v6674_v50 = vld [vmem:[#allocation3 + $0xa0] ss:$2 sm:$0xff]  ;;  %v6734_v51 = vld [vmem:[#allocation3 + $0xa1] ss:$2 sm:$0xff]  ;;  %v6195_v12 = vpop.f32.mrb[112].mxu0 }
 0x3e9   : > { %v5611_v25 = vadd.f32 %v5433_v8, %v4952_v18  ;;  %v7791_v40 = vpop.f32.mrb[117].mxu1  ;;  %v6783_v27 = vmax.f32 %v6674_v50, %v6734_v51  ;;  %6618 = vst.msk [vmem:[#allocation3 + $0xb8] sm:$0xff] %vm4144_vm5, %v6559_v7  ;;  %v6385_v9 = vadd.f32 %v6195_v12, %v5726_v48  ;;  %v7967_v34 = vpop.f32.mrb[113].mxu0  ;;  %v4958_v12 = vld [vmem:[#allocation3 + $0x118] sm:$0xff] }
 0x3ea   : > { %v6501_v26 = vld [vmem:[#allocation3 + $0xc0] sm:$0xff]  ;;  %v5727_v1 = vld [vmem:[#allocation3 + $0xd8] sm:$0xff] }
 0x3eb   : > { %5670 = vst.msk [vmem:[#allocation3 + $0xe8] sm:$0xff] %vm4144_vm5, %v5611_v25  ;;  %v7300_v17 = vpack.c.bf16 %v6783_v27, %v6783_v27  ;;  %v6560_v57 = vmax.f32 %v6501_v26, 0.0  ;;  %6444 = vst.msk [vmem:[#allocation3 + $0xd0] sm:$0xff] %vm4144_vm5, %v6385_v9 }
 0x3ec   : > { %v5438_v59 = vpop.f32.mrb[118].mxu1  ;;  %v6200_v38 = vpop.f32.mrb[114].mxu0 }
 0x3ed   : > { %v5612_v49 = vadd.f32 %v5438_v59, %v4953_v15  ;;  %v7794_v24 = vpop.f32.mrb[119].mxu1  ;;  %6934 = vst.msk [vmem:[%s13106_s16 + $0x28] sm:$0xf] %vm6923_vm7, %v7300_v17  ;;  %v6386_v2 = vadd.f32 %v6200_v38, %v5727_v1  ;;  %v7970_v44 = vpop.f32.mrb[115].mxu0 }
 0x3ee   : > { %6619 = vst.msk [vmem:[#allocation3 + $0xc0] sm:$0xff] %vm4144_vm5, %v6560_v57  ;;  %v6502_v55 = vld [vmem:[#allocation3 + $0xc8] sm:$0xff]  ;;  %v5728_v31 = vld [vmem:[#allocation3 + $0xe0] sm:$0xff] }
 0x3ef   : > { %5671 = vst.msk [vmem:[#allocation3 + $0xf0] sm:$0xff] %vm4144_vm5, %v5612_v49  ;;  %v6561_v33 = vmax.f32 %v6502_v55, 0.0  ;;  %6445 = vst.msk [vmem:[#allocation3 + $0xd8] sm:$0xff] %vm4144_vm5, %v6386_v2  ;;  %v4959_v2 = vld [vmem:[#allocation3 + $0x120] sm:$0xff] }
 0x3f0   : > { %v5443_v4 = vpop.f32.mrb[120].mxu1  ;;  %v6676_v45 = vld [vmem:[#allocation3 + $0xb0] ss:$2 sm:$0xff]  ;;  %v6736_v43 = vld [vmem:[#allocation3 + $0xb1] ss:$2 sm:$0xff]  ;;  %v6205_v63 = vpop.f32.mrb[116].mxu0 }
 0x3f1   : > { %v5613_v10 = vadd.f32 %v5443_v4, %v4954_v53  ;;  %v7797_v28 = vpop.f32.mrb[121].mxu1  ;;  %v6784_v16 = vmax.f32 %v6676_v45, %v6736_v43  ;;  %6620 = vst.msk [vmem:[#allocation3 + $0xc8] sm:$0xff] %vm4144_vm5, %v6561_v33  ;;  %v6387_v11 = vadd.f32 %v6205_v63, %v5728_v31  ;;  %v7973_v3 = vpop.f32.mrb[117].mxu0  ;;  %v4960_v63 = vld [vmem:[#allocation3 + $0x128] sm:$0xff] }
 0x3f2   : > { %v6503_v30 = vld [vmem:[#allocation3 + $0xd0] sm:$0xff]  ;;  %v5729_v42 = vld [vmem:[#allocation3 + $0xe8] sm:$0xff] }
 0x3f3   : > { %5672 = vst.msk [vmem:[#allocation3 + $0xf8] sm:$0xff] %vm4144_vm5, %v5613_v10  ;;  %v7301_v0 = vpack.c.bf16 %v6784_v16, %v6784_v16  ;;  %v6562_v14 = vmax.f32 %v6503_v30, 0.0  ;;  %6446 = vst.msk [vmem:[#allocation3 + $0xe0] sm:$0xff] %vm4144_vm5, %v6387_v11 }
 0x3f4   : > { %v5448_v52 = vpop.f32.mrb[122].mxu1  ;;  %v6210_v36 = vpop.f32.mrb[118].mxu0 }
 0x3f5   : > { %v5614_v19 = vadd.f32 %v5448_v52, %v4955_v13  ;;  %v7800_v47 = vpop.f32.mrb[123].mxu1  ;;  %6935 = vst.msk [vmem:[%s13106_s16 + $0x2c] sm:$0xf] %vm6923_vm7, %v7301_v0  ;;  %v6388_v5 = vadd.f32 %v6210_v36, %v5729_v42  ;;  %v7976_v37 = vpop.f32.mrb[119].mxu0 }
 0x3f6   : > { %6621 = vst.msk [vmem:[#allocation3 + $0xd0] sm:$0xff] %vm4144_vm5, %v6562_v14  ;;  %v6504_v62 = vld [vmem:[#allocation3 + $0xd8] sm:$0xff]  ;;  %v5730_v41 = vld [vmem:[#allocation3 + $0xf0] sm:$0xff] }
 0x3f7   : > { %5673 = vst.msk [vmem:[#allocation3 + $0x100] sm:$0xff] %vm4144_vm5, %v5614_v19  ;;  %v6563_v46 = vmax.f32 %v6504_v62, 0.0  ;;  %6447 = vst.msk [vmem:[#allocation3 + $0xe8] sm:$0xff] %vm4144_vm5, %v6388_v5  ;;  %v4961_v5 = vld [vmem:[#allocation3 + $0x130] sm:$0xff] }
 0x3f8   : > { %v5453_v58 = vpop.f32.mrb[124].mxu1  ;;  %v6678_v60 = vld [vmem:[#allocation3 + $0xc0] ss:$2 sm:$0xff]  ;;  %v6738_v61 = vld [vmem:[#allocation3 + $0xc1] ss:$2 sm:$0xff]  ;;  %v6215_v22 = vpop.f32.mrb[120].mxu0 }
 0x3f9   : > { %v5615_v32 = vadd.f32 %v5453_v58, %v4956_v56  ;;  %v7803_v20 = vpop.f32.mrb[125].mxu1  ;;  %v6785_v21 = vmax.f32 %v6678_v60, %v6738_v61  ;;  %6622 = vst.msk [vmem:[#allocation3 + $0xd8] sm:$0xff] %vm4144_vm5, %v6563_v46  ;;  %v6389_v54 = vadd.f32 %v6215_v22, %v5730_v41  ;;  %v7979_v39 = vpop.f32.mrb[121].mxu0  ;;  %v4962_v22 = vld [vmem:[#allocation3 + $0x138] sm:$0xff] }
 0x3fa   : > { %v6505_v23 = vld [vmem:[#allocation3 + $0xe0] sm:$0xff]  ;;  %v5731_v25 = vld [vmem:[#allocation3 + $0xf8] sm:$0xff] }
 0x3fb   : > { %5674 = vst.msk [vmem:[#allocation3 + $0x108] sm:$0xff] %vm4144_vm5, %v5615_v32  ;;  %v7302_v29 = vpack.c.bf16 %v6785_v21, %v6785_v21  ;;  %v6564_v18 = vmax.f32 %v6505_v23, 0.0  ;;  %6448 = vst.msk [vmem:[#allocation3 + $0xf0] sm:$0xff] %vm4144_vm5, %v6389_v54 }
 0x3fc   : > { %v5458_v35 = vpop.f32.mrb[126].mxu1  ;;  %v6220_v40 = vpop.f32.mrb[122].mxu0 }
 0x3fd   : > { %v5616_v8 = vadd.f32 %v5458_v35, %v4957_v6  ;;  %v7806_v7 = vpop.f32.mrb[127].mxu1  ;;  %6936 = vst.msk [vmem:[%s13106_s16 + $0x30] sm:$0xf] %vm6923_vm7, %v7302_v29  ;;  %v6390_v50 = vadd.f32 %v6220_v40, %v5731_v25  ;;  %v7982_v51 = vpop.f32.mrb[123].mxu0 }
 0x3fe   : > { %6623 = vst.msk [vmem:[#allocation3 + $0xe0] sm:$0xff] %vm4144_vm5, %v6564_v18  ;;  %v6506_v48 = vld [vmem:[#allocation3 + $0xe8] sm:$0xff]  ;;  %v5732_v17 = vld [vmem:[#allocation3 + $0x100] sm:$0xff] }
 0x3ff   : > { %5675 = vst.msk [vmem:[#allocation3 + $0x110] sm:$0xff] %vm4144_vm5, %v5616_v8  ;;  %v6565_v9 = vmax.f32 %v6506_v48, 0.0  ;;  %6449 = vst.msk [vmem:[#allocation3 + $0xf8] sm:$0xff] %vm4144_vm5, %v6390_v50  ;;  %v4963_v50 = vld [vmem:[#allocation3 + $0x140] sm:$0xff] }
 0x400   : > { %v5463_v27 = vpop.f32.mrb[128].mxu1  ;;  %v6680_v15 = vld [vmem:[#allocation3 + $0xd0] ss:$2 sm:$0xff]  ;;  %v6740_v59 = vld [vmem:[#allocation3 + $0xd1] ss:$2 sm:$0xff]  ;;  %v6225_v57 = vpop.f32.mrb[124].mxu0 }
 0x401   : > { %v5617_v34 = vadd.f32 %v5463_v27, %v4958_v12  ;;  %v7809_v26 = vpop.f32.mrb[129].mxu1  ;;  %v6786_v49 = vmax.f32 %v6680_v15, %v6740_v59  ;;  %6624 = vst.msk [vmem:[#allocation3 + $0xe8] sm:$0xff] %vm4144_vm5, %v6565_v9  ;;  %v6391_v24 = vadd.f32 %v6225_v57, %v5732_v17  ;;  %v7985_v1 = vpop.f32.mrb[125].mxu0  ;;  %v4964_v57 = vld [vmem:[#allocation3 + $0x148] sm:$0xff] }
 0x402   : > { %v6507_v38 = vld [vmem:[#allocation3 + $0xf0] sm:$0xff]  ;;  %v5733_v10 = vld [vmem:[#allocation3 + $0x108] sm:$0xff] }
 0x403   : > { %5676 = vst.msk [vmem:[#allocation3 + $0x118] sm:$0xff] %vm4144_vm5, %v5617_v34  ;;  %v7303_v55 = vpack.c.bf16 %v6786_v49, %v6786_v49  ;;  %v6566_v53 = vmax.f32 %v6507_v38, 0.0  ;;  %6450 = vst.msk [vmem:[#allocation3 + $0x100] sm:$0xff] %vm4144_vm5, %v6391_v24 }
 0x404   : > { %v5468_v44 = vpop.f32.mrb[130].mxu1  ;;  %v6230_v28 = vpop.f32.mrb[126].mxu0 }
 0x405   : > { %v5618_v4 = vadd.f32 %v5468_v44, %v4959_v2  ;;  %v7812_v33 = vpop.f32.mrb[131].mxu1  ;;  %6937 = vst.msk [vmem:[%s13106_s16 + $0x34] sm:$0xf] %vm6923_vm7, %v7303_v55  ;;  %v6392_v45 = vadd.f32 %v6230_v28, %v5733_v10  ;;  %v7988_v43 = vpop.f32.mrb[127].mxu0 }
 0x406   : > { %6625 = vst.msk [vmem:[#allocation3 + $0xf0] sm:$0xff] %vm4144_vm5, %v6566_v53  ;;  %v6508_v31 = vld [vmem:[#allocation3 + $0xf8] sm:$0xff]  ;;  %v5734_v0 = vld [vmem:[#allocation3 + $0x110] sm:$0xff] }
 0x407   : > { %5677 = vst.msk [vmem:[#allocation3 + $0x120] sm:$0xff] %vm4144_vm5, %v5618_v4  ;;  %v6567_v11 = vmax.f32 %v6508_v31, 0.0  ;;  %6451 = vst.msk [vmem:[#allocation3 + $0x108] sm:$0xff] %vm4144_vm5, %v6392_v45  ;;  %v4965_v45 = vld [vmem:[#allocation3 + $0x150] sm:$0xff] }
 0x408   : > { %v5473_v16 = vpop.f32.mrb[132].mxu1  ;;  %v6682_v13 = vld [vmem:[#allocation3 + $0xe0] ss:$2 sm:$0xff]  ;;  %v6742_v52 = vld [vmem:[#allocation3 + $0xe1] ss:$2 sm:$0xff]  ;;  %v6235_v14 = vpop.f32.mrb[128].mxu0 }
 0x409   : > { %v5619_v3 = vadd.f32 %v5473_v16, %v4960_v63  ;;  %v7815_v30 = vpop.f32.mrb[133].mxu1  ;;  %v6787_v19 = vmax.f32 %v6682_v13, %v6742_v52  ;;  %6626 = vst.msk [vmem:[#allocation3 + $0xf8] sm:$0xff] %vm4144_vm5, %v6567_v11  ;;  %v6393_v47 = vadd.f32 %v6235_v14, %v5734_v0  ;;  %v7991_v42 = vpop.f32.mrb[129].mxu0  ;;  %v4966_v14 = vld [vmem:[#allocation3 + $0x158] sm:$0xff] }
 0x40a   : > { %v6509_v36 = vld [vmem:[#allocation3 + $0x100] sm:$0xff]  ;;  %v5735_v32 = vld [vmem:[#allocation3 + $0x118] sm:$0xff] }
 0x40b   : > { %5678 = vst.msk [vmem:[#allocation3 + $0x128] sm:$0xff] %vm4144_vm5, %v5619_v3  ;;  %v7304_v62 = vpack.c.bf16 %v6787_v19, %v6787_v19  ;;  %v6568_v56 = vmax.f32 %v6509_v36, 0.0  ;;  %6452 = vst.msk [vmem:[#allocation3 + $0x110] sm:$0xff] %vm4144_vm5, %v6393_v47 }
 0x40c   : > { %v5478_v37 = vpop.f32.mrb[134].mxu1  ;;  %v6240_v20 = vpop.f32.mrb[130].mxu0 }
 0x40d   : > { %v5620_v58 = vadd.f32 %v5478_v37, %v4961_v5  ;;  %v7818_v46 = vpop.f32.mrb[135].mxu1  ;;  %6938 = vst.msk [vmem:[%s13106_s16 + $0x38] sm:$0xf] %vm6923_vm7, %v7304_v62  ;;  %v6394_v60 = vadd.f32 %v6240_v20, %v5735_v32  ;;  %v7994_v61 = vpop.f32.mrb[131].mxu0 }
 0x40e   : > { %6627 = vst.msk [vmem:[#allocation3 + $0x100] sm:$0xff] %vm4144_vm5, %v6568_v56  ;;  %v6510_v41 = vld [vmem:[#allocation3 + $0x108] sm:$0xff]  ;;  %v5736_v29 = vld [vmem:[#allocation3 + $0x120] sm:$0xff] }
 0x40f   : > { %5679 = vst.msk [vmem:[#allocation3 + $0x130] sm:$0xff] %vm4144_vm5, %v5620_v58  ;;  %v6569_v54 = vmax.f32 %v6510_v41, 0.0  ;;  %6453 = vst.msk [vmem:[#allocation3 + $0x118] sm:$0xff] %vm4144_vm5, %v6394_v60  ;;  %v4967_v60 = vld [vmem:[#allocation3 + $0x160] sm:$0xff] }
 0x410   : > { %v5483_v21 = vpop.f32.mrb[136].mxu1  ;;  %v6684_v6 = vld [vmem:[#allocation3 + $0xf0] ss:$2 sm:$0xff]  ;;  %v6744_v35 = vld [vmem:[#allocation3 + $0xf1] ss:$2 sm:$0xff]  ;;  %v6245_v18 = vpop.f32.mrb[132].mxu0 }
 0x411   : > { %v5621_v39 = vadd.f32 %v5483_v21, %v4962_v22  ;;  %v7821_v23 = vpop.f32.mrb[137].mxu1  ;;  %v6788_v8 = vmax.f32 %v6684_v6, %v6744_v35  ;;  %6628 = vst.msk [vmem:[#allocation3 + $0x108] sm:$0xff] %vm4144_vm5, %v6569_v54  ;;  %v6395_v7 = vadd.f32 %v6245_v18, %v5736_v29  ;;  %v7997_v25 = vpop.f32.mrb[133].mxu0  ;;  %v4968_v18 = vld [vmem:[#allocation3 + $0x168] sm:$0xff] }
 0x412   : > { %v6511_v40 = vld [vmem:[#allocation3 + $0x110] sm:$0xff]  ;;  %v5737_v34 = vld [vmem:[#allocation3 + $0x128] sm:$0xff] }
 0x413   : > { %5680 = vst.msk [vmem:[#allocation3 + $0x138] sm:$0xff] %vm4144_vm5, %v5621_v39  ;;  %v7305_v48 = vpack.c.bf16 %v6788_v8, %v6788_v8  ;;  %v6570_v12 = vmax.f32 %v6511_v40, 0.0  ;;  %6454 = vst.msk [vmem:[#allocation3 + $0x120] sm:$0xff] %vm4144_vm5, %v6395_v7 }
 0x414   : > { %v5488_v51 = vpop.f32.mrb[138].mxu1  ;;  %v6250_v26 = vpop.f32.mrb[134].mxu0 }
 0x415   : > { %v5622_v27 = vadd.f32 %v5488_v51, %v4963_v50  ;;  %v7824_v9 = vpop.f32.mrb[139].mxu1  ;;  %6939 = vst.msk [vmem:[%s13106_s16 + $0x3c] sm:$0xf] %vm6923_vm7, %v7305_v48  ;;  %v6396_v15 = vadd.f32 %v6250_v26, %v5737_v34  ;;  %v8000_v59 = vpop.f32.mrb[135].mxu0 }
 0x416   : > { %6629 = vst.msk [vmem:[#allocation3 + $0x110] sm:$0xff] %vm4144_vm5, %v6570_v12  ;;  %v6512_v17 = vld [vmem:[#allocation3 + $0x118] sm:$0xff]  ;;  %v5738_v55 = vld [vmem:[#allocation3 + $0x130] sm:$0xff] }
 0x417   : > { %5681 = vst.msk [vmem:[#allocation3 + $0x140] sm:$0xff] %vm4144_vm5, %v5622_v27  ;;  %v6571_v24 = vmax.f32 %v6512_v17, 0.0  ;;  %6455 = vst.msk [vmem:[#allocation3 + $0x128] sm:$0xff] %vm4144_vm5, %v6396_v15  ;;  %v4969_v15 = vld [vmem:[#allocation3 + $0x170] sm:$0xff] }
 0x418   : > { %v5493_v49 = vpop.f32.mrb[140].mxu1  ;;  %v6686_v2 = vld [vmem:[#allocation3 + $0x100] ss:$2 sm:$0xff]  ;;  %v6746_v44 = vld [vmem:[#allocation3 + $0x101] ss:$2 sm:$0xff]  ;;  %v6255_v53 = vpop.f32.mrb[136].mxu0 }
 0x419   : > { %v5623_v1 = vadd.f32 %v5493_v49, %v4964_v57  ;;  %v7827_v38 = vpop.f32.mrb[141].mxu1  ;;  %v6789_v4 = vmax.f32 %v6686_v2, %v6746_v44  ;;  %6630 = vst.msk [vmem:[#allocation3 + $0x118] sm:$0xff] %vm4144_vm5, %v6571_v24  ;;  %v6397_v33 = vadd.f32 %v6255_v53, %v5738_v55  ;;  %v8003_v10 = vpop.f32.mrb[137].mxu0  ;;  %v4970_v53 = vld [vmem:[#allocation3 + $0x178] sm:$0xff] }
 0x41a   : > { %v6513_v28 = vld [vmem:[#allocation3 + $0x120] sm:$0xff]  ;;  %v5739_v3 = vld [vmem:[#allocation3 + $0x138] sm:$0xff] }
 0x41b   : > { %5682 = vst.msk [vmem:[#allocation3 + $0x148] sm:$0xff] %vm4144_vm5, %v5623_v1  ;;  %v7306_v31 = vpack.c.bf16 %v6789_v4, %v6789_v4  ;;  %v6572_v63 = vmax.f32 %v6513_v28, 0.0  ;;  %6456 = vst.msk [vmem:[#allocation3 + $0x130] sm:$0xff] %vm4144_vm5, %v6397_v33 }
 0x41c   : > { %v5498_v43 = vpop.f32.mrb[142].mxu1  ;;  %v6260_v30 = vpop.f32.mrb[138].mxu0 }
 0x41d   : > { %v5624_v16 = vadd.f32 %v5498_v43, %v4965_v45  ;;  %v7830_v11 = vpop.f32.mrb[143].mxu1  ;;  %6940 = vst.msk [vmem:[%s13106_s16 + $0x40] sm:$0xf] %vm6923_vm7, %v7306_v31  ;;  %v6398_v13 = vadd.f32 %v6260_v30, %v5739_v3  ;;  %v8006_v52 = vpop.f32.mrb[139].mxu0 }
 0x41e   : > { %6631 = vst.msk [vmem:[#allocation3 + $0x120] sm:$0xff] %vm4144_vm5, %v6572_v63  ;;  %v6514_v0 = vld [vmem:[#allocation3 + $0x128] sm:$0xff]  ;;  %v5740_v62 = vld [vmem:[#allocation3 + $0x140] sm:$0xff] }
 0x41f   : > { %5683 = vst.msk [vmem:[#allocation3 + $0x150] sm:$0xff] %vm4144_vm5, %v5624_v16  ;;  %v6573_v47 = vmax.f32 %v6514_v0, 0.0  ;;  %6457 = vst.msk [vmem:[#allocation3 + $0x138] sm:$0xff] %vm4144_vm5, %v6398_v13  ;;  %v4971_v13 = vld [vmem:[#allocation3 + $0x180] sm:$0xff] }
 0x420   : > { %v5503_v19 = vpop.f32.mrb[144].mxu1  ;;  %v6688_v5 = vld [vmem:[#allocation3 + $0x110] ss:$2 sm:$0xff]  ;;  %v6748_v37 = vld [vmem:[#allocation3 + $0x111] ss:$2 sm:$0xff]  ;;  %v6265_v56 = vpop.f32.mrb[140].mxu0 }
 0x421   : > { %v5625_v42 = vadd.f32 %v5503_v19, %v4966_v14  ;;  %v7833_v36 = vpop.f32.mrb[145].mxu1  ;;  %v6790_v58 = vmax.f32 %v6688_v5, %v6748_v37  ;;  %6632 = vst.msk [vmem:[#allocation3 + $0x128] sm:$0xff] %vm4144_vm5, %v6573_v47  ;;  %v6399_v46 = vadd.f32 %v6265_v56, %v5740_v62  ;;  %v8009_v32 = vpop.f32.mrb[141].mxu0  ;;  %v4972_v56 = vld [vmem:[#allocation3 + $0x188] sm:$0xff] }
 0x422   : > { %v6515_v20 = vld [vmem:[#allocation3 + $0x130] sm:$0xff]  ;;  %v5741_v39 = vld [vmem:[#allocation3 + $0x148] sm:$0xff] }
 0x423   : > { %5684 = vst.msk [vmem:[#allocation3 + $0x158] sm:$0xff] %vm4144_vm5, %v5625_v42  ;;  %v7307_v41 = vpack.c.bf16 %v6790_v58, %v6790_v58  ;;  %v6574_v22 = vmax.f32 %v6515_v20, 0.0  ;;  %6458 = vst.msk [vmem:[#allocation3 + $0x140] sm:$0xff] %vm4144_vm5, %v6399_v46 }
 0x424   : > { %v5508_v61 = vpop.f32.mrb[146].mxu1  ;;  %v6270_v23 = vpop.f32.mrb[142].mxu0 }
 0x425   : > { %v5626_v21 = vadd.f32 %v5508_v61, %v4967_v60  ;;  %v7836_v54 = vpop.f32.mrb[147].mxu1  ;;  %6941 = vst.msk [vmem:[%s13106_s16 + $0x44] sm:$0xf] %vm6923_vm7, %v7307_v41  ;;  %v6400_v6 = vadd.f32 %v6270_v23, %v5741_v39  ;;  %v8012_v35 = vpop.f32.mrb[143].mxu0 }
 0x426   : > { %6633 = vst.msk [vmem:[#allocation3 + $0x130] sm:$0xff] %vm4144_vm5, %v6574_v22  ;;  %v6516_v29 = vld [vmem:[#allocation3 + $0x138] sm:$0xff]  ;;  %v5742_v48 = vld [vmem:[#allocation3 + $0x150] sm:$0xff] }
 0x427   : > { %5685 = vst.msk [vmem:[#allocation3 + $0x160] sm:$0xff] %vm4144_vm5, %v5626_v21  ;;  %v6575_v7 = vmax.f32 %v6516_v29, 0.0  ;;  %6459 = vst.msk [vmem:[#allocation3 + $0x148] sm:$0xff] %vm4144_vm5, %v6400_v6  ;;  %v4973_v6 = vld [vmem:[#allocation3 + $0x190] sm:$0xff] }
 0x428   : > { %v5513_v8 = vpop.f32.mrb[148].mxu1  ;;  %v6690_v50 = vld [vmem:[#allocation3 + $0x120] ss:$2 sm:$0xff]  ;;  %v6750_v51 = vld [vmem:[#allocation3 + $0x121] ss:$2 sm:$0xff]  ;;  %v6275_v12 = vpop.f32.mrb[144].mxu0 }
 0x429   : > { %v5627_v25 = vadd.f32 %v5513_v8, %v4968_v18  ;;  %v7839_v40 = vpop.f32.mrb[149].mxu1  ;;  %v6791_v27 = vmax.f32 %v6690_v50, %v6750_v51  ;;  %6634 = vst.msk [vmem:[#allocation3 + $0x138] sm:$0xff] %vm4144_vm5, %v6575_v7  ;;  %v6401_v9 = vadd.f32 %v6275_v12, %v5742_v48  ;;  %v8015_v34 = vpop.f32.mrb[145].mxu0  ;;  %v4974_v12 = vld [vmem:[#allocation3 + $0x198] sm:$0xff] }
 0x42a   : > { %v6517_v26 = vld [vmem:[#allocation3 + $0x140] sm:$0xff]  ;;  %v5743_v1 = vld [vmem:[#allocation3 + $0x158] sm:$0xff] }
 0x42b   : > { %5686 = vst.msk [vmem:[#allocation3 + $0x168] sm:$0xff] %vm4144_vm5, %v5627_v25  ;;  %v7308_v17 = vpack.c.bf16 %v6791_v27, %v6791_v27  ;;  %v6576_v57 = vmax.f32 %v6517_v26, 0.0  ;;  %6460 = vst.msk [vmem:[#allocation3 + $0x150] sm:$0xff] %vm4144_vm5, %v6401_v9 }
 0x42c   : > { %v5518_v59 = vpop.f32.mrb[150].mxu1  ;;  %v6280_v38 = vpop.f32.mrb[146].mxu0 }
 0x42d   : > { %v5628_v49 = vadd.f32 %v5518_v59, %v4969_v15  ;;  %v7842_v24 = vpop.f32.mrb[151].mxu1  ;;  %6942 = vst.msk [vmem:[%s13106_s16 + $0x48] sm:$0xf] %vm6923_vm7, %v7308_v17  ;;  %v6402_v2 = vadd.f32 %v6280_v38, %v5743_v1  ;;  %v8018_v44 = vpop.f32.mrb[147].mxu0 }
 0x42e   : > { %6635 = vst.msk [vmem:[#allocation3 + $0x140] sm:$0xff] %vm4144_vm5, %v6576_v57  ;;  %v6518_v55 = vld [vmem:[#allocation3 + $0x148] sm:$0xff]  ;;  %v5744_v31 = vld [vmem:[#allocation3 + $0x160] sm:$0xff] }
 0x42f   : > { %5687 = vst.msk [vmem:[#allocation3 + $0x170] sm:$0xff] %vm4144_vm5, %v5628_v49  ;;  %v6577_v33 = vmax.f32 %v6518_v55, 0.0  ;;  %6461 = vst.msk [vmem:[#allocation3 + $0x158] sm:$0xff] %vm4144_vm5, %v6402_v2  ;;  %v4975_v2 = vld [vmem:[#allocation3 + $0x1a0] sm:$0xff] }
 0x430   : > { %v5523_v4 = vpop.f32.mrb[152].mxu1  ;;  %v6692_v45 = vld [vmem:[#allocation3 + $0x130] ss:$2 sm:$0xff]  ;;  %v6752_v43 = vld [vmem:[#allocation3 + $0x131] ss:$2 sm:$0xff]  ;;  %v6285_v63 = vpop.f32.mrb[148].mxu0 }
 0x431   : > { %v5629_v10 = vadd.f32 %v5523_v4, %v4970_v53  ;;  %v7845_v28 = vpop.f32.mrb[153].mxu1  ;;  %v6792_v16 = vmax.f32 %v6692_v45, %v6752_v43  ;;  %6636 = vst.msk [vmem:[#allocation3 + $0x148] sm:$0xff] %vm4144_vm5, %v6577_v33  ;;  %v6403_v11 = vadd.f32 %v6285_v63, %v5744_v31  ;;  %v8021_v3 = vpop.f32.mrb[149].mxu0  ;;  %v4976_v63 = vld [vmem:[#allocation3 + $0x1a8] sm:$0xff] }
 0x432   : > { %v6519_v30 = vld [vmem:[#allocation3 + $0x150] sm:$0xff]  ;;  %v5745_v42 = vld [vmem:[#allocation3 + $0x168] sm:$0xff] }
 0x433   : > { %5688 = vst.msk [vmem:[#allocation3 + $0x178] sm:$0xff] %vm4144_vm5, %v5629_v10  ;;  %v7309_v0 = vpack.c.bf16 %v6792_v16, %v6792_v16  ;;  %v6578_v14 = vmax.f32 %v6519_v30, 0.0  ;;  %6462 = vst.msk [vmem:[#allocation3 + $0x160] sm:$0xff] %vm4144_vm5, %v6403_v11 }
 0x434   : > { %v5528_v52 = vpop.f32.mrb[154].mxu1  ;;  %v6290_v36 = vpop.f32.mrb[150].mxu0 }
 0x435   : > { %v5630_v19 = vadd.f32 %v5528_v52, %v4971_v13  ;;  %v7848_v47 = vpop.f32.mrb[155].mxu1  ;;  %6943 = vst.msk [vmem:[%s13106_s16 + $0x4c] sm:$0xf] %vm6923_vm7, %v7309_v0  ;;  %v6404_v5 = vadd.f32 %v6290_v36, %v5745_v42  ;;  %v8024_v37 = vpop.f32.mrb[151].mxu0 }
 0x436   : > { %6637 = vst.msk [vmem:[#allocation3 + $0x150] sm:$0xff] %vm4144_vm5, %v6578_v14  ;;  %v6520_v62 = vld [vmem:[#allocation3 + $0x158] sm:$0xff]  ;;  %v5746_v41 = vld [vmem:[#allocation3 + $0x170] sm:$0xff] }
 0x437   : > { %5689 = vst.msk [vmem:[#allocation3 + $0x180] sm:$0xff] %vm4144_vm5, %v5630_v19  ;;  %v6579_v46 = vmax.f32 %v6520_v62, 0.0  ;;  %6463 = vst.msk [vmem:[#allocation3 + $0x168] sm:$0xff] %vm4144_vm5, %v6404_v5  ;;  %v4977_v5 = vld [vmem:[#allocation3 + $0x1b0] sm:$0xff] }
 0x438   : > { %v5533_v58 = vpop.f32.mrb[156].mxu1  ;;  %v6694_v60 = vld [vmem:[#allocation3 + $0x140] ss:$2 sm:$0xff]  ;;  %v6754_v61 = vld [vmem:[#allocation3 + $0x141] ss:$2 sm:$0xff]  ;;  %v6295_v22 = vpop.f32.mrb[152].mxu0 }
 0x439   : > { %v5631_v32 = vadd.f32 %v5533_v58, %v4972_v56  ;;  %v7851_v20 = vpop.f32.mrb[157].mxu1  ;;  %v6793_v21 = vmax.f32 %v6694_v60, %v6754_v61  ;;  %6638 = vst.msk [vmem:[#allocation3 + $0x158] sm:$0xff] %vm4144_vm5, %v6579_v46  ;;  %v6405_v54 = vadd.f32 %v6295_v22, %v5746_v41  ;;  %v8027_v39 = vpop.f32.mrb[153].mxu0  ;;  %v4978_v22 = vld [vmem:[#allocation3 + $0x1b8] sm:$0xff] }
 0x43a   : > { %v6521_v23 = vld [vmem:[#allocation3 + $0x160] sm:$0xff]  ;;  %v5747_v25 = vld [vmem:[#allocation3 + $0x178] sm:$0xff] }
 0x43b   : > { %5690 = vst.msk [vmem:[#allocation3 + $0x188] sm:$0xff] %vm4144_vm5, %v5631_v32  ;;  %v7310_v29 = vpack.c.bf16 %v6793_v21, %v6793_v21  ;;  %v6580_v18 = vmax.f32 %v6521_v23, 0.0  ;;  %6464 = vst.msk [vmem:[#allocation3 + $0x170] sm:$0xff] %vm4144_vm5, %v6405_v54 }
 0x43c   : > { %v5538_v35 = vpop.f32.mrb[158].mxu1  ;;  %v6300_v40 = vpop.f32.mrb[154].mxu0 }
 0x43d   : > { %v5632_v8 = vadd.f32 %v5538_v35, %v4973_v6  ;;  %v7854_v7 = vpop.f32.mrb[159].mxu1  ;;  %6944 = vst.msk [vmem:[%s13106_s16 + $0x50] sm:$0xf] %vm6923_vm7, %v7310_v29  ;;  %v6406_v50 = vadd.f32 %v6300_v40, %v5747_v25  ;;  %v8030_v51 = vpop.f32.mrb[155].mxu0 }
 0x43e   : > { %6639 = vst.msk [vmem:[#allocation3 + $0x160] sm:$0xff] %vm4144_vm5, %v6580_v18  ;;  %v6522_v48 = vld [vmem:[#allocation3 + $0x168] sm:$0xff]  ;;  %v5748_v17 = vld [vmem:[#allocation3 + $0x180] sm:$0xff] }
 0x43f   : > { %5691 = vst.msk [vmem:[#allocation3 + $0x190] sm:$0xff] %vm4144_vm5, %v5632_v8  ;;  %v6581_v9 = vmax.f32 %v6522_v48, 0.0  ;;  %6465 = vst.msk [vmem:[#allocation3 + $0x178] sm:$0xff] %vm4144_vm5, %v6406_v50  ;;  %v4979_v50 = vld [vmem:[#allocation3 + $0x1c0] sm:$0xff] }
 0x440   : > { %v5543_v27 = vpop.f32.mrb[160].mxu1  ;;  %v6696_v15 = vld [vmem:[#allocation3 + $0x150] ss:$2 sm:$0xff]  ;;  %v6756_v59 = vld [vmem:[#allocation3 + $0x151] ss:$2 sm:$0xff]  ;;  %v6305_v57 = vpop.f32.mrb[156].mxu0 }
 0x441   : > { %v5633_v34 = vadd.f32 %v5543_v27, %v4974_v12  ;;  %v7857_v26 = vpop.f32.mrb[161].mxu1  ;;  %v6794_v49 = vmax.f32 %v6696_v15, %v6756_v59  ;;  %6640 = vst.msk [vmem:[#allocation3 + $0x168] sm:$0xff] %vm4144_vm5, %v6581_v9  ;;  %v6407_v24 = vadd.f32 %v6305_v57, %v5748_v17  ;;  %v8033_v1 = vpop.f32.mrb[157].mxu0  ;;  %v4980_v57 = vld [vmem:[#allocation3 + $0x1c8] sm:$0xff] }
 0x442   : > { %v6523_v38 = vld [vmem:[#allocation3 + $0x170] sm:$0xff]  ;;  %v5749_v10 = vld [vmem:[#allocation3 + $0x188] sm:$0xff] }
 0x443   : > { %5692 = vst.msk [vmem:[#allocation3 + $0x198] sm:$0xff] %vm4144_vm5, %v5633_v34  ;;  %v7311_v55 = vpack.c.bf16 %v6794_v49, %v6794_v49  ;;  %v6582_v53 = vmax.f32 %v6523_v38, 0.0  ;;  %6466 = vst.msk [vmem:[#allocation3 + $0x180] sm:$0xff] %vm4144_vm5, %v6407_v24 }
 0x444   : > { %v5548_v44 = vpop.f32.mrb[162].mxu1  ;;  %v6310_v28 = vpop.f32.mrb[158].mxu0 }
 0x445   : > { %v5634_v4 = vadd.f32 %v5548_v44, %v4975_v2  ;;  %v7860_v33 = vpop.f32.mrb[163].mxu1  ;;  %6945 = vst.msk [vmem:[%s13106_s16 + $0x54] sm:$0xf] %vm6923_vm7, %v7311_v55  ;;  %v6408_v45 = vadd.f32 %v6310_v28, %v5749_v10  ;;  %v8036_v43 = vpop.f32.mrb[159].mxu0 }
 0x446   : > { %6641 = vst.msk [vmem:[#allocation3 + $0x170] sm:$0xff] %vm4144_vm5, %v6582_v53  ;;  %v6524_v31 = vld [vmem:[#allocation3 + $0x178] sm:$0xff]  ;;  %v5750_v0 = vld [vmem:[#allocation3 + $0x190] sm:$0xff] }
 0x447   : > { %5693 = vst.msk [vmem:[#allocation3 + $0x1a0] sm:$0xff] %vm4144_vm5, %v5634_v4  ;;  %v6583_v11 = vmax.f32 %v6524_v31, 0.0  ;;  %6467 = vst.msk [vmem:[#allocation3 + $0x188] sm:$0xff] %vm4144_vm5, %v6408_v45  ;;  %v4981_v45 = vld [vmem:[#allocation3 + $0x1d0] sm:$0x7] }
 0x448   : > { %v5553_v16 = vpop.f32.mrb[164].mxu1  ;;  %v6698_v13 = vld [vmem:[#allocation3 + $0x160] ss:$2 sm:$0xff]  ;;  %v6758_v52 = vld [vmem:[#allocation3 + $0x161] ss:$2 sm:$0xff]  ;;  %v6315_v14 = vpop.f32.mrb[160].mxu0 }
 0x449   : > { %v5635_v3 = vadd.f32 %v5553_v16, %v4976_v63  ;;  %v7863_v30 = vpop.f32.mrb[165].mxu1  ;;  %v6795_v19 = vmax.f32 %v6698_v13, %v6758_v52  ;;  %6642 = vst.msk [vmem:[#allocation3 + $0x178] sm:$0xff] %vm4144_vm5, %v6583_v11  ;;  %v6409_v47 = vadd.f32 %v6315_v14, %v5750_v0  ;;  %v8039_v42 = vpop.f32.mrb[161].mxu0 }
 0x44a   : > { %v6525_v36 = vld [vmem:[#allocation3 + $0x180] sm:$0xff]  ;;  %v5751_v32 = vld [vmem:[#allocation3 + $0x198] sm:$0xff] }
 0x44b   : > { %5694 = vst.msk [vmem:[#allocation3 + $0x1a8] sm:$0xff] %vm4144_vm5, %v5635_v3  ;;  %v7312_v62 = vpack.c.bf16 %v6795_v19, %v6795_v19  ;;  %v6584_v56 = vmax.f32 %v6525_v36, 0.0  ;;  %6468 = vst.msk [vmem:[#allocation3 + $0x190] sm:$0xff] %vm4144_vm5, %v6409_v47 }
 0x44c   : > { %v5558_v37 = vpop.f32.mrb[166].mxu1  ;;  %v6320_v20 = vpop.f32.mrb[162].mxu0 }
 0x44d   : > { %v5636_v58 = vadd.f32 %v5558_v37, %v4977_v5  ;;  %v7866_v46 = vpop.f32.mrb[167].mxu1  ;;  %6946 = vst.msk [vmem:[%s13106_s16 + $0x58] sm:$0xf] %vm6923_vm7, %v7312_v62  ;;  %v6410_v60 = vadd.f32 %v6320_v20, %v5751_v32  ;;  %v8042_v61 = vpop.f32.mrb[163].mxu0 }
 0x44e   : > { %6643 = vst.msk [vmem:[#allocation3 + $0x180] sm:$0xff] %vm4144_vm5, %v6584_v56  ;;  %v6526_v41 = vld [vmem:[#allocation3 + $0x188] sm:$0xff]  ;;  %v5752_v29 = vld [vmem:[#allocation3 + $0x1a0] sm:$0xff] }
 0x44f   : > { %5695 = vst.msk [vmem:[#allocation3 + $0x1b0] sm:$0xff] %vm4144_vm5, %v5636_v58  ;;  %v6585_v54 = vmax.f32 %v6526_v41, 0.0  ;;  %6469 = vst.msk [vmem:[#allocation3 + $0x198] sm:$0xff] %vm4144_vm5, %v6410_v60 }
 0x450   : > { %v5563_v21 = vpop.f32.mrb[168].mxu1  ;;  %v6700_v6 = vld [vmem:[#allocation3 + $0x170] ss:$2 sm:$0xff]  ;;  %v6760_v35 = vld [vmem:[#allocation3 + $0x171] ss:$2 sm:$0xff]  ;;  %v6325_v18 = vpop.f32.mrb[164].mxu0 }
 0x451   : > { %v5637_v39 = vadd.f32 %v5563_v21, %v4978_v22  ;;  %v7869_v23 = vpop.f32.mrb[169].mxu1  ;;  %v6796_v8 = vmax.f32 %v6700_v6, %v6760_v35  ;;  %6644 = vst.msk [vmem:[#allocation3 + $0x188] sm:$0xff] %vm4144_vm5, %v6585_v54  ;;  %v6411_v7 = vadd.f32 %v6325_v18, %v5752_v29  ;;  %v8045_v25 = vpop.f32.mrb[165].mxu0 }
 0x452   : > { %v6527_v40 = vld [vmem:[#allocation3 + $0x190] sm:$0xff]  ;;  %v5753_v34 = vld [vmem:[#allocation3 + $0x1a8] sm:$0xff] }
 0x453   : > { %5696 = vst.msk [vmem:[#allocation3 + $0x1b8] sm:$0xff] %vm4144_vm5, %v5637_v39  ;;  %v7313_v48 = vpack.c.bf16 %v6796_v8, %v6796_v8  ;;  %v6586_v12 = vmax.f32 %v6527_v40, 0.0  ;;  %6470 = vst.msk [vmem:[#allocation3 + $0x1a0] sm:$0xff] %vm4144_vm5, %v6411_v7 }
 0x454   : > { %v5568_v51 = vpop.f32.mrb[170].mxu1  ;;  %v6330_v26 = vpop.f32.mrb[166].mxu0 }
 0x455   : > { %v5638_v27 = vadd.f32 %v5568_v51, %v4979_v50  ;;  %v7872_v9 = vpop.f32.mrb[171].mxu1  ;;  %6947 = vst.msk [vmem:[%s13106_s16 + $0x5c] sm:$0xf] %vm6923_vm7, %v7313_v48  ;;  %v6412_v15 = vadd.f32 %v6330_v26, %v5753_v34  ;;  %v8048_v59 = vpop.f32.mrb[167].mxu0 }
 0x456   : > { %6645 = vst.msk [vmem:[#allocation3 + $0x190] sm:$0xff] %vm4144_vm5, %v6586_v12  ;;  %v6528_v17 = vld [vmem:[#allocation3 + $0x198] sm:$0xff]  ;;  %v5754_v55 = vld [vmem:[#allocation3 + $0x1b0] sm:$0xff] }
 0x457   : > { %5697 = vst.msk [vmem:[#allocation3 + $0x1c0] sm:$0xff] %vm4144_vm5, %v5638_v27  ;;  %v6587_v24 = vmax.f32 %v6528_v17, 0.0  ;;  %6471 = vst.msk [vmem:[#allocation3 + $0x1a8] sm:$0xff] %vm4144_vm5, %v6412_v15 }
 0x458   : > { %v5573_v49 = vpop.f32.mrb[172].mxu1  ;;  %v6702_v2 = vld [vmem:[#allocation3 + $0x180] ss:$2 sm:$0xff]  ;;  %v6762_v44 = vld [vmem:[#allocation3 + $0x181] ss:$2 sm:$0xff]  ;;  %v6335_v53 = vpop.f32.mrb[168].mxu0 }
 0x459   : > { %v5639_v1 = vadd.f32 %v5573_v49, %v4980_v57  ;;  %v7875_v38 = vpop.f32.mrb[173].mxu1  ;;  %v6797_v4 = vmax.f32 %v6702_v2, %v6762_v44  ;;  %6646 = vst.msk [vmem:[#allocation3 + $0x198] sm:$0xff] %vm4144_vm5, %v6587_v24  ;;  %v6413_v33 = vadd.f32 %v6335_v53, %v5754_v55  ;;  %v8051_v10 = vpop.f32.mrb[169].mxu0  ;;  %v6956_v24 = vld [vmem:[%s13106_s16 + $0x74] sm:$0x1] }
 0x45a   : > { %v6529_v28 = vld [vmem:[#allocation3 + $0x1a0] sm:$0xff]  ;;  %v5755_v3 = vld [vmem:[#allocation3 + $0x1b8] sm:$0xff] }
 0x45b   : > { %5698 = vst.msk [vmem:[#allocation3 + $0x1c8] sm:$0xff] %vm4144_vm5, %v5639_v1  ;;  %v7314_v31 = vpack.c.bf16 %v6797_v4, %v6797_v4  ;;  %v6588_v63 = vmax.f32 %v6529_v28, 0.0  ;;  %6472 = vst.msk [vmem:[#allocation3 + $0x1b0] sm:$0xff] %vm4144_vm5, %v6413_v33 }
 0x45c   : > { %v5578_v43 = vpop.f32.mrb[174].mxu1  ;;  %v6340_v30 = vpop.f32.mrb[170].mxu0 }
 0x45d   : > { %v5640_v16 = vadd.f32 %v5578_v43, %v4981_v45  ;;  %v7878_v11 = vpop.f32.mrb[175].mxu1  ;;  %6948 = vst.msk [vmem:[%s13106_s16 + $0x60] sm:$0xf] %vm6923_vm7, %v7314_v31  ;;  %v6414_v13 = vadd.f32 %v6340_v30, %v5755_v3  ;;  %v8054_v52 = vpop.f32.mrb[171].mxu0 }
 0x45e   : > { %6647 = vst.msk [vmem:[#allocation3 + $0x1a0] sm:$0xff] %vm4144_vm5, %v6588_v63  ;;  %v6530_v0 = vld [vmem:[#allocation3 + $0x1a8] sm:$0xff]  ;;  %v5756_v42 = vld [vmem:[#allocation3 + $0x1c0] sm:$0xff] }
 0x45f   : > { %5699 = vst.msk [vmem:[#allocation3 + $0x1d0] sm:$0x7] %vm4203_vm6, %v5640_v16  ;;  %v6589_v14 = vmax.f32 %v6530_v0, 0.0 }
 0x460   : > { %6473 = vst.msk [vmem:[#allocation3 + $0x1b8] sm:$0xff] %vm4144_vm5, %v6414_v13  ;;  %v6704_v19 = vld [vmem:[#allocation3 + $0x190] ss:$2 sm:$0xff]  ;;  %v6764_v47 = vld [vmem:[#allocation3 + $0x191] ss:$2 sm:$0xff]  ;;  %v6345_v36 = vpop.f32.mrb[172].mxu0 }
 0x461   : > { %v6798_v5 = vmax.f32 %v6704_v19, %v6764_v47  ;;  %6648 = vst.msk [vmem:[#allocation3 + $0x1a8] sm:$0xff] %vm4144_vm5, %v6589_v14  ;;  %v6415_v37 = vadd.f32 %v6345_v36, %v5756_v42  ;;  %v8057_v62 = vpop.f32.mrb[173].mxu0 }
 0x462   : > { %v6531_v56 = vld [vmem:[#allocation3 + $0x1b0] sm:$0xff]  ;;  %v5757_v32 = vld [vmem:[#allocation3 + $0x1c8] sm:$0xff] }
 0x463   : > { %v7315_v58 = vpack.c.bf16 %v6798_v5, %v6798_v5  ;;  %v6590_v46 = vmax.f32 %v6531_v56, 0.0  ;;  %6474 = vst.msk [vmem:[#allocation3 + $0x1c0] sm:$0xff] %vm4144_vm5, %v6415_v37 }
 0x464   : > { %v6350_v20 = vpop.f32.mrb[174].mxu0 }
 0x465   : > { %6949 = vst.msk [vmem:[%s13106_s16 + $0x64] sm:$0xf] %vm6923_vm7, %v7315_v58  ;;  %v6416_v60 = vadd.f32 %v6350_v20, %v5757_v32  ;;  %v8060_v61 = vpop.f32.mrb[175].mxu0 }
 0x466   : > { %6649 = vst.msk [vmem:[#allocation3 + $0x1b0] sm:$0xff] %vm4144_vm5, %v6590_v46  ;;  %v5758_v21 = vld [vmem:[#allocation3 + $0x1d0] sm:$0x7] }
 0x467   : > { %v6532_v41 = vld [vmem:[#allocation3 + $0x1b8] sm:$0xff]  ;;  %6475 = vst.msk [vmem:[#allocation3 + $0x1c8] sm:$0xff] %vm4144_vm5, %v6416_v60 }
 0x468   : > { %v6591_v22 = vmax.f32 %v6532_v41, 0.0  ;;  %v6706_v54 = vld [vmem:[#allocation3 + $0x1a0] ss:$2 sm:$0xff]  ;;  %v6766_v39 = vld [vmem:[#allocation3 + $0x1a1] ss:$2 sm:$0xff]  ;;  %v6355_v23 = vpop.f32.mrb[176].mxu0 }
 0x469   : > { %v6799_v6 = vmax.f32 %v6706_v54, %v6766_v39  ;;  %v6417_v35 = vadd.f32 %v6355_v23, %v5758_v21  ;;  %v8063_v29 = vpop.f32.mrb[177].mxu0 }
 0x46a   : > { %6650 = vst.msk [vmem:[#allocation3 + $0x1b8] sm:$0xff] %vm4144_vm5, %v6591_v22  ;;  %v6533_v18 = vld [vmem:[#allocation3 + $0x1c0] sm:$0xff] }
 0x46b   : > { %v7316_v8 = vpack.c.bf16 %v6799_v6, %v6799_v6  ;;  %v6592_v7 = vmax.f32 %v6533_v18, 0.0  ;;  %6476 = vst.msk [vmem:[#allocation3 + $0x1d0] sm:$0x7] %vm4203_vm6, %v6417_v35 }
 0x46d   : > { %6950 = vst.msk [vmem:[%s13106_s16 + $0x68] sm:$0xf] %vm6923_vm7, %v7316_v8 }
 0x46e   : > { %6651 = vst.msk [vmem:[#allocation3 + $0x1c0] sm:$0xff] %vm4144_vm5, %v6592_v7  ;;  %v6534_v25 = vld [vmem:[#allocation3 + $0x1c8] sm:$0xff] }
 0x46f   : > { %v6593_v40 = vmax.f32 %v6534_v25, 0.0 }
 0x471   : > { %v6708_v50 = vld [vmem:[#allocation3 + $0x1b0] ss:$2 sm:$0xff]  ;;  %v6768_v51 = vld [vmem:[#allocation3 + $0x1b1] ss:$2 sm:$0xff]  ;;  %6652 = vst.msk [vmem:[#allocation3 + $0x1c8] sm:$0xff] %vm4144_vm5, %v6593_v40 }
 0x472   : > { %v6800_v48 = vmax.f32 %v6708_v50, %v6768_v51  ;;  %v6535_v12 = vld [vmem:[#allocation3 + $0x1d0] sm:$0x7] }
 0x473   : > { %v6594_v9 = vmax.f32 %v6535_v12, 0.0 }
 0x474   : > { %v7317_v27 = vpack.c.bf16 %v6800_v48, %v6800_v48 }
 0x475   : > { %6653 = vst.msk [vmem:[#allocation3 + $0x1d0] sm:$0x7] %vm4203_vm6, %v6594_v9 }
 0x476   : > { %6951 = vst.msk [vmem:[%s13106_s16 + $0x6c] sm:$0xf] %vm6923_vm7, %v7317_v27 }
 0x478   : > { %v6710_v34 = vld [vmem:[#allocation3 + $0x1c0] ss:$2 sm:$0xff]  ;;  %v6770_v26 = vld [vmem:[#allocation3 + $0x1c1] ss:$2 sm:$0xff] }
 0x479   : > { %v6801_v15 = vmax.f32 %v6710_v34, %v6770_v26 }
 0x47b   : > { %v7318_v59 = vpack.c.bf16 %v6801_v15, %v6801_v15 }
 0x47c   : > { %v6712_v17 = vld [vmem:[#allocation3 + $0x1d0] ss:$2 sm:$0x1]  ;;  %v6772_v57 = vld [vmem:[#allocation3 + $0x1d1] ss:$2 sm:$0x1] }
 0x47d   : > { %6952 = vst.msk [vmem:[%s13106_s16 + $0x70] sm:$0xf] %vm6923_vm7, %v7318_v59  ;;  %v6802_v49 = vmax.f32 %v6712_v17, %v6772_v57 }
 0x47f   : > { %v7319_v1 = vpack.c.bf16 %v6802_v49, %v6802_v49 }
 0x481   : > { %v6957_v38 = vsel %vm6955_vm10, %v7319_v1, %v6956_v24 }
 0x482   : > { %6958 = vst [vmem:[%s13106_s16 + $0x74] sm:$0x1] %v6957_v38 }
 0x489   : > { %v6962_v2 = vld [vmem:[%s13106_s16 + $0x74] sm:$0xf] }
 0x48a   : > { %v6963_v44 = vsel %vm6961_vm12, 0, %v6962_v2 }
 0x48b   : > { %6964 = vst [vmem:[%s13106_s16 + $0x74] sm:$0xf] %v6963_v44 }
 0x48c PF: > { %s18_s18 = sadd.s32 1, %s8290_s18  }
 0x48d   : > { %p15_p6 = scmp.ge.s32.totalorder %s18_s18, 4  }
 0x48f   :  { %17 = sbr.rel (!%p15_p6) target bundleno = 3 (0x3), region = 265 }
 0x496   :  { %6986 = vsyncpa [#allocation5], 1 }
 0x497   :  { %6988 = vsyncpa [#allocation5 + $0x1], 1 }
 0x498   :  { %6989 = vsyncpa [#allocation7], 1 }
 0x499   :  { %6990 = vsyncpa [#allocation10], 1 }

</bundles_post_ra>
